<compile_context>
chip_gen: v5e
topology: v5e:2x2
jax: 0.10.0
libtpu: 0.0.40
codegen_flags: <defaults>
</compile_context>

<pallas_src>
import jax
import jax.numpy as jnp
from jax.experimental import pallas as pl
from jax.experimental.pallas import tpu as pltpu

EPS = 1e-5


# ----------------------------------------------------------------------------
# Fused forward kernel
# ----------------------------------------------------------------------------
def _make_kernel(cin, cmid, cout, d1, d2, m):
    """Fused forward kernel for static sizes.

    In-kernel layout (channels on sublanes, depth*M flattened on lanes):
      xp  : (cin, (d1+2)*m)    depth-padded input (pad 2 each side)
      y   : (2*cmid, d1*m)     conv1 output of both branches; overwritten in
                               place with relu(bn1(y))
      z   : (2*cout, d2*m)     conv2 output; columns [0, ne*m) = even output
                               depths, [ne*m, d2*m) = odd output depths;
                               overwritten in place with tanh(bn2(z))
      out : (cout, d2*m)       branch1 + branch2, depth-interleaved
    """
    ne = d1 - 2                      # number of even output depths (do = 2i)
    no = d1 - 3                      # number of odd output depths  (do = 2i+1)
    inv_n1 = 1.0 / float(d1 * m)
    inv_n2 = 1.0 / float(d2 * m)
    d1m = d1 * m
    f32 = jnp.float32

    def kernel(xp_ref, w1_ref, p1_ref, w2_ref, p2_ref, out_ref, y_ref, z_ref):
        # ---- conv1 (both branches fused): 3 shifted-window dots ------------
        #   y[:, d*m:(d+1)*m] = sum_k W1[:, k*cin:(k+1)*cin] @ xpad[d+k]
        # over all d at once -> the tap-k window is xp[:, k*m : k*m + d1*m].
        b1 = p1_ref[:, 0:1]
        y_ref[...] = (
            jnp.dot(w1_ref[:, 0:cin], xp_ref[:, 0:d1m],
                    preferred_element_type=f32)
            + jnp.dot(w1_ref[:, cin:2 * cin], xp_ref[:, m:m + d1m],
                      preferred_element_type=f32)
            + jnp.dot(w1_ref[:, 2 * cin:3 * cin], xp_ref[:, 2 * m:2 * m + d1m],
                      preferred_element_type=f32)
            + b1)

        # ---- BN1 (two-pass batch stats) + ReLU, whole buffer, in place -----
        mean1 = jnp.sum(y_ref[...], axis=1, keepdims=True) * inv_n1
        c1 = y_ref[...] - mean1
        var1 = jnp.sum(c1 * c1, axis=1, keepdims=True) * inv_n1
        scale1 = p1_ref[:, 1:2] * jax.lax.rsqrt(var1 + EPS)
        shift1 = p1_ref[:, 2:3] - mean1 * scale1
        y_ref[...] = jnp.maximum(y_ref[...] * scale1 + shift1, 0.0)

        # ---- conv2: stride-2 transposed conv via output-depth parity -------
        #   even do = 2i   : z = W2[k=1] @ y[i+1]
        #   odd  do = 2i+1 : z = W2[k=0] @ y[i+2] + W2[k=2] @ y[i+1]
        # Both branches fused via block-diagonal (2*cout, 2*cmid) tap mats;
        # contiguous lane windows -> 3 dots total.
        b2 = p2_ref[:, 0:1]
        z_ref[:, 0:ne * m] = (
            jnp.dot(w2_ref[1], y_ref[:, m:(d1 - 1) * m],
                    preferred_element_type=f32) + b2)
        z_ref[:, ne * m:(ne + no) * m] = (
            jnp.dot(w2_ref[0], y_ref[:, 2 * m:(d1 - 1) * m],
                    preferred_element_type=f32)
            + jnp.dot(w2_ref[2], y_ref[:, m:(d1 - 2) * m],
                      preferred_element_type=f32)
            + b2)

        # ---- BN2 (two-pass) + tanh, whole buffer, in place ------------------
        mean2 = jnp.sum(z_ref[...], axis=1, keepdims=True) * inv_n2
        c2 = z_ref[...] - mean2
        var2 = jnp.sum(c2 * c2, axis=1, keepdims=True) * inv_n2
        scale2 = p2_ref[:, 1:2] * jax.lax.rsqrt(var2 + EPS)
        shift2 = p2_ref[:, 2:3] - mean2 * scale2
        z_ref[...] = jnp.tanh(z_ref[...] * scale2 + shift2)

        # ---- branch add (XLU sublane rotate) + depth-interleaved store ------
        for do in range(d2):
            src = (do // 2) if (do % 2 == 0) else (ne + do // 2)
            a = z_ref[:, src * m:(src + 1) * m]                 # (2*cout, m)
            s = a + pltpu.roll(a, shift=cout, axis=0)           # rows 0:cout = sum
            out_ref[:, do * m:(do + 1) * m] = s[0:cout, :]

    return kernel


# ----------------------------------------------------------------------------
# Weight packing helpers (tiny, run in glue)
# ----------------------------------------------------------------------------
def _conv1_weight_mat(w):
    """ConvTranspose3d weight (Cin, Co, 3) -> correlation matrix (Co, 3*Cin):
       W[o, k*Cin + c] = w[c, o, 2-k]  (flipped taps over the padded input)."""
    wf = w[:, :, ::-1]
    return jnp.transpose(wf, (1, 2, 0)).reshape(w.shape[1], 3 * w.shape[0])


def _conv2_blockdiag_taps(w_a, w_b):
    """Two ConvT weights (Cmid, Cout, 3) -> (3, 2*Cout, 2*Cmid) block-diagonal
       native-tap matrices (branch1 block top-left, branch2 bottom-right)."""
    cmid, cout, _ = w_a.shape
    taps = []
    for k in range(3):
        t = jnp.zeros((2 * cout, 2 * cmid), jnp.float32)
        t = t.at[:cout, :cmid].set(w_a[:, :, k].T)
        t = t.at[cout:, cmid:].set(w_b[:, :, k].T)
        taps.append(t)
    return jnp.stack(taps, axis=0)


# ----------------------------------------------------------------------------
# Forward pass (Pallas path)
# ----------------------------------------------------------------------------
@jax.jit
def gs_forward(x, params):
    """x: (N, Cin, D, H, W) float32.  Returns (N, Cout, 2*(D+2)-5, H, W)."""
    n, cin, d, h, w = x.shape
    m = n * h * w
    d1 = d + 2                      # conv1 output depth
    d2 = 2 * d1 - 5                 # conv2 output depth
    p1, p2 = params["g1"], params["g2"]
    cmid = p1[0].shape[1]
    cout = p1[4].shape[1]

    # Lane-dense layout; pad depth by 2 each side ONCE (no 3x im2col in HBM).
    x_cdm = jnp.transpose(x, (1, 2, 0, 3, 4)).reshape(cin, d, m)
    xpad = jnp.pad(x_cdm, ((0, 0), (2, 2), (0, 0))).reshape(cin, (d + 4) * m)

    # Pack per-branch parameters (tiny arrays, few DMAs).
    w1cat = jnp.concatenate([_conv1_weight_mat(p1[0]),
                             _conv1_weight_mat(p2[0])], axis=0)   # (2*Cmid, 3*Cin)
    p1cat = jnp.stack([jnp.concatenate([p1[1], p2[1]]),
                       jnp.concatenate([p1[2], p2[2]]),
                       jnp.concatenate([p1[3], p2[3]])], axis=1)  # (2*Cmid, 3)
    w2cat = _conv2_blockdiag_taps(p1[4], p2[4])                   # (3, 2*Cout, 2*Cmid)
    p2cat = jnp.stack([jnp.concatenate([p1[5], p2[5]]),
                       jnp.concatenate([p1[6], p2[6]]),
                       jnp.concatenate([p1[7], p2[7]])], axis=1)  # (2*Cout, 3)

    kernel = _make_kernel(cin, cmid, cout, d1, d2, m)
    out2d = pl.pallas_call(
        kernel,
        out_shape=jax.ShapeDtypeStruct((cout, d2 * m), jnp.float32),
        scratch_shapes=[
            pltpu.VMEM((2 * cmid, d1 * m), jnp.float32),   # conv1 / relu(bn1)
            pltpu.VMEM((2 * cout, d2 * m), jnp.float32),   # conv2 even|odd planes
        ],
        compiler_params=pltpu.CompilerParams(
            vmem_limit_bytes=32 * 1024 * 1024),
    )(xpad, w1cat, p1cat, w2cat, p2cat)

    # (Cout, D2*M) -> (N, Cout, D2, H, W)
    return jnp.transpose(out2d.reshape(cout, d2, n, h, w), (2, 0, 1, 3, 4))


# ----------------------------------------------------------------------------
# Pure-JAX reference (mirrors PyTorch semantics) for correctness check
# ----------------------------------------------------------------------------
def _ref_convT_depth(y, wgt, b, stride, pad):
    n, cin, d, h, wd = y.shape
    _, cout, k = wgt.shape
    d_out = (d - 1) * stride - 2 * pad + k
    out = jnp.zeros((n, cout, d_out, h, wd), jnp.float32)
    for di in range(d):
        contrib = jnp.einsum("nihw,iok->nokhw", y[:, :, di], wgt)
        for kk in range(k):
            do = di * stride - pad + kk
            if 0 <= do < d_out:
                out = out.at[:, :, do].add(contrib[:, :, kk])
    return out + b[None, :, None, None, None]


def _ref_bn(y, g, b):
    mean = jnp.mean(y, axis=(0, 2, 3, 4), keepdims=True)
    var = jnp.mean((y - mean) ** 2, axis=(0, 2, 3, 4), keepdims=True)
    return ((y - mean) / jnp.sqrt(var + EPS)) * g[None, :, None, None, None] \
        + b[None, :, None, None, None]


def ref_forward(x, params):
    def branch(p):
        w1, b1, g1, be1, w2, b2, g2, be2 = p
        y = _ref_convT_depth(x, w1, b1, 1, 0)
        y = jnp.maximum(_ref_bn(y, g1, be1), 0.0)
        z = _ref_convT_depth(y, w2, b2, 2, 3)
        return jnp.tanh(_ref_bn(z, g2, be2))
    return branch(params["g1"]) + branch(params["g2"])


# ----------------------------------------------------------------------------
def make_params(key, cin, c_mid, cout):
    ks = jax.random.split(key, 2)

    def branch(kb):
        k = jax.random.split(kb, 8)
        w1 = 0.2 * jax.random.normal(k[0], (cin, c_mid, 3), jnp.float32)
        b1 = 0.1 * jax.random.normal(k[1], (c_mid,), jnp.float32)
        g1 = 1.0 + 0.1 * jax.random.normal(k[2], (c_mid,), jnp.float32)
        be1 = 0.1 * jax.random.normal(k[3], (c_mid,), jnp.float32)
        w2 = 0.2 * jax.random.normal(k[4], (c_mid, cout, 3), jnp.float32)
        b2 = 0.1 * jax.random.normal(k[5], (cout,), jnp.float32)
        g2 = 1.0 + 0.1 * jax.random.normal(k[6], (cout,), jnp.float32)
        be2 = 0.1 * jax.random.normal(k[7], (cout,), jnp.float32)
        return (w1, b1, g1, be1, w2, b2, g2, be2)

    return {"g1": branch(ks[0]), "g2": branch(ks[1])}


if __name__ == "__main__":
    # config: in_channels=4, fil_num_g=2 (-> mid=16), out_channels=4
    N, CIN, D, H, W = 2, 4, 8, 16, 16        # M = N*H*W = 512 (lane-dense)
    C_MID, COUT = 16, 4

    key = jax.random.PRNGKey(0)
    kx, kp = jax.random.split(key)
    x = jax.random.normal(kx, (N, CIN, D, H, W), jnp.float32)
    params = make_params(kp, CIN, C_MID, COUT)

    out = gs_forward(x, params)
    out = jax.block_until_ready(out)

    expected_shape = (N, COUT, 2 * (D + 2) - 5, H, W)
    assert out.shape == expected_shape, (out.shape, expected_shape)

    ref = ref_forward(x, params)
    err = float(jnp.max(jnp.abs(out - ref)))
    assert jnp.allclose(out, ref, atol=1e-3, rtol=1e-3), err

    print("KERNEL_OK")
</pallas_src>

<mosaic_0001>
module attributes {stable_mosaic.version = 11 : i64} {
  func.func @kernel(%arg0: memref<4x6144xf32, #tpu.memory_space<vmem>>, %arg1: memref<32x12xf32, #tpu.memory_space<vmem>>, %arg2: memref<32x3xf32, #tpu.memory_space<vmem>>, %arg3: memref<3x8x32xf32, #tpu.memory_space<vmem>>, %arg4: memref<8x3xf32, #tpu.memory_space<vmem>>, %arg5: memref<4x7680xf32, #tpu.memory_space<vmem>>, %arg6: memref<32x5120xf32, #tpu.memory_space<vmem>>, %arg7: memref<8x7680xf32, #tpu.memory_space<vmem>>) attributes {dimension_semantics = [], scalar_prefetch = 0 : i64, scratch_operands = 2 : i64, tpu.core_type = #tpu.core_type<tc>} {
    %c0 = arith.constant 0 : index
    %c0_0 = arith.constant 0 : index
    %0 = vector.load %arg2[%c0, %c0_0] : memref<32x3xf32, #tpu.memory_space<vmem>>, vector<32x1xf32>
    %c0_1 = arith.constant 0 : index
    %c0_2 = arith.constant 0 : index
    %1 = vector.load %arg1[%c0_1, %c0_2] : memref<32x12xf32, #tpu.memory_space<vmem>>, vector<32x4xf32>
    %c0_3 = arith.constant 0 : index
    %c0_4 = arith.constant 0 : index
    %2 = vector.load %arg0[%c0_3, %c0_4] : memref<4x6144xf32, #tpu.memory_space<vmem>>, vector<4x5120xf32>
    %cst = arith.constant dense<0.000000e+00> : vector<32x5120xf32>
    %3 = tpu.matmul %1, %2, %cst {dimension_numbers = #tpu.dot_dimension_numbers<[1], [0], [0], [1], [0, 0, 1, 1], [], []>} : vector<32x4xf32>, vector<4x5120xf32>, vector<32x5120xf32> -> vector<32x5120xf32>
    %c0_5 = arith.constant 0 : index
    %c4 = arith.constant 4 : index
    %4 = vector.load %arg1[%c0_5, %c4] : memref<32x12xf32, #tpu.memory_space<vmem>>, vector<32x4xf32>
    %c0_6 = arith.constant 0 : index
    %c512 = arith.constant 512 : index
    %5 = vector.load %arg0[%c0_6, %c512] : memref<4x6144xf32, #tpu.memory_space<vmem>>, vector<4x5120xf32>
    %cst_7 = arith.constant dense<0.000000e+00> : vector<32x5120xf32>
    %6 = tpu.matmul %4, %5, %cst_7 {dimension_numbers = #tpu.dot_dimension_numbers<[1], [0], [0], [1], [0, 0, 1, 1], [], []>} : vector<32x4xf32>, vector<4x5120xf32>, vector<32x5120xf32> -> vector<32x5120xf32>
    %7 = arith.addf %3, %6 : vector<32x5120xf32>
    %c0_8 = arith.constant 0 : index
    %c8 = arith.constant 8 : index
    %8 = vector.load %arg1[%c0_8, %c8] : memref<32x12xf32, #tpu.memory_space<vmem>>, vector<32x4xf32>
    %c0_9 = arith.constant 0 : index
    %c1024 = arith.constant 1024 : index
    %9 = vector.load %arg0[%c0_9, %c1024] : memref<4x6144xf32, #tpu.memory_space<vmem>>, vector<4x5120xf32>
    %cst_10 = arith.constant dense<0.000000e+00> : vector<32x5120xf32>
    %10 = tpu.matmul %8, %9, %cst_10 {dimension_numbers = #tpu.dot_dimension_numbers<[1], [0], [0], [1], [0, 0, 1, 1], [], []>} : vector<32x4xf32>, vector<4x5120xf32>, vector<32x5120xf32> -> vector<32x5120xf32>
    %11 = arith.addf %7, %10 : vector<32x5120xf32>
    %12 = vector.broadcast %0 : vector<32x1xf32> to vector<32x5120xf32>
    %13 = arith.addf %11, %12 : vector<32x5120xf32>
    %c0_11 = arith.constant 0 : index
    %c0_12 = arith.constant 0 : index
    %14 = vector.load %arg6[%c0_11, %c0_12] : memref<32x5120xf32, #tpu.memory_space<vmem>>, vector<32x5120xf32>
    tpu.vector_store %arg6[%c0_11, %c0_12], %13 {strides = array<i32>} : memref<32x5120xf32, #tpu.memory_space<vmem>>, vector<32x5120xf32>,
    %c0_13 = arith.constant 0 : index
    %c0_14 = arith.constant 0 : index
    %15 = vector.load %arg6[%c0_13, %c0_14] : memref<32x5120xf32, #tpu.memory_space<vmem>>, vector<32x5120xf32>
    %cst_15 = arith.constant dense<0.000000e+00> : vector<32xf32>
    %16 = vector.multi_reduction <add>, %15, %cst_15 [1] : vector<32x5120xf32> to vector<32xf32>
    %17 = vector.shape_cast %16 : vector<32xf32> to vector<32x1xf32>
    %cst_16 = arith.constant 1.95312503E-4 : f32
    %18 = vector.broadcast %cst_16 : f32 to vector<32x1xf32>
    %19 = arith.mulf %17, %18 : vector<32x1xf32>
    %c0_17 = arith.constant 0 : index
    %c0_18 = arith.constant 0 : index
    %20 = vector.load %arg6[%c0_17, %c0_18] : memref<32x5120xf32, #tpu.memory_space<vmem>>, vector<32x5120xf32>
    %21 = vector.broadcast %19 : vector<32x1xf32> to vector<32x5120xf32>
    %22 = arith.subf %20, %21 : vector<32x5120xf32>
    %23 = arith.mulf %22, %22 : vector<32x5120xf32>
    %cst_19 = arith.constant dense<0.000000e+00> : vector<32xf32>
    %24 = vector.multi_reduction <add>, %23, %cst_19 [1] : vector<32x5120xf32> to vector<32xf32>
    %25 = vector.shape_cast %24 : vector<32xf32> to vector<32x1xf32>
    %cst_20 = arith.constant 1.95312503E-4 : f32
    %26 = vector.broadcast %cst_20 : f32 to vector<32x1xf32>
    %27 = arith.mulf %25, %26 : vector<32x1xf32>
    %c0_21 = arith.constant 0 : index
    %c1 = arith.constant 1 : index
    %28 = vector.load %arg2[%c0_21, %c1] : memref<32x3xf32, #tpu.memory_space<vmem>>, vector<32x1xf32>
    %cst_22 = arith.constant 9.99999974E-6 : f32
    %29 = vector.broadcast %cst_22 : f32 to vector<32x1xf32>
    %30 = arith.addf %27, %29 : vector<32x1xf32>
    %31 = math.rsqrt %30 : vector<32x1xf32>
    %32 = arith.mulf %28, %31 : vector<32x1xf32>
    %c0_23 = arith.constant 0 : index
    %c2 = arith.constant 2 : index
    %33 = vector.load %arg2[%c0_23, %c2] : memref<32x3xf32, #tpu.memory_space<vmem>>, vector<32x1xf32>
    %34 = arith.mulf %19, %32 : vector<32x1xf32>
    %35 = arith.subf %33, %34 : vector<32x1xf32>
    %c0_24 = arith.constant 0 : index
    %c0_25 = arith.constant 0 : index
    %36 = vector.load %arg6[%c0_24, %c0_25] : memref<32x5120xf32, #tpu.memory_space<vmem>>, vector<32x5120xf32>
    %37 = vector.broadcast %32 : vector<32x1xf32> to vector<32x5120xf32>
    %38 = arith.mulf %36, %37 : vector<32x5120xf32>
    %39 = vector.broadcast %35 : vector<32x1xf32> to vector<32x5120xf32>
    %40 = arith.addf %38, %39 : vector<32x5120xf32>
    %cst_26 = arith.constant 0.000000e+00 : f32
    %41 = vector.broadcast %cst_26 : f32 to vector<32x5120xf32>
    %42 = arith.maximumf %40, %41 : vector<32x5120xf32>
    %c0_27 = arith.constant 0 : index
    %c0_28 = arith.constant 0 : index
    %43 = vector.load %arg6[%c0_27, %c0_28] : memref<32x5120xf32, #tpu.memory_space<vmem>>, vector<32x5120xf32>
    tpu.vector_store %arg6[%c0_27, %c0_28], %42 {strides = array<i32>} : memref<32x5120xf32, #tpu.memory_space<vmem>>, vector<32x5120xf32>,
    %c0_29 = arith.constant 0 : index
    %c0_30 = arith.constant 0 : index
    %44 = vector.load %arg4[%c0_29, %c0_30] : memref<8x3xf32, #tpu.memory_space<vmem>>, vector<8x1xf32>
    %c1_31 = arith.constant 1 : index
    %c0_32 = arith.constant 0 : index
    %c0_33 = arith.constant 0 : index
    %45 = vector.load %arg3[%c1_31, %c0_32, %c0_33] : memref<3x8x32xf32, #tpu.memory_space<vmem>>, vector<1x8x32xf32>
    %46 = vector.shape_cast %45 : vector<1x8x32xf32> to vector<8x32xf32>
    %c0_34 = arith.constant 0 : index
    %c512_35 = arith.constant 512 : index
    %47 = vector.load %arg6[%c0_34, %c512_35] : memref<32x5120xf32, #tpu.memory_space<vmem>>, vector<32x4096xf32>
    %cst_36 = arith.constant dense<0.000000e+00> : vector<8x4096xf32>
    %48 = tpu.matmul %46, %47, %cst_36 {dimension_numbers = #tpu.dot_dimension_numbers<[1], [0], [0], [1], [0, 0, 1, 1], [], []>} : vector<8x32xf32>, vector<32x4096xf32>, vector<8x4096xf32> -> vector<8x4096xf32>
    %49 = vector.broadcast %44 : vector<8x1xf32> to vector<8x4096xf32>
    %50 = arith.addf %48, %49 : vector<8x4096xf32>
    %c0_37 = arith.constant 0 : index
    %c0_38 = arith.constant 0 : index
    %51 = vector.load %arg7[%c0_37, %c0_38] : memref<8x7680xf32, #tpu.memory_space<vmem>>, vector<8x4096xf32>
    tpu.vector_store %arg7[%c0_37, %c0_38], %50 {strides = array<i32>} : memref<8x7680xf32, #tpu.memory_space<vmem>>, vector<8x4096xf32>,
    %c0_39 = arith.constant 0 : index
    %c0_40 = arith.constant 0 : index
    %c0_41 = arith.constant 0 : index
    %52 = vector.load %arg3[%c0_39, %c0_40, %c0_41] : memref<3x8x32xf32, #tpu.memory_space<vmem>>, vector<1x8x32xf32>
    %53 = vector.shape_cast %52 : vector<1x8x32xf32> to vector<8x32xf32>
    %c0_42 = arith.constant 0 : index
    %c1024_43 = arith.constant 1024 : index
    %54 = vector.load %arg6[%c0_42, %c1024_43] : memref<32x5120xf32, #tpu.memory_space<vmem>>, vector<32x3584xf32>
    %cst_44 = arith.constant dense<0.000000e+00> : vector<8x3584xf32>
    %55 = tpu.matmul %53, %54, %cst_44 {dimension_numbers = #tpu.dot_dimension_numbers<[1], [0], [0], [1], [0, 0, 1, 1], [], []>} : vector<8x32xf32>, vector<32x3584xf32>, vector<8x3584xf32> -> vector<8x3584xf32>
    %c2_45 = arith.constant 2 : index
    %c0_46 = arith.constant 0 : index
    %c0_47 = arith.constant 0 : index
    %56 = vector.load %arg3[%c2_45, %c0_46, %c0_47] : memref<3x8x32xf32, #tpu.memory_space<vmem>>, vector<1x8x32xf32>
    %57 = vector.shape_cast %56 : vector<1x8x32xf32> to vector<8x32xf32>
    %c0_48 = arith.constant 0 : index
    %c512_49 = arith.constant 512 : index
    %58 = vector.load %arg6[%c0_48, %c512_49] : memref<32x5120xf32, #tpu.memory_space<vmem>>, vector<32x3584xf32>
    %cst_50 = arith.constant dense<0.000000e+00> : vector<8x3584xf32>
    %59 = tpu.matmul %57, %58, %cst_50 {dimension_numbers = #tpu.dot_dimension_numbers<[1], [0], [0], [1], [0, 0, 1, 1], [], []>} : vector<8x32xf32>, vector<32x3584xf32>, vector<8x3584xf32> -> vector<8x3584xf32>
    %60 = arith.addf %55, %59 : vector<8x3584xf32>
    %61 = vector.broadcast %44 : vector<8x1xf32> to vector<8x3584xf32>
    %62 = arith.addf %60, %61 : vector<8x3584xf32>
    %c0_51 = arith.constant 0 : index
    %c4096 = arith.constant 4096 : index
    %63 = vector.load %arg7[%c0_51, %c4096] : memref<8x7680xf32, #tpu.memory_space<vmem>>, vector<8x3584xf32>
    tpu.vector_store %arg7[%c0_51, %c4096], %62 {strides = array<i32>} : memref<8x7680xf32, #tpu.memory_space<vmem>>, vector<8x3584xf32>,
    %c0_52 = arith.constant 0 : index
    %c0_53 = arith.constant 0 : index
    %64 = vector.load %arg7[%c0_52, %c0_53] : memref<8x7680xf32, #tpu.memory_space<vmem>>, vector<8x7680xf32>
    %cst_54 = arith.constant dense<0.000000e+00> : vector<8xf32>
    %65 = vector.multi_reduction <add>, %64, %cst_54 [1] : vector<8x7680xf32> to vector<8xf32>
    %66 = vector.shape_cast %65 : vector<8xf32> to vector<8x1xf32>
    %cst_55 = arith.constant 1.3020834E-4 : f32
    %67 = vector.broadcast %cst_55 : f32 to vector<8x1xf32>
    %68 = arith.mulf %66, %67 : vector<8x1xf32>
    %c0_56 = arith.constant 0 : index
    %c0_57 = arith.constant 0 : index
    %69 = vector.load %arg7[%c0_56, %c0_57] : memref<8x7680xf32, #tpu.memory_space<vmem>>, vector<8x7680xf32>
    %70 = vector.broadcast %68 : vector<8x1xf32> to vector<8x7680xf32>
    %71 = arith.subf %69, %70 : vector<8x7680xf32>
    %72 = arith.mulf %71, %71 : vector<8x7680xf32>
    %cst_58 = arith.constant dense<0.000000e+00> : vector<8xf32>
    %73 = vector.multi_reduction <add>, %72, %cst_58 [1] : vector<8x7680xf32> to vector<8xf32>
    %74 = vector.shape_cast %73 : vector<8xf32> to vector<8x1xf32>
    %cst_59 = arith.constant 1.3020834E-4 : f32
    %75 = vector.broadcast %cst_59 : f32 to vector<8x1xf32>
    %76 = arith.mulf %74, %75 : vector<8x1xf32>
    %c0_60 = arith.constant 0 : index
    %c1_61 = arith.constant 1 : index
    %77 = vector.load %arg4[%c0_60, %c1_61] : memref<8x3xf32, #tpu.memory_space<vmem>>, vector<8x1xf32>
    %cst_62 = arith.constant 9.99999974E-6 : f32
    %78 = vector.broadcast %cst_62 : f32 to vector<8x1xf32>
    %79 = arith.addf %76, %78 : vector<8x1xf32>
    %80 = math.rsqrt %79 : vector<8x1xf32>
    %81 = arith.mulf %77, %80 : vector<8x1xf32>
    %c0_63 = arith.constant 0 : index
    %c2_64 = arith.constant 2 : index
    %82 = vector.load %arg4[%c0_63, %c2_64] : memref<8x3xf32, #tpu.memory_space<vmem>>, vector<8x1xf32>
    %83 = arith.mulf %68, %81 : vector<8x1xf32>
    %84 = arith.subf %82, %83 : vector<8x1xf32>
    %c0_65 = arith.constant 0 : index
    %c0_66 = arith.constant 0 : index
    %85 = vector.load %arg7[%c0_65, %c0_66] : memref<8x7680xf32, #tpu.memory_space<vmem>>, vector<8x7680xf32>
    %86 = vector.broadcast %81 : vector<8x1xf32> to vector<8x7680xf32>
    %87 = arith.mulf %85, %86 : vector<8x7680xf32>
    %88 = vector.broadcast %84 : vector<8x1xf32> to vector<8x7680xf32>
    %89 = arith.addf %87, %88 : vector<8x7680xf32>
    %90 = math.tanh %89 : vector<8x7680xf32>
    %c0_67 = arith.constant 0 : index
    %c0_68 = arith.constant 0 : index
    %91 = vector.load %arg7[%c0_67, %c0_68] : memref<8x7680xf32, #tpu.memory_space<vmem>>, vector<8x7680xf32>
    tpu.vector_store %arg7[%c0_67, %c0_68], %90 {strides = array<i32>} : memref<8x7680xf32, #tpu.memory_space<vmem>>, vector<8x7680xf32>,
    %c0_69 = arith.constant 0 : index
    %c0_70 = arith.constant 0 : index
    %92 = vector.load %arg7[%c0_69, %c0_70] : memref<8x7680xf32, #tpu.memory_space<vmem>>, vector<8x512xf32>
    %c4_i32 = arith.constant 4 : i32
    %93 = tpu.dynamic_rotate %92 by %c4_i32 dim 0 : vector<8x512xf32>, i32 -> vector<8x512xf32>
    %94 = arith.addf %92, %93 : vector<8x512xf32>
    %95 = vector.extract_strided_slice %94 {offsets = [0, 0], sizes = [4, 512], strides = [1, 1]} : vector<8x512xf32> to vector<4x512xf32>
    %c0_71 = arith.constant 0 : index
    %c0_72 = arith.constant 0 : index
    %96 = vector.load %arg5[%c0_71, %c0_72] : memref<4x7680xf32, #tpu.memory_space<vmem>>, vector<4x512xf32>
    tpu.vector_store %arg5[%c0_71, %c0_72], %95 {strides = array<i32>} : memref<4x7680xf32, #tpu.memory_space<vmem>>, vector<4x512xf32>,
    %c0_73 = arith.constant 0 : index
    %c4096_74 = arith.constant 4096 : index
    %97 = vector.load %arg7[%c0_73, %c4096_74] : memref<8x7680xf32, #tpu.memory_space<vmem>>, vector<8x512xf32>
    %c4_i32_75 = arith.constant 4 : i32
    %98 = tpu.dynamic_rotate %97 by %c4_i32_75 dim 0 : vector<8x512xf32>, i32 -> vector<8x512xf32>
    %99 = arith.addf %97, %98 : vector<8x512xf32>
    %100 = vector.extract_strided_slice %99 {offsets = [0, 0], sizes = [4, 512], strides = [1, 1]} : vector<8x512xf32> to vector<4x512xf32>
    %c0_76 = arith.constant 0 : index
    %c512_77 = arith.constant 512 : index
    %101 = vector.load %arg5[%c0_76, %c512_77] : memref<4x7680xf32, #tpu.memory_space<vmem>>, vector<4x512xf32>
    tpu.vector_store %arg5[%c0_76, %c512_77], %100 {strides = array<i32>} : memref<4x7680xf32, #tpu.memory_space<vmem>>, vector<4x512xf32>,
    %c0_78 = arith.constant 0 : index
    %c512_79 = arith.constant 512 : index
    %102 = vector.load %arg7[%c0_78, %c512_79] : memref<8x7680xf32, #tpu.memory_space<vmem>>, vector<8x512xf32>
    %c4_i32_80 = arith.constant 4 : i32
    %103 = tpu.dynamic_rotate %102 by %c4_i32_80 dim 0 : vector<8x512xf32>, i32 -> vector<8x512xf32>
    %104 = arith.addf %102, %103 : vector<8x512xf32>
    %105 = vector.extract_strided_slice %104 {offsets = [0, 0], sizes = [4, 512], strides = [1, 1]} : vector<8x512xf32> to vector<4x512xf32>
    %c0_81 = arith.constant 0 : index
    %c1024_82 = arith.constant 1024 : index
    %106 = vector.load %arg5[%c0_81, %c1024_82] : memref<4x7680xf32, #tpu.memory_space<vmem>>, vector<4x512xf32>
    tpu.vector_store %arg5[%c0_81, %c1024_82], %105 {strides = array<i32>} : memref<4x7680xf32, #tpu.memory_space<vmem>>, vector<4x512xf32>,
    %c0_83 = arith.constant 0 : index
    %c4608 = arith.constant 4608 : index
    %107 = vector.load %arg7[%c0_83, %c4608] : memref<8x7680xf32, #tpu.memory_space<vmem>>, vector<8x512xf32>
    %c4_i32_84 = arith.constant 4 : i32
    %108 = tpu.dynamic_rotate %107 by %c4_i32_84 dim 0 : vector<8x512xf32>, i32 -> vector<8x512xf32>
    %109 = arith.addf %107, %108 : vector<8x512xf32>
    %110 = vector.extract_strided_slice %109 {offsets = [0, 0], sizes = [4, 512], strides = [1, 1]} : vector<8x512xf32> to vector<4x512xf32>
    %c0_85 = arith.constant 0 : index
    %c1536 = arith.constant 1536 : index
    %111 = vector.load %arg5[%c0_85, %c1536] : memref<4x7680xf32, #tpu.memory_space<vmem>>, vector<4x512xf32>
    tpu.vector_store %arg5[%c0_85, %c1536], %110 {strides = array<i32>} : memref<4x7680xf32, #tpu.memory_space<vmem>>, vector<4x512xf32>,
    %c0_86 = arith.constant 0 : index
    %c1024_87 = arith.constant 1024 : index
    %112 = vector.load %arg7[%c0_86, %c1024_87] : memref<8x7680xf32, #tpu.memory_space<vmem>>, vector<8x512xf32>
    %c4_i32_88 = arith.constant 4 : i32
    %113 = tpu.dynamic_rotate %112 by %c4_i32_88 dim 0 : vector<8x512xf32>, i32 -> vector<8x512xf32>
    %114 = arith.addf %112, %113 : vector<8x512xf32>
    %115 = vector.extract_strided_slice %114 {offsets = [0, 0], sizes = [4, 512], strides = [1, 1]} : vector<8x512xf32> to vector<4x512xf32>
    %c0_89 = arith.constant 0 : index
    %c2048 = arith.constant 2048 : index
    %116 = vector.load %arg5[%c0_89, %c2048] : memref<4x7680xf32, #tpu.memory_space<vmem>>, vector<4x512xf32>
    tpu.vector_store %arg5[%c0_89, %c2048], %115 {strides = array<i32>} : memref<4x7680xf32, #tpu.memory_space<vmem>>, vector<4x512xf32>,
    %c0_90 = arith.constant 0 : index
    %c5120 = arith.constant 5120 : index
    %117 = vector.load %arg7[%c0_90, %c5120] : memref<8x7680xf32, #tpu.memory_space<vmem>>, vector<8x512xf32>
    %c4_i32_91 = arith.constant 4 : i32
    %118 = tpu.dynamic_rotate %117 by %c4_i32_91 dim 0 : vector<8x512xf32>, i32 -> vector<8x512xf32>
    %119 = arith.addf %117, %118 : vector<8x512xf32>
    %120 = vector.extract_strided_slice %119 {offsets = [0, 0], sizes = [4, 512], strides = [1, 1]} : vector<8x512xf32> to vector<4x512xf32>
    %c0_92 = arith.constant 0 : index
    %c2560 = arith.constant 2560 : index
    %121 = vector.load %arg5[%c0_92, %c2560] : memref<4x7680xf32, #tpu.memory_space<vmem>>, vector<4x512xf32>
    tpu.vector_store %arg5[%c0_92, %c2560], %120 {strides = array<i32>} : memref<4x7680xf32, #tpu.memory_space<vmem>>, vector<4x512xf32>,
    %c0_93 = arith.constant 0 : index
    %c1536_94 = arith.constant 1536 : index
    %122 = vector.load %arg7[%c0_93, %c1536_94] : memref<8x7680xf32, #tpu.memory_space<vmem>>, vector<8x512xf32>
    %c4_i32_95 = arith.constant 4 : i32
    %123 = tpu.dynamic_rotate %122 by %c4_i32_95 dim 0 : vector<8x512xf32>, i32 -> vector<8x512xf32>
    %124 = arith.addf %122, %123 : vector<8x512xf32>
    %125 = vector.extract_strided_slice %124 {offsets = [0, 0], sizes = [4, 512], strides = [1, 1]} : vector<8x512xf32> to vector<4x512xf32>
    %c0_96 = arith.constant 0 : index
    %c3072 = arith.constant 3072 : index
    %126 = vector.load %arg5[%c0_96, %c3072] : memref<4x7680xf32, #tpu.memory_space<vmem>>, vector<4x512xf32>
    tpu.vector_store %arg5[%c0_96, %c3072], %125 {strides = array<i32>} : memref<4x7680xf32, #tpu.memory_space<vmem>>, vector<4x512xf32>,
    %c0_97 = arith.constant 0 : index
    %c5632 = arith.constant 5632 : index
    %127 = vector.load %arg7[%c0_97, %c5632] : memref<8x7680xf32, #tpu.memory_space<vmem>>, vector<8x512xf32>
    %c4_i32_98 = arith.constant 4 : i32
    %128 = tpu.dynamic_rotate %127 by %c4_i32_98 dim 0 : vector<8x512xf32>, i32 -> vector<8x512xf32>
    %129 = arith.addf %127, %128 : vector<8x512xf32>
    %130 = vector.extract_strided_slice %129 {offsets = [0, 0], sizes = [4, 512], strides = [1, 1]} : vector<8x512xf32> to vector<4x512xf32>
    %c0_99 = arith.constant 0 : index
    %c3584 = arith.constant 3584 : index
    %131 = vector.load %arg5[%c0_99, %c3584] : memref<4x7680xf32, #tpu.memory_space<vmem>>, vector<4x512xf32>
    tpu.vector_store %arg5[%c0_99, %c3584], %130 {strides = array<i32>} : memref<4x7680xf32, #tpu.memory_space<vmem>>, vector<4x512xf32>,
    %c0_100 = arith.constant 0 : index
    %c2048_101 = arith.constant 2048 : index
    %132 = vector.load %arg7[%c0_100, %c2048_101] : memref<8x7680xf32, #tpu.memory_space<vmem>>, vector<8x512xf32>
    %c4_i32_102 = arith.constant 4 : i32
    %133 = tpu.dynamic_rotate %132 by %c4_i32_102 dim 0 : vector<8x512xf32>, i32 -> vector<8x512xf32>
    %134 = arith.addf %132, %133 : vector<8x512xf32>
    %135 = vector.extract_strided_slice %134 {offsets = [0, 0], sizes = [4, 512], strides = [1, 1]} : vector<8x512xf32> to vector<4x512xf32>
    %c0_103 = arith.constant 0 : index
    %c4096_104 = arith.constant 4096 : index
    %136 = vector.load %arg5[%c0_103, %c4096_104] : memref<4x7680xf32, #tpu.memory_space<vmem>>, vector<4x512xf32>
    tpu.vector_store %arg5[%c0_103, %c4096_104], %135 {strides = array<i32>} : memref<4x7680xf32, #tpu.memory_space<vmem>>, vector<4x512xf32>,
    %c0_105 = arith.constant 0 : index
    %c6144 = arith.constant 6144 : index
    %137 = vector.load %arg7[%c0_105, %c6144] : memref<8x7680xf32, #tpu.memory_space<vmem>>, vector<8x512xf32>
    %c4_i32_106 = arith.constant 4 : i32
    %138 = tpu.dynamic_rotate %137 by %c4_i32_106 dim 0 : vector<8x512xf32>, i32 -> vector<8x512xf32>
    %139 = arith.addf %137, %138 : vector<8x512xf32>
    %140 = vector.extract_strided_slice %139 {offsets = [0, 0], sizes = [4, 512], strides = [1, 1]} : vector<8x512xf32> to vector<4x512xf32>
    %c0_107 = arith.constant 0 : index
    %c4608_108 = arith.constant 4608 : index
    %141 = vector.load %arg5[%c0_107, %c4608_108] : memref<4x7680xf32, #tpu.memory_space<vmem>>, vector<4x512xf32>
    tpu.vector_store %arg5[%c0_107, %c4608_108], %140 {strides = array<i32>} : memref<4x7680xf32, #tpu.memory_space<vmem>>, vector<4x512xf32>,
    %c0_109 = arith.constant 0 : index
    %c2560_110 = arith.constant 2560 : index
    %142 = vector.load %arg7[%c0_109, %c2560_110] : memref<8x7680xf32, #tpu.memory_space<vmem>>, vector<8x512xf32>
    %c4_i32_111 = arith.constant 4 : i32
    %143 = tpu.dynamic_rotate %142 by %c4_i32_111 dim 0 : vector<8x512xf32>, i32 -> vector<8x512xf32>
    %144 = arith.addf %142, %143 : vector<8x512xf32>
    %145 = vector.extract_strided_slice %144 {offsets = [0, 0], sizes = [4, 512], strides = [1, 1]} : vector<8x512xf32> to vector<4x512xf32>
    %c0_112 = arith.constant 0 : index
    %c5120_113 = arith.constant 5120 : index
    %146 = vector.load %arg5[%c0_112, %c5120_113] : memref<4x7680xf32, #tpu.memory_space<vmem>>, vector<4x512xf32>
    tpu.vector_store %arg5[%c0_112, %c5120_113], %145 {strides = array<i32>} : memref<4x7680xf32, #tpu.memory_space<vmem>>, vector<4x512xf32>,
    %c0_114 = arith.constant 0 : index
    %c6656 = arith.constant 6656 : index
    %147 = vector.load %arg7[%c0_114, %c6656] : memref<8x7680xf32, #tpu.memory_space<vmem>>, vector<8x512xf32>
    %c4_i32_115 = arith.constant 4 : i32
    %148 = tpu.dynamic_rotate %147 by %c4_i32_115 dim 0 : vector<8x512xf32>, i32 -> vector<8x512xf32>
    %149 = arith.addf %147, %148 : vector<8x512xf32>
    %150 = vector.extract_strided_slice %149 {offsets = [0, 0], sizes = [4, 512], strides = [1, 1]} : vector<8x512xf32> to vector<4x512xf32>
    %c0_116 = arith.constant 0 : index
    %c5632_117 = arith.constant 5632 : index
    %151 = vector.load %arg5[%c0_116, %c5632_117] : memref<4x7680xf32, #tpu.memory_space<vmem>>, vector<4x512xf32>
    tpu.vector_store %arg5[%c0_116, %c5632_117], %150 {strides = array<i32>} : memref<4x7680xf32, #tpu.memory_space<vmem>>, vector<4x512xf32>,
    %c0_118 = arith.constant 0 : index
    %c3072_119 = arith.constant 3072 : index
    %152 = vector.load %arg7[%c0_118, %c3072_119] : memref<8x7680xf32, #tpu.memory_space<vmem>>, vector<8x512xf32>
    %c4_i32_120 = arith.constant 4 : i32
    %153 = tpu.dynamic_rotate %152 by %c4_i32_120 dim 0 : vector<8x512xf32>, i32 -> vector<8x512xf32>
    %154 = arith.addf %152, %153 : vector<8x512xf32>
    %155 = vector.extract_strided_slice %154 {offsets = [0, 0], sizes = [4, 512], strides = [1, 1]} : vector<8x512xf32> to vector<4x512xf32>
    %c0_121 = arith.constant 0 : index
    %c6144_122 = arith.constant 6144 : index
    %156 = vector.load %arg5[%c0_121, %c6144_122] : memref<4x7680xf32, #tpu.memory_space<vmem>>, vector<4x512xf32>
    tpu.vector_store %arg5[%c0_121, %c6144_122], %155 {strides = array<i32>} : memref<4x7680xf32, #tpu.memory_space<vmem>>, vector<4x512xf32>,
    %c0_123 = arith.constant 0 : index
    %c7168 = arith.constant 7168 : index
    %157 = vector.load %arg7[%c0_123, %c7168] : memref<8x7680xf32, #tpu.memory_space<vmem>>, vector<8x512xf32>
    %c4_i32_124 = arith.constant 4 : i32
    %158 = tpu.dynamic_rotate %157 by %c4_i32_124 dim 0 : vector<8x512xf32>, i32 -> vector<8x512xf32>
    %159 = arith.addf %157, %158 : vector<8x512xf32>
    %160 = vector.extract_strided_slice %159 {offsets = [0, 0], sizes = [4, 512], strides = [1, 1]} : vector<8x512xf32> to vector<4x512xf32>
    %c0_125 = arith.constant 0 : index
    %c6656_126 = arith.constant 6656 : index
    %161 = vector.load %arg5[%c0_125, %c6656_126] : memref<4x7680xf32, #tpu.memory_space<vmem>>, vector<4x512xf32>
    tpu.vector_store %arg5[%c0_125, %c6656_126], %160 {strides = array<i32>} : memref<4x7680xf32, #tpu.memory_space<vmem>>, vector<4x512xf32>,
    %c0_127 = arith.constant 0 : index
    %c3584_128 = arith.constant 3584 : index
    %162 = vector.load %arg7[%c0_127, %c3584_128] : memref<8x7680xf32, #tpu.memory_space<vmem>>, vector<8x512xf32>
    %c4_i32_129 = arith.constant 4 : i32
    %163 = tpu.dynamic_rotate %162 by %c4_i32_129 dim 0 : vector<8x512xf32>, i32 -> vector<8x512xf32>
    %164 = arith.addf %162, %163 : vector<8x512xf32>
    %165 = vector.extract_strided_slice %164 {offsets = [0, 0], sizes = [4, 512], strides = [1, 1]} : vector<8x512xf32> to vector<4x512xf32>
    %c0_130 = arith.constant 0 : index
    %c7168_131 = arith.constant 7168 : index
    %166 = vector.load %arg5[%c0_130, %c7168_131] : memref<4x7680xf32, #tpu.memory_space<vmem>>, vector<4x512xf32>
    tpu.vector_store %arg5[%c0_130, %c7168_131], %165 {strides = array<i32>} : memref<4x7680xf32, #tpu.memory_space<vmem>>, vector<4x512xf32>,
    return
  }
}

</mosaic_0001>

<bundles_post_ra>
// kernel: gs_forward.1
= control target key start
LH: loop header
LB: loop body
LE: loop exit
PB: predicated region body
PF: predicated region fallthrough
CT: control target
= control target key end

     0   :  { %s10050_s22 = smov 124   ;;  %vm154_vm0 = vcmask 1043456   ;;  %vm145_vm1 = vcmask 31744   ;;  %s10051_s6 = smov 120   ;;  %vm6283_vm14 = vcmask 261120   ;;  %s17458_s1 = inlined_call_operand.vmem [shape: f32[32,12], index: 1, kind: input, shape index: {}]   ;;  %s17459_s0 = inlined_call_operand.vmem [shape: f32[4,6144], index: 0, kind: input, shape index: {}]   ;;  %s17460_s2 = inlined_call_operand.vmem [shape: f32[32,3], index: 2, kind: input, shape index: {}]   ;;  %s17461_s3 = inlined_call_operand.vmem [shape: f32[3,8,32], index: 3, kind: input, shape index: {}]   ;;  %s17462_s4 = inlined_call_operand.vmem [shape: f32[8,3], index: 4, kind: input, shape index: {}]   ;;  %s17463_s5 = inlined_call_operand.vmem [shape: f32[4,7680], index: 5, kind: output, shape index: {}]  }
   0x1   :  { %v10089_v0 = vld [vmem:[%s17458_s1] sm:$0xff]  ;;  %v10094_v1 = vld [vmem:[%s17458_s1 + $0x10] sm:$0xff]  ;;  %v10101_v2 = vld [vmem:[%s17458_s1 + $0x8] sm:$0xff]  ;;  %s10054_s10 = smov 1  }
   0x2   :  { %54 = vrot.lane.b32.xlu0 %v10089_v0, %s10050_s22  ;;  %58 = vrot.lane.b32.xlu1 %v10094_v1, %s10050_s22  ;;  %v10106_v3 = vld [vmem:[%s17458_s1 + $0x18] sm:$0xff]  ;;  %v10113_v4 = vld [vmem:[%s17459_s0 + $0x10] sm:$0xff] }
   0x3   :  { %v10118_v5 = vld [vmem:[%s17459_s0 + $0x18] sm:$0xff]  ;;  %82 = vst [vmem:[#allocation1] ss:$2 sm:$0xff] %v10113_v4  ;;  %v10129_v10 = vld [vmem:[%s17459_s0 + $0x28] sm:$0xff]  ;;  %v10135_v11 = vld [vmem:[%s17459_s0 + $0x20] sm:$0xff] }
   0x4   :  { %84 = vst [vmem:[#allocation1 + $0x10] ss:$2 sm:$0xff] %v10118_v5  ;;  %v10155_v17 = vld [vmem:[%s17459_s0 + $0x38] sm:$0xff]  ;;  %v10171_v20 = vld [vmem:[%s17459_s0 + $0x30] sm:$0xff]  ;;  %v10209_v26 = vld [vmem:[%s17459_s0 + $0x48] sm:$0xff] }
   0x5   :  { %88 = vst [vmem:[#allocation1 + $0x30] ss:$2 sm:$0xff] %v10129_v10  ;;  %v10223_v28 = vld [vmem:[%s17459_s0 + $0x40] sm:$0xff]  ;;  %v10257_v32 = vld [vmem:[%s17459_s0 + $0x58] sm:$0xff]  ;;  %v10271_v34 = vld [vmem:[%s17459_s0 + $0x50] sm:$0xff] }
   0x6   :  { %86 = vst [vmem:[#allocation1 + $0x20] ss:$2 sm:$0xff] %v10135_v11  ;;  %v10305_v38 = vld [vmem:[%s17459_s0 + $0x68] sm:$0xff]  ;;  %v10319_v39 = vld [vmem:[%s17459_s0 + $0x60] sm:$0xff]  ;;  %v10365_v50 = vld [vmem:[%s17459_s0 + $0x78] sm:$0xff] }
   0x7   :  { %v10379_v51 = vld [vmem:[%s17459_s0 + $0x70] sm:$0xff] }
   0xa   :  { %56 = vrot.lane.b32.xlu0 %v10101_v2, %s10050_s22  ;;  %60 = vrot.lane.b32.xlu1 %v10106_v3, %s10050_s22  ;;  %v89_v6 = vld.sshfl [vmem:[#allocation1] sm:$0xff pattern:$0x75316420]  ;;  %v90_v7 = vld.sshfl [vmem:[#allocation1 + $0x8] sm:$0xff pattern:$0x75316420] }
   0xb   :  { %9209 = vmatpush.msk.msra.mxu0 %vm154_vm0, %v89_v6  ;;  %v91_v8 = vld.sshfl [vmem:[#allocation1 + $0x10] sm:$0xff pattern:$0x75316420]  ;;  %9214 = vmatpush.msk.msra.mxu1 %vm154_vm0, %v90_v7  ;;  %v92_v9 = vld.sshfl [vmem:[#allocation1 + $0x18] sm:$0xff pattern:$0x75316420] }
   0xc   :  { %9219 = vmatpush.msk.msra.mxu2 %vm154_vm0, %v91_v8  ;;  %9224 = vmatpush.msk.msra.mxu3 %vm154_vm0, %v92_v9  ;;  %v95_v12 = vld.sshfl [vmem:[#allocation1 + $0x30] sm:$0xff pattern:$0x75316420]  ;;  %v96_v13 = vld.sshfl [vmem:[#allocation1 + $0x38] sm:$0xff pattern:$0x75316420] }
   0xd   :  { %v93_v14 = vld.sshfl [vmem:[#allocation1 + $0x20] sm:$0xff pattern:$0x75316420]  ;;  %v94_v15 = vld.sshfl [vmem:[#allocation1 + $0x28] sm:$0xff pattern:$0x75316420] }
   0xe   :  { %9239 = vmatpush.msk.msrb.mxu2 %vm154_vm0, %v95_v12  ;;  %9244 = vmatpush.msk.msrb.mxu3 %vm154_vm0, %v96_v13  ;;  %98 = vst [vmem:[#allocation1 + $0x10] ss:$2 sm:$0xff] %v10155_v17 }
   0xf   :  { %9229 = vmatpush.msk.msrb.mxu0 %vm154_vm0, %v93_v14  ;;  %9234 = vmatpush.msk.msrb.mxu1 %vm154_vm0, %v94_v15  ;;  %97 = vst [vmem:[#allocation1] ss:$2 sm:$0xff] %v10171_v20 }
  0x10   :  { %100 = vst [vmem:[#allocation1 + $0x30] ss:$2 sm:$0xff] %v10209_v26 }
  0x11   :  { %99 = vst [vmem:[#allocation1 + $0x20] ss:$2 sm:$0xff] %v10223_v28 }
  0x15   :  { %v103_v19 = vld.sshfl [vmem:[#allocation1 + $0x10] sm:$0xff pattern:$0x75316420]  ;;  %v104_v21 = vld.sshfl [vmem:[#allocation1 + $0x18] sm:$0xff pattern:$0x75316420] }
  0x16   :  { %v101_v23 = vld.sshfl [vmem:[#allocation1] sm:$0xff pattern:$0x75316420]  ;;  %v102_v24 = vld.sshfl [vmem:[#allocation1 + $0x8] sm:$0xff pattern:$0x75316420] }
  0x17   :  { %v107_v27 = vld.sshfl [vmem:[#allocation1 + $0x30] sm:$0xff pattern:$0x75316420]  ;;  %v108_v29 = vld.sshfl [vmem:[#allocation1 + $0x38] sm:$0xff pattern:$0x75316420] }
  0x18   :  { %v105_v30 = vld.sshfl [vmem:[#allocation1 + $0x20] sm:$0xff pattern:$0x75316420]  ;;  %v106_v31 = vld.sshfl [vmem:[#allocation1 + $0x28] sm:$0xff pattern:$0x75316420] }
  0x19   :  { %110 = vst [vmem:[#allocation1 + $0x10] ss:$2 sm:$0xff] %v10257_v32 }
  0x1a   :  { %109 = vst [vmem:[#allocation1] ss:$2 sm:$0xff] %v10271_v34 }
  0x1b   :  { %112 = vst [vmem:[#allocation1 + $0x30] ss:$2 sm:$0xff] %v10305_v38 }
  0x1c   :  { %111 = vst [vmem:[#allocation1 + $0x20] ss:$2 sm:$0xff] %v10319_v39 }
  0x20   :  { %v115_v33 = vld.sshfl [vmem:[#allocation1 + $0x10] sm:$0xff pattern:$0x75316420]  ;;  %v116_v35 = vld.sshfl [vmem:[#allocation1 + $0x18] sm:$0xff pattern:$0x75316420] }
  0x21   :  { %v113_v36 = vld.sshfl [vmem:[#allocation1] sm:$0xff pattern:$0x75316420]  ;;  %v114_v37 = vld.sshfl [vmem:[#allocation1 + $0x8] sm:$0xff pattern:$0x75316420] }
  0x22   :  { %v119_v40 = vld.sshfl [vmem:[#allocation1 + $0x30] sm:$0xff pattern:$0x75316420]  ;;  %v120_v41 = vld.sshfl [vmem:[#allocation1 + $0x38] sm:$0xff pattern:$0x75316420] }
  0x23   :  { %v117_v42 = vld.sshfl [vmem:[#allocation1 + $0x20] sm:$0xff pattern:$0x75316420]  ;;  %v118_v43 = vld.sshfl [vmem:[#allocation1 + $0x28] sm:$0xff pattern:$0x75316420] }
  0x24   :  { %122 = vst [vmem:[#allocation1 + $0x10] ss:$2 sm:$0xff] %v10365_v50 }
  0x25   :  { %121 = vst [vmem:[#allocation1] ss:$2 sm:$0xff] %v10379_v51 }
  0x2b   :  { %v127_v56 = vld.sshfl [vmem:[#allocation1 + $0x10] sm:$0xff pattern:$0x75316420]  ;;  %v128_v57 = vld.sshfl [vmem:[#allocation1 + $0x18] sm:$0xff pattern:$0x75316420] }
  0x2c   :  { %v125_v58 = vld.sshfl [vmem:[#allocation1] sm:$0xff pattern:$0x75316420]  ;;  %v126_v59 = vld.sshfl [vmem:[#allocation1 + $0x8] sm:$0xff pattern:$0x75316420] }
  0x74   :  { %v10142_v16 = vpop.permute.xlu0 %54  ;;  %v10175_v22 = vpop.permute.xlu1 %58 }
  0x75   :  { %9210 = vmatmul.msk.f32.vlgmr.msra.gmra.mxu0 %vm145_vm1, %v10142_v16  ;;  %9215 = vmatmul.msk.f32.vlgmr.msra.gmra.mxu1 %vm145_vm1, %v10142_v16 }
  0x76   :  { %9220 = vmatmul.msk.f32.vlgmr.msra.gmra.mxu2 %vm145_vm1, %v10142_v16  ;;  %9225 = vmatmul.msk.f32.vlgmr.msra.gmra.mxu3 %vm145_vm1, %v10142_v16 }
  0x77   :  { %9259 = vmatpush.msk.msra.mxu2 %vm154_vm0, %v103_v19  ;;  %9264 = vmatpush.msk.msra.mxu3 %vm154_vm0, %v104_v21  ;;  %v10445_v19 = vld [vmem:[%s17459_s0 + $0x88] sm:$0xff]  ;;  %v10459_v21 = vld [vmem:[%s17459_s0 + $0x80] sm:$0xff] }
  0x78   :  { %9249 = vmatpush.msk.msra.mxu0 %vm154_vm0, %v101_v23  ;;  %9254 = vmatpush.msk.msra.mxu1 %vm154_vm0, %v102_v24  ;;  %124 = vst [vmem:[#allocation1 + $0x30] ss:$2 sm:$0xff] %v10445_v19 }
  0x79   :  { %123 = vst [vmem:[#allocation1 + $0x20] ss:$2 sm:$0xff] %v10459_v21 }
  0x7c   :  { %v10158_v18 = vpop.permute.xlu0 %56  ;;  %v10188_v25 = vpop.permute.xlu1 %60 }
  0x7d   :  { %9211 = vmatmul.msk.f32.gmra.mxu0 %vm145_vm1, %v10158_v18  ;;  %9216 = vmatmul.msk.f32.gmra.mxu1 %vm145_vm1, %v10158_v18 }
  0x7e   :  { %9221 = vmatmul.msk.f32.gmra.mxu2 %vm145_vm1, %v10158_v18  ;;  %9226 = vmatmul.msk.f32.gmra.mxu3 %vm145_vm1, %v10158_v18 }
  0x85   :  { %9212 = vmatmul.msk.f32.gmra.mxu0 %vm145_vm1, %v10175_v22  ;;  %9217 = vmatmul.msk.f32.gmra.mxu1 %vm145_vm1, %v10175_v22 }
  0x86   :  { %9222 = vmatmul.msk.f32.gmra.mxu2 %vm145_vm1, %v10175_v22  ;;  %9227 = vmatmul.msk.f32.gmra.mxu3 %vm145_vm1, %v10175_v22 }
  0x8d   :  { %9213 = vmatmul.msk.f32.gmra.mxu0 %vm145_vm1, %v10188_v25  ;;  %9218 = vmatmul.msk.f32.gmra.mxu1 %vm145_vm1, %v10188_v25 }
  0x8e   :  { %9223 = vmatmul.msk.f32.gmra.mxu2 %vm145_vm1, %v10188_v25  ;;  %9228 = vmatmul.msk.f32.gmra.mxu3 %vm145_vm1, %v10188_v25 }
  0x95   :  { %9230 = vmatmul.msk.f32.vlgmr.msrb.gmra.mxu0 %vm145_vm1, %v10142_v16  ;;  %9235 = vmatmul.msk.f32.vlgmr.msrb.gmra.mxu1 %vm145_vm1, %v10142_v16 }
  0x96   :  { %9240 = vmatmul.msk.f32.vlgmr.msrb.gmra.mxu2 %vm145_vm1, %v10142_v16  ;;  %9245 = vmatmul.msk.f32.vlgmr.msrb.gmra.mxu3 %vm145_vm1, %v10142_v16 }
  0x97   :  { %9279 = vmatpush.msk.msrb.mxu2 %vm154_vm0, %v107_v27  ;;  %9284 = vmatpush.msk.msrb.mxu3 %vm154_vm0, %v108_v29 }
  0x98   :  { %9269 = vmatpush.msk.msrb.mxu0 %vm154_vm0, %v105_v30  ;;  %9274 = vmatpush.msk.msrb.mxu1 %vm154_vm0, %v106_v31  ;;  %v131_v30 = vld.sshfl [vmem:[#allocation1 + $0x30] sm:$0xff pattern:$0x75316420]  ;;  %v132_v31 = vld.sshfl [vmem:[#allocation1 + $0x38] sm:$0xff pattern:$0x75316420] }
  0x9d   :  { %9231 = vmatmul.msk.f32.gmra.mxu0 %vm145_vm1, %v10158_v18  ;;  %9236 = vmatmul.msk.f32.gmra.mxu1 %vm145_vm1, %v10158_v18 }
  0x9e   :  { %9241 = vmatmul.msk.f32.gmra.mxu2 %vm145_vm1, %v10158_v18  ;;  %9246 = vmatmul.msk.f32.gmra.mxu3 %vm145_vm1, %v10158_v18 }
  0xa5   :  { %9232 = vmatmul.msk.f32.gmra.mxu0 %vm145_vm1, %v10175_v22  ;;  %9237 = vmatmul.msk.f32.gmra.mxu1 %vm145_vm1, %v10175_v22 }
  0xa6   :  { %9242 = vmatmul.msk.f32.gmra.mxu2 %vm145_vm1, %v10175_v22  ;;  %9247 = vmatmul.msk.f32.gmra.mxu3 %vm145_vm1, %v10175_v22 }
  0xad   :  { %9233 = vmatmul.msk.f32.gmra.mxu0 %vm145_vm1, %v10188_v25  ;;  %9238 = vmatmul.msk.f32.gmra.mxu1 %vm145_vm1, %v10188_v25 }
  0xae   :  { %9243 = vmatmul.msk.f32.gmra.mxu2 %vm145_vm1, %v10188_v25  ;;  %9248 = vmatmul.msk.f32.gmra.mxu3 %vm145_vm1, %v10188_v25 }
  0xb5   :  { %9250 = vmatmul.msk.f32.vlgmr.msra.gmra.mxu0 %vm145_vm1, %v10142_v16  ;;  %9255 = vmatmul.msk.f32.vlgmr.msra.gmra.mxu1 %vm145_vm1, %v10142_v16 }
  0xb6   :  { %9260 = vmatmul.msk.f32.vlgmr.msra.gmra.mxu2 %vm145_vm1, %v10142_v16  ;;  %9265 = vmatmul.msk.f32.vlgmr.msra.gmra.mxu3 %vm145_vm1, %v10142_v16 }
  0xb7   :  { %9299 = vmatpush.msk.msra.mxu2 %vm154_vm0, %v115_v33  ;;  %9304 = vmatpush.msk.msra.mxu3 %vm154_vm0, %v116_v35  ;;  %v129_v33 = vld.sshfl [vmem:[#allocation1 + $0x20] sm:$0xff pattern:$0x75316420]  ;;  %v130_v35 = vld.sshfl [vmem:[#allocation1 + $0x28] sm:$0xff pattern:$0x75316420] }
  0xb8   :  { %9289 = vmatpush.msk.msra.mxu0 %vm154_vm0, %v113_v36  ;;  %9294 = vmatpush.msk.msra.mxu1 %vm154_vm0, %v114_v37 }
  0xbd   :  { %9251 = vmatmul.msk.f32.gmra.mxu0 %vm145_vm1, %v10158_v18  ;;  %9256 = vmatmul.msk.f32.gmra.mxu1 %vm145_vm1, %v10158_v18 }
  0xbe   :  { %9261 = vmatmul.msk.f32.gmra.mxu2 %vm145_vm1, %v10158_v18  ;;  %9266 = vmatmul.msk.f32.gmra.mxu3 %vm145_vm1, %v10158_v18 }
  0xc5   :  { %9252 = vmatmul.msk.f32.gmra.mxu0 %vm145_vm1, %v10175_v22  ;;  %9257 = vmatmul.msk.f32.gmra.mxu1 %vm145_vm1, %v10175_v22 }
  0xc6   :  { %9262 = vmatmul.msk.f32.gmra.mxu2 %vm145_vm1, %v10175_v22  ;;  %9267 = vmatmul.msk.f32.gmra.mxu3 %vm145_vm1, %v10175_v22 }
  0xcd   :  { %9253 = vmatmul.msk.f32.gmra.mxu0 %vm145_vm1, %v10188_v25  ;;  %9258 = vmatmul.msk.f32.gmra.mxu1 %vm145_vm1, %v10188_v25 }
  0xce   :  { %9263 = vmatmul.msk.f32.gmra.mxu2 %vm145_vm1, %v10188_v25  ;;  %9268 = vmatmul.msk.f32.gmra.mxu3 %vm145_vm1, %v10188_v25 }
  0xd5   :  { %9270 = vmatmul.msk.f32.vlgmr.msrb.gmra.mxu0 %vm145_vm1, %v10142_v16  ;;  %9275 = vmatmul.msk.f32.vlgmr.msrb.gmra.mxu1 %vm145_vm1, %v10142_v16 }
  0xd6   :  { %9280 = vmatmul.msk.f32.vlgmr.msrb.gmra.mxu2 %vm145_vm1, %v10142_v16  ;;  %9285 = vmatmul.msk.f32.vlgmr.msrb.gmra.mxu3 %vm145_vm1, %v10142_v16 }
  0xd7   :  { %9319 = vmatpush.msk.msrb.mxu2 %vm154_vm0, %v119_v40  ;;  %9324 = vmatpush.msk.msrb.mxu3 %vm154_vm0, %v120_v41 }
  0xd8   :  { %9309 = vmatpush.msk.msrb.mxu0 %vm154_vm0, %v117_v42  ;;  %9314 = vmatpush.msk.msrb.mxu1 %vm154_vm0, %v118_v43 }
  0xdd   :  { %9271 = vmatmul.msk.f32.gmra.mxu0 %vm145_vm1, %v10158_v18  ;;  %9276 = vmatmul.msk.f32.gmra.mxu1 %vm145_vm1, %v10158_v18 }
  0xde   :  { %9281 = vmatmul.msk.f32.gmra.mxu2 %vm145_vm1, %v10158_v18  ;;  %9286 = vmatmul.msk.f32.gmra.mxu3 %vm145_vm1, %v10158_v18 }
  0xe5   :  { %9272 = vmatmul.msk.f32.gmra.mxu0 %vm145_vm1, %v10175_v22  ;;  %9277 = vmatmul.msk.f32.gmra.mxu1 %vm145_vm1, %v10175_v22 }
  0xe6   :  { %9282 = vmatmul.msk.f32.gmra.mxu2 %vm145_vm1, %v10175_v22  ;;  %9287 = vmatmul.msk.f32.gmra.mxu3 %vm145_vm1, %v10175_v22 }
  0xed   :  { %9273 = vmatmul.msk.f32.gmra.mxu0 %vm145_vm1, %v10188_v25  ;;  %9278 = vmatmul.msk.f32.gmra.mxu1 %vm145_vm1, %v10188_v25 }
  0xee   :  { %9283 = vmatmul.msk.f32.gmra.mxu2 %vm145_vm1, %v10188_v25  ;;  %9288 = vmatmul.msk.f32.gmra.mxu3 %vm145_vm1, %v10188_v25 }
  0xf2   :  { %v10342_v44 = vpop.f32.mrf.mxu0  ;;  %v10344_v45 = vpop.f32.mrf.mxu1 }
  0xf3   :  { %17955 = vst [vmem:[#allocation4_spill] sm:$0xff] %v10342_v44 }
  0xf4   :  { %17956 = vst [vmem:[#allocation5_spill] sm:$0xff] %v10344_v45 }
  0xf5   :  { %9290 = vmatmul.msk.f32.vlgmr.msra.gmra.mxu0 %vm145_vm1, %v10142_v16  ;;  %9295 = vmatmul.msk.f32.vlgmr.msra.gmra.mxu1 %vm145_vm1, %v10142_v16 }
  0xf6   :  { %9300 = vmatmul.msk.f32.vlgmr.msra.gmra.mxu2 %vm145_vm1, %v10142_v16  ;;  %9305 = vmatmul.msk.f32.vlgmr.msra.gmra.mxu3 %vm145_vm1, %v10142_v16 }
  0xf7   :  { %9339 = vmatpush.msk.msra.mxu2 %vm154_vm0, %v127_v56  ;;  %9344 = vmatpush.msk.msra.mxu3 %vm154_vm0, %v128_v57 }
  0xf8   :  { %9329 = vmatpush.msk.msra.mxu0 %vm154_vm0, %v125_v58  ;;  %9334 = vmatpush.msk.msra.mxu1 %vm154_vm0, %v126_v59 }
  0xf9   :  { %v10354_v46 = vpop.f32.mrf.mxu2  ;;  %v10356_v47 = vpop.f32.mrf.mxu3 }
  0xfa   :  { %v10358_v48 = vpop.f32.mrf.mxu0  ;;  %v10360_v49 = vpop.f32.mrf.mxu1 }
  0xfb   :  { %17957 = vst [vmem:[#allocation6_spill] sm:$0xff] %v10358_v48 }
  0xfc   :  { %17958 = vst [vmem:[#allocation7_spill] sm:$0xff] %v10360_v49 }
  0xfd   :  { %9291 = vmatmul.msk.f32.gmra.mxu0 %vm145_vm1, %v10158_v18  ;;  %9296 = vmatmul.msk.f32.gmra.mxu1 %vm145_vm1, %v10158_v18 }
  0xfe   :  { %9301 = vmatmul.msk.f32.gmra.mxu2 %vm145_vm1, %v10158_v18  ;;  %9306 = vmatmul.msk.f32.gmra.mxu3 %vm145_vm1, %v10158_v18 }
 0x101   :  { %v10382_v52 = vpop.f32.mrf.mxu2  ;;  %v10384_v53 = vpop.f32.mrf.mxu3 }
 0x102   :  { %v10386_v54 = vpop.f32.mrf.mxu0  ;;  %v10388_v55 = vpop.f32.mrf.mxu1 }
 0x103   :  { %17959 = vst [vmem:[#allocation8_spill] sm:$0xff] %v10386_v54 }
 0x104   :  { %17960 = vst [vmem:[#allocation9_spill] sm:$0xff] %v10388_v55 }
 0x105   :  { %9292 = vmatmul.msk.f32.gmra.mxu0 %vm145_vm1, %v10175_v22  ;;  %9297 = vmatmul.msk.f32.gmra.mxu1 %vm145_vm1, %v10175_v22 }
 0x106   :  { %9302 = vmatmul.msk.f32.gmra.mxu2 %vm145_vm1, %v10175_v22  ;;  %9307 = vmatmul.msk.f32.gmra.mxu3 %vm145_vm1, %v10175_v22 }
 0x109   :  { %v10402_v60 = vpop.f32.mrf.mxu2  ;;  %v10404_v61 = vpop.f32.mrf.mxu3 }
 0x10a   :  { %v10406_v62 = vpop.f32.mrf.mxu0  ;;  %v10408_v63 = vpop.f32.mrf.mxu1 }
 0x10b   :  { %17961 = vst [vmem:[#allocation10_spill] sm:$0xff] %v10406_v62 }
 0x10c   :  { %17962 = vst [vmem:[#allocation11_spill] sm:$0xff] %v10408_v63 }
 0x10d   :  { %9293 = vmatmul.msk.f32.gmra.mxu0 %vm145_vm1, %v10188_v25  ;;  %9298 = vmatmul.msk.f32.gmra.mxu1 %vm145_vm1, %v10188_v25 }
 0x10e   :  { %9303 = vmatmul.msk.f32.gmra.mxu2 %vm145_vm1, %v10188_v25  ;;  %9308 = vmatmul.msk.f32.gmra.mxu3 %vm145_vm1, %v10188_v25 }
 0x111   :  { %v10418_v6 = vpop.f32.mrf.mxu2  ;;  %v10420_v7 = vpop.f32.mrf.mxu3 }
 0x112   :  { %v10422_v8 = vpop.f32.mrf.mxu0  ;;  %v10424_v9 = vpop.f32.mrf.mxu1 }
 0x113   :  { %17963 = vst [vmem:[#allocation12_spill] sm:$0xff] %v10422_v8 }
 0x114   :  { %17964 = vst [vmem:[#allocation13_spill] sm:$0xff] %v10424_v9 }
 0x115   :  { %9310 = vmatmul.msk.f32.vlgmr.msrb.gmra.mxu0 %vm145_vm1, %v10142_v16  ;;  %9315 = vmatmul.msk.f32.vlgmr.msrb.gmra.mxu1 %vm145_vm1, %v10142_v16 }
 0x116   :  { %9320 = vmatmul.msk.f32.vlgmr.msrb.gmra.mxu2 %vm145_vm1, %v10142_v16  ;;  %9325 = vmatmul.msk.f32.vlgmr.msrb.gmra.mxu3 %vm145_vm1, %v10142_v16 }
 0x117   :  { %9359 = vmatpush.msk.msrb.mxu2 %vm154_vm0, %v131_v30  ;;  %9364 = vmatpush.msk.msrb.mxu3 %vm154_vm0, %v132_v31 }
 0x118   :  { %9349 = vmatpush.msk.msrb.mxu0 %vm154_vm0, %v129_v33  ;;  %9354 = vmatpush.msk.msrb.mxu1 %vm154_vm0, %v130_v35  ;;  %v10525_v33 = vld [vmem:[%s17459_s0 + $0x98] sm:$0xff]  ;;  %v10539_v35 = vld [vmem:[%s17459_s0 + $0x90] sm:$0xff] }
 0x119   :  { %v10434_v12 = vpop.f32.mrf.mxu2  ;;  %v10436_v13 = vpop.f32.mrf.mxu3  ;;  %134 = vst [vmem:[#allocation1 + $0x10] ss:$2 sm:$0xff] %v10525_v33 }
 0x11a   :  { %v10438_v14 = vpop.f32.mrf.mxu0  ;;  %v10440_v15 = vpop.f32.mrf.mxu1  ;;  %133 = vst [vmem:[#allocation1] ss:$2 sm:$0xff] %v10539_v35 }
 0x11b   :  { %17965 = vst [vmem:[#allocation14_spill] sm:$0xff] %v10438_v14 }
 0x11c   :  { %17966 = vst [vmem:[#allocation15_spill] sm:$0xff] %v10440_v15 }
 0x11d   :  { %9311 = vmatmul.msk.f32.gmra.mxu0 %vm145_vm1, %v10158_v18  ;;  %9316 = vmatmul.msk.f32.gmra.mxu1 %vm145_vm1, %v10158_v18 }
 0x11e   :  { %9321 = vmatmul.msk.f32.gmra.mxu2 %vm145_vm1, %v10158_v18  ;;  %9326 = vmatmul.msk.f32.gmra.mxu3 %vm145_vm1, %v10158_v18 }
 0x121   :  { %v10462_v23 = vpop.f32.mrf.mxu2  ;;  %v10464_v24 = vpop.f32.mrf.mxu3 }
 0x122   :  { %v10466_v27 = vpop.f32.mrf.mxu0  ;;  %v10468_v29 = vpop.f32.mrf.mxu1 }
 0x123   :  { %17967 = vst [vmem:[#allocation16_spill] sm:$0xff] %v10466_v27 }
 0x124   :  { %17968 = vst [vmem:[#allocation17_spill] sm:$0xff] %v10468_v29 }
 0x125   :  { %9312 = vmatmul.msk.f32.gmra.mxu0 %vm145_vm1, %v10175_v22  ;;  %9317 = vmatmul.msk.f32.gmra.mxu1 %vm145_vm1, %v10175_v22 }
 0x126   :  { %9322 = vmatmul.msk.f32.gmra.mxu2 %vm145_vm1, %v10175_v22  ;;  %9327 = vmatmul.msk.f32.gmra.mxu3 %vm145_vm1, %v10175_v22 }
 0x129   :  { %v10482_v36 = vpop.f32.mrf.mxu2  ;;  %v10484_v37 = vpop.f32.mrf.mxu3 }
 0x12a   :  { %v10486_v40 = vpop.f32.mrf.mxu0  ;;  %v10488_v41 = vpop.f32.mrf.mxu1 }
 0x12b   :  { %17969 = vst [vmem:[#allocation18_spill] sm:$0xff] %v10486_v40  ;;  %v140_v40 = vld.sshfl [vmem:[#allocation1 + $0x18] sm:$0xff pattern:$0x75316420] }
 0x12c   :  { %17970 = vst [vmem:[#allocation19_spill] sm:$0xff] %v10488_v41  ;;  %v139_v41 = vld.sshfl [vmem:[#allocation1 + $0x10] sm:$0xff pattern:$0x75316420] }
 0x12d   :  { %9313 = vmatmul.msk.f32.gmra.mxu0 %vm145_vm1, %v10188_v25  ;;  %9318 = vmatmul.msk.f32.gmra.mxu1 %vm145_vm1, %v10188_v25 }
 0x12e   :  { %9323 = vmatmul.msk.f32.gmra.mxu2 %vm145_vm1, %v10188_v25  ;;  %9328 = vmatmul.msk.f32.gmra.mxu3 %vm145_vm1, %v10188_v25 }
 0x131   :  { %v10498_v42 = vpop.f32.mrf.mxu2  ;;  %v10500_v43 = vpop.f32.mrf.mxu3 }
 0x132   :  { %v10502_v56 = vpop.f32.mrf.mxu0  ;;  %v10504_v57 = vpop.f32.mrf.mxu1 }
 0x133   :  { %17971 = vst [vmem:[#allocation20_spill] sm:$0xff] %v10502_v56 }
 0x134   :  { %17972 = vst [vmem:[#allocation21_spill] sm:$0xff] %v10504_v57 }
 0x135   :  { %9330 = vmatmul.msk.f32.vlgmr.msra.gmra.mxu0 %vm145_vm1, %v10142_v16  ;;  %9335 = vmatmul.msk.f32.vlgmr.msra.gmra.mxu1 %vm145_vm1, %v10142_v16 }
 0x136   :  { %9340 = vmatmul.msk.f32.vlgmr.msra.gmra.mxu2 %vm145_vm1, %v10142_v16  ;;  %9345 = vmatmul.msk.f32.vlgmr.msra.gmra.mxu3 %vm145_vm1, %v10142_v16 }
 0x137   :  { %9379 = vmatpush.msk.msra.mxu2 %vm154_vm0, %v139_v41  ;;  %9384 = vmatpush.msk.msra.mxu3 %vm154_vm0, %v140_v40 }
 0x139   :  { %v10514_v58 = vpop.f32.mrf.mxu2  ;;  %v10516_v59 = vpop.f32.mrf.mxu3 }
 0x13a   :  { %v10518_v30 = vpop.f32.mrf.mxu0  ;;  %v10520_v31 = vpop.f32.mrf.mxu1 }
 0x13b   :  { %17973 = vst [vmem:[#allocation22_spill] sm:$0xff] %v10518_v30 }
 0x13c   :  { %17974 = vst [vmem:[#allocation23_spill] sm:$0xff] %v10520_v31 }
 0x13d   :  { %9331 = vmatmul.msk.f32.gmra.mxu0 %vm145_vm1, %v10158_v18  ;;  %9336 = vmatmul.msk.f32.gmra.mxu1 %vm145_vm1, %v10158_v18 }
 0x13e   :  { %9341 = vmatmul.msk.f32.gmra.mxu2 %vm145_vm1, %v10158_v18  ;;  %9346 = vmatmul.msk.f32.gmra.mxu3 %vm145_vm1, %v10158_v18 }
 0x141   :  { %v10542_v31 = vpop.f32.mrf.mxu2  ;;  %v10544_v30 = vpop.f32.mrf.mxu3 }
 0x142   :  { %v10546_v57 = vpop.f32.mrf.mxu0  ;;  %v10548_v56 = vpop.f32.mrf.mxu1 }
 0x143   :  { %17975 = vst [vmem:[#allocation24_spill] sm:$0xff] %v10546_v57  ;;  %v137_v57 = vld.sshfl [vmem:[#allocation1] sm:$0xff pattern:$0x75316420] }
 0x144   :  { %17976 = vst [vmem:[#allocation25_spill] sm:$0xff] %v10548_v56  ;;  %v138_v56 = vld.sshfl [vmem:[#allocation1 + $0x8] sm:$0xff pattern:$0x75316420]  ;;  %9369 = vmatpush.msk.msra.mxu0 %vm154_vm0, %v137_v57 }
 0x145   :  { %9332 = vmatmul.msk.f32.gmra.mxu0 %vm145_vm1, %v10175_v22  ;;  %9337 = vmatmul.msk.f32.gmra.mxu1 %vm145_vm1, %v10175_v22 }
 0x146   :  { %9342 = vmatmul.msk.f32.gmra.mxu2 %vm145_vm1, %v10175_v22  ;;  %9347 = vmatmul.msk.f32.gmra.mxu3 %vm145_vm1, %v10175_v22 }
 0x147   :  { %9374 = vmatpush.msk.msra.mxu1 %vm154_vm0, %v138_v56 }
 0x149   :  { %v10562_v41 = vpop.f32.mrf.mxu2  ;;  %v10564_v40 = vpop.f32.mrf.mxu3 }
 0x14a   :  { %v10566_v29 = vpop.f32.mrf.mxu0  ;;  %v10568_v27 = vpop.f32.mrf.mxu1 }
 0x14b   :  { %17977 = vst [vmem:[#allocation26_spill] sm:$0xff] %v10566_v29 }
 0x14c   :  { %17978 = vst [vmem:[#allocation27_spill] sm:$0xff] %v10568_v27 }
 0x14d   :  { %9333 = vmatmul.msk.f32.gmra.mxu0 %vm145_vm1, %v10188_v25  ;;  %9338 = vmatmul.msk.f32.gmra.mxu1 %vm145_vm1, %v10188_v25 }
 0x14e   :  { %9343 = vmatmul.msk.f32.gmra.mxu2 %vm145_vm1, %v10188_v25  ;;  %9348 = vmatmul.msk.f32.gmra.mxu3 %vm145_vm1, %v10188_v25 }
 0x151   :  { %v10578_v56 = vpop.f32.mrf.mxu2  ;;  %v10580_v57 = vpop.f32.mrf.mxu3 }
 0x152   :  { %v10582_v15 = vpop.f32.mrf.mxu0  ;;  %v10584_v29 = vpop.f32.mrf.mxu1 }
 0x153   :  { %17979 = vst [vmem:[#allocation28_spill] sm:$0xff] %v10582_v15 }
 0x154   :  { %17980 = vst [vmem:[#allocation29_spill] sm:$0xff] %v10584_v29  ;;  %v49_v29 = vld [vmem:[%s17459_s0 + $0xa8] sm:$0xff] }
 0x155   :  { %9350 = vmatmul.msk.f32.vlgmr.msrb.gmra.mxu0 %vm145_vm1, %v10142_v16  ;;  %9355 = vmatmul.msk.f32.vlgmr.msrb.gmra.mxu1 %vm145_vm1, %v10142_v16  ;;  %136 = vst [vmem:[#allocation1 + $0x30] ss:$2 sm:$0xff] %v49_v29 }
 0x156   :  { %9360 = vmatmul.msk.f32.vlgmr.msrb.gmra.mxu2 %vm145_vm1, %v10142_v16  ;;  %9365 = vmatmul.msk.f32.vlgmr.msrb.gmra.mxu3 %vm145_vm1, %v10142_v16 }
 0x159   :  { %v10594_v27 = vpop.f32.mrf.mxu2  ;;  %v10596_v14 = vpop.f32.mrf.mxu3 }
 0x15a   :  { %v10598_v9 = vpop.f32.mrf.mxu0  ;;  %v10600_v15 = vpop.f32.mrf.mxu1 }
 0x15b   :  { %17981 = vst [vmem:[#allocation30_spill] sm:$0xff] %v10598_v9 }
 0x15c   :  { %17982 = vst [vmem:[#allocation31_spill] sm:$0xff] %v10600_v15  ;;  %v48_v15 = vld [vmem:[%s17459_s0 + $0xa0] sm:$0xff]  ;;  %v143_v62 = vld.sshfl [vmem:[#allocation1 + $0x30] sm:$0xff pattern:$0x75316420] }
 0x15d   :  { %9351 = vmatmul.msk.f32.gmra.mxu0 %vm145_vm1, %v10158_v18  ;;  %9356 = vmatmul.msk.f32.gmra.mxu1 %vm145_vm1, %v10158_v18  ;;  %135 = vst [vmem:[#allocation1 + $0x20] ss:$2 sm:$0xff] %v48_v15  ;;  %v144_v55 = vld.sshfl [vmem:[#allocation1 + $0x38] sm:$0xff pattern:$0x75316420] }
 0x15e   :  { %9361 = vmatmul.msk.f32.gmra.mxu2 %vm145_vm1, %v10158_v18  ;;  %9366 = vmatmul.msk.f32.gmra.mxu3 %vm145_vm1, %v10158_v18  ;;  %1403 = vst [vmem:[#allocation1 + $0x30] ss:$2 sm:$0xff] %v10118_v5 }
 0x15f   :  { %9399 = vmatpush.msk.msrb.mxu2 %vm154_vm0, %v143_v62  ;;  %9404 = vmatpush.msk.msrb.mxu3 %vm154_vm0, %v144_v55 }
 0x161   :  { %v10616_v9 = vpop.f32.mrf.mxu2  ;;  %v10618_v29 = vpop.f32.mrf.mxu3 }
 0x162   :  { %17983 = vst [vmem:[#allocation32_spill] sm:$0xff] %v10616_v9  ;;  %v10620_v8 = vpop.f32.mrf.mxu0  ;;  %v10622_v63 = vpop.f32.mrf.mxu1 }
 0x163   :  { %17984 = vst [vmem:[#allocation33_spill] sm:$0xff] %v10618_v29 }
 0x164   :  { %17985 = vst [vmem:[#allocation34_spill] sm:$0xff] %v10620_v8  ;;  %v141_v15 = vld.sshfl [vmem:[#allocation1 + $0x20] sm:$0xff pattern:$0x75316420] }
 0x165   :  { %17986 = vst [vmem:[#allocation35_spill] sm:$0xff] %v10622_v63  ;;  %9352 = vmatmul.msk.f32.gmra.mxu0 %vm145_vm1, %v10175_v22  ;;  %9357 = vmatmul.msk.f32.gmra.mxu1 %vm145_vm1, %v10175_v22  ;;  %v142_v63 = vld.sshfl [vmem:[#allocation1 + $0x28] sm:$0xff pattern:$0x75316420] }
 0x166   :  { %9362 = vmatmul.msk.f32.gmra.mxu2 %vm145_vm1, %v10175_v22  ;;  %9367 = vmatmul.msk.f32.gmra.mxu3 %vm145_vm1, %v10175_v22  ;;  %1401 = vst [vmem:[#allocation1 + $0x20] ss:$2 sm:$0xff] %v10113_v4 }
 0x167   :  { %9389 = vmatpush.msk.msrb.mxu0 %vm154_vm0, %v141_v15  ;;  %9394 = vmatpush.msk.msrb.mxu1 %vm154_vm0, %v142_v63 }
 0x169   :  { %v10638_v5 = vpop.f32.mrf.mxu2  ;;  %v10640_v55 = vpop.f32.mrf.mxu3 }
 0x16a   :  { %17987 = vst [vmem:[#allocation36_spill] sm:$0xff] %v10638_v5  ;;  %v10642_v62 = vpop.f32.mrf.mxu0  ;;  %v10644_v8 = vpop.f32.mrf.mxu1 }
 0x16b   :  { %17988 = vst [vmem:[#allocation37_spill] sm:$0xff] %v10640_v55 }
 0x16c   :  { %17989 = vst [vmem:[#allocation38_spill] sm:$0xff] %v10642_v62 }
 0x16d   :  { %17990 = vst [vmem:[#allocation39_spill] sm:$0xff] %v10644_v8  ;;  %9353 = vmatmul.msk.f32.gmra.mxu0 %vm145_vm1, %v10188_v25  ;;  %9358 = vmatmul.msk.f32.gmra.mxu1 %vm145_vm1, %v10188_v25 }
 0x16e   :  { %9363 = vmatmul.msk.f32.gmra.mxu2 %vm145_vm1, %v10188_v25  ;;  %9368 = vmatmul.msk.f32.gmra.mxu3 %vm145_vm1, %v10188_v25 }
 0x171   :  { %v10654_v4 = vpop.f32.mrf.mxu2  ;;  %v10656_v63 = vpop.f32.mrf.mxu3 }
 0x172   :  { %17991 = vst [vmem:[#allocation40_spill] sm:$0xff] %v10654_v4  ;;  %v10658_v15 = vpop.f32.mrf.mxu0  ;;  %v10660_v62 = vpop.f32.mrf.mxu1 }
 0x173   :  { %17992 = vst [vmem:[#allocation41_spill] sm:$0xff] %v10656_v63 }
 0x174   :  { %17993 = vst [vmem:[#allocation42_spill] sm:$0xff] %v10658_v15 }
 0x175   :  { %17994 = vst [vmem:[#allocation43_spill] sm:$0xff] %v10660_v62  ;;  %9370 = vmatmul.msk.f32.vlgmr.msra.gmra.mxu0 %vm145_vm1, %v10142_v16  ;;  %9375 = vmatmul.msk.f32.vlgmr.msra.gmra.mxu1 %vm145_vm1, %v10142_v16  ;;  %v29_v62 = vld [vmem:[%s17459_s0 + $0x8] sm:$0xff] }
 0x176   :  { %9380 = vmatmul.msk.f32.vlgmr.msra.gmra.mxu2 %vm145_vm1, %v10142_v16  ;;  %9385 = vmatmul.msk.f32.vlgmr.msra.gmra.mxu3 %vm145_vm1, %v10142_v16  ;;  %1399 = vst [vmem:[#allocation1 + $0x10] ss:$2 sm:$0xff] %v29_v62 }
 0x179   :  { %v10670_v8 = vpop.f32.mrf.mxu2  ;;  %v10672_v54 = vpop.f32.mrf.mxu3 }
 0x17a   :  { %17995 = vst [vmem:[#allocation44_spill] sm:$0xff] %v10670_v8  ;;  %v10674_v49 = vpop.f32.mrf.mxu0  ;;  %v10676_v15 = vpop.f32.mrf.mxu1 }
 0x17b   :  { %17996 = vst [vmem:[#allocation45_spill] sm:$0xff] %v10672_v54 }
 0x17c   :  { %17997 = vst [vmem:[#allocation46_spill] sm:$0xff] %v10674_v49 }
 0x17d   :  { %17998 = vst [vmem:[#allocation47_spill] sm:$0xff] %v10676_v15  ;;  %9371 = vmatmul.msk.f32.gmra.mxu0 %vm145_vm1, %v10158_v18  ;;  %9376 = vmatmul.msk.f32.gmra.mxu1 %vm145_vm1, %v10158_v18  ;;  %v28_v15 = vld [vmem:[%s17459_s0] sm:$0xff]  ;;  %v1406_v48 = vld.sshfl [vmem:[#allocation1 + $0x10] sm:$0xff pattern:$0x75316420] }
 0x17e   :  { %9381 = vmatmul.msk.f32.gmra.mxu2 %vm145_vm1, %v10158_v18  ;;  %9386 = vmatmul.msk.f32.gmra.mxu3 %vm145_vm1, %v10158_v18  ;;  %1397 = vst [vmem:[#allocation1] ss:$2 sm:$0xff] %v28_v15  ;;  %v1407_v45 = vld.sshfl [vmem:[#allocation1 + $0x18] sm:$0xff pattern:$0x75316420] }
 0x17f   :  { %9419 = vmatpush.msk.msra.mxu2 %vm154_vm0, %v1406_v48  ;;  %9424 = vmatpush.msk.msra.mxu3 %vm154_vm0, %v1407_v45  ;;  %1413 = vst [vmem:[#allocation1 + $0x10] ss:$2 sm:$0xff] %v10129_v10 }
 0x181   :  { %v10692_v49 = vpop.f32.mrf.mxu2  ;;  %v10694_v62 = vpop.f32.mrf.mxu3 }
 0x182   :  { %17999 = vst [vmem:[#allocation48_spill] sm:$0xff] %v10692_v49  ;;  %v10696_v54 = vpop.f32.mrf.mxu0  ;;  %v10698_v8 = vpop.f32.mrf.mxu1 }
 0x183   :  { %18000 = vst [vmem:[#allocation49_spill] sm:$0xff] %v10694_v62 }
 0x184   :  { %18001 = vst [vmem:[#allocation50_spill] sm:$0xff] %v10696_v54 }
 0x185   :  { %18002 = vst [vmem:[#allocation51_spill] sm:$0xff] %v10698_v8  ;;  %9372 = vmatmul.msk.f32.gmra.mxu0 %vm145_vm1, %v10175_v22  ;;  %9377 = vmatmul.msk.f32.gmra.mxu1 %vm145_vm1, %v10175_v22  ;;  %v1404_v15 = vld.sshfl [vmem:[#allocation1] sm:$0xff pattern:$0x75316420] }
 0x186   :  { %9382 = vmatmul.msk.f32.gmra.mxu2 %vm145_vm1, %v10175_v22  ;;  %9387 = vmatmul.msk.f32.gmra.mxu3 %vm145_vm1, %v10175_v22  ;;  %v1405_v8 = vld.sshfl [vmem:[#allocation1 + $0x8] sm:$0xff pattern:$0x75316420] }
 0x187   :  { %9409 = vmatpush.msk.msra.mxu0 %vm154_vm0, %v1404_v15  ;;  %9414 = vmatpush.msk.msra.mxu1 %vm154_vm0, %v1405_v8  ;;  %1412 = vst [vmem:[#allocation1] ss:$2 sm:$0xff] %v10135_v11 }
 0x189   :  { %v10714_v10 = vpop.f32.mrf.mxu2  ;;  %v10716_v45 = vpop.f32.mrf.mxu3 }
 0x18a   :  { %18003 = vst [vmem:[#allocation52_spill] sm:$0xff] %v10714_v10  ;;  %v10718_v48 = vpop.f32.mrf.mxu0  ;;  %v10720_v54 = vpop.f32.mrf.mxu1 }
 0x18b   :  { %18004 = vst [vmem:[#allocation53_spill] sm:$0xff] %v10716_v45 }
 0x18c   :  { %18005 = vst [vmem:[#allocation54_spill] sm:$0xff] %v10718_v48 }
 0x18d   :  { %18006 = vst [vmem:[#allocation55_spill] sm:$0xff] %v10720_v54  ;;  %9373 = vmatmul.msk.f32.gmra.mxu0 %vm145_vm1, %v10188_v25  ;;  %9378 = vmatmul.msk.f32.gmra.mxu1 %vm145_vm1, %v10188_v25 }
 0x18e   :  { %9383 = vmatmul.msk.f32.gmra.mxu2 %vm145_vm1, %v10188_v25  ;;  %9388 = vmatmul.msk.f32.gmra.mxu3 %vm145_vm1, %v10188_v25 }
 0x191   :  { %v10730_v11 = vpop.f32.mrf.mxu2  ;;  %v10732_v8 = vpop.f32.mrf.mxu3 }
 0x192   :  { %18007 = vst [vmem:[#allocation56_spill] sm:$0xff] %v10730_v11  ;;  %v10734_v15 = vpop.f32.mrf.mxu0  ;;  %v10736_v48 = vpop.f32.mrf.mxu1 }
 0x193   :  { %18008 = vst [vmem:[#allocation57_spill] sm:$0xff] %v10732_v8 }
 0x194   :  { %18009 = vst [vmem:[#allocation58_spill] sm:$0xff] %v10734_v15 }
 0x195   :  { %18010 = vst [vmem:[#allocation59_spill] sm:$0xff] %v10736_v48  ;;  %9390 = vmatmul.msk.f32.vlgmr.msrb.gmra.mxu0 %vm145_vm1, %v10142_v16  ;;  %9395 = vmatmul.msk.f32.vlgmr.msrb.gmra.mxu1 %vm145_vm1, %v10142_v16  ;;  %v1410_v48 = vld.sshfl [vmem:[#allocation1 + $0x30] sm:$0xff pattern:$0x75316420] }
 0x196   :  { %9400 = vmatmul.msk.f32.vlgmr.msrb.gmra.mxu2 %vm145_vm1, %v10142_v16  ;;  %9405 = vmatmul.msk.f32.vlgmr.msrb.gmra.mxu3 %vm145_vm1, %v10142_v16  ;;  %v1408_v16 = vld.sshfl [vmem:[#allocation1 + $0x20] sm:$0xff pattern:$0x75316420] }
 0x197   :  { %9439 = vmatpush.msk.msrb.mxu2 %vm154_vm0, %v1410_v48  ;;  %9429 = vmatpush.msk.msrb.mxu0 %vm154_vm0, %v1408_v16 }
 0x199   :  { %v10746_v54 = vpop.f32.mrf.mxu2  ;;  %v10748_v11 = vpop.f32.mrf.mxu3 }
 0x19a   :  { %18011 = vst [vmem:[#allocation60_spill] sm:$0xff] %v10746_v54  ;;  %v10750_v8 = vpop.f32.mrf.mxu0  ;;  %v10752_v15 = vpop.f32.mrf.mxu1 }
 0x19b   :  { %18012 = vst [vmem:[#allocation61_spill] sm:$0xff] %v10748_v11  ;;  %v1411_v11 = vld.sshfl [vmem:[#allocation1 + $0x38] sm:$0xff pattern:$0x75316420] }
 0x19c   :  { %18013 = vst [vmem:[#allocation62_spill] sm:$0xff] %v10750_v8  ;;  %9444 = vmatpush.msk.msrb.mxu3 %vm154_vm0, %v1411_v11  ;;  %v1409_v8 = vld.sshfl [vmem:[#allocation1 + $0x28] sm:$0xff pattern:$0x75316420] }
 0x19d   :  { %18014 = vst [vmem:[#allocation63_spill] sm:$0xff] %v10752_v15  ;;  %9391 = vmatmul.msk.f32.gmra.mxu0 %vm145_vm1, %v10158_v18  ;;  %9396 = vmatmul.msk.f32.gmra.mxu1 %vm145_vm1, %v10158_v18 }
 0x19e   :  { %9401 = vmatmul.msk.f32.gmra.mxu2 %vm145_vm1, %v10158_v18  ;;  %9406 = vmatmul.msk.f32.gmra.mxu3 %vm145_vm1, %v10158_v18  ;;  %1415 = vst [vmem:[#allocation1 + $0x30] ss:$2 sm:$0xff] %v10155_v17 }
 0x19f   :  { %9434 = vmatpush.msk.msrb.mxu1 %vm154_vm0, %v1409_v8  ;;  %1414 = vst [vmem:[#allocation1 + $0x20] ss:$2 sm:$0xff] %v10171_v20 }
 0x1a1   :  { %v10766_v48 = vpop.f32.mrf.mxu2  ;;  %v10768_v15 = vpop.f32.mrf.mxu3 }
 0x1a2   :  { %18015 = vst [vmem:[#allocation64_spill] sm:$0xff] %v10766_v48  ;;  %v10770_v54 = vpop.f32.mrf.mxu0  ;;  %v10772_v45 = vpop.f32.mrf.mxu1 }
 0x1a3   :  { %18016 = vst [vmem:[#allocation65_spill] sm:$0xff] %v10768_v15 }
 0x1a4   :  { %18017 = vst [vmem:[#allocation66_spill] sm:$0xff] %v10770_v54 }
 0x1a5   :  { %18018 = vst [vmem:[#allocation67_spill] sm:$0xff] %v10772_v45  ;;  %9392 = vmatmul.msk.f32.gmra.mxu0 %vm145_vm1, %v10175_v22  ;;  %9397 = vmatmul.msk.f32.gmra.mxu1 %vm145_vm1, %v10175_v22 }
 0x1a6   :  { %9402 = vmatmul.msk.f32.gmra.mxu2 %vm145_vm1, %v10175_v22  ;;  %9407 = vmatmul.msk.f32.gmra.mxu3 %vm145_vm1, %v10175_v22 }
 0x1a9   :  { %v10784_v17 = vpop.f32.mrf.mxu2  ;;  %v10786_v18 = vpop.f32.mrf.mxu3 }
 0x1aa   :  { %18019 = vst [vmem:[#allocation68_spill] sm:$0xff] %v10784_v17  ;;  %v10788_v11 = vpop.f32.mrf.mxu0  ;;  %v10790_v8 = vpop.f32.mrf.mxu1 }
 0x1ab   :  { %18020 = vst [vmem:[#allocation69_spill] sm:$0xff] %v10786_v18 }
 0x1ac   :  { %18021 = vst [vmem:[#allocation70_spill] sm:$0xff] %v10788_v11 }
 0x1ad   :  { %18022 = vst [vmem:[#allocation71_spill] sm:$0xff] %v10790_v8  ;;  %9393 = vmatmul.msk.f32.gmra.mxu0 %vm145_vm1, %v10188_v25  ;;  %9398 = vmatmul.msk.f32.gmra.mxu1 %vm145_vm1, %v10188_v25 }
 0x1ae   :  { %9403 = vmatmul.msk.f32.gmra.mxu2 %vm145_vm1, %v10188_v25  ;;  %9408 = vmatmul.msk.f32.gmra.mxu3 %vm145_vm1, %v10188_v25 }
 0x1b1   :  { %v10800_v20 = vpop.f32.mrf.mxu2  ;;  %v10802_v22 = vpop.f32.mrf.mxu3 }
 0x1b2   :  { %18023 = vst [vmem:[#allocation72_spill] sm:$0xff] %v10800_v20  ;;  %v10804_v16 = vpop.f32.mrf.mxu0  ;;  %v10806_v11 = vpop.f32.mrf.mxu1 }
 0x1b3   :  { %18024 = vst [vmem:[#allocation73_spill] sm:$0xff] %v10802_v22 }
 0x1b4   :  { %18025 = vst [vmem:[#allocation74_spill] sm:$0xff] %v10804_v16 }
 0x1b5   :  { %18026 = vst [vmem:[#allocation75_spill] sm:$0xff] %v10806_v11  ;;  %9410 = vmatmul.msk.f32.vlgmr.msra.gmra.mxu0 %vm145_vm1, %v10089_v0  ;;  %9415 = vmatmul.msk.f32.vlgmr.msra.gmra.mxu1 %vm145_vm1, %v10089_v0  ;;  %v1418_v11 = vld.sshfl [vmem:[#allocation1 + $0x10] sm:$0xff pattern:$0x75316420] }
 0x1b6   :  { %9420 = vmatmul.msk.f32.vlgmr.msra.gmra.mxu2 %vm145_vm1, %v10089_v0  ;;  %9425 = vmatmul.msk.f32.vlgmr.msra.gmra.mxu3 %vm145_vm1, %v10089_v0 }
 0x1b7   :  { %9459 = vmatpush.msk.msra.mxu2 %vm154_vm0, %v1418_v11 }
 0x1b9   :  { %v10816_v25 = vpop.f32.mrf.mxu2  ;;  %v10818_v20 = vpop.f32.mrf.mxu3 }
 0x1ba   :  { %18027 = vst [vmem:[#allocation76_spill] sm:$0xff] %v10816_v25  ;;  %v10820_v22 = vpop.f32.mrf.mxu0  ;;  %v10822_v16 = vpop.f32.mrf.mxu1  ;;  %v1419_v25 = vld.sshfl [vmem:[#allocation1 + $0x18] sm:$0xff pattern:$0x75316420] }
 0x1bb   :  { %18028 = vst [vmem:[#allocation77_spill] sm:$0xff] %v10818_v20  ;;  %v1416_v20 = vld.sshfl [vmem:[#allocation1] sm:$0xff pattern:$0x75316420]  ;;  %9464 = vmatpush.msk.msra.mxu3 %vm154_vm0, %v1419_v25 }
 0x1bc   :  { %18029 = vst [vmem:[#allocation78_spill] sm:$0xff] %v10820_v22  ;;  %9449 = vmatpush.msk.msra.mxu0 %vm154_vm0, %v1416_v20  ;;  %v1417_v22 = vld.sshfl [vmem:[#allocation1 + $0x8] sm:$0xff pattern:$0x75316420] }
 0x1bd   :  { %18030 = vst [vmem:[#allocation79_spill] sm:$0xff] %v10822_v16  ;;  %9411 = vmatmul.msk.f32.gmra.mxu0 %vm145_vm1, %v10101_v2  ;;  %9416 = vmatmul.msk.f32.gmra.mxu1 %vm145_vm1, %v10101_v2 }
 0x1be   :  { %9421 = vmatmul.msk.f32.gmra.mxu2 %vm145_vm1, %v10101_v2  ;;  %9426 = vmatmul.msk.f32.gmra.mxu3 %vm145_vm1, %v10101_v2  ;;  %1425 = vst [vmem:[#allocation1 + $0x10] ss:$2 sm:$0xff] %v10209_v26 }
 0x1bf   :  { %9454 = vmatpush.msk.msra.mxu1 %vm154_vm0, %v1417_v22  ;;  %1424 = vst [vmem:[#allocation1] ss:$2 sm:$0xff] %v10223_v28 }
 0x1c1   :  { %v10836_v11 = vpop.f32.mrf.mxu2  ;;  %v10838_v16 = vpop.f32.mrf.mxu3 }
 0x1c2   :  { %18031 = vst [vmem:[#allocation80_spill] sm:$0xff] %v10836_v11  ;;  %v10840_v8 = vpop.f32.mrf.mxu0  ;;  %v10842_v18 = vpop.f32.mrf.mxu1 }
 0x1c3   :  { %18032 = vst [vmem:[#allocation81_spill] sm:$0xff] %v10838_v16 }
 0x1c4   :  { %18033 = vst [vmem:[#allocation82_spill] sm:$0xff] %v10840_v8 }
 0x1c5   :  { %18034 = vst [vmem:[#allocation83_spill] sm:$0xff] %v10842_v18  ;;  %9412 = vmatmul.msk.f32.gmra.mxu0 %vm145_vm1, %v10094_v1  ;;  %9417 = vmatmul.msk.f32.gmra.mxu1 %vm145_vm1, %v10094_v1 }
 0x1c6   :  { %9422 = vmatmul.msk.f32.gmra.mxu2 %vm145_vm1, %v10094_v1  ;;  %9427 = vmatmul.msk.f32.gmra.mxu3 %vm145_vm1, %v10094_v1 }
 0x1c9   :  { %v10854_v26 = vpop.f32.mrf.mxu2  ;;  %v10856_v20 = vpop.f32.mrf.mxu3 }
 0x1ca   :  { %18035 = vst [vmem:[#allocation84_spill] sm:$0xff] %v10854_v26  ;;  %v10858_v25 = vpop.f32.mrf.mxu0  ;;  %v10860_v22 = vpop.f32.mrf.mxu1 }
 0x1cb   :  { %18036 = vst [vmem:[#allocation85_spill] sm:$0xff] %v10856_v20 }
 0x1cc   :  { %18037 = vst [vmem:[#allocation86_spill] sm:$0xff] %v10858_v25 }
 0x1cd   :  { %18038 = vst [vmem:[#allocation87_spill] sm:$0xff] %v10860_v22  ;;  %9413 = vmatmul.msk.f32.gmra.mxu0 %vm145_vm1, %v10106_v3  ;;  %9418 = vmatmul.msk.f32.gmra.mxu1 %vm145_vm1, %v10106_v3 }
 0x1ce   :  { %9423 = vmatmul.msk.f32.gmra.mxu2 %vm145_vm1, %v10106_v3  ;;  %9428 = vmatmul.msk.f32.gmra.mxu3 %vm145_vm1, %v10106_v3 }
 0x1d1   :  { %v10870_v28 = vpop.f32.mrf.mxu2  ;;  %v10872_v26 = vpop.f32.mrf.mxu3 }
 0x1d2   :  { %18039 = vst [vmem:[#allocation88_spill] sm:$0xff] %v10870_v28  ;;  %v10874_v20 = vpop.f32.mrf.mxu0  ;;  %v10876_v25 = vpop.f32.mrf.mxu1 }
 0x1d3   :  { %18040 = vst [vmem:[#allocation89_spill] sm:$0xff] %v10872_v26 }
 0x1d4   :  { %18041 = vst [vmem:[#allocation90_spill] sm:$0xff] %v10874_v20 }
 0x1d5   :  { %18042 = vst [vmem:[#allocation91_spill] sm:$0xff] %v10876_v25  ;;  %9430 = vmatmul.msk.f32.vlgmr.msrb.gmra.mxu0 %vm145_vm1, %v10089_v0  ;;  %9435 = vmatmul.msk.f32.vlgmr.msrb.gmra.mxu1 %vm145_vm1, %v10089_v0  ;;  %v1422_v25 = vld.sshfl [vmem:[#allocation1 + $0x30] sm:$0xff pattern:$0x75316420] }
 0x1d6   :  { %9440 = vmatmul.msk.f32.vlgmr.msrb.gmra.mxu2 %vm145_vm1, %v10089_v0  ;;  %9445 = vmatmul.msk.f32.vlgmr.msrb.gmra.mxu3 %vm145_vm1, %v10089_v0 }
 0x1d7   :  { %9479 = vmatpush.msk.msrb.mxu2 %vm154_vm0, %v1422_v25 }
 0x1d9   :  { %v10886_v22 = vpop.f32.mrf.mxu2  ;;  %v10888_v28 = vpop.f32.mrf.mxu3 }
 0x1da   :  { %18043 = vst [vmem:[#allocation92_spill] sm:$0xff] %v10886_v22  ;;  %v10890_v26 = vpop.f32.mrf.mxu0  ;;  %v10892_v20 = vpop.f32.mrf.mxu1  ;;  %v1423_v22 = vld.sshfl [vmem:[#allocation1 + $0x38] sm:$0xff pattern:$0x75316420] }
 0x1db   :  { %18044 = vst [vmem:[#allocation93_spill] sm:$0xff] %v10888_v28  ;;  %v1420_v28 = vld.sshfl [vmem:[#allocation1 + $0x20] sm:$0xff pattern:$0x75316420]  ;;  %9484 = vmatpush.msk.msrb.mxu3 %vm154_vm0, %v1423_v22 }
 0x1dc   :  { %18045 = vst [vmem:[#allocation94_spill] sm:$0xff] %v10890_v26  ;;  %9469 = vmatpush.msk.msrb.mxu0 %vm154_vm0, %v1420_v28  ;;  %v1421_v26 = vld.sshfl [vmem:[#allocation1 + $0x28] sm:$0xff pattern:$0x75316420] }
 0x1dd   :  { %18046 = vst [vmem:[#allocation95_spill] sm:$0xff] %v10892_v20  ;;  %9431 = vmatmul.msk.f32.gmra.mxu0 %vm145_vm1, %v10101_v2  ;;  %9436 = vmatmul.msk.f32.gmra.mxu1 %vm145_vm1, %v10101_v2 }
 0x1de   :  { %9441 = vmatmul.msk.f32.gmra.mxu2 %vm145_vm1, %v10101_v2  ;;  %9446 = vmatmul.msk.f32.gmra.mxu3 %vm145_vm1, %v10101_v2  ;;  %1427 = vst [vmem:[#allocation1 + $0x30] ss:$2 sm:$0xff] %v10257_v32 }
 0x1df   :  { %9474 = vmatpush.msk.msrb.mxu1 %vm154_vm0, %v1421_v26  ;;  %1426 = vst [vmem:[#allocation1 + $0x20] ss:$2 sm:$0xff] %v10271_v34 }
 0x1e1   :  { %v10906_v25 = vpop.f32.mrf.mxu2  ;;  %v10908_v20 = vpop.f32.mrf.mxu3 }
 0x1e2   :  { %18047 = vst [vmem:[#allocation96_spill] sm:$0xff] %v10906_v25  ;;  %v10910_v18 = vpop.f32.mrf.mxu0  ;;  %v10912_v8 = vpop.f32.mrf.mxu1 }
 0x1e3   :  { %18048 = vst [vmem:[#allocation97_spill] sm:$0xff] %v10908_v20 }
 0x1e4   :  { %18049 = vst [vmem:[#allocation98_spill] sm:$0xff] %v10910_v18 }
 0x1e5   :  { %18050 = vst [vmem:[#allocation99_spill] sm:$0xff] %v10912_v8  ;;  %9432 = vmatmul.msk.f32.gmra.mxu0 %vm145_vm1, %v10094_v1  ;;  %9437 = vmatmul.msk.f32.gmra.mxu1 %vm145_vm1, %v10094_v1 }
 0x1e6   :  { %9442 = vmatmul.msk.f32.gmra.mxu2 %vm145_vm1, %v10094_v1  ;;  %9447 = vmatmul.msk.f32.gmra.mxu3 %vm145_vm1, %v10094_v1 }
 0x1e9   :  { %v10924_v32 = vpop.f32.mrf.mxu2  ;;  %v10926_v22 = vpop.f32.mrf.mxu3 }
 0x1ea   :  { %18051 = vst [vmem:[#allocation100_spill] sm:$0xff] %v10924_v32  ;;  %v10928_v28 = vpop.f32.mrf.mxu0  ;;  %v10930_v26 = vpop.f32.mrf.mxu1  ;;  %v1433_v32 = vld.sshfl [vmem:[#allocation1 + $0x28] sm:$0xff pattern:$0x75316420] }
 0x1eb   :  { %18052 = vst [vmem:[#allocation101_spill] sm:$0xff] %v10926_v22 }
 0x1ec   :  { %18053 = vst [vmem:[#allocation102_spill] sm:$0xff] %v10928_v28 }
 0x1ed   :  { %18054 = vst [vmem:[#allocation103_spill] sm:$0xff] %v10930_v26  ;;  %9433 = vmatmul.msk.f32.gmra.mxu0 %vm145_vm1, %v10106_v3  ;;  %9438 = vmatmul.msk.f32.gmra.mxu1 %vm145_vm1, %v10106_v3 }
 0x1ee   :  { %9443 = vmatmul.msk.f32.gmra.mxu2 %vm145_vm1, %v10106_v3  ;;  %9448 = vmatmul.msk.f32.gmra.mxu3 %vm145_vm1, %v10106_v3 }
 0x1f1   :  { %v10940_v1 = vpop.f32.mrf.mxu2  ;;  %v10942_v34 = vpop.f32.mrf.mxu3 }
 0x1f2   :  { %18055 = vst [vmem:[#allocation104_spill] sm:$0xff] %v10940_v1  ;;  %v10944_v22 = vpop.f32.mrf.mxu0  ;;  %v10946_v28 = vpop.f32.mrf.mxu1 }
 0x1f3   :  { %18056 = vst [vmem:[#allocation105_spill] sm:$0xff] %v10942_v34 }
 0x1f4   :  { %18057 = vst [vmem:[#allocation106_spill] sm:$0xff] %v10944_v22 }
 0x1f5   :  { %18058 = vst [vmem:[#allocation107_spill] sm:$0xff] %v10946_v28  ;;  %9450 = vmatmul.msk.f32.vlgmr.msra.gmra.mxu0 %vm145_vm1, %v10089_v0  ;;  %9455 = vmatmul.msk.f32.vlgmr.msra.gmra.mxu1 %vm145_vm1, %v10089_v0  ;;  %v1430_v28 = vld.sshfl [vmem:[#allocation1 + $0x10] sm:$0xff pattern:$0x75316420] }
 0x1f6   :  { %9460 = vmatmul.msk.f32.vlgmr.msra.gmra.mxu2 %vm145_vm1, %v10089_v0  ;;  %9465 = vmatmul.msk.f32.vlgmr.msra.gmra.mxu3 %vm145_vm1, %v10089_v0  ;;  %v10974_v0 = vld [vmem:[%s17458_s1 + $0x8] sm:$0xff] }
 0x1f7   :  { %9499 = vmatpush.msk.msra.mxu2 %vm154_vm0, %v1430_v28 }
 0x1f9   :  { %v10956_v3 = vpop.f32.mrf.mxu2  ;;  %v10958_v1 = vpop.f32.mrf.mxu3 }
 0x1fa   :  { %18059 = vst [vmem:[#allocation108_spill] sm:$0xff] %v10956_v3  ;;  %v10960_v34 = vpop.f32.mrf.mxu0  ;;  %v10962_v22 = vpop.f32.mrf.mxu1 }
 0x1fb   :  { %18060 = vst [vmem:[#allocation109_spill] sm:$0xff] %v10958_v1 }
 0x1fc   :  { %18061 = vst [vmem:[#allocation110_spill] sm:$0xff] %v10960_v34  ;;  %v1431_v34 = vld.sshfl [vmem:[#allocation1 + $0x18] sm:$0xff pattern:$0x75316420] }
 0x1fd   :  { %18062 = vst [vmem:[#allocation111_spill] sm:$0xff] %v10962_v22  ;;  %9451 = vmatmul.msk.f32.gmra.mxu0 %vm145_vm1, %v10101_v2  ;;  %9456 = vmatmul.msk.f32.gmra.mxu1 %vm145_vm1, %v10101_v2  ;;  %v1428_v22 = vld.sshfl [vmem:[#allocation1] sm:$0xff pattern:$0x75316420] }
 0x1fe   :  { %9461 = vmatmul.msk.f32.gmra.mxu2 %vm145_vm1, %v10101_v2  ;;  %9466 = vmatmul.msk.f32.gmra.mxu3 %vm145_vm1, %v10974_v0  ;;  %1437 = vst [vmem:[#allocation1 + $0x10] ss:$2 sm:$0xff] %v10305_v38  ;;  %v1429_v2 = vld.sshfl [vmem:[#allocation1 + $0x8] sm:$0xff pattern:$0x75316420] }
 0x1ff   :  { %9489 = vmatpush.msk.msra.mxu0 %vm154_vm0, %v1428_v22  ;;  %9504 = vmatpush.msk.msra.mxu3 %vm154_vm0, %v1431_v34  ;;  %1436 = vst [vmem:[#allocation1] ss:$2 sm:$0xff] %v10319_v39  ;;  %v10994_v22 = vld [vmem:[%s17458_s1 + $0x10] sm:$0xff] }
 0x200   :  { %9494 = vmatpush.msk.msra.mxu1 %vm154_vm0, %v1429_v2 }
 0x201   :  { %v10981_v28 = vpop.f32.mrf.mxu2  ;;  %v10983_v1 = vpop.f32.mrf.mxu3 }
 0x202   :  { %18063 = vst [vmem:[#allocation112_spill] sm:$0xff] %v10981_v28  ;;  %v10985_v3 = vpop.f32.mrf.mxu0  ;;  %v10987_v26 = vpop.f32.mrf.mxu1 }
 0x203   :  { %18064 = vst [vmem:[#allocation113_spill] sm:$0xff] %v10983_v1  ;;  %v1434_v1 = vld.sshfl [vmem:[#allocation1 + $0x30] sm:$0xff pattern:$0x75316420] }
 0x204   :  { %18065 = vst [vmem:[#allocation114_spill] sm:$0xff] %v10985_v3  ;;  %v11036_v3 = vld [vmem:[%s17458_s1] sm:$0xff] }
 0x205   :  { %18066 = vst [vmem:[#allocation115_spill] sm:$0xff] %v10987_v26  ;;  %9452 = vmatmul.msk.f32.gmra.mxu0 %vm145_vm1, %v10994_v22  ;;  %9457 = vmatmul.msk.f32.gmra.mxu1 %vm145_vm1, %v10994_v22  ;;  %v11015_v26 = vld [vmem:[%s17458_s1 + $0x18] sm:$0xff] }
 0x206   :  { %9462 = vmatmul.msk.f32.gmra.mxu2 %vm145_vm1, %v10994_v22  ;;  %9467 = vmatmul.msk.f32.gmra.mxu3 %vm145_vm1, %v10994_v22  ;;  %v1441_v25 = vld.sshfl [vmem:[#allocation1 + $0x8] sm:$0xff pattern:$0x75316420] }
 0x209   :  { %v11004_v38 = vpop.f32.mrf.mxu2  ;;  %v11006_v39 = vpop.f32.mrf.mxu3 }
 0x20a   :  { %18067 = vst [vmem:[#allocation116_spill] sm:$0xff] %v11004_v38  ;;  %v11008_v34 = vpop.f32.mrf.mxu0  ;;  %v11010_v2 = vpop.f32.mrf.mxu1 }
 0x20b   :  { %18068 = vst [vmem:[#allocation117_spill] sm:$0xff] %v11006_v39 }
 0x20c   :  { %18069 = vst [vmem:[#allocation118_spill] sm:$0xff] %v11008_v34 }
 0x20d   :  { %18070 = vst [vmem:[#allocation119_spill] sm:$0xff] %v11010_v2  ;;  %9453 = vmatmul.msk.f32.gmra.mxu0 %vm145_vm1, %v11015_v26  ;;  %9458 = vmatmul.msk.f32.gmra.mxu1 %vm145_vm1, %v11015_v26 }
 0x20e   :  { %9463 = vmatmul.msk.f32.gmra.mxu2 %vm145_vm1, %v11015_v26  ;;  %9468 = vmatmul.msk.f32.gmra.mxu3 %vm145_vm1, %v11015_v26 }
 0x211   :  { %v11025_v34 = vpop.f32.mrf.mxu2  ;;  %v11027_v2 = vpop.f32.mrf.mxu3 }
 0x212   :  { %18071 = vst [vmem:[#allocation120_spill] sm:$0xff] %v11025_v34  ;;  %v11029_v39 = vpop.f32.mrf.mxu0  ;;  %v11031_v38 = vpop.f32.mrf.mxu1 }
 0x213   :  { %18072 = vst [vmem:[#allocation121_spill] sm:$0xff] %v11027_v2 }
 0x214   :  { %18073 = vst [vmem:[#allocation122_spill] sm:$0xff] %v11029_v39 }
 0x215   :  { %18074 = vst [vmem:[#allocation123_spill] sm:$0xff] %v11031_v38  ;;  %9470 = vmatmul.msk.f32.vlgmr.msrb.gmra.mxu0 %vm145_vm1, %v11036_v3  ;;  %9475 = vmatmul.msk.f32.vlgmr.msrb.gmra.mxu1 %vm145_vm1, %v11036_v3 }
 0x216   :  { %9480 = vmatmul.msk.f32.vlgmr.msrb.gmra.mxu2 %vm145_vm1, %v11036_v3  ;;  %9485 = vmatmul.msk.f32.vlgmr.msrb.gmra.mxu3 %vm145_vm1, %v11036_v3 }
 0x217   :  { %9519 = vmatpush.msk.msrb.mxu2 %vm154_vm0, %v1434_v1  ;;  %9514 = vmatpush.msk.msrb.mxu1 %vm154_vm0, %v1433_v32 }
 0x219   :  { %v11046_v39 = vpop.f32.mrf.mxu2  ;;  %v11048_v38 = vpop.f32.mrf.mxu3 }
 0x21a   :  { %18075 = vst [vmem:[#allocation124_spill] sm:$0xff] %v11046_v39  ;;  %v11050_v2 = vpop.f32.mrf.mxu0  ;;  %v11052_v34 = vpop.f32.mrf.mxu1  ;;  %v1435_v39 = vld.sshfl [vmem:[#allocation1 + $0x38] sm:$0xff pattern:$0x75316420] }
 0x21b   :  { %18076 = vst [vmem:[#allocation125_spill] sm:$0xff] %v11048_v38  ;;  %v1432_v38 = vld.sshfl [vmem:[#allocation1 + $0x20] sm:$0xff pattern:$0x75316420]  ;;  %9524 = vmatpush.msk.msrb.mxu3 %vm154_vm0, %v1435_v39 }
 0x21c   :  { %18077 = vst [vmem:[#allocation126_spill] sm:$0xff] %v11050_v2  ;;  %9509 = vmatpush.msk.msrb.mxu0 %vm154_vm0, %v1432_v38 }
 0x21d   :  { %18078 = vst [vmem:[#allocation127_spill] sm:$0xff] %v11052_v34  ;;  %9471 = vmatmul.msk.f32.gmra.mxu0 %vm145_vm1, %v10974_v0  ;;  %9476 = vmatmul.msk.f32.gmra.mxu1 %vm145_vm1, %v10974_v0 }
 0x21e   :  { %9481 = vmatmul.msk.f32.gmra.mxu2 %vm145_vm1, %v10974_v0  ;;  %9486 = vmatmul.msk.f32.gmra.mxu3 %vm145_vm1, %v10974_v0  ;;  %1439 = vst [vmem:[#allocation1 + $0x30] ss:$2 sm:$0xff] %v10365_v50 }
 0x21f   :  { %1438 = vst [vmem:[#allocation1 + $0x20] ss:$2 sm:$0xff] %v10379_v51 }
 0x221   :  { %v11066_v1 = vpop.f32.mrf.mxu2  ;;  %v11068_v34 = vpop.f32.mrf.mxu3 }
 0x222   :  { %18079 = vst [vmem:[#allocation128_spill] sm:$0xff] %v11066_v1  ;;  %v11070_v2 = vpop.f32.mrf.mxu0  ;;  %v11072_v28 = vpop.f32.mrf.mxu1  ;;  %v1443_v1 = vld.sshfl [vmem:[#allocation1 + $0x18] sm:$0xff pattern:$0x75316420] }
 0x223   :  { %18080 = vst [vmem:[#allocation129_spill] sm:$0xff] %v11068_v34  ;;  %v1440_v34 = vld.sshfl [vmem:[#allocation1] sm:$0xff pattern:$0x75316420] }
 0x224   :  { %18081 = vst [vmem:[#allocation130_spill] sm:$0xff] %v11070_v2  ;;  %v1442_v2 = vld.sshfl [vmem:[#allocation1 + $0x10] sm:$0xff pattern:$0x75316420] }
 0x225   :  { %18082 = vst [vmem:[#allocation131_spill] sm:$0xff] %v11072_v28  ;;  %9472 = vmatmul.msk.f32.gmra.mxu0 %vm145_vm1, %v10994_v22  ;;  %9477 = vmatmul.msk.f32.gmra.mxu1 %vm145_vm1, %v10994_v22  ;;  %v1446_v10 = vld.sshfl [vmem:[#allocation1 + $0x30] sm:$0xff pattern:$0x75316420] }
 0x226   :  { %9482 = vmatmul.msk.f32.gmra.mxu2 %vm145_vm1, %v10994_v22  ;;  %9487 = vmatmul.msk.f32.gmra.mxu3 %vm145_vm1, %v10994_v22  ;;  %1449 = vst [vmem:[#allocation1 + $0x10] ss:$2 sm:$0xff] %v10445_v19  ;;  %v1444_v62 = vld.sshfl [vmem:[#allocation1 + $0x20] sm:$0xff pattern:$0x75316420] }
 0x227   :  { %1448 = vst [vmem:[#allocation1] ss:$2 sm:$0xff] %v10459_v21  ;;  %v1447_v49 = vld.sshfl [vmem:[#allocation1 + $0x38] sm:$0xff pattern:$0x75316420] }
 0x228   :  { %1451 = vst [vmem:[#allocation1 + $0x30] ss:$2 sm:$0xff] %v10525_v33 }
 0x229   :  { %v11084_v50 = vpop.f32.mrf.mxu2  ;;  %v11086_v38 = vpop.f32.mrf.mxu3 }
 0x22a   :  { %18083 = vst [vmem:[#allocation132_spill] sm:$0xff] %v11084_v50  ;;  %v11088_v39 = vpop.f32.mrf.mxu0  ;;  %v11090_v32 = vpop.f32.mrf.mxu1 }
 0x22b   :  { %18084 = vst [vmem:[#allocation133_spill] sm:$0xff] %v11086_v38 }
 0x22c   :  { %18085 = vst [vmem:[#allocation134_spill] sm:$0xff] %v11088_v39 }
 0x22d   :  { %18086 = vst [vmem:[#allocation135_spill] sm:$0xff] %v11090_v32  ;;  %9473 = vmatmul.msk.f32.gmra.mxu0 %vm145_vm1, %v11015_v26  ;;  %9478 = vmatmul.msk.f32.gmra.mxu1 %vm145_vm1, %v11015_v26 }
 0x22e   :  { %9483 = vmatmul.msk.f32.gmra.mxu2 %vm145_vm1, %v11015_v26  ;;  %9488 = vmatmul.msk.f32.gmra.mxu3 %vm145_vm1, %v11015_v26 }
 0x22f   :  { %v1459_v55 = vld.sshfl [vmem:[#allocation1 + $0x38] sm:$0xff pattern:$0x75316420] }
 0x231   :  { %v11100_v51 = vpop.f32.mrf.mxu2  ;;  %v11102_v50 = vpop.f32.mrf.mxu3 }
 0x232   :  { %18087 = vst [vmem:[#allocation136_spill] sm:$0xff] %v11100_v51  ;;  %v11104_v38 = vpop.f32.mrf.mxu0  ;;  %v11106_v39 = vpop.f32.mrf.mxu1 }
 0x233   :  { %18088 = vst [vmem:[#allocation137_spill] sm:$0xff] %v11102_v50 }
 0x234   :  { %18089 = vst [vmem:[#allocation138_spill] sm:$0xff] %v11104_v38 }
 0x235   :  { %18090 = vst [vmem:[#allocation139_spill] sm:$0xff] %v11106_v39  ;;  %9490 = vmatmul.msk.f32.vlgmr.msra.gmra.mxu0 %vm145_vm1, %v11036_v3  ;;  %9495 = vmatmul.msk.f32.vlgmr.msra.gmra.mxu1 %vm145_vm1, %v11036_v3  ;;  %v2709_v39 = vld [vmem:[%s17458_s1 + $0x8] sm:$0xff] }
 0x236   :  { %9500 = vmatmul.msk.f32.vlgmr.msra.gmra.mxu2 %vm145_vm1, %v11036_v3  ;;  %9505 = vmatmul.msk.f32.vlgmr.msra.gmra.mxu3 %vm145_vm1, %v11036_v3 }
 0x237   :  { %9539 = vmatpush.msk.msra.mxu2 %vm154_vm0, %v1442_v2  ;;  %9529 = vmatpush.msk.msra.mxu0 %vm154_vm0, %v1440_v34 }
 0x238   :  { %9544 = vmatpush.msk.msra.mxu3 %vm154_vm0, %v1443_v1  ;;  %9534 = vmatpush.msk.msra.mxu1 %vm154_vm0, %v1441_v25 }
 0x239   :  { %v11116_v32 = vpop.f32.mrf.mxu2  ;;  %v11118_v51 = vpop.f32.mrf.mxu3 }
 0x23a   :  { %v11120_v50 = vpop.f32.mrf.mxu0  ;;  %v11122_v28 = vpop.f32.mrf.mxu1 }
 0x23b   :  { %18091 = vst [vmem:[#allocation140_spill] sm:$0xff] %v11120_v50  ;;  %v1453_v50 = vld.sshfl [vmem:[#allocation1 + $0x8] sm:$0xff pattern:$0x75316420] }
 0x23c   :  { %18092 = vst [vmem:[#allocation141_spill] sm:$0xff] %v11122_v28 }
 0x23d   :  { %9491 = vmatmul.msk.f32.gmra.mxu0 %vm145_vm1, %v10974_v0  ;;  %9496 = vmatmul.msk.f32.gmra.mxu1 %vm145_vm1, %v10974_v0 }
 0x23e   :  { %9501 = vmatmul.msk.f32.gmra.mxu2 %vm145_vm1, %v10974_v0  ;;  %9506 = vmatmul.msk.f32.gmra.mxu3 %vm145_vm1, %v10974_v0 }
 0x241   :  { %v11136_v2 = vpop.f32.mrf.mxu2  ;;  %v11138_v8 = vpop.f32.mrf.mxu3 }
 0x242   :  { %v11140_v18 = vpop.f32.mrf.mxu0  ;;  %v11142_v20 = vpop.f32.mrf.mxu1 }
 0x243   :  { %18093 = vst [vmem:[#allocation142_spill] sm:$0xff] %v11140_v18  ;;  %v1454_v18 = vld.sshfl [vmem:[#allocation1 + $0x10] sm:$0xff pattern:$0x75316420] }
 0x244   :  { %18094 = vst [vmem:[#allocation143_spill] sm:$0xff] %v11142_v20  ;;  %v2711_v20 = vld [vmem:[%s17458_s1 + $0x18] sm:$0xff] }
 0x245   :  { %9492 = vmatmul.msk.f32.gmra.mxu0 %vm145_vm1, %v10994_v22  ;;  %9497 = vmatmul.msk.f32.gmra.mxu1 %vm145_vm1, %v10994_v22 }
 0x246   :  { %9502 = vmatmul.msk.f32.gmra.mxu2 %vm145_vm1, %v10994_v22  ;;  %9507 = vmatmul.msk.f32.gmra.mxu3 %vm145_vm1, %v10994_v22 }
 0x247   :  { %2742 = vrot.lane.b32.xlu1 %v2711_v20, %s10051_s6 }
 0x249   :  { %v11154_v19 = vpop.f32.mrf.mxu2  ;;  %v11156_v34 = vpop.f32.mrf.mxu3 }
 0x24a   :  { %v11158_v1 = vpop.f32.mrf.mxu0  ;;  %v11160_v25 = vpop.f32.mrf.mxu1 }
 0x24b   :  { %18095 = vst [vmem:[#allocation144_spill] sm:$0xff] %v11158_v1 }
 0x24c   :  { %18096 = vst [vmem:[#allocation145_spill] sm:$0xff] %v11160_v25 }
 0x24d   :  { %9493 = vmatmul.msk.f32.gmra.mxu0 %vm145_vm1, %v11015_v26  ;;  %9498 = vmatmul.msk.f32.gmra.mxu1 %vm145_vm1, %v11015_v26 }
 0x24e   :  { %9503 = vmatmul.msk.f32.gmra.mxu2 %vm145_vm1, %v11015_v26  ;;  %9508 = vmatmul.msk.f32.gmra.mxu3 %vm145_vm1, %v11015_v26 }
 0x251   :  { %v11170_v21 = vpop.f32.mrf.mxu2  ;;  %v11172_v16 = vpop.f32.mrf.mxu3 }
 0x252   :  { %v11174_v11 = vpop.f32.mrf.mxu0  ;;  %v11176_v17 = vpop.f32.mrf.mxu1 }
 0x253   :  { %18097 = vst [vmem:[#allocation146_spill] sm:$0xff] %v11174_v11  ;;  %v1445_v11 = vld.sshfl [vmem:[#allocation1 + $0x28] sm:$0xff pattern:$0x75316420] }
 0x254   :  { %18098 = vst [vmem:[#allocation147_spill] sm:$0xff] %v11176_v17 }
 0x255   :  { %9510 = vmatmul.msk.f32.vlgmr.msrb.gmra.mxu0 %vm145_vm1, %v11036_v3  ;;  %9515 = vmatmul.msk.f32.vlgmr.msrb.gmra.mxu1 %vm145_vm1, %v11036_v3  ;;  %1450 = vst [vmem:[#allocation1 + $0x20] ss:$2 sm:$0xff] %v10539_v35 }
 0x256   :  { %9520 = vmatmul.msk.f32.vlgmr.msrb.gmra.mxu2 %vm145_vm1, %v11036_v3  ;;  %9525 = vmatmul.msk.f32.vlgmr.msrb.gmra.mxu3 %vm145_vm1, %v11036_v3 }
 0x257   :  { %9559 = vmatpush.msk.msrb.mxu2 %vm154_vm0, %v1446_v10  ;;  %9549 = vmatpush.msk.msrb.mxu0 %vm154_vm0, %v1444_v62 }
 0x258   :  { %9564 = vmatpush.msk.msrb.mxu3 %vm154_vm0, %v1447_v49  ;;  %9554 = vmatpush.msk.msrb.mxu1 %vm154_vm0, %v1445_v11 }
 0x259   :  { %v11186_v45 = vpop.f32.mrf.mxu2  ;;  %v11188_v54 = vpop.f32.mrf.mxu3 }
 0x25a   :  { %v11190_v15 = vpop.f32.mrf.mxu0  ;;  %v11192_v48 = vpop.f32.mrf.mxu1 }
 0x25b   :  { %18099 = vst [vmem:[#allocation148_spill] sm:$0xff] %v11190_v15 }
 0x25c   :  { %18100 = vst [vmem:[#allocation149_spill] sm:$0xff] %v11192_v48  ;;  %v1456_v4 = vld.sshfl [vmem:[#allocation1 + $0x20] sm:$0xff pattern:$0x75316420] }
 0x25d   :  { %9511 = vmatmul.msk.f32.gmra.mxu0 %vm145_vm1, %v10974_v0  ;;  %9516 = vmatmul.msk.f32.gmra.mxu1 %vm145_vm1, %v10974_v0  ;;  %v1457_v29 = vld.sshfl [vmem:[#allocation1 + $0x28] sm:$0xff pattern:$0x75316420] }
 0x25e   :  { %9521 = vmatmul.msk.f32.gmra.mxu2 %vm145_vm1, %v10974_v0  ;;  %9526 = vmatmul.msk.f32.gmra.mxu3 %vm145_vm1, %v10974_v0 }
 0x261   :  { %v11206_v10 = vpop.f32.mrf.mxu2  ;;  %v11208_v48 = vpop.f32.mrf.mxu3 }
 0x262   :  { %v11210_v15 = vpop.f32.mrf.mxu0  ;;  %v11212_v17 = vpop.f32.mrf.mxu1 }
 0x263   :  { %18101 = vst [vmem:[#allocation150_spill] sm:$0xff] %v11210_v15 }
 0x264   :  { %18102 = vst [vmem:[#allocation151_spill] sm:$0xff] %v11212_v17 }
 0x265   :  { %9512 = vmatmul.msk.f32.gmra.mxu0 %vm145_vm1, %v10994_v22  ;;  %9517 = vmatmul.msk.f32.gmra.mxu1 %vm145_vm1, %v10994_v22 }
 0x266   :  { %9522 = vmatmul.msk.f32.gmra.mxu2 %vm145_vm1, %v10994_v22  ;;  %9527 = vmatmul.msk.f32.gmra.mxu3 %vm145_vm1, %v10994_v22 }
 0x269   :  { %v11224_v49 = vpop.f32.mrf.mxu2  ;;  %v11226_v33 = vpop.f32.mrf.mxu3 }
 0x26a   :  { %v11228_v62 = vpop.f32.mrf.mxu0  ;;  %v11230_v11 = vpop.f32.mrf.mxu1 }
 0x26b   :  { %18103 = vst [vmem:[#allocation152_spill] sm:$0xff] %v11228_v62 }
 0x26c   :  { %18104 = vst [vmem:[#allocation153_spill] sm:$0xff] %v11230_v11  ;;  %v2710_v11 = vld [vmem:[%s17458_s1 + $0x10] sm:$0xff] }
 0x26d   :  { %9513 = vmatmul.msk.f32.gmra.mxu0 %vm145_vm1, %v11015_v26  ;;  %9518 = vmatmul.msk.f32.gmra.mxu1 %vm145_vm1, %v11015_v26 }
 0x26e   :  { %9523 = vmatmul.msk.f32.gmra.mxu2 %vm145_vm1, %v11015_v26  ;;  %9528 = vmatmul.msk.f32.gmra.mxu3 %vm145_vm1, %v11015_v26 }
 0x26f   :  { %2740 = vrot.lane.b32.xlu0 %v2710_v11, %s10051_s6  ;;  %v2708_v11 = vld [vmem:[%s17458_s1] sm:$0xff] }
 0x270   :  { %2736 = vrot.lane.b32.xlu2 %v2708_v11, %s10051_s6 }
 0x271   :  { %v11240_v35 = vpop.f32.mrf.mxu2  ;;  %v11242_v17 = vpop.f32.mrf.mxu3 }
 0x272   :  { %v11244_v15 = vpop.f32.mrf.mxu0  ;;  %v11246_v62 = vpop.f32.mrf.mxu1 }
 0x273   :  { %18105 = vst [vmem:[#allocation154_spill] sm:$0xff] %v11244_v15 }
 0x274   :  { %18106 = vst [vmem:[#allocation155_spill] sm:$0xff] %v11246_v62 }
 0x275   :  { %9530 = vmatmul.msk.f32.vlgmr.msra.gmra.mxu0 %vm145_vm1, %v11036_v3  ;;  %9535 = vmatmul.msk.f32.vlgmr.msra.gmra.mxu1 %vm145_vm1, %v11036_v3 }
 0x276   :  { %9540 = vmatmul.msk.f32.vlgmr.msra.gmra.mxu2 %vm145_vm1, %v11036_v3  ;;  %9545 = vmatmul.msk.f32.vlgmr.msra.gmra.mxu3 %vm145_vm1, %v11036_v3 }
 0x277   :  { %9579 = vmatpush.msk.msra.mxu2 %vm154_vm0, %v1454_v18  ;;  %9574 = vmatpush.msk.msra.mxu1 %vm154_vm0, %v1453_v50 }
 0x278   :  { %2738 = vrot.lane.b32.xlu2 %v2709_v39, %s10051_s6 }
 0x279   :  { %v11260_v62 = vpop.f32.mrf.mxu2  ;;  %v11262_v15 = vpop.f32.mrf.mxu3 }
 0x27a   :  { %v11264_v25 = vpop.f32.mrf.mxu0  ;;  %v11266_v1 = vpop.f32.mrf.mxu1 }
 0x27b   :  { %18107 = vst [vmem:[#allocation156_spill] sm:$0xff] %v11264_v25  ;;  %v1455_v25 = vld.sshfl [vmem:[#allocation1 + $0x18] sm:$0xff pattern:$0x75316420] }
 0x27c   :  { %18108 = vst [vmem:[#allocation157_spill] sm:$0xff] %v11266_v1  ;;  %v1452_v1 = vld.sshfl [vmem:[#allocation1] sm:$0xff pattern:$0x75316420]  ;;  %9584 = vmatpush.msk.msra.mxu3 %vm154_vm0, %v1455_v25 }
 0x27d   :  { %9531 = vmatmul.msk.f32.gmra.mxu0 %vm145_vm1, %v10974_v0  ;;  %9536 = vmatmul.msk.f32.gmra.mxu1 %vm145_vm1, %v10974_v0 }
 0x27e   :  { %9541 = vmatmul.msk.f32.gmra.mxu2 %vm145_vm1, %v10974_v0  ;;  %9546 = vmatmul.msk.f32.gmra.mxu3 %vm145_vm1, %v10974_v0 }
 0x27f   :  { %9569 = vmatpush.msk.msra.mxu0 %vm154_vm0, %v1452_v1 }
 0x281   :  { %v11287_v20 = vpop.f32.mrf.mxu2  ;;  %v11289_v18 = vpop.f32.mrf.mxu3 }
 0x282   :  { %v11291_v11 = vpop.f32.mrf.mxu0  ;;  %v11293_v28 = vpop.f32.mrf.mxu1 }
 0x283   :  { %18109 = vst [vmem:[#allocation158_spill] sm:$0xff] %v11291_v11 }
 0x284   :  { %18110 = vst [vmem:[#allocation159_spill] sm:$0xff] %v11293_v28 }
 0x285   :  { %9532 = vmatmul.msk.f32.gmra.mxu0 %vm145_vm1, %v10994_v22  ;;  %9537 = vmatmul.msk.f32.gmra.mxu1 %vm145_vm1, %v10994_v22 }
 0x286   :  { %9542 = vmatmul.msk.f32.gmra.mxu2 %vm145_vm1, %v10994_v22  ;;  %9547 = vmatmul.msk.f32.gmra.mxu3 %vm145_vm1, %v10994_v22 }
 0x289   :  { %v11308_v1 = vpop.f32.mrf.mxu2  ;;  %v11310_v25 = vpop.f32.mrf.mxu3 }
 0x28a   :  { %v11312_v28 = vpop.f32.mrf.mxu0  ;;  %v11314_v50 = vpop.f32.mrf.mxu1 }
 0x28b   :  { %18111 = vst [vmem:[#allocation160_spill] sm:$0xff] %v11312_v28 }
 0x28c   :  { %18112 = vst [vmem:[#allocation161_spill] sm:$0xff] %v11314_v50 }
 0x28d   :  { %9533 = vmatmul.msk.f32.gmra.mxu0 %vm145_vm1, %v11015_v26  ;;  %9538 = vmatmul.msk.f32.gmra.mxu1 %vm145_vm1, %v11015_v26 }
 0x28e   :  { %9543 = vmatmul.msk.f32.gmra.mxu2 %vm145_vm1, %v11015_v26  ;;  %9548 = vmatmul.msk.f32.gmra.mxu3 %vm145_vm1, %v11015_v26 }
 0x291   :  { %v11324_v39 = vpop.f32.mrf.mxu2  ;;  %v11326_v11 = vpop.f32.mrf.mxu3 }
 0x292   :  { %v11328_v38 = vpop.f32.mrf.mxu0  ;;  %v11330_v28 = vpop.f32.mrf.mxu1 }
 0x293   :  { %18113 = vst [vmem:[#allocation162_spill] sm:$0xff] %v11328_v38 }
 0x294   :  { %18114 = vst [vmem:[#allocation163_spill] sm:$0xff] %v11330_v28  ;;  %v1458_v28 = vld.sshfl [vmem:[#allocation1 + $0x30] sm:$0xff pattern:$0x75316420] }
 0x295   :  { %9550 = vmatmul.msk.f32.vlgmr.msrb.gmra.mxu0 %vm145_vm1, %v11036_v3  ;;  %9555 = vmatmul.msk.f32.vlgmr.msrb.gmra.mxu1 %vm145_vm1, %v11036_v3 }
 0x296   :  { %9560 = vmatmul.msk.f32.vlgmr.msrb.gmra.mxu2 %vm145_vm1, %v11036_v3  ;;  %9565 = vmatmul.msk.f32.vlgmr.msrb.gmra.mxu3 %vm145_vm1, %v11036_v3 }
 0x297   :  { %9599 = vmatpush.msk.msrb.mxu2 %vm154_vm0, %v1458_v28  ;;  %9589 = vmatpush.msk.msrb.mxu0 %vm154_vm0, %v1456_v4 }
 0x298   :  { %9604 = vmatpush.msk.msrb.mxu3 %vm154_vm0, %v1459_v55  ;;  %9594 = vmatpush.msk.msrb.mxu1 %vm154_vm0, %v1457_v29 }
 0x299   :  { %v11340_v50 = vpop.f32.mrf.mxu2  ;;  %v11342_v44 = vpop.f32.mrf.mxu3 }
 0x29a   :  { %v11344_v63 = vpop.f32.mrf.mxu0  ;;  %v11346_v38 = vpop.f32.mrf.mxu1 }
 0x29b   :  { %18115 = vst [vmem:[#allocation164_spill] sm:$0xff] %v11344_v63 }
 0x29c   :  { %18116 = vst [vmem:[#allocation165_spill] sm:$0xff] %v11346_v38 }
 0x29d   :  { %9551 = vmatmul.msk.f32.gmra.mxu0 %vm145_vm1, %v10974_v0  ;;  %9556 = vmatmul.msk.f32.gmra.mxu1 %vm145_vm1, %v10974_v0 }
 0x29e   :  { %9561 = vmatmul.msk.f32.gmra.mxu2 %vm145_vm1, %v10974_v0  ;;  %9566 = vmatmul.msk.f32.gmra.mxu3 %vm145_vm1, %v10974_v0 }
 0x2a1   :  { %v11359_v38 = vpop.f32.mrf.mxu2  ;;  %v11361_v28 = vpop.f32.mrf.mxu3 }
 0x2a2   :  { %18117 = vst [vmem:[#allocation166_spill] sm:$0xff] %v11359_v38  ;;  %v11363_v63 = vpop.f32.mrf.mxu0  ;;  %v11365_v5 = vpop.f32.mrf.mxu1 }
 0x2a3   :  { %18118 = vst [vmem:[#allocation167_spill] sm:$0xff] %v11361_v28 }
 0x2a4   :  { %18119 = vst [vmem:[#allocation168_spill] sm:$0xff] %v11363_v63 }
 0x2a5   :  { %18120 = vst [vmem:[#allocation169_spill] sm:$0xff] %v11365_v5  ;;  %9552 = vmatmul.msk.f32.gmra.mxu0 %vm145_vm1, %v10994_v22  ;;  %9557 = vmatmul.msk.f32.gmra.mxu1 %vm145_vm1, %v10994_v22 }
 0x2a6   :  { %9562 = vmatmul.msk.f32.gmra.mxu2 %vm145_vm1, %v10994_v22  ;;  %9567 = vmatmul.msk.f32.gmra.mxu3 %vm145_vm1, %v10994_v22 }
 0x2a9   :  { %v11376_v55 = vpop.f32.mrf.mxu2  ;;  %v11378_v4 = vpop.f32.mrf.mxu3 }
 0x2aa   :  { %18121 = vst [vmem:[#allocation170_spill] sm:$0xff] %v11376_v55  ;;  %v11380_v5 = vpop.f32.mrf.mxu0  ;;  %v11382_v63 = vpop.f32.mrf.mxu1 }
 0x2ab   :  { %18122 = vst [vmem:[#allocation171_spill] sm:$0xff] %v11378_v4 }
 0x2ac   :  { %18123 = vst [vmem:[#allocation172_spill] sm:$0xff] %v11380_v5 }
 0x2ad   :  { %18124 = vst [vmem:[#allocation173_spill] sm:$0xff] %v11382_v63  ;;  %9553 = vmatmul.msk.f32.gmra.mxu0 %vm145_vm1, %v11015_v26  ;;  %9558 = vmatmul.msk.f32.gmra.mxu1 %vm145_vm1, %v11015_v26 }
 0x2ae   :  { %9563 = vmatmul.msk.f32.gmra.mxu2 %vm145_vm1, %v11015_v26  ;;  %9568 = vmatmul.msk.f32.gmra.mxu3 %vm145_vm1, %v11015_v26 }
 0x2b1   :  { %v11392_v29 = vpop.f32.mrf.mxu2  ;;  %v11394_v55 = vpop.f32.mrf.mxu3 }
 0x2b2   :  { %18125 = vst [vmem:[#allocation174_spill] sm:$0xff] %v11392_v29  ;;  %v11396_v4 = vpop.f32.mrf.mxu0  ;;  %v11398_v5 = vpop.f32.mrf.mxu1 }
 0x2b3   :  { %18126 = vst [vmem:[#allocation175_spill] sm:$0xff] %v11394_v55 }
 0x2b4   :  { %18127 = vst [vmem:[#allocation176_spill] sm:$0xff] %v11396_v4 }
 0x2b5   :  { %18128 = vst [vmem:[#allocation177_spill] sm:$0xff] %v11398_v5  ;;  %9570 = vmatmul.msk.f32.vlgmr.msra.gmra.mxu0 %vm145_vm1, %v11036_v3  ;;  %9575 = vmatmul.msk.f32.vlgmr.msra.gmra.mxu1 %vm145_vm1, %v11036_v3  ;;  %v2713_v5 = vld [vmem:[%s17459_s0 + $0x28] sm:$0xff] }
 0x2b6   :  { %9580 = vmatmul.msk.f32.vlgmr.msra.gmra.mxu2 %vm145_vm1, %v11036_v3  ;;  %9585 = vmatmul.msk.f32.vlgmr.msra.gmra.mxu3 %vm145_vm1, %v11036_v3  ;;  %2766 = vst [vmem:[#allocation1 + $0x10] ss:$2 sm:$0xff] %v2713_v5 }
 0x2b9   :  { %v11408_v63 = vpop.f32.mrf.mxu2  ;;  %v11410_v29 = vpop.f32.mrf.mxu3 }
 0x2ba   :  { %18129 = vst [vmem:[#allocation178_spill] sm:$0xff] %v11408_v63  ;;  %v11412_v55 = vpop.f32.mrf.mxu0  ;;  %v11414_v4 = vpop.f32.mrf.mxu1 }
 0x2bb   :  { %18130 = vst [vmem:[#allocation179_spill] sm:$0xff] %v11410_v29 }
 0x2bc   :  { %18131 = vst [vmem:[#allocation180_spill] sm:$0xff] %v11412_v55 }
 0x2bd   :  { %18132 = vst [vmem:[#allocation181_spill] sm:$0xff] %v11414_v4  ;;  %9571 = vmatmul.msk.f32.gmra.mxu0 %vm145_vm1, %v10974_v0  ;;  %9576 = vmatmul.msk.f32.gmra.mxu1 %vm145_vm1, %v10974_v0  ;;  %v2712_v4 = vld [vmem:[%s17459_s0 + $0x20] sm:$0xff]  ;;  %v2773_v28 = vld.sshfl [vmem:[#allocation1 + $0x10] sm:$0xff pattern:$0x75316420] }
 0x2be   :  { %9581 = vmatmul.msk.f32.gmra.mxu2 %vm145_vm1, %v10974_v0  ;;  %9586 = vmatmul.msk.f32.gmra.mxu3 %vm145_vm1, %v10974_v0  ;;  %2764 = vst [vmem:[#allocation1] ss:$2 sm:$0xff] %v2712_v4  ;;  %v2774_v38 = vld.sshfl [vmem:[#allocation1 + $0x18] sm:$0xff pattern:$0x75316420] }
 0x2bf   :  { %9619 = vmatpush.msk.msra.mxu2 %vm154_vm0, %v2773_v28  ;;  %9624 = vmatpush.msk.msra.mxu3 %vm154_vm0, %v2774_v38 }
 0x2c1   :  { %v11430_v55 = vpop.f32.mrf.mxu2  ;;  %v11432_v5 = vpop.f32.mrf.mxu3 }
 0x2c2   :  { %18133 = vst [vmem:[#allocation182_spill] sm:$0xff] %v11430_v55  ;;  %v11434_v29 = vpop.f32.mrf.mxu0  ;;  %v11436_v63 = vpop.f32.mrf.mxu1 }
 0x2c3   :  { %18134 = vst [vmem:[#allocation183_spill] sm:$0xff] %v11432_v5 }
 0x2c4   :  { %18135 = vst [vmem:[#allocation184_spill] sm:$0xff] %v11434_v29 }
 0x2c5   :  { %18136 = vst [vmem:[#allocation185_spill] sm:$0xff] %v11436_v63  ;;  %9572 = vmatmul.msk.f32.gmra.mxu0 %vm145_vm1, %v10994_v22  ;;  %9577 = vmatmul.msk.f32.gmra.mxu1 %vm145_vm1, %v10994_v22  ;;  %v2771_v4 = vld.sshfl [vmem:[#allocation1] sm:$0xff pattern:$0x75316420] }
 0x2c6   :  { %9582 = vmatmul.msk.f32.gmra.mxu2 %vm145_vm1, %v10994_v22  ;;  %9587 = vmatmul.msk.f32.gmra.mxu3 %vm145_vm1, %v10994_v22  ;;  %v2772_v63 = vld.sshfl [vmem:[#allocation1 + $0x8] sm:$0xff pattern:$0x75316420] }
 0x2c7   :  { %9609 = vmatpush.msk.msra.mxu0 %vm154_vm0, %v2771_v4  ;;  %9614 = vmatpush.msk.msra.mxu1 %vm154_vm0, %v2772_v63 }
 0x2c9   :  { %v11450_v28 = vpop.f32.mrf.mxu2  ;;  %v11452_v38 = vpop.f32.mrf.mxu3 }
 0x2ca   :  { %18137 = vst [vmem:[#allocation186_spill] sm:$0xff] %v11450_v28  ;;  %v11454_v29 = vpop.f32.mrf.mxu0  ;;  %v11456_v5 = vpop.f32.mrf.mxu1 }
 0x2cb   :  { %18138 = vst [vmem:[#allocation187_spill] sm:$0xff] %v11452_v38 }
 0x2cc   :  { %18139 = vst [vmem:[#allocation188_spill] sm:$0xff] %v11454_v29 }
 0x2cd   :  { %18140 = vst [vmem:[#allocation189_spill] sm:$0xff] %v11456_v5  ;;  %9573 = vmatmul.msk.f32.gmra.mxu0 %vm145_vm1, %v11015_v26  ;;  %9578 = vmatmul.msk.f32.gmra.mxu1 %vm145_vm1, %v11015_v26 }
 0x2ce   :  { %9583 = vmatmul.msk.f32.gmra.mxu2 %vm145_vm1, %v11015_v26  ;;  %9588 = vmatmul.msk.f32.gmra.mxu3 %vm145_vm1, %v11015_v26 }
 0x2d1   :  { %v11466_v63 = vpop.f32.mrf.mxu2  ;;  %v11468_v4 = vpop.f32.mrf.mxu3 }
 0x2d2   :  { %18141 = vst [vmem:[#allocation190_spill] sm:$0xff] %v11466_v63  ;;  %v11470_v38 = vpop.f32.mrf.mxu0  ;;  %v11472_v29 = vpop.f32.mrf.mxu1 }
 0x2d3   :  { %18142 = vst [vmem:[#allocation191_spill] sm:$0xff] %v11468_v4 }
 0x2d4   :  { %18143 = vst [vmem:[#allocation192_spill] sm:$0xff] %v11470_v38 }
 0x2d5   :  { %18144 = vst [vmem:[#allocation193_spill] sm:$0xff] %v11472_v29  ;;  %9590 = vmatmul.msk.f32.vlgmr.msrb.gmra.mxu0 %vm145_vm1, %v11036_v3  ;;  %9595 = vmatmul.msk.f32.vlgmr.msrb.gmra.mxu1 %vm145_vm1, %v11036_v3  ;;  %v2715_v29 = vld [vmem:[%s17459_s0 + $0x38] sm:$0xff] }
 0x2d6   :  { %9600 = vmatmul.msk.f32.vlgmr.msrb.gmra.mxu2 %vm145_vm1, %v11036_v3  ;;  %9605 = vmatmul.msk.f32.vlgmr.msrb.gmra.mxu3 %vm145_vm1, %v11036_v3  ;;  %2770 = vst [vmem:[#allocation1 + $0x30] ss:$2 sm:$0xff] %v2715_v29  ;;  %v2714_v3 = vld [vmem:[%s17459_s0 + $0x30] sm:$0xff] }
 0x2d7   :  { %2768 = vst [vmem:[#allocation1 + $0x20] ss:$2 sm:$0xff] %v2714_v3 }
 0x2d9   :  { %v11482_v5 = vpop.f32.mrf.mxu2  ;;  %v11484_v63 = vpop.f32.mrf.mxu3 }
 0x2da   :  { %18145 = vst [vmem:[#allocation194_spill] sm:$0xff] %v11482_v5  ;;  %v11486_v4 = vpop.f32.mrf.mxu0  ;;  %v11488_v38 = vpop.f32.mrf.mxu1 }
 0x2db   :  { %18146 = vst [vmem:[#allocation195_spill] sm:$0xff] %v11484_v63 }
 0x2dc   :  { %18147 = vst [vmem:[#allocation196_spill] sm:$0xff] %v11486_v4 }
 0x2dd   :  { %18148 = vst [vmem:[#allocation197_spill] sm:$0xff] %v11488_v38  ;;  %9591 = vmatmul.msk.f32.gmra.mxu0 %vm145_vm1, %v10974_v0  ;;  %9596 = vmatmul.msk.f32.gmra.mxu1 %vm145_vm1, %v10974_v0  ;;  %v2777_v5 = vld.sshfl [vmem:[#allocation1 + $0x30] sm:$0xff pattern:$0x75316420] }
 0x2de   :  { %9601 = vmatmul.msk.f32.gmra.mxu2 %vm145_vm1, %v10974_v0  ;;  %9606 = vmatmul.msk.f32.gmra.mxu3 %vm145_vm1, %v10974_v0  ;;  %v2778_v28 = vld.sshfl [vmem:[#allocation1 + $0x38] sm:$0xff pattern:$0x75316420]  ;;  %v2775_v0 = vld.sshfl [vmem:[#allocation1 + $0x20] sm:$0xff pattern:$0x75316420] }
 0x2df   :  { %9639 = vmatpush.msk.msrb.mxu2 %vm154_vm0, %v2777_v5  ;;  %9644 = vmatpush.msk.msrb.mxu3 %vm154_vm0, %v2778_v28  ;;  %v2776_v3 = vld.sshfl [vmem:[#allocation1 + $0x28] sm:$0xff pattern:$0x75316420] }
 0x2e0   :  { %9629 = vmatpush.msk.msrb.mxu0 %vm154_vm0, %v2775_v0  ;;  %9634 = vmatpush.msk.msrb.mxu1 %vm154_vm0, %v2776_v3  ;;  %v11546_v0 = vpop.permute.xlu2 %2736 }
 0x2e1   :  { %v11504_v38 = vpop.f32.mrf.mxu2  ;;  %v11506_v29 = vpop.f32.mrf.mxu3 }
 0x2e2   :  { %18149 = vst [vmem:[#allocation198_spill] sm:$0xff] %v11504_v38  ;;  %v11508_v4 = vpop.f32.mrf.mxu0  ;;  %v11510_v63 = vpop.f32.mrf.mxu1 }
 0x2e3   :  { %18150 = vst [vmem:[#allocation199_spill] sm:$0xff] %v11506_v29  ;;  %v17464_v29 = vmov 0  }
 0x2e4   :  { %18151 = vst [vmem:[#allocation200_spill] sm:$0xff] %v11508_v4  ;;  %9907 = vset.pattern.permute.xlu1 %v17464_v29  ;;  %9906 = vset.pattern.permute.xlu0 %v17464_v29 }
 0x2e5   :  { %18152 = vst [vmem:[#allocation201_spill] sm:$0xff] %v11510_v63  ;;  %9592 = vmatmul.msk.f32.gmra.mxu0 %vm145_vm1, %v10994_v22  ;;  %9597 = vmatmul.msk.f32.gmra.mxu1 %vm145_vm1, %v10994_v22 }
 0x2e6   :  { %9602 = vmatmul.msk.f32.gmra.mxu2 %vm145_vm1, %v10994_v22  ;;  %9607 = vmatmul.msk.f32.gmra.mxu3 %vm145_vm1, %v10994_v22  ;;  %v21_v22 = vld [vmem:[%s17460_s2 + $0x8] sm:$0xff] }
 0x2e7   :  { %4242 = vperm.xlu1 %9907, %v21_v22   ;;  %9905 = vset.pattern.permute.xlu2 %v17464_v29 }
 0x2e9   :  { %v11524_v5 = vpop.f32.mrf.mxu2  ;;  %v11526_v28 = vpop.f32.mrf.mxu3 }
 0x2ea   :  { %18153 = vst [vmem:[#allocation202_spill] sm:$0xff] %v11524_v5  ;;  %v11528_v63 = vpop.f32.mrf.mxu0  ;;  %v11530_v4 = vpop.f32.mrf.mxu1 }
 0x2eb   :  { %18154 = vst [vmem:[#allocation203_spill] sm:$0xff] %v11526_v28  ;;  %v22_v28 = vld [vmem:[%s17460_s2 + $0x10] sm:$0xff] }
 0x2ec   :  { %18155 = vst [vmem:[#allocation204_spill] sm:$0xff] %v11528_v63  ;;  %v23_v63 = vld [vmem:[%s17460_s2 + $0x18] sm:$0xff]  ;;  %4247 = vperm.xlu0 %9906, %v22_v28  }
 0x2ed   :  { %18156 = vst [vmem:[#allocation205_spill] sm:$0xff] %v11530_v4  ;;  %9593 = vmatmul.msk.f32.gmra.mxu0 %vm145_vm1, %v11015_v26  ;;  %9598 = vmatmul.msk.f32.gmra.mxu1 %vm145_vm1, %v11015_v26 }
 0x2ee   :  { %9603 = vmatmul.msk.f32.gmra.mxu2 %vm145_vm1, %v11015_v26  ;;  %9608 = vmatmul.msk.f32.gmra.mxu3 %vm145_vm1, %v11015_v26  ;;  %v11570_v26 = vpop.permute.xlu2 %2738 }
 0x2ef   :  { %4252 = vperm.xlu2 %9905, %v23_v63  }
 0x2f1   :  { %v11548_v3 = vpop.f32.mrf.mxu2  ;;  %v11550_v4 = vpop.f32.mrf.mxu3 }
 0x2f2   :  { %18157 = vst [vmem:[#allocation206_spill] sm:$0xff] %v11548_v3  ;;  %v11552_v22 = vpop.f32.mrf.mxu0  ;;  %v11554_v29 = vpop.f32.mrf.mxu1  ;;  %v2717_v3 = vld [vmem:[%s17459_s0 + $0x48] sm:$0xff] }
 0x2f3   :  { %18158 = vst [vmem:[#allocation207_spill] sm:$0xff] %v11550_v4  ;;  %v20_v4 = vld [vmem:[%s17460_s2] sm:$0xff] }
 0x2f4   :  { %18159 = vst [vmem:[#allocation208_spill] sm:$0xff] %v11552_v22 }
 0x2f5   :  { %18160 = vst [vmem:[#allocation209_spill] sm:$0xff] %v11554_v29  ;;  %9610 = vmatmul.msk.f32.vlgmr.msra.gmra.mxu0 %vm145_vm1, %v11546_v0  ;;  %9615 = vmatmul.msk.f32.vlgmr.msra.gmra.mxu1 %vm145_vm1, %v11546_v0 }
 0x2f6   :  { %9620 = vmatmul.msk.f32.vlgmr.msra.gmra.mxu2 %vm145_vm1, %v11546_v0  ;;  %9625 = vmatmul.msk.f32.vlgmr.msra.gmra.mxu3 %vm145_vm1, %v11546_v0  ;;  %2780 = vst [vmem:[#allocation1 + $0x10] ss:$2 sm:$0xff] %v2717_v3 }
 0x2f7   :  { %4237 = vperm.xlu2 %9905, %v20_v4   ;;  %v2716_v4 = vld [vmem:[%s17459_s0 + $0x40] sm:$0xff] }
 0x2f8   :  { %2779 = vst [vmem:[#allocation1] ss:$2 sm:$0xff] %v2716_v4 }
 0x2f9   :  { %v11572_v29 = vpop.f32.mrf.mxu2  ;;  %v11574_v22 = vpop.f32.mrf.mxu3 }
 0x2fa   :  { %18161 = vst [vmem:[#allocation210_spill] sm:$0xff] %v11572_v29  ;;  %v11576_v63 = vpop.f32.mrf.mxu0  ;;  %v11578_v28 = vpop.f32.mrf.mxu1 }
 0x2fb   :  { %18162 = vst [vmem:[#allocation211_spill] sm:$0xff] %v11574_v22 }
 0x2fc   :  { %18163 = vst [vmem:[#allocation212_spill] sm:$0xff] %v11576_v63 }
 0x2fd   :  { %18164 = vst [vmem:[#allocation213_spill] sm:$0xff] %v11578_v28  ;;  %9611 = vmatmul.msk.f32.gmra.mxu0 %vm145_vm1, %v11570_v26  ;;  %9616 = vmatmul.msk.f32.gmra.mxu1 %vm145_vm1, %v11570_v26  ;;  %v11597_v28 = vpop.permute.xlu0 %2740  ;;  %v2785_v5 = vld.sshfl [vmem:[#allocation1 + $0x10] sm:$0xff pattern:$0x75316420] }
 0x2fe   :  { %9621 = vmatmul.msk.f32.gmra.mxu2 %vm145_vm1, %v11570_v26  ;;  %9626 = vmatmul.msk.f32.gmra.mxu3 %vm145_vm1, %v11570_v26  ;;  %v2786_v38 = vld.sshfl [vmem:[#allocation1 + $0x18] sm:$0xff pattern:$0x75316420] }
 0x2ff   :  { %9659 = vmatpush.msk.msra.mxu2 %vm154_vm0, %v2785_v5  ;;  %9664 = vmatpush.msk.msra.mxu3 %vm154_vm0, %v2786_v38  ;;  %v2783_v4 = vld.sshfl [vmem:[#allocation1] sm:$0xff pattern:$0x75316420]  ;;  %v11619_v5 = vpop.permute.xlu1 %2742 }
 0x300   :  { %9649 = vmatpush.msk.msra.mxu0 %vm154_vm0, %v2783_v4 }
 0x301   :  { %v11599_v3 = vpop.f32.mrf.mxu2  ;;  %v11601_v63 = vpop.f32.mrf.mxu3 }
 0x302   :  { %18165 = vst [vmem:[#allocation214_spill] sm:$0xff] %v11599_v3  ;;  %v11603_v22 = vpop.f32.mrf.mxu0  ;;  %v11605_v29 = vpop.f32.mrf.mxu1 }
 0x303   :  { %18166 = vst [vmem:[#allocation215_spill] sm:$0xff] %v11601_v63 }
 0x304   :  { %18167 = vst [vmem:[#allocation216_spill] sm:$0xff] %v11603_v22 }
 0x305   :  { %18168 = vst [vmem:[#allocation217_spill] sm:$0xff] %v11605_v29  ;;  %9612 = vmatmul.msk.f32.gmra.mxu0 %vm145_vm1, %v11597_v28  ;;  %9617 = vmatmul.msk.f32.gmra.mxu1 %vm145_vm1, %v11597_v28  ;;  %v2784_v29 = vld.sshfl [vmem:[#allocation1 + $0x8] sm:$0xff pattern:$0x75316420] }
 0x306   :  { %9622 = vmatmul.msk.f32.gmra.mxu2 %vm145_vm1, %v11597_v28  ;;  %9627 = vmatmul.msk.f32.gmra.mxu3 %vm145_vm1, %v11597_v28 }
 0x307   :  { %9654 = vmatpush.msk.msra.mxu1 %vm154_vm0, %v2784_v29 }
 0x309   :  { %v11621_v38 = vpop.f32.mrf.mxu2  ;;  %v11623_v22 = vpop.f32.mrf.mxu3 }
 0x30a   :  { %18169 = vst [vmem:[#allocation218_spill] sm:$0xff] %v11621_v38  ;;  %v11625_v63 = vpop.f32.mrf.mxu0  ;;  %v11627_v3 = vpop.f32.mrf.mxu1 }
 0x30b   :  { %18170 = vst [vmem:[#allocation219_spill] sm:$0xff] %v11623_v22 }
 0x30c   :  { %18171 = vst [vmem:[#allocation220_spill] sm:$0xff] %v11625_v63 }
 0x30d   :  { %18172 = vst [vmem:[#allocation221_spill] sm:$0xff] %v11627_v3  ;;  %9613 = vmatmul.msk.f32.gmra.mxu0 %vm145_vm1, %v11619_v5  ;;  %9618 = vmatmul.msk.f32.gmra.mxu1 %vm145_vm1, %v11619_v5 }
 0x30e   :  { %9623 = vmatmul.msk.f32.gmra.mxu2 %vm145_vm1, %v11619_v5  ;;  %9628 = vmatmul.msk.f32.gmra.mxu3 %vm145_vm1, %v11619_v5 }
 0x311   :  { %v11637_v29 = vpop.f32.mrf.mxu2  ;;  %v11639_v4 = vpop.f32.mrf.mxu3 }
 0x312   :  { %18173 = vst [vmem:[#allocation222_spill] sm:$0xff] %v11637_v29  ;;  %v11641_v22 = vpop.f32.mrf.mxu0  ;;  %v11643_v63 = vpop.f32.mrf.mxu1 }
 0x313   :  { %18174 = vst [vmem:[#allocation223_spill] sm:$0xff] %v11639_v4 }
 0x314   :  { %18175 = vst [vmem:[#allocation224_spill] sm:$0xff] %v11641_v22 }
 0x315   :  { %18176 = vst [vmem:[#allocation225_spill] sm:$0xff] %v11643_v63  ;;  %9630 = vmatmul.msk.f32.vlgmr.msrb.gmra.mxu0 %vm145_vm1, %v11546_v0  ;;  %9635 = vmatmul.msk.f32.vlgmr.msrb.gmra.mxu1 %vm145_vm1, %v11546_v0  ;;  %v2719_v63 = vld [vmem:[%s17459_s0 + $0x58] sm:$0xff] }
 0x316   :  { %9640 = vmatmul.msk.f32.vlgmr.msrb.gmra.mxu2 %vm145_vm1, %v11546_v0  ;;  %9645 = vmatmul.msk.f32.vlgmr.msrb.gmra.mxu3 %vm145_vm1, %v11546_v0  ;;  %2782 = vst [vmem:[#allocation1 + $0x30] ss:$2 sm:$0xff] %v2719_v63 }
 0x319   :  { %v11653_v3 = vpop.f32.mrf.mxu2  ;;  %v11655_v29 = vpop.f32.mrf.mxu3 }
 0x31a   :  { %18177 = vst [vmem:[#allocation226_spill] sm:$0xff] %v11653_v3  ;;  %v11657_v4 = vpop.f32.mrf.mxu0  ;;  %v11659_v22 = vpop.f32.mrf.mxu1 }
 0x31b   :  { %18178 = vst [vmem:[#allocation227_spill] sm:$0xff] %v11655_v29 }
 0x31c   :  { %18179 = vst [vmem:[#allocation228_spill] sm:$0xff] %v11657_v4 }
 0x31d   :  { %18180 = vst [vmem:[#allocation229_spill] sm:$0xff] %v11659_v22  ;;  %9631 = vmatmul.msk.f32.gmra.mxu0 %vm145_vm1, %v11570_v26  ;;  %9636 = vmatmul.msk.f32.gmra.mxu1 %vm145_vm1, %v11570_v26  ;;  %v2718_v22 = vld [vmem:[%s17459_s0 + $0x50] sm:$0xff]  ;;  %v2790_v55 = vld.sshfl [vmem:[#allocation1 + $0x38] sm:$0xff pattern:$0x75316420] }
 0x31e   :  { %9641 = vmatmul.msk.f32.gmra.mxu2 %vm145_vm1, %v11570_v26  ;;  %9646 = vmatmul.msk.f32.gmra.mxu3 %vm145_vm1, %v11570_v26  ;;  %2781 = vst [vmem:[#allocation1 + $0x20] ss:$2 sm:$0xff] %v2718_v22  ;;  %v2789_v38 = vld.sshfl [vmem:[#allocation1 + $0x30] sm:$0xff pattern:$0x75316420] }
 0x31f   :  { %9679 = vmatpush.msk.msrb.mxu2 %vm154_vm0, %v2789_v38  ;;  %9684 = vmatpush.msk.msrb.mxu3 %vm154_vm0, %v2790_v55 }
 0x321   :  { %v11675_v4 = vpop.f32.mrf.mxu2  ;;  %v11677_v63 = vpop.f32.mrf.mxu3 }
 0x322   :  { %18181 = vst [vmem:[#allocation230_spill] sm:$0xff] %v11675_v4  ;;  %v11679_v29 = vpop.f32.mrf.mxu0  ;;  %v11681_v3 = vpop.f32.mrf.mxu1 }
 0x323   :  { %18182 = vst [vmem:[#allocation231_spill] sm:$0xff] %v11677_v63 }
 0x324   :  { %18183 = vst [vmem:[#allocation232_spill] sm:$0xff] %v11679_v29 }
 0x325   :  { %18184 = vst [vmem:[#allocation233_spill] sm:$0xff] %v11681_v3  ;;  %9632 = vmatmul.msk.f32.gmra.mxu0 %vm145_vm1, %v11597_v28  ;;  %9637 = vmatmul.msk.f32.gmra.mxu1 %vm145_vm1, %v11597_v28  ;;  %v2787_v22 = vld.sshfl [vmem:[#allocation1 + $0x20] sm:$0xff pattern:$0x75316420] }
 0x326   :  { %9642 = vmatmul.msk.f32.gmra.mxu2 %vm145_vm1, %v11597_v28  ;;  %9647 = vmatmul.msk.f32.gmra.mxu3 %vm145_vm1, %v11597_v28  ;;  %v2788_v3 = vld.sshfl [vmem:[#allocation1 + $0x28] sm:$0xff pattern:$0x75316420] }
 0x327   :  { %9669 = vmatpush.msk.msrb.mxu0 %vm154_vm0, %v2787_v22  ;;  %9674 = vmatpush.msk.msrb.mxu1 %vm154_vm0, %v2788_v3 }
 0x329   :  { %v11695_v38 = vpop.f32.mrf.mxu2  ;;  %v11697_v55 = vpop.f32.mrf.mxu3 }
 0x32a   :  { %18185 = vst [vmem:[#allocation234_spill] sm:$0xff] %v11695_v38  ;;  %v11699_v29 = vpop.f32.mrf.mxu0  ;;  %v11701_v63 = vpop.f32.mrf.mxu1 }
 0x32b   :  { %18186 = vst [vmem:[#allocation235_spill] sm:$0xff] %v11697_v55 }
 0x32c   :  { %18187 = vst [vmem:[#allocation236_spill] sm:$0xff] %v11699_v29 }
 0x32d   :  { %18188 = vst [vmem:[#allocation237_spill] sm:$0xff] %v11701_v63  ;;  %9633 = vmatmul.msk.f32.gmra.mxu0 %vm145_vm1, %v11619_v5  ;;  %9638 = vmatmul.msk.f32.gmra.mxu1 %vm145_vm1, %v11619_v5 }
 0x32e   :  { %9643 = vmatmul.msk.f32.gmra.mxu2 %vm145_vm1, %v11619_v5  ;;  %9648 = vmatmul.msk.f32.gmra.mxu3 %vm145_vm1, %v11619_v5 }
 0x331   :  { %v11711_v3 = vpop.f32.mrf.mxu2  ;;  %v11713_v22 = vpop.f32.mrf.mxu3 }
 0x332   :  { %18189 = vst [vmem:[#allocation238_spill] sm:$0xff] %v11711_v3  ;;  %v11715_v55 = vpop.f32.mrf.mxu0  ;;  %v11717_v29 = vpop.f32.mrf.mxu1 }
 0x333   :  { %18190 = vst [vmem:[#allocation239_spill] sm:$0xff] %v11713_v22 }
 0x334   :  { %18191 = vst [vmem:[#allocation240_spill] sm:$0xff] %v11715_v55 }
 0x335   :  { %18192 = vst [vmem:[#allocation241_spill] sm:$0xff] %v11717_v29  ;;  %9650 = vmatmul.msk.f32.vlgmr.msra.gmra.mxu0 %vm145_vm1, %v11546_v0  ;;  %9655 = vmatmul.msk.f32.vlgmr.msra.gmra.mxu1 %vm145_vm1, %v11546_v0  ;;  %v2721_v29 = vld [vmem:[%s17459_s0 + $0x68] sm:$0xff] }
 0x336   :  { %9660 = vmatmul.msk.f32.vlgmr.msra.gmra.mxu2 %vm145_vm1, %v11546_v0  ;;  %9665 = vmatmul.msk.f32.vlgmr.msra.gmra.mxu3 %vm145_vm1, %v11546_v0  ;;  %2792 = vst [vmem:[#allocation1 + $0x10] ss:$2 sm:$0xff] %v2721_v29 }
 0x339   :  { %v11727_v63 = vpop.f32.mrf.mxu2  ;;  %v11729_v3 = vpop.f32.mrf.mxu3 }
 0x33a   :  { %18193 = vst [vmem:[#allocation242_spill] sm:$0xff] %v11727_v63  ;;  %v11731_v22 = vpop.f32.mrf.mxu0  ;;  %v11733_v55 = vpop.f32.mrf.mxu1 }
 0x33b   :  { %18194 = vst [vmem:[#allocation243_spill] sm:$0xff] %v11729_v3 }
 0x33c   :  { %18195 = vst [vmem:[#allocation244_spill] sm:$0xff] %v11731_v22 }
 0x33d   :  { %18196 = vst [vmem:[#allocation245_spill] sm:$0xff] %v11733_v55  ;;  %9651 = vmatmul.msk.f32.gmra.mxu0 %vm145_vm1, %v11570_v26  ;;  %9656 = vmatmul.msk.f32.gmra.mxu1 %vm145_vm1, %v11570_v26  ;;  %v2720_v55 = vld [vmem:[%s17459_s0 + $0x60] sm:$0xff]  ;;  %v2797_v38 = vld.sshfl [vmem:[#allocation1 + $0x10] sm:$0xff pattern:$0x75316420] }
 0x33e   :  { %9661 = vmatmul.msk.f32.gmra.mxu2 %vm145_vm1, %v11570_v26  ;;  %9666 = vmatmul.msk.f32.gmra.mxu3 %vm145_vm1, %v11570_v26  ;;  %2791 = vst [vmem:[#allocation1] ss:$2 sm:$0xff] %v2720_v55  ;;  %v2798_v4 = vld.sshfl [vmem:[#allocation1 + $0x18] sm:$0xff pattern:$0x75316420] }
 0x33f   :  { %9699 = vmatpush.msk.msra.mxu2 %vm154_vm0, %v2797_v38  ;;  %9704 = vmatpush.msk.msra.mxu3 %vm154_vm0, %v2798_v4 }
 0x341   :  { %v11749_v22 = vpop.f32.mrf.mxu2  ;;  %v11751_v29 = vpop.f32.mrf.mxu3 }
 0x342   :  { %18197 = vst [vmem:[#allocation246_spill] sm:$0xff] %v11749_v22  ;;  %v11753_v3 = vpop.f32.mrf.mxu0  ;;  %v11755_v63 = vpop.f32.mrf.mxu1 }
 0x343   :  { %18198 = vst [vmem:[#allocation247_spill] sm:$0xff] %v11751_v29 }
 0x344   :  { %18199 = vst [vmem:[#allocation248_spill] sm:$0xff] %v11753_v3 }
 0x345   :  { %18200 = vst [vmem:[#allocation249_spill] sm:$0xff] %v11755_v63  ;;  %9652 = vmatmul.msk.f32.gmra.mxu0 %vm145_vm1, %v11597_v28  ;;  %9657 = vmatmul.msk.f32.gmra.mxu1 %vm145_vm1, %v11597_v28  ;;  %v2795_v55 = vld.sshfl [vmem:[#allocation1] sm:$0xff pattern:$0x75316420] }
 0x346   :  { %9662 = vmatmul.msk.f32.gmra.mxu2 %vm145_vm1, %v11597_v28  ;;  %9667 = vmatmul.msk.f32.gmra.mxu3 %vm145_vm1, %v11597_v28  ;;  %v2796_v63 = vld.sshfl [vmem:[#allocation1 + $0x8] sm:$0xff pattern:$0x75316420] }
 0x347   :  { %9689 = vmatpush.msk.msra.mxu0 %vm154_vm0, %v2795_v55  ;;  %9694 = vmatpush.msk.msra.mxu1 %vm154_vm0, %v2796_v63 }
 0x349   :  { %v11769_v38 = vpop.f32.mrf.mxu2  ;;  %v11771_v4 = vpop.f32.mrf.mxu3 }
 0x34a   :  { %18201 = vst [vmem:[#allocation250_spill] sm:$0xff] %v11769_v38  ;;  %v11773_v3 = vpop.f32.mrf.mxu0  ;;  %v11775_v29 = vpop.f32.mrf.mxu1 }
 0x34b   :  { %18202 = vst [vmem:[#allocation251_spill] sm:$0xff] %v11771_v4 }
 0x34c   :  { %18203 = vst [vmem:[#allocation252_spill] sm:$0xff] %v11773_v3 }
 0x34d   :  { %18204 = vst [vmem:[#allocation253_spill] sm:$0xff] %v11775_v29  ;;  %9653 = vmatmul.msk.f32.gmra.mxu0 %vm145_vm1, %v11619_v5  ;;  %9658 = vmatmul.msk.f32.gmra.mxu1 %vm145_vm1, %v11619_v5 }
 0x34e   :  { %9663 = vmatmul.msk.f32.gmra.mxu2 %vm145_vm1, %v11619_v5  ;;  %9668 = vmatmul.msk.f32.gmra.mxu3 %vm145_vm1, %v11619_v5 }
 0x351   :  { %v11785_v63 = vpop.f32.mrf.mxu2  ;;  %v11787_v55 = vpop.f32.mrf.mxu3 }
 0x352   :  { %18205 = vst [vmem:[#allocation254_spill] sm:$0xff] %v11785_v63  ;;  %v11789_v4 = vpop.f32.mrf.mxu0  ;;  %v11791_v3 = vpop.f32.mrf.mxu1 }
 0x353   :  { %18206 = vst [vmem:[#allocation255_spill] sm:$0xff] %v11787_v55 }
 0x354   :  { %18207 = vst [vmem:[#allocation256_spill] sm:$0xff] %v11789_v4 }
 0x355   :  { %18208 = vst [vmem:[#allocation257_spill] sm:$0xff] %v11791_v3  ;;  %9670 = vmatmul.msk.f32.vlgmr.msrb.gmra.mxu0 %vm145_vm1, %v11546_v0  ;;  %9675 = vmatmul.msk.f32.vlgmr.msrb.gmra.mxu1 %vm145_vm1, %v11546_v0 }
 0x356   :  { %9680 = vmatmul.msk.f32.vlgmr.msrb.gmra.mxu2 %vm145_vm1, %v11546_v0  ;;  %9685 = vmatmul.msk.f32.vlgmr.msrb.gmra.mxu3 %vm145_vm1, %v11546_v0 }
 0x359   :  { %v11801_v29 = vpop.f32.mrf.mxu2  ;;  %v11803_v63 = vpop.f32.mrf.mxu3 }
 0x35a   :  { %18209 = vst [vmem:[#allocation258_spill] sm:$0xff] %v11801_v29  ;;  %v11805_v55 = vpop.f32.mrf.mxu0  ;;  %v11807_v4 = vpop.f32.mrf.mxu1  ;;  %v2722_v29 = vld [vmem:[%s17459_s0 + $0x70] sm:$0xff] }
 0x35b   :  { %18210 = vst [vmem:[#allocation259_spill] sm:$0xff] %v11803_v63  ;;  %v2723_v63 = vld [vmem:[%s17459_s0 + $0x78] sm:$0xff] }
 0x35c   :  { %18211 = vst [vmem:[#allocation260_spill] sm:$0xff] %v11805_v55 }
 0x35d   :  { %18212 = vst [vmem:[#allocation261_spill] sm:$0xff] %v11807_v4  ;;  %9671 = vmatmul.msk.f32.gmra.mxu0 %vm145_vm1, %v11570_v26  ;;  %9676 = vmatmul.msk.f32.gmra.mxu1 %vm145_vm1, %v11570_v26 }
 0x35e   :  { %9681 = vmatmul.msk.f32.gmra.mxu2 %vm145_vm1, %v11570_v26  ;;  %9686 = vmatmul.msk.f32.gmra.mxu3 %vm145_vm1, %v11570_v26  ;;  %2794 = vst [vmem:[#allocation1 + $0x30] ss:$2 sm:$0xff] %v2723_v63 }
 0x35f   :  { %2793 = vst [vmem:[#allocation1 + $0x20] ss:$2 sm:$0xff] %v2722_v29 }
 0x361   :  { %v11823_v3 = vpop.f32.mrf.mxu2  ;;  %v11825_v4 = vpop.f32.mrf.mxu3 }
 0x362   :  { %18213 = vst [vmem:[#allocation262_spill] sm:$0xff] %v11823_v3  ;;  %v11827_v55 = vpop.f32.mrf.mxu0  ;;  %v11829_v38 = vpop.f32.mrf.mxu1 }
 0x363   :  { %18214 = vst [vmem:[#allocation263_spill] sm:$0xff] %v11825_v4 }
 0x364   :  { %18215 = vst [vmem:[#allocation264_spill] sm:$0xff] %v11827_v55 }
 0x365   :  { %18216 = vst [vmem:[#allocation265_spill] sm:$0xff] %v11829_v38  ;;  %9672 = vmatmul.msk.f32.gmra.mxu0 %vm145_vm1, %v11597_v28  ;;  %9677 = vmatmul.msk.f32.gmra.mxu1 %vm145_vm1, %v11597_v28  ;;  %v2801_v3 = vld.sshfl [vmem:[#allocation1 + $0x30] sm:$0xff pattern:$0x75316420] }
 0x366   :  { %9682 = vmatmul.msk.f32.gmra.mxu2 %vm145_vm1, %v11597_v28  ;;  %9687 = vmatmul.msk.f32.gmra.mxu3 %vm145_vm1, %v11597_v28  ;;  %v2802_v4 = vld.sshfl [vmem:[#allocation1 + $0x38] sm:$0xff pattern:$0x75316420]  ;;  %v2799_v29 = vld.sshfl [vmem:[#allocation1 + $0x20] sm:$0xff pattern:$0x75316420] }
 0x367   :  { %9719 = vmatpush.msk.msrb.mxu2 %vm154_vm0, %v2801_v3  ;;  %9724 = vmatpush.msk.msrb.mxu3 %vm154_vm0, %v2802_v4  ;;  %v2800_v38 = vld.sshfl [vmem:[#allocation1 + $0x28] sm:$0xff pattern:$0x75316420] }
 0x368   :  { %9709 = vmatpush.msk.msrb.mxu0 %vm154_vm0, %v2799_v29  ;;  %9714 = vmatpush.msk.msrb.mxu1 %vm154_vm0, %v2800_v38  ;;  %v1624_v38 = vadd.f32 %v11116_v32, %v10354_v46  ;;  %v1627_v46 = vadd.f32 %v11136_v2, %v10382_v52 }
 0x369   :  { %v11839_v63 = vpop.f32.mrf.mxu2  ;;  %v11841_v55 = vpop.f32.mrf.mxu3 }
 0x36a   :  { %18217 = vst [vmem:[#allocation266_spill] sm:$0xff] %v11839_v63  ;;  %v11845_v22 = vpop.f32.mrf.mxu0  ;;  %v11847_v9 = vpop.f32.mrf.mxu1 }
 0x36b   :  { %18218 = vst [vmem:[#allocation267_spill] sm:$0xff] %v11841_v55 }
 0x36c   :  { %18219 = vst [vmem:[#allocation268_spill] sm:$0xff] %v11845_v22 }
 0x36d   :  { %18220 = vst [vmem:[#allocation269_spill] sm:$0xff] %v11847_v9  ;;  %9673 = vmatmul.msk.f32.gmra.mxu0 %vm145_vm1, %v11619_v5  ;;  %9678 = vmatmul.msk.f32.gmra.mxu1 %vm145_vm1, %v11619_v5 }
 0x36e   :  { %9683 = vmatmul.msk.f32.gmra.mxu2 %vm145_vm1, %v11619_v5  ;;  %9688 = vmatmul.msk.f32.gmra.mxu3 %vm145_vm1, %v11619_v5 }
 0x371   :  { %v11859_v3 = vpop.f32.mrf.mxu2  ;;  %v11861_v4 = vpop.f32.mrf.mxu3 }
 0x372   :  { %18221 = vst [vmem:[#allocation270_spill] sm:$0xff] %v11859_v3  ;;  %v11863_v9 = vpop.f32.mrf.mxu0  ;;  %v11865_v29 = vpop.f32.mrf.mxu1 }
 0x373   :  { %18222 = vst [vmem:[#allocation271_spill] sm:$0xff] %v11861_v4  ;;  %v1653_v4 = vadd.f32 %v11118_v51, %v10356_v47  ;;  %v1656_v47 = vadd.f32 %v11138_v8, %v10384_v53  ;;  %v1630_v53 = vadd.f32 %v11154_v19, %v10402_v60  ;;  %v1659_v8 = vadd.f32 %v11156_v34, %v10404_v61 }
 0x374   :  { %18223 = vst [vmem:[#allocation272_spill] sm:$0xff] %v11863_v9  ;;  %v1633_v61 = vadd.f32 %v11170_v21, %v10418_v6  ;;  %v1662_v19 = vadd.f32 %v11172_v16, %v10420_v7  ;;  %v1740_v6 = vadd.f32 %v11186_v45, %v10434_v12  ;;  %v1769_v7 = vadd.f32 %v11188_v54, %v10436_v13 }
 0x375   :  { %18224 = vst [vmem:[#allocation273_spill] sm:$0xff] %v11865_v29  ;;  %9690 = vmatmul.msk.f32.vlgmr.msra.gmra.mxu0 %vm145_vm1, %v11546_v0  ;;  %9695 = vmatmul.msk.f32.vlgmr.msra.gmra.mxu1 %vm145_vm1, %v11546_v0  ;;  %v1743_v54 = vadd.f32 %v11206_v10, %v10462_v23  ;;  %v1772_v12 = vadd.f32 %v11208_v48, %v10464_v24 }
 0x376   :  { %9700 = vmatmul.msk.f32.vlgmr.msra.gmra.mxu2 %vm145_vm1, %v11546_v0  ;;  %9705 = vmatmul.msk.f32.vlgmr.msra.gmra.mxu3 %vm145_vm1, %v11546_v0  ;;  %v1746_v24 = vadd.f32 %v11224_v49, %v10482_v36  ;;  %v1775_v48 = vadd.f32 %v11226_v33, %v10484_v37  ;;  %v1749_v37 = vadd.f32 %v11240_v35, %v10498_v42 }
 0x377   :  { %v1778_v49 = vadd.f32 %v11242_v17, %v10500_v43  ;;  %v1856_v42 = vadd.f32 %v11260_v62, %v10514_v58  ;;  %v1885_v43 = vadd.f32 %v11262_v15, %v10516_v59  ;;  %v1859_v58 = vadd.f32 %v11287_v20, %v10542_v31 }
 0x378   :  { %v1888_v59 = vadd.f32 %v11289_v18, %v10544_v30  ;;  %v1862_v30 = vadd.f32 %v11308_v1, %v10562_v41  ;;  %v1891_v20 = vadd.f32 %v11310_v25, %v10564_v40  ;;  %v1865_v40 = vadd.f32 %v11324_v39, %v10578_v56 }
 0x379   :  { %v2990_v3 = vpop.f32.mrf.mxu2  ;;  %v3019_v22 = vpop.f32.mrf.mxu3  ;;  %v1894_v1 = vadd.f32 %v11326_v11, %v10580_v57  ;;  %v1972_v56 = vadd.f32 %v11340_v50, %v10594_v27  ;;  %v2001_v57 = vadd.f32 %v11342_v44, %v10596_v14  ;;  %v18251_v44 = vld [vmem:[#allocation32_spill] sm:$0xff]  ;;  %v18252_v14 = vld [vmem:[#allocation166_spill] sm:$0xff]  ;;  %v18253_v50 = vld [vmem:[#allocation33_spill] sm:$0xff] }
 0x37a   :  { %v11879_v55 = vadd.f32 %v2990_v3, %v1624_v38  ;;  %v11881_v63 = vadd.f32 %v3019_v22, %v1653_v4  ;;  %v11883_v29 = vpop.f32.mrf.mxu0  ;;  %v11885_v9 = vpop.f32.mrf.mxu1  ;;  %v2725_v22 = vld [vmem:[%s17459_s0 + $0x88] sm:$0xff]  ;;  %v2724_v3 = vld [vmem:[%s17459_s0 + $0x80] sm:$0xff]  ;;  %v1975_v27 = vadd.f32 %v18252_v14, %v18251_v44 }
 0x37b   :  { %2804 = vst [vmem:[#allocation1 + $0x10] ss:$2 sm:$0xff] %v2725_v22  ;;  %v18259_v14 = vld [vmem:[#allocation36_spill] sm:$0xff] }
 0x37c   :  { %18225 = vst [vmem:[#allocation274_spill] sm:$0xff] %v11879_v55 }
 0x37d   :  { %18226 = vst [vmem:[#allocation275_spill] sm:$0xff] %v11881_v63  ;;  %9691 = vmatmul.msk.f32.gmra.mxu0 %vm145_vm1, %v11570_v26  ;;  %9696 = vmatmul.msk.f32.gmra.mxu1 %vm145_vm1, %v11570_v26 }
 0x37e   :  { %9701 = vmatmul.msk.f32.gmra.mxu2 %vm145_vm1, %v11570_v26  ;;  %9706 = vmatmul.msk.f32.gmra.mxu3 %vm145_vm1, %v11570_v26  ;;  %2803 = vst [vmem:[#allocation1] ss:$2 sm:$0xff] %v2724_v3 }
 0x381   :  { %v2993_v32 = vpop.f32.mrf.mxu2  ;;  %v3022_v51 = vpop.f32.mrf.mxu3 }
 0x382   :  { %v11905_v4 = vadd.f32 %v2993_v32, %v1627_v46  ;;  %v11907_v38 = vadd.f32 %v3022_v51, %v1656_v47  ;;  %v11909_v63 = vpop.f32.mrf.mxu0  ;;  %v11911_v52 = vpop.f32.mrf.mxu1  ;;  %v2809_v47 = vld.sshfl [vmem:[#allocation1 + $0x10] sm:$0xff pattern:$0x75316420]  ;;  %v2810_v32 = vld.sshfl [vmem:[#allocation1 + $0x18] sm:$0xff pattern:$0x75316420] }
 0x383   :  { %9739 = vmatpush.msk.msra.mxu2 %vm154_vm0, %v2809_v47  ;;  %9744 = vmatpush.msk.msra.mxu3 %vm154_vm0, %v2810_v32 }
 0x384   :  { %18227 = vst [vmem:[#allocation276_spill] sm:$0xff] %v11907_v38 }
 0x385   :  { %9692 = vmatmul.msk.f32.gmra.mxu0 %vm145_vm1, %v11597_v28  ;;  %9697 = vmatmul.msk.f32.gmra.mxu1 %vm145_vm1, %v11597_v28  ;;  %v2807_v55 = vld.sshfl [vmem:[#allocation1] sm:$0xff pattern:$0x75316420]  ;;  %v2808_v60 = vld.sshfl [vmem:[#allocation1 + $0x8] sm:$0xff pattern:$0x75316420] }
 0x386   :  { %9702 = vmatmul.msk.f32.gmra.mxu2 %vm145_vm1, %v11597_v28  ;;  %9707 = vmatmul.msk.f32.gmra.mxu3 %vm145_vm1, %v11597_v28 }
 0x387   :  { %9729 = vmatpush.msk.msra.mxu0 %vm154_vm0, %v2807_v55  ;;  %9734 = vmatpush.msk.msra.mxu1 %vm154_vm0, %v2808_v60 }
 0x389   :  { %v2996_v2 = vpop.f32.mrf.mxu2  ;;  %v3025_v46 = vpop.f32.mrf.mxu3 }
 0x38a   :  { %v11925_v51 = vadd.f32 %v2996_v2, %v1630_v53  ;;  %v11927_v22 = vadd.f32 %v3025_v46, %v1659_v8  ;;  %v11929_v3 = vpop.f32.mrf.mxu0  ;;  %v11931_v38 = vpop.f32.mrf.mxu1 }
 0x38d   :  { %9693 = vmatmul.msk.f32.gmra.mxu0 %vm145_vm1, %v11619_v5  ;;  %9698 = vmatmul.msk.f32.gmra.mxu1 %vm145_vm1, %v11619_v5 }
 0x38e   :  { %9703 = vmatmul.msk.f32.gmra.mxu2 %vm145_vm1, %v11619_v5  ;;  %9708 = vmatmul.msk.f32.gmra.mxu3 %vm145_vm1, %v11619_v5 }
 0x391   :  { %v2999_v34 = vpop.f32.mrf.mxu2  ;;  %v3028_v55 = vpop.f32.mrf.mxu3 }
 0x392   :  { %v11949_v53 = vadd.f32 %v2999_v34, %v1633_v61  ;;  %v11951_v8 = vadd.f32 %v3028_v55, %v1662_v19  ;;  %v11953_v2 = vpop.f32.mrf.mxu0  ;;  %v11955_v46 = vpop.f32.mrf.mxu1  ;;  %v2727_v19 = vld [vmem:[%s17459_s0 + $0x98] sm:$0xff]  ;;  %v2726_v34 = vld [vmem:[%s17459_s0 + $0x90] sm:$0xff] }
 0x393   :  { %2806 = vst [vmem:[#allocation1 + $0x30] ss:$2 sm:$0xff] %v2727_v19 }
 0x394   :  { %2805 = vst [vmem:[#allocation1 + $0x20] ss:$2 sm:$0xff] %v2726_v34 }
 0x395   :  { %9710 = vmatmul.msk.f32.vlgmr.msrb.gmra.mxu0 %vm145_vm1, %v11546_v0  ;;  %9715 = vmatmul.msk.f32.vlgmr.msrb.gmra.mxu1 %vm145_vm1, %v11546_v0 }
 0x396   :  { %9720 = vmatmul.msk.f32.vlgmr.msrb.gmra.mxu2 %vm145_vm1, %v11546_v0  ;;  %9725 = vmatmul.msk.f32.vlgmr.msrb.gmra.mxu3 %vm145_vm1, %v11546_v0 }
 0x399   :  { %v3106_v16 = vpop.f32.mrf.mxu2  ;;  %v3135_v21 = vpop.f32.mrf.mxu3 }
 0x39a   :  { %v11969_v47 = vadd.f32 %v3106_v16, %v1740_v6  ;;  %v11971_v32 = vadd.f32 %v3135_v21, %v1769_v7  ;;  %v11973_v60 = vpop.f32.mrf.mxu0  ;;  %v11975_v61 = vpop.f32.mrf.mxu1  ;;  %v2813_v21 = vld.sshfl [vmem:[#allocation1 + $0x30] sm:$0xff pattern:$0x75316420] }
 0x39b   :  { %9759 = vmatpush.msk.msrb.mxu2 %vm154_vm0, %v2813_v21  ;;  %v2811_v34 = vld.sshfl [vmem:[#allocation1 + $0x20] sm:$0xff pattern:$0x75316420]  ;;  %v2812_v36 = vld.sshfl [vmem:[#allocation1 + $0x28] sm:$0xff pattern:$0x75316420] }
 0x39c   :  { %18228 = vst [vmem:[#allocation277_spill] sm:$0xff] %v11971_v32  ;;  %9749 = vmatpush.msk.msrb.mxu0 %vm154_vm0, %v2811_v34  ;;  %9754 = vmatpush.msk.msrb.mxu1 %vm154_vm0, %v2812_v36  ;;  %v18383_v32 = vld [vmem:[#allocation177_spill] sm:$0xff] }
 0x39d   :  { %9711 = vmatmul.msk.f32.gmra.mxu0 %vm145_vm1, %v11570_v26  ;;  %9716 = vmatmul.msk.f32.gmra.mxu1 %vm145_vm1, %v11570_v26 }
 0x39e   :  { %9721 = vmatmul.msk.f32.gmra.mxu2 %vm145_vm1, %v11570_v26  ;;  %9726 = vmatmul.msk.f32.gmra.mxu3 %vm145_vm1, %v11570_v26 }
 0x3a1   :  { %v3109_v13 = vpop.f32.mrf.mxu2  ;;  %v3138_v45 = vpop.f32.mrf.mxu3 }
 0x3a2   :  { %v11995_v55 = vadd.f32 %v3109_v13, %v1743_v54  ;;  %v11997_v6 = vadd.f32 %v3138_v45, %v1772_v12  ;;  %v11999_v7 = vpop.f32.mrf.mxu0  ;;  %v12001_v23 = vpop.f32.mrf.mxu1  ;;  %v2814_v54 = vld.sshfl [vmem:[#allocation1 + $0x38] sm:$0xff pattern:$0x75316420] }
 0x3a3   :  { %9764 = vmatpush.msk.msrb.mxu3 %vm154_vm0, %v2814_v54 }
 0x3a5   :  { %9712 = vmatmul.msk.f32.gmra.mxu0 %vm145_vm1, %v11597_v28  ;;  %9717 = vmatmul.msk.f32.gmra.mxu1 %vm145_vm1, %v11597_v28 }
 0x3a6   :  { %9722 = vmatmul.msk.f32.gmra.mxu2 %vm145_vm1, %v11597_v28  ;;  %9727 = vmatmul.msk.f32.gmra.mxu3 %vm145_vm1, %v11597_v28 }
 0x3a9   :  { %v3112_v10 = vpop.f32.mrf.mxu2  ;;  %v3141_v16 = vpop.f32.mrf.mxu3 }
 0x3aa   :  { %v12015_v12 = vadd.f32 %v3112_v10, %v1746_v24  ;;  %v12017_v13 = vadd.f32 %v3141_v16, %v1775_v48  ;;  %v12019_v45 = vpop.f32.mrf.mxu0  ;;  %v12021_v19 = vpop.f32.mrf.mxu1 }
 0x3ab   :  { %18230 = vst [vmem:[#allocation279_spill] sm:$0xff] %v12021_v19  ;;  %v18355_v19 = vld [vmem:[#allocation162_spill] sm:$0xff] }
 0x3ac   :  { %18229 = vst [vmem:[#allocation278_spill] sm:$0xff] %v12017_v13  ;;  %v18354_v13 = vld [vmem:[#allocation28_spill] sm:$0xff] }
 0x3ad   :  { %9713 = vmatmul.msk.f32.gmra.mxu0 %vm145_vm1, %v11619_v5  ;;  %9718 = vmatmul.msk.f32.gmra.mxu1 %vm145_vm1, %v11619_v5 }
 0x3ae   :  { %9723 = vmatmul.msk.f32.gmra.mxu2 %vm145_vm1, %v11619_v5  ;;  %9728 = vmatmul.msk.f32.gmra.mxu3 %vm145_vm1, %v11619_v5 }
 0x3b1   :  { %v3115_v33 = vpop.f32.mrf.mxu2  ;;  %v3144_v24 = vpop.f32.mrf.mxu3 }
 0x3b2   :  { %v12039_v48 = vadd.f32 %v3115_v33, %v1749_v37  ;;  %v12041_v10 = vadd.f32 %v3144_v24, %v1778_v49  ;;  %v12043_v16 = vpop.f32.mrf.mxu0  ;;  %v12045_v21 = vpop.f32.mrf.mxu1  ;;  %v2729_v49 = vld [vmem:[%s17459_s0 + $0xa8] sm:$0xff]  ;;  %v2728_v33 = vld [vmem:[%s17459_s0 + $0xa0] sm:$0xff] }
 0x3b3   :  { %18233 = vst [vmem:[#allocation282_spill] sm:$0xff] %v12045_v21 }
 0x3b4   :  { %18231 = vst [vmem:[#allocation280_spill] sm:$0xff] %v12039_v48  ;;  %v18338_v48 = vld [vmem:[#allocation156_spill] sm:$0xff] }
 0x3b5   :  { %18232 = vst [vmem:[#allocation281_spill] sm:$0xff] %v12041_v10  ;;  %9730 = vmatmul.msk.f32.vlgmr.msra.gmra.mxu0 %vm145_vm1, %v11546_v0  ;;  %9735 = vmatmul.msk.f32.vlgmr.msra.gmra.mxu1 %vm145_vm1, %v11546_v0 }
 0x3b6   :  { %9740 = vmatmul.msk.f32.vlgmr.msra.gmra.mxu2 %vm145_vm1, %v11546_v0  ;;  %9745 = vmatmul.msk.f32.vlgmr.msra.gmra.mxu3 %vm145_vm1, %v11546_v0  ;;  %2816 = vst [vmem:[#allocation1 + $0x10] ss:$2 sm:$0xff] %v2729_v49 }
 0x3b7   :  { %2815 = vst [vmem:[#allocation1] ss:$2 sm:$0xff] %v2728_v33 }
 0x3b9   :  { %v3222_v17 = vpop.f32.mrf.mxu2  ;;  %v3251_v35 = vpop.f32.mrf.mxu3 }
 0x3ba   :  { %v12059_v54 = vadd.f32 %v3222_v17, %v1856_v42  ;;  %v12061_v34 = vadd.f32 %v3251_v35, %v1885_v43  ;;  %v12063_v36 = vpop.f32.mrf.mxu0  ;;  %v12065_v37 = vpop.f32.mrf.mxu1 }
 0x3bc   :  { %18234 = vst [vmem:[#allocation283_spill] sm:$0xff] %v12059_v54  ;;  %v18335_v54 = vld [vmem:[#allocation155_spill] sm:$0xff] }
 0x3bd   :  { %18235 = vst [vmem:[#allocation284_spill] sm:$0xff] %v12061_v34  ;;  %9731 = vmatmul.msk.f32.gmra.mxu0 %vm145_vm1, %v11570_v26  ;;  %9736 = vmatmul.msk.f32.gmra.mxu1 %vm145_vm1, %v11570_v26  ;;  %v2821_v35 = vld.sshfl [vmem:[#allocation1 + $0x10] sm:$0xff pattern:$0x75316420] }
 0x3be   :  { %9741 = vmatmul.msk.f32.gmra.mxu2 %vm145_vm1, %v11570_v26  ;;  %9746 = vmatmul.msk.f32.gmra.mxu3 %vm145_vm1, %v11570_v26  ;;  %v2819_v33 = vld.sshfl [vmem:[#allocation1] sm:$0xff pattern:$0x75316420]  ;;  %v2820_v41 = vld.sshfl [vmem:[#allocation1 + $0x8] sm:$0xff pattern:$0x75316420] }
 0x3bf   :  { %9779 = vmatpush.msk.msra.mxu2 %vm154_vm0, %v2821_v35  ;;  %9769 = vmatpush.msk.msra.mxu0 %vm154_vm0, %v2819_v33 }
 0x3c0   :  { %9774 = vmatpush.msk.msra.mxu1 %vm154_vm0, %v2820_v41 }
 0x3c1   :  { %v3225_v15 = vpop.f32.mrf.mxu2  ;;  %v3254_v62 = vpop.f32.mrf.mxu3 }
 0x3c2   :  { %v12085_v24 = vadd.f32 %v3225_v15, %v1859_v58  ;;  %v12087_v42 = vadd.f32 %v3254_v62, %v1888_v59  ;;  %v12089_v43 = vpop.f32.mrf.mxu0  ;;  %v12091_v31 = vpop.f32.mrf.mxu1  ;;  %v2822_v58 = vld.sshfl [vmem:[#allocation1 + $0x18] sm:$0xff pattern:$0x75316420] }
 0x3c3   :  { %18238 = vst [vmem:[#allocation287_spill] sm:$0xff] %v12091_v31  ;;  %9784 = vmatpush.msk.msra.mxu3 %vm154_vm0, %v2822_v58 }
 0x3c4   :  { %18236 = vst [vmem:[#allocation285_spill] sm:$0xff] %v12085_v24 }
 0x3c5   :  { %18237 = vst [vmem:[#allocation286_spill] sm:$0xff] %v12087_v42  ;;  %9732 = vmatmul.msk.f32.gmra.mxu0 %vm145_vm1, %v11597_v28  ;;  %9737 = vmatmul.msk.f32.gmra.mxu1 %vm145_vm1, %v11597_v28  ;;  %v18333_v42 = vld [vmem:[#allocation154_spill] sm:$0xff] }
 0x3c6   :  { %9742 = vmatmul.msk.f32.gmra.mxu2 %vm145_vm1, %v11597_v28  ;;  %9747 = vmatmul.msk.f32.gmra.mxu3 %vm145_vm1, %v11597_v28 }
 0x3c9   :  { %v3228_v18 = vpop.f32.mrf.mxu2  ;;  %v3257_v17 = vpop.f32.mrf.mxu3 }
 0x3ca   :  { %v12105_v59 = vadd.f32 %v3228_v18, %v1862_v30  ;;  %v12107_v15 = vadd.f32 %v3257_v17, %v1891_v20  ;;  %v12109_v62 = vpop.f32.mrf.mxu0  ;;  %v12111_v49 = vpop.f32.mrf.mxu1 }
 0x3cb   :  { %18241 = vst [vmem:[#allocation290_spill] sm:$0xff] %v12109_v62 }
 0x3cc   :  { %18239 = vst [vmem:[#allocation288_spill] sm:$0xff] %v12105_v59  ;;  %v18332_v59 = vld [vmem:[#allocation20_spill] sm:$0xff] }
 0x3cd   :  { %18240 = vst [vmem:[#allocation289_spill] sm:$0xff] %v12107_v15  ;;  %9733 = vmatmul.msk.f32.gmra.mxu0 %vm145_vm1, %v11619_v5  ;;  %9738 = vmatmul.msk.f32.gmra.mxu1 %vm145_vm1, %v11619_v5  ;;  %v12393_v62 = vadd.f32 %v18333_v42, %v18332_v59  ;;  %v18343_v42 = vld [vmem:[#allocation25_spill] sm:$0xff]  ;;  %v18344_v59 = vld [vmem:[#allocation159_spill] sm:$0xff] }
 0x3ce   :  { %18242 = vst [vmem:[#allocation291_spill] sm:$0xff] %v12111_v49  ;;  %9743 = vmatmul.msk.f32.gmra.mxu2 %vm145_vm1, %v11619_v5  ;;  %9748 = vmatmul.msk.f32.gmra.mxu3 %vm145_vm1, %v11619_v5  ;;  %v12415_v21 = vadd.f32 %v18344_v59, %v18343_v42  ;;  %v18360_v59 = vld [vmem:[#allocation30_spill] sm:$0xff] }
 0x3d1   :  { %v3231_v25 = vpop.f32.mrf.mxu2  ;;  %v3260_v30 = vpop.f32.mrf.mxu3 }
 0x3d2   :  { %v12129_v20 = vadd.f32 %v3231_v25, %v1865_v40  ;;  %v12131_v18 = vadd.f32 %v3260_v30, %v1894_v1  ;;  %v12133_v17 = vpop.f32.mrf.mxu0  ;;  %v12135_v35 = vpop.f32.mrf.mxu1  ;;  %v18254_v1 = vld [vmem:[#allocation167_spill] sm:$0xff] }
 0x3d3   :  { %18245 = vst [vmem:[#allocation294_spill] sm:$0xff] %v12133_v17  ;;  %v2004_v25 = vadd.f32 %v18254_v1, %v18253_v50  ;;  %v18261_v1 = vld [vmem:[#allocation37_spill] sm:$0xff] }
 0x3d4   :  { %18243 = vst [vmem:[#allocation292_spill] sm:$0xff] %v12129_v20 }
 0x3d5   :  { %18244 = vst [vmem:[#allocation293_spill] sm:$0xff] %v12131_v18  ;;  %9750 = vmatmul.msk.f32.vlgmr.msrb.gmra.mxu0 %vm145_vm1, %v11546_v0  ;;  %9755 = vmatmul.msk.f32.vlgmr.msrb.gmra.mxu1 %vm145_vm1, %v11546_v0 }
 0x3d6   :  { %18246 = vst [vmem:[#allocation295_spill] sm:$0xff] %v12135_v35  ;;  %9760 = vmatmul.msk.f32.vlgmr.msrb.gmra.mxu2 %vm145_vm1, %v11546_v0  ;;  %9765 = vmatmul.msk.f32.vlgmr.msrb.gmra.mxu3 %vm145_vm1, %v11546_v0 }
 0x3d9   :  { %v3338_v11 = vpop.f32.mrf.mxu2  ;;  %v3367_v39 = vpop.f32.mrf.mxu3 }
 0x3da   :  { %v12149_v58 = vadd.f32 %v3338_v11, %v1972_v56  ;;  %v12151_v33 = vadd.f32 %v3367_v39, %v2001_v57  ;;  %v12153_v41 = vpop.f32.mrf.mxu0  ;;  %v12155_v40 = vpop.f32.mrf.mxu1  ;;  %v2731_v57 = vld [vmem:[%s17459_s0 + $0xb8] sm:$0xff]  ;;  %v2730_v11 = vld [vmem:[%s17459_s0 + $0xb0] sm:$0xff] }
 0x3db   :  { %18249 = vst [vmem:[#allocation298_spill] sm:$0xff] %v12153_v41  ;;  %v18340_v41 = vld [vmem:[#allocation157_spill] sm:$0xff] }
 0x3dc   :  { %18247 = vst [vmem:[#allocation296_spill] sm:$0xff] %v12149_v58 }
 0x3dd   :  { %18248 = vst [vmem:[#allocation297_spill] sm:$0xff] %v12151_v33  ;;  %9751 = vmatmul.msk.f32.gmra.mxu0 %vm145_vm1, %v11570_v26  ;;  %9756 = vmatmul.msk.f32.gmra.mxu1 %vm145_vm1, %v11570_v26 }
 0x3de   :  { %18250 = vst [vmem:[#allocation299_spill] sm:$0xff] %v12155_v40  ;;  %9761 = vmatmul.msk.f32.gmra.mxu2 %vm145_vm1, %v11570_v26  ;;  %9766 = vmatmul.msk.f32.gmra.mxu3 %vm145_vm1, %v11570_v26 }
 0x3df   :  { %2818 = vst [vmem:[#allocation1 + $0x30] ss:$2 sm:$0xff] %v2731_v57 }
 0x3e0   :  { %2817 = vst [vmem:[#allocation1 + $0x20] ss:$2 sm:$0xff] %v2730_v11 }
 0x3e1   :  { %v3341_v30 = vpop.f32.mrf.mxu2  ;;  %v3370_v56 = vpop.f32.mrf.mxu3 }
 0x3e2   :  { %v12175_v39 = vadd.f32 %v3341_v30, %v1975_v27  ;;  %v12177_v33 = vadd.f32 %v3370_v56, %v2004_v25  ;;  %v12179_v18 = vpop.f32.mrf.mxu0  ;;  %v12181_v44 = vpop.f32.mrf.mxu1  ;;  %v18260_v27 = vld [vmem:[#allocation170_spill] sm:$0xff]  ;;  %v18262_v25 = vld [vmem:[#allocation171_spill] sm:$0xff] }
 0x3e3   :  { %18257 = vst [vmem:[#allocation33_spill] sm:$0xff] %v12179_v18  ;;  %v1978_v50 = vadd.f32 %v18260_v27, %v18259_v14  ;;  %v2007_v30 = vadd.f32 %v18262_v25, %v18261_v1  ;;  %v18267_v27 = vld [vmem:[#allocation40_spill] sm:$0xff]  ;;  %v18269_v1 = vld [vmem:[#allocation41_spill] sm:$0xff]  ;;  %v18270_v25 = vld [vmem:[#allocation175_spill] sm:$0xff] }
 0x3e4   :  { %18255 = vst [vmem:[#allocation32_spill] sm:$0xff] %v12175_v39 }
 0x3e5   :  { %18256 = vst [vmem:[#allocation166_spill] sm:$0xff] %v12177_v33  ;;  %9752 = vmatmul.msk.f32.gmra.mxu0 %vm145_vm1, %v11597_v28  ;;  %9757 = vmatmul.msk.f32.gmra.mxu1 %vm145_vm1, %v11597_v28 }
 0x3e6   :  { %18258 = vst [vmem:[#allocation167_spill] sm:$0xff] %v12181_v44  ;;  %9762 = vmatmul.msk.f32.gmra.mxu2 %vm145_vm1, %v11597_v28  ;;  %9767 = vmatmul.msk.f32.gmra.mxu3 %vm145_vm1, %v11597_v28  ;;  %v2825_v11 = vld.sshfl [vmem:[#allocation1 + $0x30] sm:$0xff pattern:$0x75316420] }
 0x3e7   :  { %v2826_v33 = vld.sshfl [vmem:[#allocation1 + $0x38] sm:$0xff pattern:$0x75316420]  ;;  %9799 = vmatpush.msk.msrb.mxu2 %vm154_vm0, %v2825_v11  ;;  %v2823_v39 = vld.sshfl [vmem:[#allocation1 + $0x20] sm:$0xff pattern:$0x75316420] }
 0x3e8   :  { %9804 = vmatpush.msk.msrb.mxu3 %vm154_vm0, %v2826_v33  ;;  %v2824_v14 = vld.sshfl [vmem:[#allocation1 + $0x28] sm:$0xff pattern:$0x75316420]  ;;  %9789 = vmatpush.msk.msrb.mxu0 %vm154_vm0, %v2823_v39  ;;  %v2010_v39 = vadd.f32 %v18270_v25, %v18269_v1 }
 0x3e9   :  { %v3344_v56 = vpop.f32.mrf.mxu2  ;;  %v3373_v57 = vpop.f32.mrf.mxu3  ;;  %9794 = vmatpush.msk.msrb.mxu1 %vm154_vm0, %v2824_v14 }
 0x3ea   :  { %v12195_v58 = vadd.f32 %v3344_v56, %v1978_v50  ;;  %v12197_v20 = vadd.f32 %v3373_v57, %v2007_v30  ;;  %v12199_v44 = vpop.f32.mrf.mxu0  ;;  %v12201_v35 = vpop.f32.mrf.mxu1  ;;  %v18268_v50 = vld [vmem:[#allocation174_spill] sm:$0xff] }
 0x3eb   :  { %18265 = vst [vmem:[#allocation37_spill] sm:$0xff] %v12199_v44  ;;  %v1981_v33 = vadd.f32 %v18268_v50, %v18267_v27  ;;  %v18306_v44 = vld [vmem:[#allocation141_spill] sm:$0xff] }
 0x3ec   :  { %18263 = vst [vmem:[#allocation36_spill] sm:$0xff] %v12195_v58  ;;  %v18307_v58 = vld [vmem:[#allocation8_spill] sm:$0xff] }
 0x3ed   :  { %18264 = vst [vmem:[#allocation170_spill] sm:$0xff] %v12197_v20  ;;  %9753 = vmatmul.msk.f32.gmra.mxu0 %vm145_vm1, %v11619_v5  ;;  %9758 = vmatmul.msk.f32.gmra.mxu1 %vm145_vm1, %v11619_v5  ;;  %v18302_v20 = vld [vmem:[#allocation139_spill] sm:$0xff] }
 0x3ee   :  { %18266 = vst [vmem:[#allocation171_spill] sm:$0xff] %v12201_v35  ;;  %9763 = vmatmul.msk.f32.gmra.mxu2 %vm145_vm1, %v11619_v5  ;;  %9768 = vmatmul.msk.f32.gmra.mxu3 %vm145_vm1, %v11619_v5 }
 0x3f1   :  { %v3347_v30 = vpop.f32.mrf.mxu2  ;;  %v3376_v56 = vpop.f32.mrf.mxu3 }
 0x3f2   :  { %v12219_v57 = vadd.f32 %v3347_v30, %v1981_v33  ;;  %v12221_v11 = vadd.f32 %v3376_v56, %v2010_v39  ;;  %v12223_v14 = vpop.f32.mrf.mxu0  ;;  %v12225_v35 = vpop.f32.mrf.mxu1 }
 0x3f3   :  { %18273 = vst [vmem:[#allocation41_spill] sm:$0xff] %v12223_v14 }
 0x3f4   :  { %18271 = vst [vmem:[#allocation40_spill] sm:$0xff] %v12219_v57 }
 0x3f5   :  { %18272 = vst [vmem:[#allocation174_spill] sm:$0xff] %v12221_v11  ;;  %9770 = vmatmul.msk.f32.vlgmr.msra.gmra.mxu0 %vm145_vm1, %v11546_v0  ;;  %9775 = vmatmul.msk.f32.vlgmr.msra.gmra.mxu1 %vm145_vm1, %v11546_v0 }
 0x3f6   :  { %18274 = vst [vmem:[#allocation175_spill] sm:$0xff] %v12225_v35  ;;  %9780 = vmatmul.msk.f32.vlgmr.msra.gmra.mxu2 %vm145_vm1, %v11546_v0  ;;  %9785 = vmatmul.msk.f32.vlgmr.msra.gmra.mxu3 %vm145_vm1, %v11546_v0  ;;  %v18301_v35 = vld [vmem:[#allocation5_spill] sm:$0xff] }
 0x3f7   :  { %18345 = vst [vmem:[#allocation5_spill] sm:$0xff] %v12415_v21  ;;  %v18361_v21 = vld [vmem:[#allocation164_spill] sm:$0xff] }
 0x3f9   :  { %v12235_v27 = vpop.f32.mrf.mxu2  ;;  %v12237_v50 = vpop.f32.mrf.mxu3 }
 0x3fa   :  { %18275 = vst [vmem:[#allocation300_spill] sm:$0xff] %v12235_v27  ;;  %v12239_v33 = vpop.f32.mrf.mxu0  ;;  %v12241_v1 = vpop.f32.mrf.mxu1 }
 0x3fb   :  { %18276 = vst [vmem:[#allocation301_spill] sm:$0xff] %v12237_v50 }
 0x3fc   :  { %18277 = vst [vmem:[#allocation302_spill] sm:$0xff] %v12239_v33 }
 0x3fd   :  { %18278 = vst [vmem:[#allocation303_spill] sm:$0xff] %v12241_v1  ;;  %9771 = vmatmul.msk.f32.gmra.mxu0 %vm145_vm1, %v11570_v26  ;;  %9776 = vmatmul.msk.f32.gmra.mxu1 %vm145_vm1, %v11570_v26  ;;  %v18304_v1 = vld [vmem:[#allocation140_spill] sm:$0xff] }
 0x3fe   :  { %9781 = vmatmul.msk.f32.gmra.mxu2 %vm145_vm1, %v11570_v26  ;;  %9786 = vmatmul.msk.f32.gmra.mxu3 %vm145_vm1, %v11570_v26 }
 0x401   :  { %v12251_v25 = vpop.f32.mrf.mxu2  ;;  %v12253_v39 = vpop.f32.mrf.mxu3 }
 0x402   :  { %18279 = vst [vmem:[#allocation304_spill] sm:$0xff] %v12251_v25  ;;  %v12255_v30 = vpop.f32.mrf.mxu0  ;;  %v12257_v56 = vpop.f32.mrf.mxu1  ;;  %v18303_v25 = vld [vmem:[#allocation6_spill] sm:$0xff] }
 0x403   :  { %18280 = vst [vmem:[#allocation305_spill] sm:$0xff] %v12253_v39  ;;  %v1569_v14 = vadd.f32 %v18304_v1, %v18303_v25  ;;  %v18315_v1 = vld [vmem:[#allocation12_spill] sm:$0xff]  ;;  %v18316_v25 = vld [vmem:[#allocation146_spill] sm:$0xff] }
 0x404   :  { %18281 = vst [vmem:[#allocation306_spill] sm:$0xff] %v12255_v30  ;;  %v12329_v30 = vadd.f32 %v18302_v20, %v18301_v35  ;;  %v18313_v20 = vld [vmem:[#allocation11_spill] sm:$0xff]  ;;  %v18314_v35 = vld [vmem:[#allocation145_spill] sm:$0xff]  ;;  %v12353_v10 = vadd.f32 %v18316_v25, %v18315_v1  ;;  %v18324_v1 = vld [vmem:[#allocation150_spill] sm:$0xff] }
 0x405   :  { %18282 = vst [vmem:[#allocation307_spill] sm:$0xff] %v12257_v56  ;;  %9772 = vmatmul.msk.f32.gmra.mxu0 %vm145_vm1, %v11597_v28  ;;  %9777 = vmatmul.msk.f32.gmra.mxu1 %vm145_vm1, %v11597_v28  ;;  %v12349_v34 = vadd.f32 %v18314_v35, %v18313_v20  ;;  %v18323_v35 = vld [vmem:[#allocation16_spill] sm:$0xff] }
 0x406   :  { %9782 = vmatmul.msk.f32.gmra.mxu2 %vm145_vm1, %v11597_v28  ;;  %9787 = vmatmul.msk.f32.gmra.mxu3 %vm145_vm1, %v11597_v28  ;;  %v12377_v25 = vadd.f32 %v18324_v1, %v18323_v35  ;;  %v18337_v1 = vld [vmem:[#allocation22_spill] sm:$0xff] }
 0x409   :  { %v12267_v50 = vpop.f32.mrf.mxu2  ;;  %v12269_v11 = vpop.f32.mrf.mxu3 }
 0x40a   :  { %18283 = vst [vmem:[#allocation308_spill] sm:$0xff] %v12267_v50  ;;  %v12271_v27 = vpop.f32.mrf.mxu0  ;;  %v12273_v57 = vpop.f32.mrf.mxu1 }
 0x40b   :  { %18284 = vst [vmem:[#allocation309_spill] sm:$0xff] %v12269_v11 }
 0x40c   :  { %18285 = vst [vmem:[#allocation310_spill] sm:$0xff] %v12271_v27 }
 0x40d   :  { %18286 = vst [vmem:[#allocation311_spill] sm:$0xff] %v12273_v57  ;;  %9773 = vmatmul.msk.f32.gmra.mxu0 %vm145_vm1, %v11619_v5  ;;  %9778 = vmatmul.msk.f32.gmra.mxu1 %vm145_vm1, %v11619_v5 }
 0x40e   :  { %9783 = vmatmul.msk.f32.gmra.mxu2 %vm145_vm1, %v11619_v5  ;;  %9788 = vmatmul.msk.f32.gmra.mxu3 %vm145_vm1, %v11619_v5 }
 0x411   :  { %v12283_v56 = vpop.f32.mrf.mxu2  ;;  %v12285_v50 = vpop.f32.mrf.mxu3 }
 0x412   :  { %18287 = vst [vmem:[#allocation312_spill] sm:$0xff] %v12283_v56  ;;  %v12287_v11 = vpop.f32.mrf.mxu0  ;;  %v12289_v27 = vpop.f32.mrf.mxu1 }
 0x413   :  { %18288 = vst [vmem:[#allocation313_spill] sm:$0xff] %v12285_v50 }
 0x414   :  { %18289 = vst [vmem:[#allocation314_spill] sm:$0xff] %v12287_v11 }
 0x415   :  { %18290 = vst [vmem:[#allocation315_spill] sm:$0xff] %v12289_v27  ;;  %9790 = vmatmul.msk.f32.vlgmr.msrb.gmra.mxu0 %vm145_vm1, %v11546_v0  ;;  %9795 = vmatmul.msk.f32.vlgmr.msrb.gmra.mxu1 %vm145_vm1, %v11546_v0 }
 0x416   :  { %9800 = vmatmul.msk.f32.vlgmr.msrb.gmra.mxu2 %vm145_vm1, %v11546_v0  ;;  %9805 = vmatmul.msk.f32.vlgmr.msrb.gmra.mxu3 %vm145_vm1, %v11546_v0 }
 0x419   :  { %v12299_v57 = vpop.f32.mrf.mxu2  ;;  %v12301_v56 = vpop.f32.mrf.mxu3 }
 0x41a   :  { %18291 = vst [vmem:[#allocation316_spill] sm:$0xff] %v12299_v57  ;;  %v12303_v50 = vpop.f32.mrf.mxu0  ;;  %v12305_v11 = vpop.f32.mrf.mxu1 }
 0x41b   :  { %18292 = vst [vmem:[#allocation317_spill] sm:$0xff] %v12301_v56 }
 0x41c   :  { %18293 = vst [vmem:[#allocation318_spill] sm:$0xff] %v12303_v50  ;;  %v18300_v50 = vld [vmem:[#allocation138_spill] sm:$0xff] }
 0x41d   :  { %18294 = vst [vmem:[#allocation319_spill] sm:$0xff] %v12305_v11  ;;  %9791 = vmatmul.msk.f32.gmra.mxu0 %vm145_vm1, %v11570_v26  ;;  %9796 = vmatmul.msk.f32.gmra.mxu1 %vm145_vm1, %v11570_v26  ;;  %v18299_v11 = vld [vmem:[#allocation4_spill] sm:$0xff] }
 0x41e   :  { %9801 = vmatmul.msk.f32.gmra.mxu2 %vm145_vm1, %v11570_v26  ;;  %9806 = vmatmul.msk.f32.gmra.mxu3 %vm145_vm1, %v11570_v26  ;;  %v12325_v39 = vadd.f32 %v18300_v50, %v18299_v11  ;;  %v18305_v26 = vld [vmem:[#allocation7_spill] sm:$0xff]  ;;  %v18311_v11 = vld [vmem:[#allocation10_spill] sm:$0xff]  ;;  %v18312_v50 = vld [vmem:[#allocation144_spill] sm:$0xff] }
 0x41f   :  { %v12345_v49 = vadd.f32 %v18312_v50, %v18311_v11  ;;  %v18321_v11 = vld [vmem:[#allocation15_spill] sm:$0xff]  ;;  %v18322_v50 = vld [vmem:[#allocation149_spill] sm:$0xff] }
 0x420   :  { %v12369_v20 = vadd.f32 %v18322_v50, %v18321_v11  ;;  %v18329_v11 = vld [vmem:[#allocation19_spill] sm:$0xff]  ;;  %v18330_v50 = vld [vmem:[#allocation153_spill] sm:$0xff] }
 0x421   :  { %v12315_v0 = vpop.f32.mrf.mxu2  ;;  %v12317_v57 = vpop.f32.mrf.mxu3  ;;  %v12389_v17 = vadd.f32 %v18330_v50, %v18329_v11  ;;  %v18341_v11 = vld [vmem:[#allocation24_spill] sm:$0xff]  ;;  %v18342_v50 = vld [vmem:[#allocation158_spill] sm:$0xff] }
 0x422   :  { %18295 = vst [vmem:[#allocation320_spill] sm:$0xff] %v12315_v0  ;;  %v12319_v56 = vpop.f32.mrf.mxu0  ;;  %v12321_v27 = vpop.f32.mrf.mxu1  ;;  %v1598_v0 = vadd.f32 %v18306_v44, %v18305_v26  ;;  %v18318_v44 = vld [vmem:[#allocation147_spill] sm:$0xff]  ;;  %v12411_v31 = vadd.f32 %v18342_v50, %v18341_v11  ;;  %v12431_v11 = vadd.f32 %v18355_v19, %v18354_v13  ;;  %v18357_v50 = vld [vmem:[#allocation29_spill] sm:$0xff] }
 0x423   :  { %18296 = vst [vmem:[#allocation321_spill] sm:$0xff] %v12317_v57  ;;  %v18308_v57 = vld [vmem:[#allocation142_spill] sm:$0xff]  ;;  %v18371_v19 = vld [vmem:[#allocation35_spill] sm:$0xff] }
 0x424   :  { %18297 = vst [vmem:[#allocation322_spill] sm:$0xff] %v12319_v56  ;;  %v12337_v33 = vadd.f32 %v18308_v57, %v18307_v58  ;;  %v18309_v56 = vld [vmem:[#allocation9_spill] sm:$0xff] }
 0x425   :  { %18298 = vst [vmem:[#allocation323_spill] sm:$0xff] %v12321_v27  ;;  %v18310_v27 = vld [vmem:[#allocation143_spill] sm:$0xff]  ;;  %9792 = vmatmul.msk.f32.gmra.mxu0 %vm145_vm1, %v11597_v28  ;;  %9797 = vmatmul.msk.f32.gmra.mxu1 %vm145_vm1, %v11597_v28  ;;  %v18317_v58 = vld [vmem:[#allocation13_spill] sm:$0xff] }
 0x426   :  { %v12341_v15 = vadd.f32 %v18310_v27, %v18309_v56  ;;  %v12361_v57 = vadd.f32 %v18318_v44, %v18317_v58  ;;  %v18319_v27 = vld [vmem:[#allocation14_spill] sm:$0xff]  ;;  %v18320_v56 = vld [vmem:[#allocation148_spill] sm:$0xff]  ;;  %9802 = vmatmul.msk.f32.gmra.mxu2 %vm145_vm1, %v11597_v28  ;;  %9807 = vmatmul.msk.f32.gmra.mxu3 %vm145_vm1, %v11597_v28  ;;  %v18325_v58 = vld [vmem:[#allocation17_spill] sm:$0xff]  ;;  %18331 = vst [vmem:[#allocation4_spill] sm:$0xff] %v12389_v17 }
 0x427   :  { %v12365_v26 = vadd.f32 %v18320_v56, %v18319_v27  ;;  %v18326_v44 = vld [vmem:[#allocation151_spill] sm:$0xff]  ;;  %v18327_v27 = vld [vmem:[#allocation18_spill] sm:$0xff]  ;;  %v18328_v56 = vld [vmem:[#allocation152_spill] sm:$0xff]  ;;  %18356 = vst [vmem:[#allocation141_spill] sm:$0xff] %v12431_v11 }
 0x428   :  { %v12381_v18 = vadd.f32 %v18326_v44, %v18325_v58  ;;  %v12385_v40 = vadd.f32 %v18328_v56, %v18327_v27  ;;  %v18334_v28 = vld [vmem:[#allocation21_spill] sm:$0xff]  ;;  %v12401_v58 = vadd.f32 %v18338_v48, %v18337_v1  ;;  %v18339_v44 = vld [vmem:[#allocation23_spill] sm:$0xff]  ;;  %v12407_v56 = vpop.permute.xlu2 %4252 }
 0x429   :  { %v12397_v35 = vadd.f32 %v18335_v54, %v18334_v28  ;;  %v12405_v27 = vadd.f32 %v18340_v41, %v18339_v44  ;;  %v18346_v54 = vld [vmem:[#allocation26_spill] sm:$0xff]  ;;  %v18347_v28 = vld [vmem:[#allocation160_spill] sm:$0xff]  ;;  %v18349_v48 = vld [vmem:[#allocation27_spill] sm:$0xff]  ;;  %v12425_v41 = vpop.f32.mrf.mxu2  ;;  %v12427_v44 = vpop.f32.mrf.mxu3 }
 0x42a   :  { %v18350_v1 = vld [vmem:[#allocation161_spill] sm:$0xff]  ;;  %18352 = vst [vmem:[#allocation140_spill] sm:$0xff] %v12425_v41  ;;  %v18358_v17 = vld [vmem:[#allocation163_spill] sm:$0xff]  ;;  %v12447_v41 = vpop.f32.mrf.mxu1 }
 0x42b   :  { %18336 = vst [vmem:[#allocation138_spill] sm:$0xff] %v12397_v35  ;;  %v12419_v35 = vadd.f32 %v18347_v28, %v18346_v54  ;;  %v12423_v24 = vadd.f32 %v18350_v1, %v18349_v48  ;;  %v12435_v42 = vadd.f32 %v18358_v17, %v18357_v50  ;;  %v12439_v54 = vadd.f32 %v18361_v21, %v18360_v59  ;;  %v18363_v28 = vld [vmem:[#allocation31_spill] sm:$0xff]  ;;  %v12445_v1 = vpop.f32.mrf.mxu0  ;;  %v18372_v11 = vld [vmem:[#allocation169_spill] sm:$0xff]  ;;  %v18374_v50 = vld [vmem:[#allocation38_spill] sm:$0xff] }
 0x42c   :  { %18353 = vst [vmem:[#allocation7_spill] sm:$0xff] %v12427_v44  ;;  %v18368_v44 = vld [vmem:[#allocation34_spill] sm:$0xff]  ;;  %v12455_v17 = vadd.f32 %v18372_v11, %v18371_v19  ;;  %v18377_v59 = vld [vmem:[#allocation39_spill] sm:$0xff]  ;;  %v18388_v19 = vld [vmem:[#allocation45_spill] sm:$0xff] }
 0x42d   :  { %18348 = vst [vmem:[#allocation139_spill] sm:$0xff] %v12419_v35  ;;  %v18364_v35 = vld [vmem:[#allocation165_spill] sm:$0xff]  ;;  %9793 = vmatmul.msk.f32.gmra.mxu0 %vm145_vm1, %v11619_v5  ;;  %9798 = vmatmul.msk.f32.gmra.mxu1 %vm145_vm1, %v11619_v5 }
 0x42e   :  { %18351 = vst [vmem:[#allocation6_spill] sm:$0xff] %v12423_v24  ;;  %v12443_v48 = vadd.f32 %v18364_v35, %v18363_v28  ;;  %v18369_v24 = vld [vmem:[#allocation168_spill] sm:$0xff]  ;;  %v18380_v28 = vld [vmem:[#allocation42_spill] sm:$0xff]  ;;  %9803 = vmatmul.msk.f32.gmra.mxu2 %vm145_vm1, %v11619_v5  ;;  %9808 = vmatmul.msk.f32.gmra.mxu3 %vm145_vm1, %v11619_v5  ;;  %v18416_v5 = vld [vmem:[#allocation55_spill] sm:$0xff] }
 0x42f   :  { %18359 = vst [vmem:[#allocation8_spill] sm:$0xff] %v12435_v42  ;;  %v12451_v13 = vadd.f32 %v18369_v24, %v18368_v44  ;;  %v18375_v42 = vld [vmem:[#allocation172_spill] sm:$0xff] }
 0x430   :  { %18362 = vst [vmem:[#allocation142_spill] sm:$0xff] %v12439_v54  ;;  %v12459_v21 = vadd.f32 %v18375_v42, %v18374_v50  ;;  %v18378_v54 = vld [vmem:[#allocation173_spill] sm:$0xff]  ;;  %v18385_v44 = vld [vmem:[#allocation44_spill] sm:$0xff]  ;;  %v18391_v50 = vld [vmem:[#allocation46_spill] sm:$0xff] }
 0x431   :  { %18365 = vst [vmem:[#allocation9_spill] sm:$0xff] %v12443_v48  ;;  %v12463_v35 = vadd.f32 %v18378_v54, %v18377_v59  ;;  %v4115_v59 = vadd.f32 %v11883_v29, %v1569_v14  ;;  %v12503_v29 = vpop.permute.xlu1 %4242  ;;  %v18403_v14 = vld [vmem:[#allocation184_spill] sm:$0xff] }
 0x432   :  { %18366 = vst [vmem:[#allocation143_spill] sm:$0xff] %v12445_v1  ;;  %v18381_v1 = vld [vmem:[#allocation176_spill] sm:$0xff] }
 0x433   :  { %18367 = vst [vmem:[#allocation10_spill] sm:$0xff] %v12447_v41  ;;  %v12467_v48 = vadd.f32 %v18381_v1, %v18380_v28  ;;  %v18382_v41 = vld [vmem:[#allocation43_spill] sm:$0xff]  ;;  %v4116_v1 = vadd.f32 %v11885_v9, %v1598_v0  ;;  %v18397_v28 = vld [vmem:[#allocation182_spill] sm:$0xff] }
 0x434   :  { %18370 = vst [vmem:[#allocation144_spill] sm:$0xff] %v12451_v13  ;;  %v12471_v24 = vadd.f32 %v18383_v32, %v18382_v41  ;;  %v18386_v13 = vld [vmem:[#allocation178_spill] sm:$0xff]  ;;  %v18393_v32 = vld [vmem:[#allocation47_spill] sm:$0xff]  ;;  %v18394_v41 = vld [vmem:[#allocation181_spill] sm:$0xff] }
 0x435   :  { %18373 = vst [vmem:[#allocation11_spill] sm:$0xff] %v12455_v17  ;;  %v12475_v11 = vadd.f32 %v18386_v13, %v18385_v44  ;;  %v18389_v17 = vld [vmem:[#allocation179_spill] sm:$0xff]  ;;  %v12493_v13 = vadd.f32 %v18394_v41, %v18393_v32  ;;  %v18402_v9 = vld [vmem:[#allocation50_spill] sm:$0xff]  ;;  %v18406_v41 = vld [vmem:[#allocation185_spill] sm:$0xff] }
 0x436   :  { %18376 = vst [vmem:[#allocation145_spill] sm:$0xff] %v12459_v21  ;;  %v12479_v42 = vadd.f32 %v18389_v17, %v18388_v19  ;;  %v18392_v21 = vld [vmem:[#allocation180_spill] sm:$0xff]  ;;  %v18400_v19 = vld [vmem:[#allocation183_spill] sm:$0xff]  ;;  %v12511_v0 = vadd.f32 %v18403_v14, %v18402_v9 }
 0x437   :  { %18379 = vst [vmem:[#allocation12_spill] sm:$0xff] %v12463_v35  ;;  %v12483_v54 = vadd.f32 %v18392_v21, %v18391_v50  ;;  %v18396_v17 = vld [vmem:[#allocation48_spill] sm:$0xff]  ;;  %v18399_v21 = vld [vmem:[#allocation49_spill] sm:$0xff]  ;;  %v18405_v32 = vld [vmem:[#allocation51_spill] sm:$0xff] }
 0x438   :  { %18384 = vst [vmem:[#allocation146_spill] sm:$0xff] %v12471_v24  ;;  %v12497_v44 = vadd.f32 %v18397_v28, %v18396_v17  ;;  %v12501_v50 = vadd.f32 %v18400_v19, %v18399_v21  ;;  %v12515_v17 = vadd.f32 %v18406_v41, %v18405_v32  ;;  %v18408_v28 = vld [vmem:[#allocation52_spill] sm:$0xff]  ;;  %v18411_v19 = vld [vmem:[#allocation53_spill] sm:$0xff]  ;;  %v18414_v24 = vld [vmem:[#allocation54_spill] sm:$0xff] }
 0x439   :  { %18387 = vst [vmem:[#allocation13_spill] sm:$0xff] %v12475_v11  ;;  %v18412_v11 = vld [vmem:[#allocation187_spill] sm:$0xff]  ;;  %v18415_v35 = vld [vmem:[#allocation188_spill] sm:$0xff]  ;;  %v18422_v41 = vld [vmem:[#allocation57_spill] sm:$0xff] }
 0x43a   :  { %18390 = vst [vmem:[#allocation147_spill] sm:$0xff] %v12479_v42  ;;  %v18409_v42 = vld [vmem:[#allocation186_spill] sm:$0xff]  ;;  %v18419_v14 = vld [vmem:[#allocation56_spill] sm:$0xff] }
 0x43b   :  { %18395 = vst [vmem:[#allocation14_spill] sm:$0xff] %v12493_v13  ;;  %v12519_v21 = vadd.f32 %v18409_v42, %v18408_v28  ;;  %v18417_v13 = vld [vmem:[#allocation189_spill] sm:$0xff]  ;;  %v18425_v28 = vld [vmem:[#allocation58_spill] sm:$0xff] }
 0x43c   :  { %18398 = vst [vmem:[#allocation148_spill] sm:$0xff] %v12497_v44  ;;  %v12527_v44 = vadd.f32 %v18415_v35, %v18414_v24  ;;  %v12531_v9 = vadd.f32 %v18417_v13, %v18416_v5  ;;  %v12550_v24 = vadd.f32 %v12503_v29, %v4115_v59  ;;  %v12553_v13 = vadd.f32 %v12503_v29, %v4116_v1  ;;  %v12557_v5 = vpop.f32.mrf.mxu3  ;;  %v18442_v59 = vld [vmem:[#allocation273_spill] sm:$0xff]  ;;  %v12571_v1 = vpop.f32.mrf.mxu0 }
 0x43d   :  { %18401 = vst [vmem:[#allocation15_spill] sm:$0xff] %v12501_v50  ;;  %v12523_v50 = vadd.f32 %v18412_v11, %v18411_v19  ;;  %v18428_v19 = vld [vmem:[#allocation59_spill] sm:$0xff] }
 0x43e   :  { %18404 = vst [vmem:[#allocation149_spill] sm:$0xff] %v12511_v0  ;;  %v18420_v0 = vld [vmem:[#allocation190_spill] sm:$0xff] }
 0x43f   :  { %18407 = vst [vmem:[#allocation16_spill] sm:$0xff] %v12515_v17  ;;  %v12535_v32 = vadd.f32 %v18420_v0, %v18419_v14  ;;  %v18423_v17 = vld [vmem:[#allocation191_spill] sm:$0xff]  ;;  %v12555_v0 = vpop.f32.mrf.mxu2  ;;  %v18436_v14 = vld [vmem:[#allocation194_spill] sm:$0xff] }
 0x440   :  { %18410 = vst [vmem:[#allocation150_spill] sm:$0xff] %v12519_v21  ;;  %v12539_v42 = vadd.f32 %v18423_v17, %v18422_v41  ;;  %v18426_v21 = vld [vmem:[#allocation192_spill] sm:$0xff] }
 0x441   :  { %18413 = vst [vmem:[#allocation17_spill] sm:$0xff] %v12523_v50  ;;  %v12543_v11 = vadd.f32 %v18426_v21, %v18425_v28  ;;  %v18429_v50 = vld [vmem:[#allocation193_spill] sm:$0xff]  ;;  %v18435_v17 = vld [vmem:[#allocation60_spill] sm:$0xff]  ;;  %v18439_v28 = vld [vmem:[#allocation195_spill] sm:$0xff] }
 0x442   :  { %18418 = vst [vmem:[#allocation151_spill] sm:$0xff] %v12531_v9  ;;  %v12547_v35 = vadd.f32 %v18429_v50, %v18428_v19  ;;  %v12561_v41 = vadd.f32 %v18436_v14, %v18435_v17  ;;  %v18438_v21 = vld [vmem:[#allocation61_spill] sm:$0xff]  ;;  %v18441_v50 = vld [vmem:[#allocation272_spill] sm:$0xff]  ;;  %v12579_v17 = vpop.permute.xlu2 %4237  ;;  %v12583_v14 = vadd.f32 %v12503_v29, %v11905_v4  ;;  %v18456_v4 = vld [vmem:[#allocation66_spill] sm:$0xff] }
 0x443   :  { %18421 = vst [vmem:[#allocation18_spill] sm:$0xff] %v12535_v32  ;;  %v4075_v19 = vadd.f32 %v18441_v50, %v12325_v39  ;;  %v4155_v39 = vadd.f32 %v11909_v63, %v12337_v33  ;;  %v12605_v63 = vpop.permute.xlu0 %4247  ;;  %v18459_v33 = vld [vmem:[#allocation67_spill] sm:$0xff] }
 0x444   :  { %18424 = vst [vmem:[#allocation152_spill] sm:$0xff] %v12539_v42  ;;  %v12565_v42 = vadd.f32 %v18439_v28, %v18438_v21  ;;  %v18448_v21 = vld [vmem:[#allocation63_spill] sm:$0xff]  ;;  %v18449_v28 = vld [vmem:[#allocation197_spill] sm:$0xff] }
 0x445   :  { %18427 = vst [vmem:[#allocation19_spill] sm:$0xff] %v12543_v11  ;;  %v12573_v11 = vpop.f32.mrf.mxu1  ;;  %v12591_v50 = vadd.f32 %v18449_v28, %v18448_v21  ;;  %v18461_v21 = vld [vmem:[#allocation68_spill] sm:$0xff]  ;;  %v18462_v28 = vld [vmem:[#allocation202_spill] sm:$0xff] }
 0x446   :  { %18430 = vst [vmem:[#allocation153_spill] sm:$0xff] %v12547_v35  ;;  %v4076_v35 = vadd.f32 %v18442_v59, %v12329_v30  ;;  %v4156_v30 = vadd.f32 %v11911_v52, %v12341_v15  ;;  %v18451_v59 = vld [vmem:[#allocation64_spill] sm:$0xff]  ;;  %v18460_v52 = vld [vmem:[#allocation201_spill] sm:$0xff] }
 0x447   :  { %18431 = vst [vmem:[#allocation20_spill] sm:$0xff] %v12550_v24  ;;  %v12609_v15 = vadd.f32 %v18460_v52, %v18459_v33  ;;  %v12628_v33 = vadd.f32 %v12579_v17, %v4075_v19  ;;  %v18478_v19 = vld [vmem:[#allocation73_spill] sm:$0xff] }
 0x448   :  { %18432 = vst [vmem:[#allocation154_spill] sm:$0xff] %v12553_v13  ;;  %v12631_v52 = vadd.f32 %v12579_v17, %v4076_v35 }
 0x449   :  { %18433 = vst [vmem:[#allocation21_spill] sm:$0xff] %v12555_v0  ;;  %v18445_v0 = vld [vmem:[#allocation62_spill] sm:$0xff] }
 0x44a   :  { %18434 = vst [vmem:[#allocation155_spill] sm:$0xff] %v12557_v5  ;;  %v18446_v5 = vld [vmem:[#allocation196_spill] sm:$0xff] }
 0x44b   :  { %18437 = vst [vmem:[#allocation22_spill] sm:$0xff] %v12561_v41  ;;  %v12577_v32 = vadd.f32 %v18446_v5, %v18445_v0  ;;  %v18453_v5 = vld [vmem:[#allocation65_spill] sm:$0xff]  ;;  %v18457_v41 = vld [vmem:[#allocation200_spill] sm:$0xff] }
 0x44c   :  { %18440 = vst [vmem:[#allocation156_spill] sm:$0xff] %v12565_v42  ;;  %v12603_v9 = vadd.f32 %v18457_v41, %v18456_v4  ;;  %v18466_v4 = vld [vmem:[#allocation70_spill] sm:$0xff] }
 0x44d   :  { %18443 = vst [vmem:[#allocation23_spill] sm:$0xff] %v12571_v1  ;;  %v18454_v1 = vld [vmem:[#allocation199_spill] sm:$0xff] }
 0x44e   :  { %18444 = vst [vmem:[#allocation157_spill] sm:$0xff] %v12573_v11  ;;  %v18452_v11 = vld [vmem:[#allocation198_spill] sm:$0xff]  ;;  %v12599_v42 = vadd.f32 %v18454_v1, %v18453_v5  ;;  %v4119_v1 = vadd.f32 %v11973_v60, %v12365_v26  ;;  %v18464_v5 = vld [vmem:[#allocation203_spill] sm:$0xff]  ;;  %v12639_v26 = vadd.f32 %v12605_v63, %v4155_v39 }
 0x44f   :  { %18447 = vst [vmem:[#allocation24_spill] sm:$0xff] %v12583_v14  ;;  %v12595_v0 = vadd.f32 %v18452_v11, %v18451_v59  ;;  %v4776_v11 = vadd.f32 %v12553_v13, %v12550_v24  ;;  %v18463_v59 = vld [vmem:[#allocation69_spill] sm:$0xff]  ;;  %v18479_v24 = vld [vmem:[#allocation207_spill] sm:$0xff] }
 0x450   :  { %18450 = vst [vmem:[#allocation158_spill] sm:$0xff] %v12591_v50  ;;  %v12613_v50 = vadd.f32 %v18462_v28, %v18461_v21  ;;  %v12621_v41 = vadd.f32 %v18464_v5, %v18463_v59  ;;  %v18471_v21 = vld [vmem:[#allocation71_spill] sm:$0xff]  ;;  %v18472_v28 = vld [vmem:[#allocation205_spill] sm:$0xff]  ;;  %v12642_v59 = vadd.f32 %v12605_v63, %v4156_v30  ;;  %v18477_v5 = vld [vmem:[#allocation206_spill] sm:$0xff]  ;;  %v12650_v35 = vadd.f32 %v18479_v24, %v18478_v19 }
 0x451   :  { %18455 = vst [vmem:[#allocation25_spill] sm:$0xff] %v12599_v42  ;;  %v18467_v42 = vld [vmem:[#allocation204_spill] sm:$0xff]  ;;  %v12635_v13 = vadd.f32 %v18472_v28, %v18471_v21  ;;  %v4777_v60 = vadd.f32 %v4776_v11, %v12583_v14  ;;  %v18484_v28 = vld [vmem:[#allocation274_spill] sm:$0xff]  ;;  %v18486_v39 = vld [vmem:[#allocation75_spill] sm:$0xff]  ;;  %v12670_v24 = vadd.f32 %v12605_v63, %v11925_v51  ;;  %v4079_v51 = vadd.f32 %v11953_v2, %v12353_v10 }
 0x452   :  { %18458 = vst [vmem:[#allocation159_spill] sm:$0xff] %v12603_v9  ;;  %v12625_v9 = vadd.f32 %v18467_v42, %v18466_v4  ;;  %v18476_v42 = vld [vmem:[#allocation72_spill] sm:$0xff]  ;;  %v12658_v11 = vadd.f32 %v12579_v17, %v18484_v28  ;;  %v18487_v14 = vld [vmem:[#allocation209_spill] sm:$0xff]  ;;  %v18495_v28 = vld [vmem:[#allocation210_spill] sm:$0xff]  ;;  %v4195_v10 = vadd.f32 %v11929_v3, %v12345_v49 }
 0x453   :  { %18465 = vst [vmem:[#allocation26_spill] sm:$0xff] %v12621_v41  ;;  %v12646_v4 = vadd.f32 %v18477_v5, %v18476_v42  ;;  %v18481_v41 = vld [vmem:[#allocation74_spill] sm:$0xff]  ;;  %v12662_v30 = vadd.f32 %v18487_v14, %v18486_v39  ;;  %v12673_v5 = vadd.f32 %v12503_v29, %v4119_v1  ;;  %v18494_v19 = vld [vmem:[#allocation76_spill] sm:$0xff]  ;;  %v18496_v14 = vld [vmem:[#allocation77_spill] sm:$0xff]  ;;  %v12691_v1 = vpop.f32.mrf.mxu0 }
 0x454   :  { %18468 = vst [vmem:[#allocation160_spill] sm:$0xff] %v12625_v9  ;;  %v18482_v9 = vld [vmem:[#allocation208_spill] sm:$0xff]  ;;  %v18497_v39 = vld [vmem:[#allocation211_spill] sm:$0xff]  ;;  %v18507_v3 = vld [vmem:[#allocation82_spill] sm:$0xff] }
 0x455   :  { %18469 = vst [vmem:[#allocation27_spill] sm:$0xff] %v12628_v33  ;;  %v12654_v21 = vadd.f32 %v18482_v9, %v18481_v41  ;;  %v12675_v9 = vpop.f32.mrf.mxu2  ;;  %v12677_v41 = vpop.f32.mrf.mxu3  ;;  %v18508_v49 = vld [vmem:[#allocation216_spill] sm:$0xff] }
 0x456   :  { %18470 = vst [vmem:[#allocation161_spill] sm:$0xff] %v12631_v52 }
 0x457   :  { %18473 = vst [vmem:[#allocation28_spill] sm:$0xff] %v12635_v13  ;;  %v18489_v13 = vld [vmem:[#allocation276_spill] sm:$0xff] }
 0x458   :  { %18474 = vst [vmem:[#allocation162_spill] sm:$0xff] %v12639_v26  ;;  %v12666_v42 = vadd.f32 %v12503_v29, %v18489_v13  ;;  %v4735_v13 = vadd.f32 %v12631_v52, %v12628_v33  ;;  %v18500_v52 = vld [vmem:[#allocation212_spill] sm:$0xff] }
 0x459   :  { %18475 = vst [vmem:[#allocation29_spill] sm:$0xff] %v12642_v59 }
 0x45a   :  { %18480 = vst [vmem:[#allocation163_spill] sm:$0xff] %v12650_v35  ;;  %v12681_v35 = vadd.f32 %v18495_v28, %v18494_v19  ;;  %v4817_v19 = vadd.f32 %v12642_v59, %v12639_v26  ;;  %v4120_v28 = vadd.f32 %v11975_v61, %v12369_v20  ;;  %v4736_v2 = vadd.f32 %v4735_v13, %v12658_v11  ;;  %v18502_v59 = vld [vmem:[#allocation213_spill] sm:$0xff]  ;;  %v18503_v61 = vld [vmem:[#allocation80_spill] sm:$0xff]  ;;  %v18504_v20 = vld [vmem:[#allocation214_spill] sm:$0xff] }
 0x45b   :  { %18483 = vst [vmem:[#allocation30_spill] sm:$0xff] %v12654_v21  ;;  %v12693_v21 = vpop.f32.mrf.mxu1  ;;  %v18506_v13 = vld [vmem:[#allocation215_spill] sm:$0xff] }
 0x45c   :  { %18485 = vst [vmem:[#allocation164_spill] sm:$0xff] %v12658_v11  ;;  %v12727_v11 = vadd.f32 %v18508_v49, %v18507_v3  ;;  %v18518_v3 = vld [vmem:[#allocation83_spill] sm:$0xff] }
 0x45d   :  { %18488 = vst [vmem:[#allocation31_spill] sm:$0xff] %v12662_v30  ;;  %v12685_v30 = vadd.f32 %v18497_v39, %v18496_v14  ;;  %v4159_v14 = vadd.f32 %v11999_v7, %v12377_v25  ;;  %v18499_v39 = vld [vmem:[#allocation78_spill] sm:$0xff]  ;;  %v4818_v7 = vadd.f32 %v4817_v19, %v12670_v24  ;;  %v12745_v19 = vadd.f32 %v12503_v29, %v11995_v55 }
 0x45e   :  { %18490 = vst [vmem:[#allocation165_spill] sm:$0xff] %v12666_v42  ;;  %v12704_v33 = vadd.f32 %v18500_v52, %v18499_v39  ;;  %v18505_v52 = vld [vmem:[#allocation81_spill] sm:$0xff]  ;;  %v4160_v55 = vadd.f32 %v12001_v23, %v12381_v18  ;;  %v12782_v18 = vpop.f32.mrf.mxu0 }
 0x45f   :  { %18491 = vst [vmem:[#allocation34_spill] sm:$0xff] %v12670_v24  ;;  %v12723_v39 = vadd.f32 %v18506_v13, %v18505_v52  ;;  %v12752_v52 = vadd.f32 %v12407_v56, %v4195_v10  ;;  %v12767_v10 = vpop.f32.mrf.mxu3  ;;  %v18563_v24 = vld [vmem:[#allocation282_spill] sm:$0xff] }
 0x460   :  { %18492 = vst [vmem:[#allocation168_spill] sm:$0xff] %v12673_v5 }
 0x461   :  { %18493 = vst [vmem:[#allocation35_spill] sm:$0xff] %v12677_v41  ;;  %v4778_v41 = vadd.f32 %v4777_v60, %v12666_v42  ;;  %v4196_v60 = vadd.f32 %v11931_v38, %v12349_v34  ;;  %v18501_v42 = vld [vmem:[#allocation79_spill] sm:$0xff] }
 0x462   :  { %18498 = vst [vmem:[#allocation169_spill] sm:$0xff] %v12685_v30  ;;  %v12713_v26 = vadd.f32 %v18502_v59, %v18501_v42  ;;  %v12717_v30 = vadd.f32 %v18504_v20, %v18503_v61  ;;  %v18509_v38 = vld [vmem:[#allocation275_spill] sm:$0xff]  ;;  %v12734_v59 = vadd.f32 %v12579_v17, %v4079_v51  ;;  %v12738_v42 = vadd.f32 %v12605_v63, %v11927_v22 }
 0x463   :  { %v4779_v25 = vadd.f32 %v4778_v41, %v12673_v5  ;;  %v12731_v34 = vadd.f32 %v12579_v17, %v18509_v38  ;;  %v12741_v41 = vadd.f32 %v12503_v29, %v4120_v28  ;;  %18514 = vst [vmem:[#allocation42_spill] sm:$0xff] %v12745_v19  ;;  %v12748_v61 = vadd.f32 %v12605_v63, %v4159_v14  ;;  %v18520_v38 = vld [vmem:[#allocation84_spill] sm:$0xff]  ;;  %v18567_v5 = vld [vmem:[#allocation298_spill] sm:$0xff] }
 0x464   :  { %18511 = vst [vmem:[#allocation172_spill] sm:$0xff] %v12734_v59  ;;  %v12755_v51 = vadd.f32 %v12407_v56, %v4196_v60  ;;  %v4080_v22 = vadd.f32 %v11955_v46, %v12361_v57  ;;  %v4819_v28 = vadd.f32 %v4818_v7, %v12738_v42  ;;  %v4123_v14 = vadd.f32 %v12063_v36, %v12401_v58  ;;  %v18519_v60 = vld [vmem:[#allocation217_spill] sm:$0xff]  ;;  %v18521_v46 = vld [vmem:[#allocation218_spill] sm:$0xff]  ;;  %v12784_v36 = vpop.f32.mrf.mxu1 }
 0x465   :  { %18510 = vst [vmem:[#allocation38_spill] sm:$0xff] %v12731_v34  ;;  %v4737_v20 = vadd.f32 %v4736_v2, %v12731_v34  ;;  %v4780_v13 = vadd.f32 %v4779_v25, %v12741_v41  ;;  %v12765_v2 = vpop.f32.mrf.mxu2  ;;  %v12771_v49 = vadd.f32 %v18519_v60, %v18518_v3  ;;  %v12775_v57 = vadd.f32 %v18521_v46, %v18520_v38  ;;  %v18523_v58 = vld [vmem:[#allocation85_spill] sm:$0xff]  ;;  %v18524_v25 = vld [vmem:[#allocation219_spill] sm:$0xff]  ;;  %v18525_v3 = vld [vmem:[#allocation86_spill] sm:$0xff] }
 0x466   :  { %18512 = vst [vmem:[#allocation39_spill] sm:$0xff] %v12738_v42  ;;  %v12779_v7 = vadd.f32 %v12407_v56, %v11949_v53  ;;  %v12788_v34 = vadd.f32 %v18524_v25, %v18523_v58  ;;  %v18526_v60 = vld [vmem:[#allocation220_spill] sm:$0xff]  ;;  %v4820_v46 = vadd.f32 %v4819_v28, %v12748_v61  ;;  %v4858_v53 = vadd.f32 %v12755_v51, %v12752_v52 }
 0x467   :  { %18513 = vst [vmem:[#allocation173_spill] sm:$0xff] %v12741_v41  ;;  %v4738_v23 = vadd.f32 %v4737_v20, %v12734_v59  ;;  %v12792_v42 = vadd.f32 %v18526_v60, %v18525_v3  ;;  %v4781_v38 = vadd.f32 %v4780_v13, %v12745_v19  ;;  %v12799_v20 = vadd.f32 %v12579_v17, %v4080_v22  ;;  %v18533_v3 = vld [vmem:[#allocation87_spill] sm:$0xff] }
 0x468   :  { %18515 = vst [vmem:[#allocation176_spill] sm:$0xff] %v12748_v61  ;;  %v12803_v59 = vadd.f32 %v12579_v17, %v11969_v47  ;;  %v4199_v58 = vadd.f32 %v12019_v45, %v12385_v40  ;;  %v12809_v25 = vadd.f32 %v12503_v29, %v11997_v6  ;;  %v12812_v13 = vadd.f32 %v12605_v63, %v4160_v55  ;;  %v18534_v47 = vld [vmem:[#allocation221_spill] sm:$0xff]  ;;  %v18565_v19 = vld [vmem:[#allocation287_spill] sm:$0xff] }
 0x469   :  { %18516 = vst [vmem:[#allocation43_spill] sm:$0xff] %v12752_v52  ;;  %v12816_v28 = vadd.f32 %v12605_v63, %v12015_v12  ;;  %v12819_v22 = vadd.f32 %v12503_v29, %v4123_v14  ;;  %v12823_v60 = vadd.f32 %v18534_v47, %v18533_v3  ;;  %v4859_v45 = vadd.f32 %v4858_v53, %v12779_v7  ;;  %v18536_v52 = vld [vmem:[#allocation88_spill] sm:$0xff]  ;;  %v18537_v3 = vld [vmem:[#allocation222_spill] sm:$0xff] }
 0x46a   :  { %18517 = vst [vmem:[#allocation177_spill] sm:$0xff] %v12755_v51  ;;  %v4739_v40 = vadd.f32 %v4738_v23, %v12799_v20  ;;  %v4083_v6 = vadd.f32 %v12043_v16, %v12393_v62  ;;  %v4782_v55 = vadd.f32 %v4781_v38, %v12809_v25  ;;  %v4821_v51 = vadd.f32 %v4820_v46, %v12812_v13  ;;  %v18541_v38 = vld [vmem:[#allocation89_spill] sm:$0xff]  ;;  %v18542_v46 = vld [vmem:[#allocation223_spill] sm:$0xff] }
 0x46b   :  { %18522 = vst [vmem:[#allocation44_spill] sm:$0xff] %v12779_v7  ;;  %v4124_v12 = vadd.f32 %v12065_v37, %v12405_v27  ;;  %v4163_v14 = vadd.f32 %v12089_v43, %v12411_v31  ;;  %v12837_v47 = vadd.f32 %v18537_v3, %v18536_v52  ;;  %v12841_v23 = vadd.f32 %v12407_v56, %v11951_v8  ;;  %v18544_v37 = vld [vmem:[#allocation90_spill] sm:$0xff]  ;;  %v18545_v27 = vld [vmem:[#allocation224_spill] sm:$0xff]  ;;  %v12859_v8 = vpop.f32.mrf.mxu3 }
 0x46c   :  { %18527 = vst [vmem:[#allocation178_spill] sm:$0xff] %v12799_v20  ;;  %v4740_v16 = vadd.f32 %v4739_v40, %v12803_v59  ;;  %v12845_v62 = vadd.f32 %v12407_v56, %v4199_v58  ;;  %v12849_v53 = vadd.f32 %v18542_v46, %v18541_v38  ;;  %v12853_v43 = vadd.f32 %v18545_v27, %v18544_v37  ;;  %v18547_v58 = vld [vmem:[#allocation277_spill] sm:$0xff]  ;;  %v18549_v38 = vld [vmem:[#allocation4_spill] sm:$0xff]  ;;  %v18550_v46 = vld [vmem:[#allocation279_spill] sm:$0xff]  ;;  %v12871_v27 = vpop.f32.mrf.mxu0 }
 0x46d   :  { %18528 = vst [vmem:[#allocation45_spill] sm:$0xff] %v12803_v59  ;;  %v4822_v31 = vadd.f32 %v4821_v51, %v12816_v28  ;;  %v4783_v52 = vadd.f32 %v4782_v55, %v12819_v22  ;;  %v12857_v3 = vpop.f32.mrf.mxu2  ;;  %v4860_v40 = vadd.f32 %v4859_v45, %v12841_v23  ;;  %v12864_v59 = vadd.f32 %v12579_v17, %v18547_v58  ;;  %v12873_v51 = vpop.f32.mrf.mxu1  ;;  %v18553_v55 = vld [vmem:[#allocation278_spill] sm:$0xff] }
 0x46e   :  { %18529 = vst [vmem:[#allocation179_spill] sm:$0xff] %v12809_v25  ;;  %v4200_v20 = vadd.f32 %v18550_v46, %v18549_v38  ;;  %v12869_v37 = vadd.f32 %v12579_v17, %v4083_v6  ;;  %v12877_v7 = vadd.f32 %v12605_v63, %v18553_v55  ;;  %v12880_v45 = vadd.f32 %v12503_v29, %v4124_v12  ;;  %v18559_v6 = vld [vmem:[#allocation91_spill] sm:$0xff]  ;;  %v18560_v46 = vld [vmem:[#allocation225_spill] sm:$0xff]  ;;  %v18562_v55 = vld [vmem:[#allocation138_spill] sm:$0xff] }
 0x46f   :  { %18530 = vst [vmem:[#allocation46_spill] sm:$0xff] %v12812_v13  ;;  %v12887_v38 = vadd.f32 %v12605_v63, %v4163_v14  ;;  %v4741_v13 = vadd.f32 %v4740_v16, %v12864_v59  ;;  %v4861_v61 = vadd.f32 %v4860_v40, %v12845_v62  ;;  %v18566_v14 = vld [vmem:[#allocation142_spill] sm:$0xff]  ;;  %v18572_v40 = vld [vmem:[#allocation280_spill] sm:$0xff] }
 0x470   :  { %18531 = vst [vmem:[#allocation180_spill] sm:$0xff] %v12816_v28  ;;  %v12891_v28 = vadd.f32 %v18560_v46, %v18559_v6  ;;  %v4823_v12 = vadd.f32 %v4822_v31, %v12877_v7  ;;  %v4784_v25 = vadd.f32 %v4783_v52, %v12880_v45  ;;  %v18569_v6 = vld [vmem:[#allocation226_spill] sm:$0xff]  ;;  %v12908_v16 = vadd.f32 %v12407_v56, %v4200_v20  ;;  %v18574_v52 = vld [vmem:[#allocation93_spill] sm:$0xff] }
 0x471   :  { %18532 = vst [vmem:[#allocation47_spill] sm:$0xff] %v12819_v22  ;;  %v4084_v22 = vadd.f32 %v18563_v24, %v18562_v55  ;;  %v12912_v24 = vadd.f32 %v12407_v56, %v18572_v40  ;;  %v4742_v31 = vadd.f32 %v4741_v13, %v12869_v37  ;;  %v18575_v55 = vld [vmem:[#allocation227_spill] sm:$0xff] }
 0x472   :  { %18535 = vst [vmem:[#allocation181_spill] sm:$0xff] %v12823_v60  ;;  %v4862_v20 = vadd.f32 %v4861_v61, %v12908_v16  ;;  %v18580_v40 = vld [vmem:[#allocation283_spill] sm:$0xff] }
 0x473   :  { %18538 = vst [vmem:[#allocation48_spill] sm:$0xff] %v12837_v47  ;;  %v12931_v13 = vadd.f32 %v12579_v17, %v18580_v40  ;;  %v12951_v40 = vpop.f32.mrf.mxu3 }
 0x474   :  { %18539 = vst [vmem:[#allocation182_spill] sm:$0xff] %v12841_v23  ;;  %v18556_v23 = vld [vmem:[#allocation285_spill] sm:$0xff] }
 0x475   :  { %18540 = vst [vmem:[#allocation49_spill] sm:$0xff] %v12845_v62  ;;  %v12884_v58 = vadd.f32 %v12503_v29, %v18556_v23  ;;  %v18564_v23 = vld [vmem:[#allocation5_spill] sm:$0xff]  ;;  %v18584_v62 = vld [vmem:[#allocation286_spill] sm:$0xff] }
 0x476   :  { %18543 = vst [vmem:[#allocation183_spill] sm:$0xff] %v12849_v53  ;;  %v4164_v41 = vadd.f32 %v18565_v19, %v18564_v23  ;;  %v4127_v53 = vadd.f32 %v18567_v5, %v18566_v14  ;;  %v18577_v19 = vld [vmem:[#allocation94_spill] sm:$0xff]  ;;  %v18578_v23 = vld [vmem:[#allocation228_spill] sm:$0xff]  ;;  %v4824_v14 = vadd.f32 %v4823_v12, %v12887_v38 }
 0x477   :  { %18546 = vst [vmem:[#allocation50_spill] sm:$0xff] %v12853_v43  ;;  %v18568_v43 = vld [vmem:[#allocation92_spill] sm:$0xff]  ;;  %v12921_v5 = vadd.f32 %v18578_v23, %v18577_v19  ;;  %v12937_v19 = vadd.f32 %v12503_v29, %v18584_v62  ;;  %v12949_v23 = vpop.f32.mrf.mxu2  ;;  %v4863_v62 = vadd.f32 %v4862_v20, %v12912_v24 }
 0x478   :  { %18548 = vst [vmem:[#allocation184_spill] sm:$0xff] %v12864_v59  ;;  %v12905_v46 = vadd.f32 %v18569_v6, %v18568_v43  ;;  %v12917_v59 = vadd.f32 %v18575_v55, %v18574_v52  ;;  %v4785_v43 = vadd.f32 %v4784_v25, %v12884_v58  ;;  %v12927_v6 = vadd.f32 %v12579_v17, %v4084_v22  ;;  %v18583_v52 = vld [vmem:[#allocation290_spill] sm:$0xff]  ;;  %v18587_v12 = vld [vmem:[#allocation288_spill] sm:$0xff] }
 0x479   :  { %18551 = vst [vmem:[#allocation51_spill] sm:$0xff] %v12869_v37  ;;  %v18582_v37 = vld [vmem:[#allocation139_spill] sm:$0xff]  ;;  %v12940_v25 = vadd.f32 %v12605_v63, %v4164_v41  ;;  %v12944_v61 = vadd.f32 %v12605_v63, %v18587_v12  ;;  %v12947_v22 = vadd.f32 %v12503_v29, %v4127_v53  ;;  %v12961_v12 = vpop.f32.mrf.mxu0  ;;  %v18602_v20 = vld [vmem:[#allocation96_spill] sm:$0xff] }
 0x47a   :  { %18552 = vst [vmem:[#allocation185_spill] sm:$0xff] %v12873_v51  ;;  %v4203_v55 = vadd.f32 %v18583_v52, %v18582_v37  ;;  %v18593_v37 = vld [vmem:[#allocation229_spill] sm:$0xff]  ;;  %v4743_v41 = vadd.f32 %v4742_v31, %v12927_v6  ;;  %v4786_v53 = vadd.f32 %v4785_v43, %v12937_v19 }
 0x47b   :  { %18554 = vst [vmem:[#allocation52_spill] sm:$0xff] %v12877_v7  ;;  %v18595_v7 = vld [vmem:[#allocation294_spill] sm:$0xff] }
 0x47c   :  { %18555 = vst [vmem:[#allocation186_spill] sm:$0xff] %v12880_v45  ;;  %v12963_v45 = vpop.f32.mrf.mxu1  ;;  %v12981_v43 = vadd.f32 %v12407_v56, %v4203_v55  ;;  %v18615_v55 = vld [vmem:[#allocation6_spill] sm:$0xff] }
 0x47d   :  { %18557 = vst [vmem:[#allocation53_spill] sm:$0xff] %v12884_v58 }
 0x47e   :  { %18558 = vst [vmem:[#allocation187_spill] sm:$0xff] %v12887_v38  ;;  %v18594_v38 = vld [vmem:[#allocation141_spill] sm:$0xff] }
 0x47f   :  { %18561 = vst [vmem:[#allocation54_spill] sm:$0xff] %v12891_v28  ;;  %v4087_v58 = vadd.f32 %v18595_v7, %v18594_v38  ;;  %v18599_v28 = vld [vmem:[#allocation299_spill] sm:$0xff]  ;;  %v4744_v38 = vadd.f32 %v4743_v41, %v12931_v13  ;;  %v13031_v51 = vpop.f32.mrf.mxu2 }
 0x480   :  { %18570 = vst [vmem:[#allocation188_spill] sm:$0xff] %v12905_v46  ;;  %v18598_v46 = vld [vmem:[#allocation9_spill] sm:$0xff] }
 0x481   :  { %18571 = vst [vmem:[#allocation55_spill] sm:$0xff] %v12908_v16  ;;  %v18592_v16 = vld [vmem:[#allocation95_spill] sm:$0xff] }
 0x482   :  { %18573 = vst [vmem:[#allocation189_spill] sm:$0xff] %v12912_v24  ;;  %v12955_v52 = vadd.f32 %v18593_v37, %v18592_v16  ;;  %v18600_v16 = vld [vmem:[#allocation144_spill] sm:$0xff]  ;;  %v18601_v37 = vld [vmem:[#allocation33_spill] sm:$0xff]  ;;  %v18603_v24 = vld [vmem:[#allocation230_spill] sm:$0xff] }
 0x483   :  { %18576 = vst [vmem:[#allocation56_spill] sm:$0xff] %v12917_v59  ;;  %v4825_v59 = vadd.f32 %v4824_v14, %v12940_v25  ;;  %v12973_v31 = vadd.f32 %v18603_v24, %v18602_v20  ;;  %v18607_v14 = vld [vmem:[#allocation97_spill] sm:$0xff]  ;;  %v18613_v20 = vld [vmem:[#allocation284_spill] sm:$0xff] }
 0x484   :  { %18579 = vst [vmem:[#allocation190_spill] sm:$0xff] %v12927_v6  ;;  %v18604_v6 = vld [vmem:[#allocation281_spill] sm:$0xff]  ;;  %v12996_v41 = vadd.f32 %v12579_v17, %v18613_v20  ;;  %v18624_v20 = vld [vmem:[#allocation99_spill] sm:$0xff] }
 0x485   :  { %18581 = vst [vmem:[#allocation57_spill] sm:$0xff] %v12931_v13  ;;  %v12977_v7 = vadd.f32 %v12407_v56, %v18604_v6  ;;  %v4826_v24 = vadd.f32 %v4825_v59, %v12944_v61  ;;  %v18616_v13 = vld [vmem:[#allocation291_spill] sm:$0xff] }
 0x486   :  { %18585 = vst [vmem:[#allocation191_spill] sm:$0xff] %v12937_v19 }
 0x487   :  { %18586 = vst [vmem:[#allocation58_spill] sm:$0xff] %v12940_v25  ;;  %v18608_v25 = vld [vmem:[#allocation231_spill] sm:$0xff]  ;;  %v4864_v6 = vadd.f32 %v4863_v62, %v12977_v7 }
 0x488   :  { %18588 = vst [vmem:[#allocation192_spill] sm:$0xff] %v12944_v61  ;;  %v12985_v19 = vadd.f32 %v18608_v25, %v18607_v14  ;;  %v13001_v25 = vadd.f32 %v12579_v17, %v4087_v58  ;;  %v18618_v14 = vld [vmem:[#allocation289_spill] sm:$0xff]  ;;  %v4745_v58 = vadd.f32 %v4744_v38, %v12996_v41  ;;  %v18628_v61 = vld [vmem:[#allocation295_spill] sm:$0xff]  ;;  %v18634_v38 = vld [vmem:[#allocation100_spill] sm:$0xff] }
 0x489   :  { %18589 = vst [vmem:[#allocation59_spill] sm:$0xff] %v12947_v22 }
 0x48a   :  { %18590 = vst [vmem:[#allocation193_spill] sm:$0xff] %v12949_v23  ;;  %v4167_v23 = vadd.f32 %v18601_v37, %v18600_v16  ;;  %v4787_v37 = vadd.f32 %v4786_v53, %v12947_v22  ;;  %v18621_v53 = vld [vmem:[#allocation32_spill] sm:$0xff] }
 0x48b   :  { %18591 = vst [vmem:[#allocation60_spill] sm:$0xff] %v12951_v40  ;;  %v4128_v40 = vadd.f32 %v18599_v28, %v18598_v46  ;;  %v18610_v28 = vld [vmem:[#allocation98_spill] sm:$0xff]  ;;  %v18611_v46 = vld [vmem:[#allocation232_spill] sm:$0xff]  ;;  %v13012_v62 = vadd.f32 %v12503_v29, %v18621_v53  ;;  %v18629_v53 = vld [vmem:[#allocation11_spill] sm:$0xff] }
 0x48c   :  { %18596 = vst [vmem:[#allocation194_spill] sm:$0xff] %v12961_v12  ;;  %v12989_v16 = vadd.f32 %v18611_v46, %v18610_v28  ;;  %v13005_v28 = vadd.f32 %v12605_v63, %v18618_v14  ;;  %v13015_v46 = vadd.f32 %v12605_v63, %v4167_v23  ;;  %v18627_v14 = vld [vmem:[#allocation8_spill] sm:$0xff]  ;;  %v18630_v12 = vld [vmem:[#allocation167_spill] sm:$0xff]  ;;  %v18631_v23 = vld [vmem:[#allocation302_spill] sm:$0xff] }
 0x48d   :  { %18597 = vst [vmem:[#allocation61_spill] sm:$0xff] %v12963_v45  ;;  %v4204_v45 = vadd.f32 %v18616_v13, %v18615_v55  ;;  %v13008_v59 = vadd.f32 %v12503_v29, %v4128_v40  ;;  %v4865_v55 = vadd.f32 %v4864_v6, %v12981_v43  ;;  %v4088_v22 = vadd.f32 %v18628_v61, %v18627_v14  ;;  %v13047_v14 = vpop.f32.mrf.mxu0 }
 0x48e   :  { %18605 = vst [vmem:[#allocation195_spill] sm:$0xff] %v12977_v7  ;;  %v18625_v7 = vld [vmem:[#allocation233_spill] sm:$0xff]  ;;  %v4827_v40 = vadd.f32 %v4826_v24, %v13005_v28  ;;  %v4168_v47 = vadd.f32 %v18630_v12, %v18629_v53  ;;  %v18638_v24 = vld [vmem:[#allocation292_spill] sm:$0xff]  ;;  %v4746_v12 = vadd.f32 %v4745_v58, %v13001_v25 }
 0x48f   :  { %18606 = vst [vmem:[#allocation272_spill] sm:$0xff] %v12981_v43  ;;  %v13019_v13 = vadd.f32 %v18625_v7, %v18624_v20  ;;  %v13033_v7 = vpop.f32.mrf.mxu3  ;;  %v18635_v20 = vld [vmem:[#allocation234_spill] sm:$0xff]  ;;  %v13040_v61 = vadd.f32 %v12407_v56, %v4204_v45  ;;  %v18640_v53 = vld [vmem:[#allocation101_spill] sm:$0xff]  ;;  %v13063_v58 = vadd.f32 %v12579_v17, %v4088_v22 }
 0x490   :  { %18609 = vst [vmem:[#allocation273_spill] sm:$0xff] %v12985_v19  ;;  %v4788_v19 = vadd.f32 %v4787_v37, %v13008_v59  ;;  %v13037_v6 = vadd.f32 %v18635_v20, %v18634_v38  ;;  %v13044_v37 = vadd.f32 %v12407_v56, %v18638_v24  ;;  %v18643_v43 = vld [vmem:[#allocation102_spill] sm:$0xff]  ;;  %v18644_v38 = vld [vmem:[#allocation236_spill] sm:$0xff] }
 0x491   :  { %18612 = vst [vmem:[#allocation62_spill] sm:$0xff] %v12989_v16  ;;  %v4131_v16 = vadd.f32 %v18631_v23, %v12483_v54  ;;  %v13049_v54 = vpop.f32.mrf.mxu1  ;;  %v18641_v23 = vld [vmem:[#allocation235_spill] sm:$0xff]  ;;  %v13057_v20 = vadd.f32 %v18644_v38, %v18643_v43  ;;  %v4866_v24 = vadd.f32 %v4865_v55, %v13040_v61  ;;  %v13074_v43 = vadd.f32 %v12605_v63, %v4168_v47  ;;  %v18655_v55 = vld [vmem:[#allocation37_spill] sm:$0xff] }
 0x492   :  { %18614 = vst [vmem:[#allocation196_spill] sm:$0xff] %v12996_v41  ;;  %v13053_v41 = vadd.f32 %v18641_v23, %v18640_v53  ;;  %v4789_v45 = vadd.f32 %v4788_v19, %v13012_v62  ;;  %v18652_v23 = vld [vmem:[#allocation36_spill] sm:$0xff] }
 0x493   :  { %18617 = vst [vmem:[#allocation63_spill] sm:$0xff] %v13001_v25  ;;  %v18647_v25 = vld [vmem:[#allocation296_spill] sm:$0xff]  ;;  %v13078_v19 = vadd.f32 %v12605_v63, %v18652_v23  ;;  %v13083_v22 = vadd.f32 %v12503_v29, %v4131_v16  ;;  %v4867_v47 = vadd.f32 %v4866_v24, %v13044_v37 }
 0x494   :  { %18619 = vst [vmem:[#allocation197_spill] sm:$0xff] %v13005_v28  ;;  %v4828_v28 = vadd.f32 %v4827_v40, %v13015_v46  ;;  %v18654_v40 = vld [vmem:[#allocation145_spill] sm:$0xff]  ;;  %v18669_v24 = vld [vmem:[#allocation304_spill] sm:$0xff] }
 0x495   :  { %18620 = vst [vmem:[#allocation64_spill] sm:$0xff] %v13008_v59  ;;  %v13067_v59 = vadd.f32 %v12579_v17, %v18647_v25  ;;  %v4207_v38 = vadd.f32 %v18655_v55, %v18654_v40  ;;  %v18658_v25 = vld [vmem:[#allocation237_spill] sm:$0xff]  ;;  %v18664_v55 = vld [vmem:[#allocation14_spill] sm:$0xff] }
 0x496   :  { %18622 = vst [vmem:[#allocation198_spill] sm:$0xff] %v13012_v62  ;;  %v18660_v62 = vld [vmem:[#allocation104_spill] sm:$0xff]  ;;  %v18663_v40 = vld [vmem:[#allocation41_spill] sm:$0xff] }
 0x497   :  { %18623 = vst [vmem:[#allocation65_spill] sm:$0xff] %v13015_v46  ;;  %v4091_v16 = vadd.f32 %v18663_v40, %v12467_v48 }
 0x498   :  { %18626 = vst [vmem:[#allocation199_spill] sm:$0xff] %v13019_v13 }
 0x499   :  { %18632 = vst [vmem:[#allocation66_spill] sm:$0xff] %v13031_v51  ;;  %v4747_v51 = vadd.f32 %v4746_v12, %v13063_v58  ;;  %v18670_v12 = vld [vmem:[#allocation149_spill] sm:$0xff] }
 0x49a   :  { %18633 = vst [vmem:[#allocation200_spill] sm:$0xff] %v13033_v7  ;;  %v18649_v7 = vld [vmem:[#allocation166_spill] sm:$0xff] }
 0x49b   :  { %18636 = vst [vmem:[#allocation67_spill] sm:$0xff] %v13037_v6  ;;  %v13071_v53 = vadd.f32 %v12503_v29, %v18649_v7  ;;  %v18661_v7 = vld [vmem:[#allocation238_spill] sm:$0xff]  ;;  %v18665_v6 = vld [vmem:[#allocation303_spill] sm:$0xff] }
 0x49c   :  { %18637 = vst [vmem:[#allocation201_spill] sm:$0xff] %v13040_v61  ;;  %v18657_v61 = vld [vmem:[#allocation103_spill] sm:$0xff]  ;;  %v4132_v13 = vadd.f32 %v18665_v6, %v18664_v55  ;;  %v13116_v6 = vadd.f32 %v12407_v56, %v4207_v38  ;;  %v13119_v55 = vpop.f32.mrf.mxu2 }
 0x49d   :  { %18639 = vst [vmem:[#allocation68_spill] sm:$0xff] %v13044_v37  ;;  %v13087_v46 = vadd.f32 %v18658_v25, %v18657_v61  ;;  %v4790_v23 = vadd.f32 %v4789_v45, %v13071_v53  ;;  %v18666_v61 = vld [vmem:[#allocation293_spill] sm:$0xff] }
 0x49e   :  { %18642 = vst [vmem:[#allocation202_spill] sm:$0xff] %v13053_v41  ;;  %v13091_v41 = vadd.f32 %v18661_v7, %v18660_v62  ;;  %v13103_v25 = vadd.f32 %v12407_v56, %v18666_v61  ;;  %v4748_v62 = vadd.f32 %v4747_v51, %v13067_v59  ;;  %v18668_v7 = vld [vmem:[#allocation148_spill] sm:$0xff]  ;;  %v13121_v51 = vpop.f32.mrf.mxu3  ;;  %v18677_v61 = vld [vmem:[#allocation106_spill] sm:$0xff] }
 0x49f   :  { %18645 = vst [vmem:[#allocation69_spill] sm:$0xff] %v13057_v20  ;;  %v4829_v20 = vadd.f32 %v4828_v28, %v13074_v43  ;;  %v4133_v37 = vadd.f32 %v18669_v24, %v18668_v7  ;;  %v18673_v28 = vld [vmem:[#allocation239_spill] sm:$0xff]  ;;  %v4791_v40 = vadd.f32 %v4790_v23, %v13083_v22  ;;  %v18678_v7 = vld [vmem:[#allocation240_spill] sm:$0xff]  ;;  %v13138_v23 = vpop.f32.mrf.mxu1 }
 0x4a0   :  { %18646 = vst [vmem:[#allocation203_spill] sm:$0xff] %v13063_v58  ;;  %v18671_v58 = vld [vmem:[#allocation306_spill] sm:$0xff]  ;;  %v13125_v24 = vadd.f32 %v18678_v7, %v18677_v61  ;;  %v18689_v61 = vld [vmem:[#allocation12_spill] sm:$0xff]  ;;  %v18690_v7 = vld [vmem:[#allocation171_spill] sm:$0xff] }
 0x4a1   :  { %18648 = vst [vmem:[#allocation70_spill] sm:$0xff] %v13067_v59  ;;  %v4171_v45 = vadd.f32 %v18671_v58, %v18670_v12  ;;  %v4830_v48 = vadd.f32 %v4829_v20, %v13078_v19  ;;  %v18680_v58 = vld [vmem:[#allocation107_spill] sm:$0xff]  ;;  %v18681_v12 = vld [vmem:[#allocation241_spill] sm:$0xff] }
 0x4a2   :  { %18650 = vst [vmem:[#allocation204_spill] sm:$0xff] %v13071_v53  ;;  %v18672_v53 = vld [vmem:[#allocation105_spill] sm:$0xff]  ;;  %v13129_v59 = vadd.f32 %v18681_v12, %v18680_v58  ;;  %v13147_v58 = vadd.f32 %v12579_v17, %v4091_v16  ;;  %v18693_v12 = vld [vmem:[#allocation108_spill] sm:$0xff] }
 0x4a3   :  { %18651 = vst [vmem:[#allocation71_spill] sm:$0xff] %v13074_v43  ;;  %v13112_v43 = vadd.f32 %v18673_v28, %v18672_v53  ;;  %v4868_v53 = vadd.f32 %v4867_v47, %v13103_v25  ;;  %v18683_v20 = vld [vmem:[#allocation297_spill] sm:$0xff]  ;;  %v13136_v28 = vpop.f32.mrf.mxu0  ;;  %v13150_v47 = vadd.f32 %v12503_v29, %v4132_v13 }
 0x4a4   :  { %18653 = vst [vmem:[#allocation205_spill] sm:$0xff] %v13078_v19  ;;  %v13134_v38 = vadd.f32 %v12579_v17, %v18683_v20  ;;  %v18687_v19 = vld [vmem:[#allocation170_spill] sm:$0xff] }
 0x4a5   :  { %18656 = vst [vmem:[#allocation72_spill] sm:$0xff] %v13083_v22  ;;  %v13142_v22 = vadd.f32 %v12605_v63, %v18687_v19  ;;  %v18694_v20 = vld [vmem:[#allocation242_spill] sm:$0xff]  ;;  %v13161_v19 = vadd.f32 %v12605_v63, %v4171_v45  ;;  %v4869_v16 = vadd.f32 %v4868_v53, %v13116_v6  ;;  %v18708_v53 = vld [vmem:[#allocation40_spill] sm:$0xff] }
 0x4a6   :  { %18659 = vst [vmem:[#allocation206_spill] sm:$0xff] %v13087_v46  ;;  %v4792_v46 = vadd.f32 %v4791_v40, %v13150_v47  ;;  %v18706_v45 = vld [vmem:[#allocation318_spill] sm:$0xff] }
 0x4a7   :  { %18662 = vst [vmem:[#allocation73_spill] sm:$0xff] %v13091_v41  ;;  %v18699_v41 = vld [vmem:[#allocation175_spill] sm:$0xff]  ;;  %v4135_v60 = vadd.f32 %v18706_v45, %v12577_v32 }
 0x4a8   :  { %18667 = vst [vmem:[#allocation207_spill] sm:$0xff] %v13103_v25  ;;  %v13154_v25 = vadd.f32 %v18694_v20, %v18693_v12  ;;  %v18701_v12 = vld [vmem:[#allocation305_spill] sm:$0xff] }
 0x4a9   :  { %18674 = vst [vmem:[#allocation74_spill] sm:$0xff] %v13112_v43  ;;  %v4208_v43 = vadd.f32 %v18690_v7, %v18689_v61  ;;  %v4831_v61 = vadd.f32 %v4830_v48, %v13142_v22  ;;  %v18698_v7 = vld [vmem:[#allocation146_spill] sm:$0xff] }
 0x4aa   :  { %18675 = vst [vmem:[#allocation208_spill] sm:$0xff] %v13116_v6  ;;  %v4092_v13 = vadd.f32 %v18699_v41, %v18698_v7  ;;  %v13181_v41 = vadd.f32 %v12407_v56, %v18708_v53  ;;  %v18710_v7 = vld [vmem:[#allocation13_spill] sm:$0xff]  ;;  %v18717_v53 = vld [vmem:[#allocation174_spill] sm:$0xff] }
 0x4ab   :  { %18676 = vst [vmem:[#allocation274_spill] sm:$0xff] %v13121_v51  ;;  %v18705_v51 = vld [vmem:[#allocation308_spill] sm:$0xff]  ;;  %v13177_v48 = vadd.f32 %v12407_v56, %v4208_v43  ;;  %v18712_v6 = vld [vmem:[#allocation109_spill] sm:$0xff]  ;;  %v4832_v43 = vadd.f32 %v4831_v61, %v13161_v19 }
 0x4ac   :  { %18679 = vst [vmem:[#allocation75_spill] sm:$0xff] %v13125_v24  ;;  %v13158_v24 = vadd.f32 %v12503_v29, %v4133_v37  ;;  %v18704_v37 = vld [vmem:[#allocation150_spill] sm:$0xff] }
 0x4ad   :  { %18682 = vst [vmem:[#allocation209_spill] sm:$0xff] %v13129_v59  ;;  %v4749_v59 = vadd.f32 %v4748_v62, %v13134_v38  ;;  %v18703_v62 = vld [vmem:[#allocation307_spill] sm:$0xff]  ;;  %v4870_v45 = vadd.f32 %v4869_v16, %v13177_v48 }
 0x4ae   :  { %18684 = vst [vmem:[#allocation276_spill] sm:$0xff] %v13134_v38  ;;  %v4793_v32 = vadd.f32 %v4792_v46, %v13158_v24 }
 0x4af   :  { %18685 = vst [vmem:[#allocation76_spill] sm:$0xff] %v13136_v28  ;;  %v4173_v28 = vadd.f32 %v18705_v51, %v18704_v37  ;;  %v4750_v40 = vadd.f32 %v4749_v59, %v13147_v58  ;;  %v18715_v51 = vld [vmem:[#allocation110_spill] sm:$0xff]  ;;  %v18716_v37 = vld [vmem:[#allocation244_spill] sm:$0xff]  ;;  %v13199_v59 = vadd.f32 %v12407_v56, %v18717_v53  ;;  %v13224_v53 = vpop.f32.mrf.mxu1 }
 0x4b0   :  { %18686 = vst [vmem:[#allocation210_spill] sm:$0xff] %v13138_v23  ;;  %v18700_v23 = vld [vmem:[#allocation15_spill] sm:$0xff] }
 0x4b1   :  { %18688 = vst [vmem:[#allocation77_spill] sm:$0xff] %v13142_v22  ;;  %v4134_v20 = vadd.f32 %v18701_v12, %v18700_v23  ;;  %v18711_v23 = vld [vmem:[#allocation300_spill] sm:$0xff]  ;;  %v13192_v22 = vadd.f32 %v18716_v37, %v18715_v51  ;;  %v13208_v51 = vpop.f32.mrf.mxu3  ;;  %v13217_v16 = vadd.f32 %v12605_v63, %v4173_v28  ;;  %v13220_v37 = vadd.f32 %v12503_v29, %v4135_v60  ;;  %v18732_v60 = vld [vmem:[#allocation17_spill] sm:$0xff] }
 0x4b2   :  { %18691 = vst [vmem:[#allocation211_spill] sm:$0xff] %v13147_v58  ;;  %v4093_v12 = vadd.f32 %v18711_v23, %v18710_v7  ;;  %v13202_v7 = vadd.f32 %v12579_v17, %v4092_v13  ;;  %v13222_v13 = vpop.f32.mrf.mxu0  ;;  %v18730_v58 = vld [vmem:[#allocation147_spill] sm:$0xff] }
 0x4b3   :  { %18692 = vst [vmem:[#allocation78_spill] sm:$0xff] %v13150_v47  ;;  %v13211_v46 = vadd.f32 %v12503_v29, %v4134_v20 }
 0x4b4   :  { %18695 = vst [vmem:[#allocation212_spill] sm:$0xff] %v13154_v25  ;;  %v18702_v25 = vld [vmem:[#allocation16_spill] sm:$0xff]  ;;  %v13229_v20 = vadd.f32 %v12579_v17, %v4093_v12 }
 0x4b5   :  { %18696 = vst [vmem:[#allocation79_spill] sm:$0xff] %v13158_v24  ;;  %v4172_v38 = vadd.f32 %v18703_v62, %v18702_v25  ;;  %v18713_v25 = vld [vmem:[#allocation243_spill] sm:$0xff]  ;;  %v4794_v28 = vadd.f32 %v4793_v32, %v13211_v46  ;;  %v18733_v24 = vld [vmem:[#allocation309_spill] sm:$0xff] }
 0x4b6   :  { %18697 = vst [vmem:[#allocation213_spill] sm:$0xff] %v13161_v19  ;;  %v13188_v62 = vadd.f32 %v18713_v25, %v18712_v6  ;;  %v18720_v6 = vld [vmem:[#allocation310_spill] sm:$0xff]  ;;  %v13206_v25 = vpop.f32.mrf.mxu2  ;;  %v4174_v47 = vadd.f32 %v18733_v24, %v18732_v60  ;;  %v18744_v24 = vld [vmem:[#allocation112_spill] sm:$0xff] }
 0x4b7   :  { %18707 = vst [vmem:[#allocation80_spill] sm:$0xff] %v13177_v48  ;;  %v4211_v23 = vadd.f32 %v18720_v6, %v12527_v44  ;;  %v13214_v61 = vadd.f32 %v12605_v63, %v4172_v38  ;;  %v4871_v44 = vadd.f32 %v4870_v45, %v13181_v41  ;;  %v4751_v6 = vadd.f32 %v4750_v40, %v13202_v7  ;;  %v18731_v38 = vld [vmem:[#allocation301_spill] sm:$0xff]  ;;  %v18737_v40 = vld [vmem:[#allocation151_spill] sm:$0xff]  ;;  %v18745_v60 = vld [vmem:[#allocation246_spill] sm:$0xff] }
 0x4b8   :  { %18709 = vst [vmem:[#allocation214_spill] sm:$0xff] %v13181_v41  ;;  %v4094_v48 = vadd.f32 %v18731_v38, %v18730_v58  ;;  %v18739_v41 = vld [vmem:[#allocation320_spill] sm:$0xff]  ;;  %v18740_v58 = vld [vmem:[#allocation159_spill] sm:$0xff]  ;;  %v18741_v38 = vld [vmem:[#allocation322_spill] sm:$0xff] }
 0x4b9   :  { %18714 = vst [vmem:[#allocation81_spill] sm:$0xff] %v13188_v62  ;;  %v4833_v19 = vadd.f32 %v4832_v43, %v13214_v61  ;;  %v18734_v62 = vld [vmem:[#allocation158_spill] sm:$0xff]  ;;  %v13240_v45 = vadd.f32 %v12407_v56, %v4211_v23  ;;  %v4175_v32 = vadd.f32 %v18741_v38, %v18740_v58  ;;  %v18743_v43 = vld [vmem:[#allocation245_spill] sm:$0xff]  ;;  %v4795_v23 = vadd.f32 %v4794_v28, %v13220_v37 }
 0x4ba   :  { %18718 = vst [vmem:[#allocation215_spill] sm:$0xff] %v13199_v59  ;;  %v13265_v58 = vadd.f32 %v12579_v17, %v4094_v48  ;;  %v18751_v38 = vld [vmem:[#allocation18_spill] sm:$0xff] }
 0x4bb   :  { %18719 = vst [vmem:[#allocation82_spill] sm:$0xff] %v13202_v7  ;;  %v18738_v7 = vld [vmem:[#allocation311_spill] sm:$0xff] }
 0x4bc   :  { %18721 = vst [vmem:[#allocation216_spill] sm:$0xff] %v13206_v25  ;;  %v4212_v12 = vadd.f32 %v18738_v7, %v18737_v40  ;;  %v13254_v25 = vadd.f32 %v18745_v60, %v18744_v24  ;;  %v18747_v7 = vld [vmem:[#allocation247_spill] sm:$0xff]  ;;  %v18754_v60 = vld [vmem:[#allocation314_spill] sm:$0xff] }
 0x4bd   :  { %18722 = vst [vmem:[#allocation275_spill] sm:$0xff] %v13208_v51  ;;  %v18735_v51 = vld [vmem:[#allocation319_spill] sm:$0xff] }
 0x4be   :  { %18723 = vst [vmem:[#allocation83_spill] sm:$0xff] %v13211_v46  ;;  %v18742_v46 = vld [vmem:[#allocation111_spill] sm:$0xff] }
 0x4bf   :  { %18724 = vst [vmem:[#allocation217_spill] sm:$0xff] %v13214_v61  ;;  %v13250_v61 = vadd.f32 %v18743_v43, %v18742_v46  ;;  %v13268_v46 = vadd.f32 %v12605_v63, %v4174_v47  ;;  %v18752_v43 = vld [vmem:[#allocation312_spill] sm:$0xff]  ;;  %v13285_v47 = vadd.f32 %v12605_v63, %v4175_v32  ;;  %v18766_v32 = vld [vmem:[#allocation25_spill] sm:$0xff] }
 0x4c0   :  { %18725 = vst [vmem:[#allocation84_spill] sm:$0xff] %v13217_v16  ;;  %v4213_v24 = vadd.f32 %v18752_v43, %v18751_v38  ;;  %v18760_v43 = vld [vmem:[#allocation152_spill] sm:$0xff] }
 0x4c1   :  { %18726 = vst [vmem:[#allocation218_spill] sm:$0xff] %v13220_v37 }
 0x4c2   :  { %18727 = vst [vmem:[#allocation85_spill] sm:$0xff] %v13222_v13  ;;  %v4137_v13 = vadd.f32 %v18739_v41, %v12595_v0  ;;  %v4872_v0 = vadd.f32 %v4871_v44, %v13199_v59  ;;  %v4752_v41 = vadd.f32 %v4751_v6, %v13229_v20  ;;  %v13279_v44 = vadd.f32 %v12407_v56, %v4212_v12  ;;  %v13287_v6 = vpop.f32.mrf.mxu2  ;;  %v18767_v59 = vld [vmem:[#allocation321_spill] sm:$0xff] }
 0x4c3   :  { %18728 = vst [vmem:[#allocation219_spill] sm:$0xff] %v13224_v53  ;;  %v4136_v53 = vadd.f32 %v18735_v51, %v18734_v62  ;;  %v4834_v62 = vadd.f32 %v4833_v19, %v13217_v16  ;;  %v18746_v51 = vld [vmem:[#allocation113_spill] sm:$0xff]  ;;  %v18753_v19 = vld [vmem:[#allocation19_spill] sm:$0xff]  ;;  %v4138_v37 = vadd.f32 %v18767_v59, %v18766_v32  ;;  %v18778_v32 = vld [vmem:[#allocation22_spill] sm:$0xff] }
 0x4c4   :  { %18729 = vst [vmem:[#allocation86_spill] sm:$0xff] %v13229_v20  ;;  %v13260_v40 = vadd.f32 %v18747_v7, %v18746_v51  ;;  %v4095_v28 = vadd.f32 %v18754_v60, %v18753_v19  ;;  %v4873_v51 = vadd.f32 %v4872_v0, %v13240_v45  ;;  %v13282_v48 = vadd.f32 %v12503_v29, %v4137_v13  ;;  %v13289_v7 = vpop.f32.mrf.mxu3  ;;  %v18762_v60 = vld [vmem:[#allocation153_spill] sm:$0xff]  ;;  %v18763_v0 = vld [vmem:[#allocation315_spill] sm:$0xff]  ;;  %v13299_v13 = vpop.f32.mrf.mxu1 }
 0x4c5   :  { %18736 = vst [vmem:[#allocation220_spill] sm:$0xff] %v13240_v45  ;;  %v13275_v16 = vadd.f32 %v12503_v29, %v4136_v53  ;;  %v4835_v38 = vadd.f32 %v4834_v62, %v13268_v46  ;;  %v18761_v53 = vld [vmem:[#allocation313_spill] sm:$0xff]  ;;  %v4096_v20 = vadd.f32 %v18763_v0, %v18762_v60  ;;  %v13297_v45 = vpop.f32.mrf.mxu0  ;;  %v18769_v62 = vld [vmem:[#allocation140_spill] sm:$0xff] }
 0x4c6   :  { %18748 = vst [vmem:[#allocation87_spill] sm:$0xff] %v13260_v40  ;;  %v4214_v19 = vadd.f32 %v18761_v53, %v18760_v43  ;;  %v18768_v40 = vld [vmem:[#allocation323_spill] sm:$0xff]  ;;  %v4139_v43 = vadd.f32 %v12691_v1, %v12704_v33  ;;  %v18770_v53 = vld [vmem:[#allocation114_spill] sm:$0xff]  ;;  %v18771_v60 = vld [vmem:[#allocation248_spill] sm:$0xff]  ;;  %v13321_v59 = vadd.f32 %v12579_v17, %v4095_v28 }
 0x4c7   :  { %18749 = vst [vmem:[#allocation221_spill] sm:$0xff] %v13265_v58  ;;  %v4796_v12 = vadd.f32 %v4795_v23, %v13275_v16  ;;  %v13311_v0 = vadd.f32 %v18771_v60, %v18770_v53  ;;  %v18772_v23 = vld [vmem:[#allocation115_spill] sm:$0xff]  ;;  %v4836_v1 = vadd.f32 %v4835_v38, %v13285_v47  ;;  %v18780_v53 = vld [vmem:[#allocation160_spill] sm:$0xff] }
 0x4c8   :  { %18750 = vst [vmem:[#allocation88_spill] sm:$0xff] %v13268_v46  ;;  %v4177_v46 = vadd.f32 %v18769_v62, %v12613_v50  ;;  %v4874_v50 = vadd.f32 %v4873_v51, %v13279_v44  ;;  %v18781_v28 = vld [vmem:[#allocation143_spill] sm:$0xff] }
 0x4c9   :  { %18755 = vst [vmem:[#allocation222_spill] sm:$0xff] %v13275_v16  ;;  %v18773_v16 = vld [vmem:[#allocation249_spill] sm:$0xff]  ;;  %v4797_v33 = vadd.f32 %v4796_v12, %v13282_v48  ;;  %v4215_v60 = vadd.f32 %v18781_v28, %v18780_v53  ;;  %v18788_v53 = vld [vmem:[#allocation26_spill] sm:$0xff]  ;;  %v18789_v28 = vld [vmem:[#allocation7_spill] sm:$0xff] }
 0x4ca   :  { %18756 = vst [vmem:[#allocation89_spill] sm:$0xff] %v13279_v44  ;;  %v13344_v38 = vadd.f32 %v12605_v63, %v4177_v46  ;;  %v4140_v46 = vadd.f32 %v12693_v21, %v12713_v26  ;;  %v13361_v44 = vpop.f32.mrf.mxu2 }
 0x4cb   :  { %18757 = vst [vmem:[#allocation223_spill] sm:$0xff] %v13282_v48 }
 0x4cc   :  { %18758 = vst [vmem:[#allocation90_spill] sm:$0xff] %v13285_v47  ;;  %v13377_v21 = vpop.f32.mrf.mxu1  ;;  %v18801_v47 = vld [vmem:[#allocation30_spill] sm:$0xff] }
 0x4cd   :  { %18759 = vst [vmem:[#allocation224_spill] sm:$0xff] %v13289_v7  ;;  %v4176_v7 = vadd.f32 %v18768_v40, %v12609_v15  ;;  %v4753_v15 = vadd.f32 %v4752_v41, %v13265_v58  ;;  %v13328_v40 = vadd.f32 %v12407_v56, %v4214_v19  ;;  %v13338_v41 = vadd.f32 %v12503_v29, %v4138_v37  ;;  %v13375_v26 = vpop.f32.mrf.mxu0 }
 0x4ce   :  { %18764 = vst [vmem:[#allocation277_spill] sm:$0xff] %v13297_v45  ;;  %v13315_v45 = vadd.f32 %v18773_v16, %v18772_v23  ;;  %v13331_v16 = vadd.f32 %v12579_v17, %v4096_v20  ;;  %v13347_v19 = vadd.f32 %v12503_v29, %v4139_v43  ;;  %v18786_v23 = vld [vmem:[#allocation156_spill] sm:$0xff]  ;;  %v4178_v37 = vadd.f32 %v18789_v28, %v18788_v53 }
 0x4cf   :  { %18765 = vst [vmem:[#allocation4_spill] sm:$0xff] %v13299_v13  ;;  %v13318_v13 = vadd.f32 %v12407_v56, %v4213_v24  ;;  %v18779_v24 = vld [vmem:[#allocation316_spill] sm:$0xff]  ;;  %v13341_v51 = vadd.f32 %v12605_v63, %v4176_v7  ;;  %v4754_v12 = vadd.f32 %v4753_v15, %v13321_v59  ;;  %v4798_v58 = vadd.f32 %v4797_v33, %v13338_v41  ;;  %v18793_v33 = vld [vmem:[#allocation10_spill] sm:$0xff] }
 0x4d0   :  { %18775 = vst [vmem:[#allocation278_spill] sm:$0xff] %v13321_v59  ;;  %v4097_v62 = vadd.f32 %v18779_v24, %v18778_v32  ;;  %v18787_v32 = vld [vmem:[#allocation317_spill] sm:$0xff]  ;;  %v4141_v43 = vadd.f32 %v12765_v2, %v12717_v30  ;;  %v18794_v30 = vld [vmem:[#allocation116_spill] sm:$0xff]  ;;  %v18795_v2 = vld [vmem:[#allocation250_spill] sm:$0xff] }
 0x4d1   :  { %18774 = vst [vmem:[#allocation279_spill] sm:$0xff] %v13318_v13  ;;  %v4875_v20 = vadd.f32 %v4874_v50, %v13318_v13  ;;  %v4098_v24 = vadd.f32 %v18787_v32, %v18786_v23  ;;  %v4837_v7 = vadd.f32 %v4836_v1, %v13341_v51  ;;  %v13363_v50 = vpop.f32.mrf.mxu3  ;;  %v13369_v23 = vadd.f32 %v12407_v56, %v4215_v60  ;;  %v18792_v32 = vld [vmem:[#allocation28_spill] sm:$0xff]  ;;  %v18796_v59 = vld [vmem:[#allocation117_spill] sm:$0xff] }
 0x4d2   :  { %18776 = vst [vmem:[#allocation285_spill] sm:$0xff] %v13328_v40  ;;  %v13366_v15 = vadd.f32 %v12579_v17, %v4097_v62  ;;  %v4216_v53 = vadd.f32 %v18793_v33, %v18792_v32  ;;  %v4179_v1 = vadd.f32 %v12782_v18, %v12727_v11  ;;  %v13381_v28 = vadd.f32 %v18795_v2, %v18794_v30  ;;  %v18797_v62 = vld [vmem:[#allocation251_spill] sm:$0xff]  ;;  %v18800_v30 = vld [vmem:[#allocation21_spill] sm:$0xff] }
 0x4d3   :  { %18777 = vst [vmem:[#allocation91_spill] sm:$0xff] %v13331_v16  ;;  %v13385_v13 = vadd.f32 %v18797_v62, %v18796_v59  ;;  %v4838_v60 = vadd.f32 %v4837_v7, %v13344_v38  ;;  %v4876_v32 = vadd.f32 %v4875_v20, %v13328_v40  ;;  %v4755_v11 = vadd.f32 %v4754_v12, %v13331_v16  ;;  %v18802_v59 = vld [vmem:[#allocation23_spill] sm:$0xff] }
 0x4d4   :  { %18782 = vst [vmem:[#allocation225_spill] sm:$0xff] %v13338_v41  ;;  %v13392_v18 = vadd.f32 %v12579_v17, %v4098_v24  ;;  %v13395_v33 = vadd.f32 %v12605_v63, %v4178_v37  ;;  %v4217_v2 = vadd.f32 %v18800_v30, %v12646_v4  ;;  %v4099_v62 = vadd.f32 %v18802_v59, %v18801_v47  ;;  %v18807_v30 = vld [vmem:[#allocation163_spill] sm:$0xff] }
 0x4d5   :  { %18783 = vst [vmem:[#allocation138_spill] sm:$0xff] %v13341_v51  ;;  %v4799_v51 = vadd.f32 %v4798_v58, %v13347_v19  ;;  %v13402_v7 = vadd.f32 %v12503_v29, %v4140_v46  ;;  %v13405_v58 = vadd.f32 %v12503_v29, %v4141_v43  ;;  %v4756_v20 = vadd.f32 %v4755_v11, %v13366_v15  ;;  %v18808_v47 = vld [vmem:[#allocation155_spill] sm:$0xff]  ;;  %v18810_v11 = vld [vmem:[#allocation157_spill] sm:$0xff] }
 0x4d6   :  { %18784 = vst [vmem:[#allocation282_spill] sm:$0xff] %v13344_v38  ;;  %v4877_v12 = vadd.f32 %v4876_v32, %v13369_v23  ;;  %v13410_v24 = vadd.f32 %v12407_v56, %v4216_v53  ;;  %v13413_v37 = vadd.f32 %v12605_v63, %v4179_v1  ;;  %v4839_v4 = vadd.f32 %v4838_v60, %v13395_v33  ;;  %v18809_v16 = vld [vmem:[#allocation31_spill] sm:$0xff]  ;;  %v18811_v32 = vld [vmem:[#allocation118_spill] sm:$0xff] }
 0x4d7   :  { %18785 = vst [vmem:[#allocation5_spill] sm:$0xff] %v13347_v19  ;;  %v4218_v59 = vadd.f32 %v18808_v47, %v18807_v30  ;;  %v4800_v46 = vadd.f32 %v4799_v51, %v13402_v7  ;;  %v4142_v43 = vadd.f32 %v12767_v10, %v12723_v39  ;;  %v4180_v53 = vadd.f32 %v12784_v36, %v12771_v49  ;;  %v18816_v36 = vld [vmem:[#allocation253_spill] sm:$0xff] }
 0x4d8   :  { %18790 = vst [vmem:[#allocation287_spill] sm:$0xff] %v13366_v15  ;;  %v4100_v15 = vadd.f32 %v18810_v11, %v18809_v16  ;;  %v4181_v1 = vadd.f32 %v12857_v3, %v12775_v57  ;;  %v4143_v60 = vadd.f32 %v13047_v14, %v12921_v5  ;;  %v13434_v51 = vadd.f32 %v12407_v56, %v4217_v2  ;;  %v13440_v16 = vpop.f32.mrf.mxu2  ;;  %v18815_v57 = vld [vmem:[#allocation119_spill] sm:$0xff]  ;;  %v13451_v2 = vpop.f32.mrf.mxu0 }
 0x4d9   :  { %18791 = vst [vmem:[#allocation142_spill] sm:$0xff] %v13369_v23  ;;  %v18812_v23 = vld [vmem:[#allocation252_spill] sm:$0xff]  ;;  %v13437_v39 = vadd.f32 %v12579_v17, %v4099_v62  ;;  %v4801_v10 = vadd.f32 %v4800_v46, %v13405_v58  ;;  %v13442_v49 = vpop.f32.mrf.mxu3  ;;  %v13446_v3 = vadd.f32 %v18816_v36, %v18815_v57  ;;  %v4757_v5 = vadd.f32 %v4756_v20, %v13392_v18  ;;  %v13453_v62 = vpop.f32.mrf.mxu1  ;;  %v18824_v57 = vld [vmem:[#allocation35_spill] sm:$0xff] }
 0x4da   :  { %18798 = vst [vmem:[#allocation298_spill] sm:$0xff] %v13392_v18  ;;  %v13431_v30 = vadd.f32 %v18812_v23, %v18811_v32  ;;  %v4878_v14 = vadd.f32 %v4877_v12, %v13410_v24  ;;  %v4840_v23 = vadd.f32 %v4839_v4, %v13413_v37  ;;  %v13456_v47 = vadd.f32 %v12407_v56, %v4218_v59  ;;  %v18831_v18 = vld [vmem:[#allocation120_spill] sm:$0xff] }
 0x4db   :  { %18799 = vst [vmem:[#allocation92_spill] sm:$0xff] %v13395_v33  ;;  %v4101_v46 = vadd.f32 %v12675_v9, %v12681_v35  ;;  %v13461_v11 = vadd.f32 %v12503_v29, %v4142_v43  ;;  %v4219_v20 = vadd.f32 %v12871_v27, %v12792_v42  ;;  %v13466_v12 = vadd.f32 %v12579_v17, %v4100_v15  ;;  %v18823_v43 = vld [vmem:[#allocation169_spill] sm:$0xff] }
 0x4dc   :  { %18803 = vst [vmem:[#allocation226_spill] sm:$0xff] %v13402_v7  ;;  %v13469_v4 = vadd.f32 %v12605_v63, %v4180_v53  ;;  %v13472_v32 = vadd.f32 %v12605_v63, %v4181_v1  ;;  %v13475_v59 = vadd.f32 %v12503_v29, %v4143_v60  ;;  %v4879_v35 = vadd.f32 %v4878_v14, %v13434_v51  ;;  %v18827_v14 = vld [vmem:[#allocation181_spill] sm:$0xff] }
 0x4dd   :  { %18804 = vst [vmem:[#allocation280_spill] sm:$0xff] %v13405_v58  ;;  %v4758_v9 = vadd.f32 %v4757_v5, %v13437_v39  ;;  %v4102_v36 = vadd.f32 %v18824_v57, %v18823_v43  ;;  %v4802_v42 = vadd.f32 %v4801_v10, %v13461_v11  ;;  %v4182_v15 = vadd.f32 %v12859_v8, %v12788_v34  ;;  %v18828_v43 = vld [vmem:[#allocation185_spill] sm:$0xff]  ;;  %v18829_v57 = vld [vmem:[#allocation62_spill] sm:$0xff] }
 0x4de   :  { %18805 = vst [vmem:[#allocation93_spill] sm:$0xff] %v13410_v24  ;;  %v4841_v27 = vadd.f32 %v4840_v23, %v13469_v4  ;;  %v4144_v53 = vadd.f32 %v13049_v54, %v12955_v52  ;;  %v4145_v1 = vadd.f32 %v13119_v55, %v12973_v31  ;;  %v13490_v60 = vadd.f32 %v12579_v17, %v4101_v46  ;;  %v18830_v23 = vld [vmem:[#allocation76_spill] sm:$0xff]  ;;  %v18832_v34 = vld [vmem:[#allocation254_spill] sm:$0xff]  ;;  %v18833_v52 = vld [vmem:[#allocation121_spill] sm:$0xff] }
 0x4df   :  { %18806 = vst [vmem:[#allocation227_spill] sm:$0xff] %v13413_v37  ;;  %v13493_v5 = vadd.f32 %v12407_v56, %v4219_v20  ;;  %v4220_v10 = vadd.f32 %v18828_v43, %v18827_v14  ;;  %v13501_v8 = vadd.f32 %v18832_v34, %v18831_v18  ;;  %v18834_v54 = vld [vmem:[#allocation255_spill] sm:$0xff]  ;;  %v4803_v55 = vadd.f32 %v4802_v42, %v13475_v59  ;;  %v18836_v43 = vld [vmem:[#allocation48_spill] sm:$0xff] }
 0x4e0   :  { %18813 = vst [vmem:[#allocation94_spill] sm:$0xff] %v13434_v51  ;;  %v13505_v51 = vadd.f32 %v18834_v54, %v18833_v52  ;;  %v4842_v31 = vadd.f32 %v4841_v27, %v13472_v32  ;;  %v4880_v46 = vadd.f32 %v4879_v35, %v13456_v47  ;;  %v4759_v20 = vadd.f32 %v4758_v9, %v13466_v12  ;;  %v13516_v18 = vpop.f32.mrf.mxu2  ;;  %v18839_v27 = vld [vmem:[#allocation50_spill] sm:$0xff]  ;;  %v18853_v37 = vld [vmem:[#allocation216_spill] sm:$0xff] }
 0x4e1   :  { %18814 = vst [vmem:[#allocation228_spill] sm:$0xff] %v13437_v39  ;;  %v4183_v39 = vadd.f32 %v18830_v23, %v18829_v57  ;;  %v13512_v14 = vadd.f32 %v12579_v17, %v4102_v36  ;;  %v18837_v57 = vld [vmem:[#allocation193_spill] sm:$0xff]  ;;  %v13518_v34 = vpop.f32.mrf.mxu3  ;;  %v13521_v52 = vadd.f32 %v12605_v63, %v4182_v15  ;;  %v18840_v54 = vld [vmem:[#allocation194_spill] sm:$0xff]  ;;  %v13526_v35 = vadd.f32 %v12503_v29, %v4144_v53  ;;  %v13531_v36 = vpop.f32.mrf.mxu0 }
 0x4e2   :  { %18817 = vst [vmem:[#allocation283_spill] sm:$0xff] %v13456_v47  ;;  %v4221_v23 = vadd.f32 %v18837_v57, %v18836_v43  ;;  %v4103_v42 = vadd.f32 %v18840_v54, %v18839_v27  ;;  %v13529_v9 = vadd.f32 %v12503_v29, %v4145_v1  ;;  %v4760_v43 = vadd.f32 %v4759_v20, %v13490_v60  ;;  %v18845_v1 = vld [vmem:[#allocation273_spill] sm:$0xff]  ;;  %v18846_v54 = vld [vmem:[#allocation274_spill] sm:$0xff] }
 0x4e3   :  { %18818 = vst [vmem:[#allocation139_spill] sm:$0xff] %v13461_v11  ;;  %v4881_v57 = vadd.f32 %v4880_v46, %v13493_v5  ;;  %v13538_v15 = vadd.f32 %v12407_v56, %v4220_v10  ;;  %v13541_v47 = vadd.f32 %v12605_v63, %v4183_v39  ;;  %v4843_v53 = vadd.f32 %v4842_v31, %v13521_v52  ;;  %v18848_v46 = vld [vmem:[#allocation183_spill] sm:$0xff] }
 0x4e4   :  { %18819 = vst [vmem:[#allocation290_spill] sm:$0xff] %v13466_v12  ;;  %v13533_v12 = vpop.f32.mrf.mxu1  ;;  %v4804_v27 = vadd.f32 %v4803_v55, %v13526_v35  ;;  %v4146_v24 = vadd.f32 %v18846_v54, %v18845_v1  ;;  %v4147_v40 = vadd.f32 %v13375_v26, %v13192_v22  ;;  %v13550_v20 = vadd.f32 %v12407_v56, %v4221_v23  ;;  %v18855_v55 = vld [vmem:[#allocation256_spill] sm:$0xff]  ;;  %v18856_v1 = vld [vmem:[#allocation126_spill] sm:$0xff] }
 0x4e5   :  { %18820 = vst [vmem:[#allocation286_spill] sm:$0xff] %v13469_v4  ;;  %v18852_v4 = vld [vmem:[#allocation67_spill] sm:$0xff]  ;;  %v18857_v54 = vld [vmem:[#allocation260_spill] sm:$0xff]  ;;  %v13565_v22 = vadd.f32 %v12579_v17, %v4103_v42  ;;  %v4882_v23 = vadd.f32 %v4881_v57, %v13538_v15 }
 0x4e6   :  { %18821 = vst [vmem:[#allocation288_spill] sm:$0xff] %v13472_v32  ;;  %v18851_v32 = vld [vmem:[#allocation210_spill] sm:$0xff]  ;;  %v4185_v31 = vadd.f32 %v18853_v37, %v18852_v4  ;;  %v2613_v38 = vadd.f32 %v18857_v54, %v18856_v1  ;;  %v4805_v26 = vadd.f32 %v4804_v27, %v13529_v9  ;;  %v18860_v37 = vld [vmem:[#allocation85_spill] sm:$0xff]  ;;  %v13578_v42 = vadd.f32 %v12503_v29, %v4146_v24 }
 0x4e7   :  { %18822 = vst [vmem:[#allocation95_spill] sm:$0xff] %v13475_v59  ;;  %v18864_v59 = vld [vmem:[#allocation66_spill] sm:$0xff]  ;;  %v13581_v27 = vadd.f32 %v12503_v29, %v4147_v40 }
 0x4e8   :  { %18825 = vst [vmem:[#allocation229_spill] sm:$0xff] %v13490_v60  ;;  %v18849_v60 = vld [vmem:[#allocation60_spill] sm:$0xff]  ;;  %v13591_v54 = vadd.f32 %v12605_v63, %v4185_v31  ;;  %v4806_v40 = vadd.f32 %v4805_v26, %v13578_v42  ;;  %v4187_v26 = vadd.f32 %v13451_v2, %v13311_v0 }
 0x4e9   :  { %18826 = vst [vmem:[#allocation141_spill] sm:$0xff] %v13493_v5  ;;  %v4222_v10 = vadd.f32 %v18849_v60, %v18848_v46  ;;  %v18850_v5 = vld [vmem:[#allocation199_spill] sm:$0xff]  ;;  %v4761_v60 = vadd.f32 %v4760_v43, %v13512_v14  ;;  %v18861_v46 = vld [vmem:[#allocation54_spill] sm:$0xff]  ;;  %v4883_v43 = vadd.f32 %v4882_v23, %v13550_v20  ;;  %v13603_v23 = vpop.f32.mrf.mxu0 }
 0x4ea   :  { %18835 = vst [vmem:[#allocation294_spill] sm:$0xff] %v13512_v14  ;;  %v4184_v39 = vadd.f32 %v18851_v32, %v18850_v5  ;;  %v4844_v32 = vadd.f32 %v4843_v53, %v13541_v47  ;;  %v18859_v5 = vld [vmem:[#allocation69_spill] sm:$0xff] }
 0x4eb   :  { %18838 = vst [vmem:[#allocation9_spill] sm:$0xff] %v13521_v52  ;;  %v18854_v52 = vld [vmem:[#allocation122_spill] sm:$0xff]  ;;  %v4223_v4 = vadd.f32 %v18860_v37, %v18859_v5  ;;  %v13585_v57 = vadd.f32 %v12407_v56, %v4222_v10  ;;  %v13593_v5 = vpop.f32.mrf.mxu2  ;;  %v4762_v24 = vadd.f32 %v4761_v60, %v13565_v22  ;;  %v4149_v10 = vadd.f32 %v13440_v16, %v13254_v25  ;;  %v18876_v16 = vld [vmem:[#allocation219_spill] sm:$0xff] }
 0x4ec   :  { %18841 = vst [vmem:[#allocation299_spill] sm:$0xff] %v13526_v35  ;;  %v13560_v33 = vadd.f32 %v18855_v55, %v18854_v52  ;;  %v18862_v52 = vld [vmem:[#allocation61_spill] sm:$0xff]  ;;  %v18863_v35 = vld [vmem:[#allocation188_spill] sm:$0xff]  ;;  %v13588_v53 = vadd.f32 %v12605_v63, %v4184_v39  ;;  %v13605_v39 = vpop.f32.mrf.mxu1  ;;  %v18870_v37 = vld [vmem:[#allocation202_spill] sm:$0xff] }
 0x4ed   :  { %18842 = vst [vmem:[#allocation144_spill] sm:$0xff] %v13529_v9  ;;  %v4104_v55 = vadd.f32 %v18862_v52, %v18861_v46  ;;  %v4105_v1 = vadd.f32 %v18864_v59, %v18863_v35  ;;  %v13595_v59 = vpop.f32.mrf.mxu3  ;;  %v4148_v35 = vadd.f32 %v13377_v21, %v13250_v61  ;;  %v18871_v46 = vld [vmem:[#allocation275_spill] sm:$0xff]  ;;  %v13611_v14 = vadd.f32 %v12407_v56, %v4223_v4  ;;  %v18875_v21 = vld [vmem:[#allocation206_spill] sm:$0xff] }
 0x4ee   :  { %18843 = vst [vmem:[#allocation33_spill] sm:$0xff] %v13538_v15  ;;  %v4845_v31 = vadd.f32 %v4844_v32, %v13588_v53  ;;  %v4186_v52 = vadd.f32 %v18871_v46, %v18870_v37  ;;  %v4224_v60 = vadd.f32 %v18876_v16, %v18875_v21  ;;  %v4807_v32 = vadd.f32 %v4806_v40, %v13581_v27  ;;  %v18879_v15 = vld [vmem:[#allocation73_spill] sm:$0xff] }
 0x4ef   :  { %18844 = vst [vmem:[#allocation96_spill] sm:$0xff] %v13541_v47  ;;  %v13616_v61 = vadd.f32 %v12579_v17, %v4104_v55  ;;  %v13619_v25 = vadd.f32 %v12579_v17, %v4105_v1  ;;  %v4884_v4 = vadd.f32 %v4883_v43, %v13585_v57  ;;  %v4225_v0 = vadd.f32 %v13287_v6, %v18879_v15  ;;  %v18880_v55 = vld [vmem:[#allocation56_spill] sm:$0xff]  ;;  %v18885_v43 = vld [vmem:[#allocation75_spill] sm:$0xff] }
 0x4f0   :  { %18847 = vst [vmem:[#allocation230_spill] sm:$0xff] %v13550_v20  ;;  %v18878_v20 = vld [vmem:[#allocation261_spill] sm:$0xff]  ;;  %v4846_v46 = vadd.f32 %v4845_v31, %v13591_v54  ;;  %v18881_v1 = vld [vmem:[#allocation200_spill] sm:$0xff]  ;;  %v13634_v47 = vadd.f32 %v12503_v29, %v4148_v35  ;;  %v13637_v40 = vadd.f32 %v12503_v29, %v4149_v10  ;;  %v13646_v6 = vadd.f32 %v12605_v63, %v4187_v26  ;;  %v18889_v10 = vld [vmem:[#allocation87_spill] sm:$0xff] }
 0x4f1   :  { %18858 = vst [vmem:[#allocation281_spill] sm:$0xff] %v13565_v22  ;;  %v18877_v22 = vld [vmem:[#allocation127_spill] sm:$0xff]  ;;  %v4763_v2 = vadd.f32 %v4762_v24, %v13616_v61  ;;  %v18886_v31 = vld [vmem:[#allocation277_spill] sm:$0xff]  ;;  %v13650_v24 = vadd.f32 %v12407_v56, %v4224_v60  ;;  %v4150_v16 = vadd.f32 %v13442_v49, %v18889_v10  ;;  %v4189_v26 = vadd.f32 %v13516_v18, %v13381_v28 }
 0x4f2   :  { %18865 = vst [vmem:[#allocation97_spill] sm:$0xff] %v13578_v42  ;;  %v2642_v37 = vadd.f32 %v18878_v20, %v18877_v22  ;;  %v13640_v20 = vadd.f32 %v12605_v63, %v4186_v52  ;;  %v4885_v22 = vadd.f32 %v4884_v4, %v13611_v14  ;;  %v4107_v21 = vadd.f32 %v18886_v31, %v18885_v43  ;;  %v18895_v31 = vld [vmem:[#allocation224_spill] sm:$0xff] }
 0x4f3   :  { %18866 = vst [vmem:[#allocation231_spill] sm:$0xff] %v13581_v27  ;;  %v4764_v15 = vadd.f32 %v4763_v2, %v13619_v25  ;;  %v4808_v35 = vadd.f32 %v4807_v32, %v13634_v47  ;;  %v13657_v4 = vadd.f32 %v12407_v56, %v4225_v0  ;;  %v13663_v2 = vpop.f32.mrf.mxu2  ;;  %v18892_v32 = vld [vmem:[#allocation262_spill] sm:$0xff] }
 0x4f4   :  { %18867 = vst [vmem:[#allocation98_spill] sm:$0xff] %v13585_v57  ;;  %v4847_v52 = vadd.f32 %v4846_v46, %v13640_v20  ;;  %v18894_v46 = vld [vmem:[#allocation74_spill] sm:$0xff]  ;;  %v13677_v28 = vadd.f32 %v12579_v17, %v4107_v21  ;;  %v13684_v57 = vadd.f32 %v12503_v29, %v4150_v16  ;;  %v13693_v21 = vadd.f32 %v12605_v63, %v4189_v26 }
 0x4f5   :  { %18868 = vst [vmem:[#allocation232_spill] sm:$0xff] %v13588_v53  ;;  %v4106_v53 = vadd.f32 %v18881_v1, %v18880_v55  ;;  %v4188_v55 = vadd.f32 %v13453_v62, %v13315_v45  ;;  %v13665_v60 = vpop.f32.mrf.mxu3  ;;  %v18891_v1 = vld [vmem:[#allocation128_spill] sm:$0xff]  ;;  %v4226_v0 = vadd.f32 %v18895_v31, %v18894_v46  ;;  %v4809_v10 = vadd.f32 %v4808_v35, %v13637_v40  ;;  %v4008_v45 = vpop.f32.mrf.mxu1 }
 0x4f6   :  { %18869 = vst [vmem:[#allocation284_spill] sm:$0xff] %v13591_v54  ;;  %v2671_v43 = vadd.f32 %v18892_v32, %v18891_v1  ;;  %v4886_v62 = vadd.f32 %v4885_v22, %v13650_v24  ;;  %v4848_v18 = vadd.f32 %v4847_v52, %v13646_v6  ;;  %v18897_v32 = vld [vmem:[#allocation209_spill] sm:$0xff]  ;;  %v4227_v35 = vadd.f32 %v13531_v36, %v13431_v30 }
 0x4f7   :  { %18872 = vst [vmem:[#allocation6_spill] sm:$0xff] %v13611_v14  ;;  %v13670_v49 = vadd.f32 %v12579_v17, %v4106_v53  ;;  %v18898_v53 = vld [vmem:[#allocation4_spill] sm:$0xff]  ;;  %v13690_v22 = vadd.f32 %v12605_v63, %v4188_v55  ;;  %v13701_v16 = vadd.f32 %v12407_v56, %v4226_v0  ;;  %v4810_v31 = vadd.f32 %v4809_v10, %v13684_v57 }
 0x4f8   :  { %18873 = vst [vmem:[#allocation291_spill] sm:$0xff] %v13616_v61  ;;  %v4108_v14 = vadd.f32 %v18898_v53, %v18897_v32  ;;  %v4887_v46 = vadd.f32 %v4886_v62, %v13657_v4  ;;  %v4152_v30 = vadd.f32 %v4008_v45, %v2642_v37  ;;  %v18905_v62 = vld [vmem:[#allocation212_spill] sm:$0xff]  ;;  %v18906_v32 = vld [vmem:[#allocation130_spill] sm:$0xff] }
 0x4f9   :  { %18874 = vst [vmem:[#allocation289_spill] sm:$0xff] %v13619_v25  ;;  %v3979_v25 = vpop.f32.mrf.mxu0  ;;  %v4765_v1 = vadd.f32 %v4764_v15, %v13670_v49  ;;  %v18903_v15 = vld [vmem:[#allocation263_spill] sm:$0xff]  ;;  %v4109_v55 = vadd.f32 %v13361_v44, %v18905_v62  ;;  %v4849_v26 = vadd.f32 %v4848_v18, %v13690_v22  ;;  %v18907_v53 = vld [vmem:[#allocation264_spill] sm:$0xff] }
 0x4fa   :  { %18882 = vst [vmem:[#allocation32_spill] sm:$0xff] %v13634_v47  ;;  %v4151_v61 = vadd.f32 %v3979_v25, %v2613_v38  ;;  %v18902_v25 = vld [vmem:[#allocation129_spill] sm:$0xff]  ;;  %v4888_v10 = vadd.f32 %v4887_v46, %v13701_v16  ;;  %v13720_v44 = vadd.f32 %v12579_v17, %v4108_v14 }
 0x4fb   :  { %18883 = vst [vmem:[#allocation99_spill] sm:$0xff] %v13637_v40  ;;  %v2700_v52 = vadd.f32 %v18903_v15, %v18902_v25  ;;  %v4766_v36 = vadd.f32 %v4765_v1, %v13677_v28  ;;  %v18908_v25 = vld [vmem:[#allocation131_spill] sm:$0xff]  ;;  %v18909_v15 = vld [vmem:[#allocation265_spill] sm:$0xff]  ;;  %v4850_v45 = vadd.f32 %v4849_v26, %v13693_v21  ;;  %v4229_v1 = vadd.f32 %v13593_v5, %v13501_v8 }
 0x4fc   :  { %18884 = vst [vmem:[#allocation233_spill] sm:$0xff] %v13640_v20  ;;  %v13696_v38 = vadd.f32 %v12503_v29, %v4151_v61  ;;  %v4190_v61 = vadd.f32 %v13518_v34, %v13385_v13  ;;  %v2645_v0 = vadd.f32 %v18909_v15, %v18908_v25  ;;  %v4228_v13 = vadd.f32 %v13533_v12, %v13446_v3  ;;  %v4037_v34 = vpop.f32.mrf.mxu2  ;;  %v18914_v12 = vld [vmem:[#allocation81_spill] sm:$0xff] }
 0x4fd   :  { %18887 = vst [vmem:[#allocation8_spill] sm:$0xff] %v13646_v6  ;;  %v4066_v18 = vpop.f32.mrf.mxu3  ;;  %v4153_v62 = vadd.f32 %v4037_v34, %v2671_v43  ;;  %v4011_v46 = vpop.f32.mrf.mxu1  ;;  %v4767_v14 = vadd.f32 %v4766_v36, %v13720_v44  ;;  %v4110_v25 = vadd.f32 %v13363_v50, %v18914_v12  ;;  %v13754_v50 = vadd.f32 %v12407_v56, %v4229_v1  ;;  %v18920_v34 = vld [vmem:[#allocation132_spill] sm:$0xff] }
 0x4fe   :  { %18888 = vst [vmem:[#allocation295_spill] sm:$0xff] %v13650_v24  ;;  %v4811_v37 = vadd.f32 %v4810_v31, %v13696_v38  ;;  %v4154_v31 = vadd.f32 %v4066_v18, %v2700_v52  ;;  %v13735_v26 = vadd.f32 %v12605_v63, %v4190_v61  ;;  %v13745_v52 = vadd.f32 %v12407_v56, %v4228_v13  ;;  %v18921_v18 = vld [vmem:[#allocation266_spill] sm:$0xff]  ;;  %v18989_v24 = vld [vmem:[#allocation192_spill] sm:$0xff] }
 0x4ff   :  { %18890 = vst [vmem:[#allocation11_spill] sm:$0xff] %v13657_v4  ;;  %v13715_v4 = vadd.f32 %v12407_v56, %v4227_v35  ;;  %v13728_v35 = vadd.f32 %v12503_v29, %v4152_v30  ;;  %v13741_v5 = vadd.f32 %v12503_v29, %v4153_v62  ;;  %v4111_v30 = vadd.f32 %v13603_v23, %v13560_v33  ;;  %v18922_v23 = vld [vmem:[#allocation133_spill] sm:$0xff]  ;;  %v18923_v62 = vld [vmem:[#allocation267_spill] sm:$0xff] }
 0x500   :  { %18893 = vst [vmem:[#allocation167_spill] sm:$0xff] %v13670_v49  ;;  %v2616_v49 = vadd.f32 %v18907_v53, %v18906_v32  ;;  %v13732_v53 = vadd.f32 %v12579_v17, %v4109_v55  ;;  %v4192_v55 = vadd.f32 %v4011_v46, %v2645_v0  ;;  %v13757_v61 = vadd.f32 %v12503_v29, %v4154_v31  ;;  %v18924_v46 = vld [vmem:[#allocation124_spill] sm:$0xff] }
 0x501   :  { %18896 = vst [vmem:[#allocation302_spill] sm:$0xff] %v13677_v28  ;;  %v3982_v32 = vpop.f32.mrf.mxu0  ;;  %v4889_v8 = vadd.f32 %v4888_v10, %v13715_v4  ;;  %v4812_v43 = vadd.f32 %v4811_v37, %v13728_v35  ;;  %v18918_v37 = vld [vmem:[#allocation123_spill] sm:$0xff]  ;;  %v18919_v10 = vld [vmem:[#allocation257_spill] sm:$0xff]  ;;  %v2674_v33 = vadd.f32 %v18921_v18, %v18920_v34  ;;  %v4230_v0 = vadd.f32 %v13595_v59, %v13505_v51  ;;  %v18974_v28 = vld [vmem:[#allocation162_spill] sm:$0xff] }
 0x502   :  { %18899 = vst [vmem:[#allocation100_spill] sm:$0xff] %v13684_v57  ;;  %v4191_v3 = vadd.f32 %v3982_v32, %v2616_v49  ;;  %v4851_v49 = vadd.f32 %v4850_v45, %v13735_v26  ;;  %v2639_v13 = vadd.f32 %v18919_v10, %v18918_v37  ;;  %v2703_v32 = vadd.f32 %v18923_v62, %v18922_v23  ;;  %v18927_v37 = vld [vmem:[#allocation268_spill] sm:$0xff]  ;;  %v18930_v62 = vld [vmem:[#allocation135_spill] sm:$0xff] }
 0x503   :  { %18900 = vst [vmem:[#allocation234_spill] sm:$0xff] %v13690_v22  ;;  %v4813_v15 = vadd.f32 %v4812_v43, %v13741_v5  ;;  %v4768_v45 = vadd.f32 %v4767_v14, %v13732_v53  ;;  %v4890_v1 = vadd.f32 %v4889_v8, %v13745_v52  ;;  %v18926_v43 = vld [vmem:[#allocation134_spill] sm:$0xff]  ;;  %v13777_v34 = vadd.f32 %v12579_v17, %v4110_v25 }
 0x504   :  { %18901 = vst [vmem:[#allocation292_spill] sm:$0xff] %v13693_v21  ;;  %v13750_v36 = vadd.f32 %v12605_v63, %v4191_v3  ;;  %v18925_v3 = vld [vmem:[#allocation258_spill] sm:$0xff]  ;;  %v2619_v10 = vadd.f32 %v18927_v37, %v18926_v43  ;;  %v13780_v14 = vadd.f32 %v12579_v17, %v4111_v30  ;;  %v4040_v8 = vpop.f32.mrf.mxu2  ;;  %v13784_v59 = vadd.f32 %v12605_v63, %v4192_v55 }
 0x505   :  { %18904 = vst [vmem:[#allocation101_spill] sm:$0xff] %v13701_v16  ;;  %v4814_v31 = vadd.f32 %v4813_v15, %v13757_v61  ;;  %v2668_v12 = vadd.f32 %v18925_v3, %v18924_v46  ;;  %v4069_v18 = vpop.f32.mrf.mxu3  ;;  %v4891_v51 = vadd.f32 %v4890_v1, %v13754_v50  ;;  %v18931_v46 = vld [vmem:[#allocation269_spill] sm:$0xff]  ;;  %v4769_v25 = vadd.f32 %v4768_v45, %v13777_v34  ;;  %v4014_v37 = vpop.f32.mrf.mxu1  ;;  %v18987_v16 = vld [vmem:[#allocation58_spill] sm:$0xff] }
 0x506   :  { %18910 = vst [vmem:[#allocation235_spill] sm:$0xff] %v13715_v4  ;;  %v4852_v29 = vadd.f32 %v4851_v49, %v13750_v36  ;;  %v4193_v49 = vadd.f32 %v4040_v8, %v2674_v33  ;;  %v4194_v15 = vadd.f32 %v4069_v18, %v2703_v32  ;;  %v2648_v3 = vadd.f32 %v18931_v46, %v18930_v62  ;;  %v18938_v8 = vld [vmem:[#allocation270_spill] sm:$0xff]  ;;  %v18941_v62 = vld [vmem:[#allocation271_spill] sm:$0xff] }
 0x507   :  { %18911 = vst [vmem:[#allocation102_spill] sm:$0xff] %v13720_v44  ;;  %4815 = vadd.xlane.f32.xlu0 %v4814_v31  ;;  %v4112_v43 = vadd.f32 %v13605_v39, %v2639_v13  ;;  %v4113_v1 = vadd.f32 %v13663_v2, %v2668_v12  ;;  %v4770_v32 = vadd.f32 %v4769_v25, %v13780_v14  ;;  %v18936_v2 = vld [vmem:[#allocation259_spill] sm:$0xff] }
 0x508   :  { %18912 = vst [vmem:[#allocation236_spill] sm:$0xff] %v13732_v53  ;;  %v13791_v53 = vadd.f32 %v12407_v56, %v4230_v0  ;;  %v4853_v55 = vadd.f32 %v4852_v29, %v13784_v59  ;;  %v13796_v33 = vadd.f32 %v12605_v63, %v4193_v49  ;;  %v13803_v45 = vadd.f32 %v12605_v63, %v4194_v15  ;;  %v18937_v29 = vld [vmem:[#allocation136_spill] sm:$0xff]  ;;  %v18985_v4 = vld [vmem:[#allocation187_spill] sm:$0xff] }
 0x509   :  { %18913 = vst [vmem:[#allocation296_spill] sm:$0xff] %v13735_v26  ;;  %v3985_v23 = vpop.f32.mrf.mxu0  ;;  %v4232_v13 = vadd.f32 %v4014_v37, %v2648_v3  ;;  %v2677_v18 = vadd.f32 %v18938_v8, %v18937_v29  ;;  %v13812_v49 = vadd.f32 %v12579_v17, %v4112_v43  ;;  %v13817_v63 = vadd.f32 %v12579_v17, %v4113_v1 }
 0x50a   :  { %18915 = vst [vmem:[#allocation166_spill] sm:$0xff] %v13745_v52  ;;  %v4231_v30 = vadd.f32 %v3985_v23, %v2619_v10  ;;  %v4892_v39 = vadd.f32 %v4891_v51, %v13791_v53  ;;  %v4854_v0 = vadd.f32 %v4853_v55, %v13796_v33  ;;  %v18935_v10 = vld [vmem:[#allocation125_spill] sm:$0xff]  ;;  %v18983_v52 = vld [vmem:[#allocation52_spill] sm:$0xff] }
 0x50b   :  { %18916 = vst [vmem:[#allocation36_spill] sm:$0xff] %v13754_v50  ;;  %v2697_v12 = vadd.f32 %v18936_v2, %v18935_v10  ;;  %v18940_v23 = vld [vmem:[#allocation137_spill] sm:$0xff]  ;;  %v13824_v55 = vadd.f32 %v12407_v56, %v4232_v13  ;;  %v18977_v50 = vld [vmem:[#allocation34_spill] sm:$0xff] }
 0x50c   :  { %18917 = vst [vmem:[#allocation145_spill] sm:$0xff] %v13757_v61  ;;  %v13800_v31 = vadd.f32 %v12407_v56, %v4231_v30  ;;  %v2706_v46 = vadd.f32 %v18941_v62, %v18940_v23  ;;  %v4855_v15 = vadd.f32 %v4854_v0, %v13803_v45  ;;  %v4043_v3 = vpop.f32.mrf.mxu2  ;;  %v4771_v30 = vadd.f32 %v4770_v32, %v13812_v49  ;;  %v18975_v61 = vld [vmem:[#allocation29_spill] sm:$0xff] }
 0x50d   :  { %18928 = vst [vmem:[#allocation37_spill] sm:$0xff] %v13777_v34  ;;  %v4072_v25 = vpop.f32.mrf.mxu3  ;;  %v4114_v37 = vadd.f32 %v13665_v60, %v2697_v12  ;;  %v4233_v43 = vadd.f32 %v4043_v3, %v2677_v18  ;;  %v18948_v18 = vld [vmem:[#allocation20_spill] sm:$0xff]  ;;  %v18970_v34 = vld [vmem:[#allocation95_spill] sm:$0xff] }
 0x50e   :  { %18929 = vst [vmem:[#allocation103_spill] sm:$0xff] %v13780_v14  ;;  %v4893_v51 = vadd.f32 %v4892_v39, %v13800_v31  ;;  %v4234_v10 = vadd.f32 %v4072_v25, %v2706_v46  ;;  %4856 = vadd.xlane.f32.xlu2 %v4855_v15  ;;  %v4772_v39 = vadd.f32 %v4771_v30, %v13817_v63  ;;  %v18950_v46 = vld [vmem:[#allocation24_spill] sm:$0xff]  ;;  %v18953_v30 = vld [vmem:[#allocation173_spill] sm:$0xff] }
 0x50f   :  { %18932 = vst [vmem:[#allocation237_spill] sm:$0xff] %v13791_v53  ;;  %v13828_v1 = vadd.f32 %v12407_v56, %v4233_v43  ;;  %v13836_v60 = vadd.f32 %v12579_v17, %v4114_v37  ;;  %v18951_v17 = vld [vmem:[#allocation165_spill] sm:$0xff]  ;;  %v18952_v3 = vld [vmem:[#allocation168_spill] sm:$0xff]  ;;  %v18954_v43 = vld [vmem:[#allocation42_spill] sm:$0xff] }
 0x510   :  { %18933 = vst [vmem:[#allocation104_spill] sm:$0xff] %v13800_v31  ;;  %v4894_v2 = vadd.f32 %v4893_v51, %v13824_v55  ;;  %v13832_v0 = vadd.f32 %v12407_v56, %v4234_v10  ;;  %v18949_v56 = vld [vmem:[#allocation154_spill] sm:$0xff] }
 0x511   :  { %18934 = vst [vmem:[#allocation238_spill] sm:$0xff] %v13803_v45  ;;  %v4773_v12 = vadd.f32 %v4772_v39, %v13836_v60 }
 0x512   :  { %18939 = vst [vmem:[#allocation41_spill] sm:$0xff] %v13812_v49  ;;  %v4895_v32 = vadd.f32 %v4894_v2, %v13828_v1  ;;  %v18955_v2 = vld [vmem:[#allocation179_spill] sm:$0xff] }
 0x513   :  { %18942 = vst [vmem:[#allocation14_spill] sm:$0xff] %v13817_v63  ;;  %v18964_v63 = vld [vmem:[#allocation72_spill] sm:$0xff] }
 0x514   :  { %18943 = vst [vmem:[#allocation303_spill] sm:$0xff] %v13824_v55  ;;  %v4896_v13 = vadd.f32 %v4895_v32, %v13832_v0  ;;  %v18956_v32 = vld [vmem:[#allocation47_spill] sm:$0xff] }
 0x515   :  { %18944 = vst [vmem:[#allocation293_spill] sm:$0xff] %v13828_v1 }
 0x516   :  { %18945 = vst [vmem:[#allocation148_spill] sm:$0xff] %v13832_v0  ;;  %4897 = vadd.xlane.f32.xlu1 %v4896_v13  ;;  %4774 = vadd.xlane.f32.xlu2 %v4773_v12  ;;  %v18957_v12 = vld [vmem:[#allocation186_spill] sm:$0xff] }
 0x517   :  { %18946 = vst [vmem:[#allocation304_spill] sm:$0xff] %v13836_v60  ;;  %v18963_v60 = vld [vmem:[#allocation204_spill] sm:$0xff]  ;;  %v18965_v0 = vld [vmem:[#allocation78_spill] sm:$0xff] }
 0x57a   :  { %v4816_v29 = vpop.xlane.xlu0 %4815 }
 0x57b   :  { %v13840_v8 = vmul.f32 0.0001953125, %v4816_v29 }
 0x57d   :  { %18947 = vst [vmem:[#allocation149_spill] sm:$0xff] %v13840_v8  ;;  %v4943_v23 = vsub.f32 %v18948_v18, %v13840_v8  ;;  %v4944_v62 = vsub.f32 %v18949_v56, %v13840_v8  ;;  %v4945_v51 = vsub.f32 %v18950_v46, %v13840_v8  ;;  %v4946_v15 = vsub.f32 %v18951_v17, %v13840_v8  ;;  %v18958_v18 = vld [vmem:[#allocation53_spill] sm:$0xff]  ;;  %v18959_v46 = vld [vmem:[#allocation191_spill] sm:$0xff] }
 0x57e   :  { %v13852_v25 = vsub.f32 %v18952_v3, %v13840_v8  ;;  %v13856_v37 = vsub.f32 %v18953_v30, %v13840_v8  ;;  %v13860_v10 = vsub.f32 %v18954_v43, %v13840_v8  ;;  %v13864_v39 = vsub.f32 %v18955_v2, %v13840_v8  ;;  %v18960_v43 = vld [vmem:[#allocation59_spill] sm:$0xff]  ;;  %v18961_v30 = vld [vmem:[#allocation64_spill] sm:$0xff]  ;;  %v18962_v3 = vld [vmem:[#allocation198_spill] sm:$0xff] }
 0x57f   :  { %v13868_v13 = vsub.f32 %v18956_v32, %v13840_v8  ;;  %v13872_v29 = vsub.f32 %v18957_v12, %v13840_v8  ;;  %v13876_v56 = vsub.f32 %v18958_v18, %v13840_v8  ;;  %v13880_v17 = vsub.f32 %v18959_v46, %v13840_v8 }
 0x580   :  { %v13884_v2 = vsub.f32 %v18960_v43, %v13840_v8  ;;  %v13888_v32 = vsub.f32 %v18961_v30, %v13840_v8  ;;  %v13892_v12 = vsub.f32 %v18962_v3, %v13840_v8  ;;  %v13896_v18 = vsub.f32 %v18963_v60, %v13840_v8  ;;  %v18966_v30 = vld [vmem:[#allocation79_spill] sm:$0xff]  ;;  %v18968_v60 = vld [vmem:[#allocation218_spill] sm:$0xff] }
 0x581   :  { %v13900_v46 = vsub.f32 %v18964_v63, %v13840_v8  ;;  %v13904_v43 = vsub.f32 %v18965_v0, %v13840_v8  ;;  %v4857_v49 = vpop.xlane.xlu2 %4856  ;;  %v13908_v45 = vsub.f32 %v18966_v30, %v13840_v8  ;;  %v18967_v3 = vld [vmem:[#allocation83_spill] sm:$0xff]  ;;  %v13916_v14 = vsub.f32 %v18968_v60, %v13840_v8  ;;  %v18969_v63 = vld [vmem:[#allocation222_spill] sm:$0xff] }
 0x582   :  { %v13912_v1 = vsub.f32 %v18967_v3, %v13840_v8  ;;  %v13920_v55 = vsub.f32 %v18969_v63, %v13840_v8  ;;  %v13924_v0 = vsub.f32 %v13282_v48, %v13840_v8  ;;  %v13928_v30 = vsub.f32 %v13338_v41, %v13840_v8 }
 0x583   :  { %v13932_v3 = vsub.f32 %v13347_v19, %v13840_v8  ;;  %v13936_v60 = vsub.f32 %v13402_v7, %v13840_v8  ;;  %v13940_v63 = vsub.f32 %v13405_v58, %v13840_v8  ;;  %v13944_v48 = vsub.f32 %v13461_v11, %v13840_v8  ;;  %v18972_v19 = vld [vmem:[#allocation299_spill] sm:$0xff] }
 0x584   :  { %v13948_v41 = vsub.f32 %v18970_v34, %v13840_v8  ;;  %v13950_v31 = vmul.f32 0.0001953125, %v4857_v49  ;;  %v13954_v44 = vsub.f32 %v18972_v19, %v13840_v8  ;;  %v13958_v7 = vsub.f32 %v13529_v9, %v13840_v8 }
 0x585   :  { %v13962_v58 = vsub.f32 %v13578_v42, %v13840_v8  ;;  %v13966_v11 = vsub.f32 %v13581_v27, %v13840_v8  ;;  %v13970_v49 = vsub.f32 %v13634_v47, %v13840_v8  ;;  %v13974_v19 = vsub.f32 %v13637_v40, %v13840_v8 }
 0x586   :  { %18971 = vst [vmem:[#allocation306_spill] sm:$0xff] %v13950_v31  ;;  %v13978_v9 = vsub.f32 %v13684_v57, %v13840_v8  ;;  %v13982_v42 = vsub.f32 %v13696_v38, %v13840_v8  ;;  %v13986_v27 = vsub.f32 %v13728_v35, %v13840_v8  ;;  %v13990_v47 = vsub.f32 %v13741_v5, %v13840_v8  ;;  %v18980_v8 = vld [vmem:[#allocation46_spill] sm:$0xff] }
 0x587   :  { %v13992_v34 = vmul.f32 %v4943_v23, %v4943_v23  ;;  %v13994_v40 = vmul.f32 %v4944_v62, %v4944_v62  ;;  %v13998_v57 = vsub.f32 %v18974_v28, %v13950_v31  ;;  %v14002_v38 = vsub.f32 %v18975_v61, %v13950_v31  ;;  %v18978_v23 = vld [vmem:[#allocation39_spill] sm:$0xff] }
 0x588   :  { %18973 = vst [vmem:[#allocation105_spill] sm:$0xff] %v13990_v47  ;;  %v14004_v53 = vmul.f32 %v4945_v51, %v4945_v51  ;;  %v14006_v35 = vmul.f32 %v4946_v15, %v4946_v15  ;;  %v14010_v5 = vsub.f32 %v18977_v50, %v13950_v31  ;;  %v14014_v62 = vsub.f32 %v18978_v23, %v13950_v31  ;;  %v18979_v47 = vld [vmem:[#allocation176_spill] sm:$0xff] }
 0x589   :  { %v14018_v28 = vsub.f32 %v18979_v47, %v13950_v31  ;;  %v14022_v61 = vsub.f32 %v18980_v8, %v13950_v31  ;;  %v18981_v51 = vld [vmem:[#allocation180_spill] sm:$0xff]  ;;  %v14030_v50 = vsub.f32 %v18983_v52, %v13950_v31  ;;  %v14034_v23 = vsub.f32 %v18985_v4, %v13950_v31 }
 0x58a   :  { %18976 = vst [vmem:[#allocation239_spill] sm:$0xff] %v14006_v35  ;;  %v14026_v15 = vsub.f32 %v18981_v51, %v13950_v31  ;;  %v14038_v47 = vsub.f32 %v18987_v16, %v13950_v31  ;;  %v14042_v8 = vsub.f32 %v18989_v24, %v13950_v31  ;;  %v18991_v35 = vld [vmem:[#allocation197_spill] sm:$0xff] }
 0x58b   :  { %18984 = vst [vmem:[#allocation240_spill] sm:$0xff] %v14030_v50  ;;  %v14046_v51 = vsub.f32 %v18991_v35, %v13950_v31  ;;  %v18995_v50 = vld [vmem:[#allocation71_spill] sm:$0xff] }
 0x58c   :  { %18982 = vst [vmem:[#allocation106_spill] sm:$0xff] %v14026_v15  ;;  %v18993_v15 = vld [vmem:[#allocation65_spill] sm:$0xff]  ;;  %v14054_v4 = vsub.f32 %v18995_v50, %v13950_v31 }
 0x58d   :  { %18986 = vst [vmem:[#allocation107_spill] sm:$0xff] %v14034_v23  ;;  %v14050_v52 = vsub.f32 %v18993_v15, %v13950_v31  ;;  %v18997_v23 = vld [vmem:[#allocation205_spill] sm:$0xff] }
 0x58e   :  { %18988 = vst [vmem:[#allocation241_spill] sm:$0xff] %v14038_v47  ;;  %v14058_v16 = vsub.f32 %v18997_v23, %v13950_v31  ;;  %v18999_v47 = vld [vmem:[#allocation77_spill] sm:$0xff] }
 0x58f   :  { %18990 = vst [vmem:[#allocation297_spill] sm:$0xff] %v14042_v8  ;;  %v14062_v24 = vsub.f32 %v18999_v47, %v13950_v31  ;;  %v19001_v8 = vld [vmem:[#allocation213_spill] sm:$0xff] }
 0x590   :  { %18992 = vst [vmem:[#allocation170_spill] sm:$0xff] %v14046_v51  ;;  %v14066_v35 = vsub.f32 %v19001_v8, %v13950_v31  ;;  %v19003_v51 = vld [vmem:[#allocation217_spill] sm:$0xff] }
 0x591   :  { %18994 = vst [vmem:[#allocation12_spill] sm:$0xff] %v14050_v52  ;;  %v14070_v15 = vsub.f32 %v19003_v51, %v13950_v31  ;;  %v19005_v52 = vld [vmem:[#allocation84_spill] sm:$0xff] }
 0x592   :  { %18996 = vst [vmem:[#allocation171_spill] sm:$0xff] %v14054_v4  ;;  %v14074_v50 = vsub.f32 %v19005_v52, %v13950_v31  ;;  %v19007_v4 = vld [vmem:[#allocation88_spill] sm:$0xff] }
 0x593   :  { %18998 = vst [vmem:[#allocation108_spill] sm:$0xff] %v14058_v16  ;;  %v14078_v23 = vsub.f32 %v19007_v4, %v13950_v31  ;;  %v19009_v16 = vld [vmem:[#allocation90_spill] sm:$0xff] }
 0x594   :  { %19000 = vst [vmem:[#allocation242_spill] sm:$0xff] %v14062_v24  ;;  %v14082_v47 = vsub.f32 %v19009_v16, %v13950_v31  ;;  %v19011_v24 = vld [vmem:[#allocation138_spill] sm:$0xff] }
 0x595   :  { %19002 = vst [vmem:[#allocation146_spill] sm:$0xff] %v14066_v35  ;;  %v14086_v8 = vsub.f32 %v19011_v24, %v13950_v31  ;;  %v19013_v35 = vld [vmem:[#allocation282_spill] sm:$0xff] }
 0x596   :  { %19004 = vst [vmem:[#allocation175_spill] sm:$0xff] %v14070_v15  ;;  %v14090_v51 = vsub.f32 %v19013_v35, %v13950_v31  ;;  %v19015_v15 = vld [vmem:[#allocation92_spill] sm:$0xff] }
 0x597   :  { %19006 = vst [vmem:[#allocation15_spill] sm:$0xff] %v14074_v50  ;;  %v14094_v52 = vsub.f32 %v19015_v15, %v13950_v31  ;;  %v19017_v50 = vld [vmem:[#allocation227_spill] sm:$0xff] }
 0x598   :  { %19008 = vst [vmem:[#allocation305_spill] sm:$0xff] %v14078_v23  ;;  %v14098_v4 = vsub.f32 %v19017_v50, %v13950_v31  ;;  %v19019_v23 = vld [vmem:[#allocation286_spill] sm:$0xff] }
 0x599   :  { %19010 = vst [vmem:[#allocation16_spill] sm:$0xff] %v14082_v47  ;;  %v14102_v16 = vsub.f32 %v19019_v23, %v13950_v31  ;;  %v19021_v47 = vld [vmem:[#allocation288_spill] sm:$0xff]  ;;  %v14122_v23 = vsub.f32 %v13591_v54, %v13950_v31  ;;  %v14142_v54 = vsub.f32 %v13735_v26, %v13950_v31  ;;  %v14162_v26 = vmul.f32 %v13856_v37, %v13856_v37 }
 0x59a   :  { %19012 = vst [vmem:[#allocation307_spill] sm:$0xff] %v14086_v8  ;;  %v14106_v24 = vsub.f32 %v19021_v47, %v13950_v31  ;;  %v19023_v8 = vld [vmem:[#allocation9_spill] sm:$0xff]  ;;  %v14126_v47 = vsub.f32 %v13640_v20, %v13950_v31  ;;  %v14146_v20 = vsub.f32 %v13750_v36, %v13950_v31  ;;  %v14166_v36 = vmul.f32 %v13860_v10, %v13860_v10 }
 0x59b   :  { %19014 = vst [vmem:[#allocation150_spill] sm:$0xff] %v14090_v51  ;;  %v14110_v35 = vsub.f32 %v19023_v8, %v13950_v31  ;;  %v19025_v51 = vld [vmem:[#allocation96_spill] sm:$0xff]  ;;  %v14130_v8 = vsub.f32 %v13646_v6, %v13950_v31  ;;  %v14150_v6 = vsub.f32 %v13784_v59, %v13950_v31  ;;  %v14170_v59 = vmul.f32 %v13864_v39, %v13864_v39 }
 0x59c   :  { %19016 = vst [vmem:[#allocation308_spill] sm:$0xff] %v14094_v52  ;;  %v14114_v15 = vsub.f32 %v19025_v51, %v13950_v31  ;;  %v19027_v52 = vld [vmem:[#allocation232_spill] sm:$0xff]  ;;  %v14134_v51 = vsub.f32 %v13690_v22, %v13950_v31  ;;  %v14154_v22 = vsub.f32 %v13796_v33, %v13950_v31  ;;  %v14174_v33 = vmul.f32 %v13868_v13, %v13868_v13 }
 0x59d   :  { %19018 = vst [vmem:[#allocation318_spill] sm:$0xff] %v14098_v4  ;;  %v14118_v50 = vsub.f32 %v19027_v52, %v13950_v31  ;;  %v14138_v52 = vsub.f32 %v13693_v21, %v13950_v31  ;;  %v14158_v21 = vmul.f32 %v13852_v25, %v13852_v25  ;;  %v14178_v25 = vmul.f32 %v13872_v29, %v13872_v29 }
 0x59e   :  { %19020 = vst [vmem:[#allocation40_spill] sm:$0xff] %v14102_v16  ;;  %v14182_v37 = vmul.f32 %v13876_v56, %v13876_v56  ;;  %v14186_v10 = vmul.f32 %v13880_v17, %v13880_v17  ;;  %v14190_v39 = vmul.f32 %v13884_v2, %v13884_v2  ;;  %v14194_v13 = vmul.f32 %v13888_v32, %v13888_v32 }
 0x59f   :  { %19022 = vst [vmem:[#allocation13_spill] sm:$0xff] %v14106_v24  ;;  %v14198_v29 = vmul.f32 %v13892_v12, %v13892_v12  ;;  %v14202_v56 = vmul.f32 %v13896_v18, %v13896_v18  ;;  %v14206_v17 = vmul.f32 %v13900_v46, %v13900_v46  ;;  %v14210_v2 = vmul.f32 %v13904_v43, %v13904_v43 }
 0x5a0   :  { %19024 = vst [vmem:[#allocation300_spill] sm:$0xff] %v14110_v35  ;;  %v14214_v32 = vmul.f32 %v13908_v45, %v13908_v45  ;;  %v14218_v12 = vmul.f32 %v13912_v1, %v13912_v1  ;;  %v14222_v18 = vmul.f32 %v13916_v14, %v13916_v14  ;;  %v14226_v46 = vmul.f32 %v13920_v55, %v13920_v55 }
 0x5a1   :  { %19026 = vst [vmem:[#allocation109_spill] sm:$0xff] %v14114_v15  ;;  %v14230_v43 = vmul.f32 %v13924_v0, %v13924_v0  ;;  %v14234_v45 = vmul.f32 %v13928_v30, %v13928_v30  ;;  %v14238_v1 = vmul.f32 %v13932_v3, %v13932_v3  ;;  %v14242_v14 = vmul.f32 %v13936_v60, %v13936_v60 }
 0x5a2   :  { %19028 = vst [vmem:[#allocation243_spill] sm:$0xff] %v14118_v50  ;;  %v14246_v55 = vmul.f32 %v13940_v63, %v13940_v63  ;;  %v14250_v0 = vmul.f32 %v13944_v48, %v13944_v48  ;;  %v14254_v30 = vmul.f32 %v13948_v41, %v13948_v41  ;;  %v14258_v3 = vmul.f32 %v13954_v44, %v13954_v44 }
 0x5a3   :  { %19029 = vst [vmem:[#allocation110_spill] sm:$0xff] %v14122_v23  ;;  %v14264_v60 = vmul.f32 %v13958_v7, %v13958_v7  ;;  %v14268_v63 = vmul.f32 %v13962_v58, %v13962_v58  ;;  %v14272_v48 = vmul.f32 %v13966_v11, %v13966_v11  ;;  %v14276_v41 = vmul.f32 %v13970_v49, %v13970_v49 }
 0x5a4   :  { %19030 = vst [vmem:[#allocation244_spill] sm:$0xff] %v14126_v47  ;;  %v14284_v7 = vmul.f32 %v13978_v9, %v13978_v9  ;;  %v14288_v58 = vmul.f32 %v13982_v42, %v13982_v42  ;;  %v5264_v11 = vadd.f32 %v13994_v40, %v13992_v34  ;;  %v14294_v44 = vmul.f32 %v13986_v27, %v13986_v27  ;;  %v4775_v40 = vpop.xlane.xlu2 %4774  ;;  %v19053_v34 = vld [vmem:[#allocation177_spill] sm:$0xff]  ;;  %v19063_v47 = vld [vmem:[#allocation207_spill] sm:$0xff] }
 0x5a5   :  { %19031 = vst [vmem:[#allocation174_spill] sm:$0xff] %v14130_v8  ;;  %v5143_v49 = vmul.f32 %v13998_v57, %v13998_v57  ;;  %v5145_v9 = vmul.f32 %v14010_v5, %v14010_v5  ;;  %v14310_v27 = vmul.f32 %v14018_v28, %v14018_v28  ;;  %v14314_v57 = vmul.f32 %v14022_v61, %v14022_v61  ;;  %v19054_v5 = vld [vmem:[#allocation44_spill] sm:$0xff]  ;;  %v19057_v28 = vld [vmem:[#allocation55_spill] sm:$0xff]  ;;  %v19058_v61 = vld [vmem:[#allocation189_spill] sm:$0xff] }
 0x5a6   :  { %19032 = vst [vmem:[#allocation310_spill] sm:$0xff] %v14134_v51 }
 0x5a7   :  { %19033 = vst [vmem:[#allocation147_spill] sm:$0xff] %v14138_v52 }
 0x5a8   :  { %19034 = vst [vmem:[#allocation301_spill] sm:$0xff] %v14142_v54 }
 0x5a9   :  { %19035 = vst [vmem:[#allocation17_spill] sm:$0xff] %v14146_v20  ;;  %v14306_v20 = vmul.f32 %v14014_v62, %v14014_v62  ;;  %v19056_v62 = vld [vmem:[#allocation49_spill] sm:$0xff] }
 0x5aa   :  { %19036 = vst [vmem:[#allocation309_spill] sm:$0xff] %v14150_v6  ;;  %v19052_v6 = vld [vmem:[#allocation43_spill] sm:$0xff] }
 0x5ab   :  { %19037 = vst [vmem:[#allocation158_spill] sm:$0xff] %v14154_v22  ;;  %v4898_v22 = vpop.xlane.xlu1 %4897 }
 0x5ac   :  { %19038 = vst [vmem:[#allocation319_spill] sm:$0xff] %v14242_v14  ;;  %v14260_v31 = vmul.f32 0.0001953125, %v4898_v22  ;;  %v14280_v22 = vmul.f32 %v13974_v19, %v13974_v19  ;;  %v5144_v19 = vmul.f32 %v14002_v38, %v14002_v38 }
 0x5ad   :  { %19039 = vst [vmem:[#allocation151_spill] sm:$0xff] %v14246_v55  ;;  %v19081_v55 = vld [vmem:[#allocation283_spill] sm:$0xff] }
 0x5ae   :  { %19040 = vst [vmem:[#allocation311_spill] sm:$0xff] %v14250_v0  ;;  %v5023_v42 = vsub.f32 %v19052_v6, %v14260_v31  ;;  %v5024_v38 = vsub.f32 %v19053_v34, %v14260_v31  ;;  %v5025_v54 = vsub.f32 %v19054_v5, %v14260_v31  ;;  %v19055_v6 = vld [vmem:[#allocation182_spill] sm:$0xff]  ;;  %v19059_v34 = vld [vmem:[#allocation195_spill] sm:$0xff]  ;;  %v5265_v5 = vadd.f32 %v5264_v11, %v14004_v53  ;;  %v19064_v53 = vld [vmem:[#allocation208_spill] sm:$0xff] }
 0x5af   :  { %19041 = vst [vmem:[#allocation320_spill] sm:$0xff] %v14254_v30  ;;  %v5026_v52 = vsub.f32 %v19055_v6, %v14260_v31  ;;  %v14336_v51 = vsub.f32 %v19059_v34, %v14260_v31  ;;  %v19060_v6 = vld [vmem:[#allocation272_spill] sm:$0xff]  ;;  %v14355_v34 = vsub.f32 %v19063_v47, %v14260_v31  ;;  %v14359_v11 = vsub.f32 %v19064_v53, %v14260_v31  ;;  %v19070_v53 = vld [vmem:[#allocation89_spill] sm:$0xff] }
 0x5b0   :  { %19042 = vst [vmem:[#allocation159_spill] sm:$0xff] %v14258_v3  ;;  %v19069_v47 = vld [vmem:[#allocation220_spill] sm:$0xff]  ;;  %v14380_v15 = vsub.f32 %v19070_v53, %v14260_v31  ;;  %v19077_v53 = vld [vmem:[#allocation94_spill] sm:$0xff]  ;;  %v5305_v4 = vadd.f32 %v5144_v19, %v5143_v49 }
 0x5b1   :  { %19043 = vst [vmem:[#allocation322_spill] sm:$0xff] %v14260_v31  ;;  %v14401_v24 = vsub.f32 %v19077_v53, %v14260_v31  ;;  %v19102_v49 = vld [vmem:[#allocation166_spill] sm:$0xff] }
 0x5b2   :  { %19044 = vst [vmem:[#allocation111_spill] sm:$0xff] %v14264_v60  ;;  %v14376_v60 = vsub.f32 %v19069_v47, %v14260_v31  ;;  %v19075_v47 = vld [vmem:[#allocation93_spill] sm:$0xff] }
 0x5b3   :  { %19045 = vst [vmem:[#allocation245_spill] sm:$0xff] %v14268_v63  ;;  %v19067_v63 = vld [vmem:[#allocation214_spill] sm:$0xff]  ;;  %v14397_v30 = vsub.f32 %v19075_v47, %v14260_v31  ;;  %v19085_v47 = vld [vmem:[#allocation33_spill] sm:$0xff] }
 0x5b4   :  { %19046 = vst [vmem:[#allocation112_spill] sm:$0xff] %v14272_v48 }
 0x5b5   :  { %19047 = vst [vmem:[#allocation246_spill] sm:$0xff] %v14276_v41 }
 0x5b6   :  { %19048 = vst [vmem:[#allocation113_spill] sm:$0xff] %v14280_v22  ;;  %v14341_v22 = vsub.f32 %v19060_v6, %v14260_v31  ;;  %v19065_v6 = vld [vmem:[#allocation80_spill] sm:$0xff] }
 0x5b7   :  { %19049 = vst [vmem:[#allocation247_spill] sm:$0xff] %v14284_v7  ;;  %v14332_v7 = vsub.f32 %v19058_v61, %v14260_v31  ;;  %v14351_v61 = vmul.f32 0.0001953125, %v4775_v40  ;;  %v14363_v48 = vsub.f32 %v19065_v6, %v14260_v31  ;;  %v19068_v40 = vld [vmem:[#allocation215_spill] sm:$0xff] }
 0x5b8   :  { %19050 = vst [vmem:[#allocation18_spill] sm:$0xff] %v14288_v58  ;;  %v14328_v58 = vsub.f32 %v19057_v28, %v14260_v31  ;;  %v19062_v28 = vld [vmem:[#allocation68_spill] sm:$0xff]  ;;  %v14372_v50 = vsub.f32 %v19068_v40, %v14260_v31  ;;  %v19071_v6 = vld [vmem:[#allocation279_spill] sm:$0xff] }
 0x5b9   :  { %19051 = vst [vmem:[#allocation312_spill] sm:$0xff] %v14294_v44  ;;  %v14324_v44 = vsub.f32 %v19056_v62, %v14260_v31  ;;  %v19061_v62 = vld [vmem:[#allocation201_spill] sm:$0xff]  ;;  %v14349_v41 = vsub.f32 %v19062_v28, %v14260_v31  ;;  %v14368_v28 = vsub.f32 %v19067_v63, %v14260_v31  ;;  %v14384_v3 = vsub.f32 %v19071_v6, %v14260_v31  ;;  %v19073_v63 = vld [vmem:[#allocation142_spill] sm:$0xff]  ;;  %v19079_v6 = vld [vmem:[#allocation27_spill] sm:$0xff] }
 0x5ba   :  { %v14345_v8 = vsub.f32 %v19061_v62, %v14260_v31  ;;  %v19066_v62 = vld [vmem:[#allocation239_spill] sm:$0xff]  ;;  %v14392_v40 = vsub.f32 %v19073_v63, %v14260_v31  ;;  %19076 = vst [vmem:[#allocation314_spill] sm:$0xff] %v14397_v30  ;;  %v4903_v0 = vsub.f32 %v19079_v6, %v14351_v61  ;;  %v14409_v63 = vsub.f32 %v19081_v55, %v14260_v31  ;;  %v19091_v55 = vld [vmem:[#allocation6_spill] sm:$0xff] }
 0x5bb   :  { %v5266_v23 = vadd.f32 %v5265_v5, %v19066_v62  ;;  %v19072_v62 = vld [vmem:[#allocation285_spill] sm:$0xff]  ;;  %19078 = vst [vmem:[#allocation152_spill] sm:$0xff] %v14401_v24  ;;  %v14417_v30 = vsub.f32 %v19085_v47, %v14260_v31  ;;  %v19087_v24 = vld [vmem:[#allocation230_spill] sm:$0xff]  ;;  %v5183_v47 = vmul.f32 %v5023_v42, %v5023_v42 }
 0x5bc   :  { %v14388_v5 = vsub.f32 %v19072_v62, %v14260_v31  ;;  %19074 = vst [vmem:[#allocation19_spill] sm:$0xff] %v14392_v40  ;;  %v19080_v62 = vld [vmem:[#allocation161_spill] sm:$0xff]  ;;  %v14422_v6 = vsub.f32 %v19087_v24, %v14260_v31 }
 0x5bd   :  { %v5267_v35 = vadd.f32 %v5266_v23, %v14158_v21  ;;  %v4904_v16 = vsub.f32 %v19080_v62, %v14351_v61  ;;  %19082 = vst [vmem:[#allocation313_spill] sm:$0xff] %v14409_v63  ;;  %v19083_v21 = vld [vmem:[#allocation141_spill] sm:$0xff]  ;;  %v19089_v62 = vld [vmem:[#allocation98_spill] sm:$0xff]  ;;  %v14430_v63 = vsub.f32 %v19091_v55, %v14260_v31 }
 0x5be   :  { %v14413_v23 = vsub.f32 %v19083_v21, %v14260_v31  ;;  %19086 = vst [vmem:[#allocation315_spill] sm:$0xff] %v14417_v30  ;;  %v14426_v40 = vsub.f32 %v19089_v62, %v14260_v31  ;;  %v19093_v21 = vld [vmem:[#allocation295_spill] sm:$0xff]  ;;  %v5184_v30 = vmul.f32 %v5024_v38, %v5024_v38  ;;  %v19097_v62 = vld [vmem:[#allocation164_spill] sm:$0xff]  ;;  %v19098_v55 = vld [vmem:[#allocation101_spill] sm:$0xff] }
 0x5bf   :  { %v5268_v53 = vadd.f32 %v5267_v35, %v14162_v26  ;;  %19088 = vst [vmem:[#allocation25_spill] sm:$0xff] %v14422_v6  ;;  %v19095_v35 = vld [vmem:[#allocation11_spill] sm:$0xff]  ;;  %v5063_v6 = vmul.f32 %v4903_v0, %v4903_v0  ;;  %v5064_v14 = vmul.f32 %v4904_v16, %v4904_v16  ;;  %v19104_v38 = vld [vmem:[#allocation36_spill] sm:$0xff]  ;;  %v19106_v16 = vld [vmem:[#allocation237_spill] sm:$0xff] }
 0x5c0   :  { %19084 = vst [vmem:[#allocation153_spill] sm:$0xff] %v14413_v23  ;;  %v14434_v23 = vsub.f32 %v19093_v21, %v14260_v31  ;;  %v14439_v24 = vsub.f32 %v19095_v35, %v14260_v31  ;;  %v19100_v21 = vld [vmem:[#allocation235_spill] sm:$0xff]  ;;  %v14462_v0 = vsub.f32 %v19106_v16, %v14260_v31 }
 0x5c1   :  { %19090 = vst [vmem:[#allocation321_spill] sm:$0xff] %v14426_v40  ;;  %v5269_v26 = vadd.f32 %v5268_v53, %v14166_v36  ;;  %v4905_v40 = vsub.f32 %v19097_v62, %v14351_v61  ;;  %v14449_v42 = vsub.f32 %v19100_v21, %v14260_v31  ;;  %v14453_v36 = vsub.f32 %v19102_v49, %v14260_v31  ;;  %v19108_v62 = vld [vmem:[#allocation106_spill] sm:$0xff] }
 0x5c2   :  { %19092 = vst [vmem:[#allocation323_spill] sm:$0xff] %v14430_v63  ;;  %v14445_v63 = vsub.f32 %v19098_v55, %v14260_v31  ;;  %v14458_v53 = vsub.f32 %v19104_v38, %v14260_v31  ;;  %v5149_v55 = vmul.f32 %v19108_v62, %v19108_v62  ;;  %v19109_v21 = vld [vmem:[#allocation38_spill] sm:$0xff]  ;;  %v19111_v38 = vld [vmem:[#allocation172_spill] sm:$0xff]  ;;  %v5223_v16 = vadd.f32 %v5064_v14, %v5063_v6 }
 0x5c3   :  { %19094 = vst [vmem:[#allocation140_spill] sm:$0xff] %v14434_v23  ;;  %v5270_v19 = vadd.f32 %v5269_v26, %v14170_v59  ;;  %v4906_v35 = vsub.f32 %v19109_v21, %v14351_v61  ;;  %v19110_v59 = vld [vmem:[#allocation240_spill] sm:$0xff]  ;;  %v19112_v21 = vld [vmem:[#allocation107_spill] sm:$0xff] }
 0x5c4   :  { %19096 = vst [vmem:[#allocation114_spill] sm:$0xff] %v14439_v24  ;;  %v5150_v26 = vmul.f32 %v19110_v59, %v19110_v59  ;;  %v5065_v24 = vmul.f32 %v4905_v40, %v4905_v40 }
 0x5c5   :  { %19099 = vst [vmem:[#allocation248_spill] sm:$0xff] %v14445_v63  ;;  %v5271_v49 = vadd.f32 %v5270_v19, %v14174_v33  ;;  %v5346_v63 = vadd.f32 %v5184_v30, %v5183_v47  ;;  %v5066_v33 = vmul.f32 %v4906_v35, %v4906_v35  ;;  %v5188_v35 = vmul.f32 %v14328_v58, %v14328_v58 }
 0x5c6   :  { %19101 = vst [vmem:[#allocation115_spill] sm:$0xff] %v14449_v42  ;;  %v5185_v42 = vmul.f32 %v5025_v54, %v5025_v54  ;;  %v5151_v54 = vmul.f32 %v19112_v21, %v19112_v21  ;;  %v5224_v30 = vadd.f32 %v5223_v16, %v5065_v24 }
 0x5c7   :  { %19103 = vst [vmem:[#allocation249_spill] sm:$0xff] %v14453_v36  ;;  %v5306_v36 = vadd.f32 %v5305_v4, %v5145_v9  ;;  %v5272_v31 = vadd.f32 %v5271_v49, %v14178_v25  ;;  %v19113_v4 = vld [vmem:[#allocation178_spill] sm:$0xff]  ;;  %v5187_v9 = vmul.f32 %v14324_v44, %v14324_v44  ;;  %v19114_v25 = vld [vmem:[#allocation241_spill] sm:$0xff] }
 0x5c8   :  { %19105 = vst [vmem:[#allocation22_spill] sm:$0xff] %v14458_v53  ;;  %v4907_v53 = vsub.f32 %v19111_v38, %v14351_v61  ;;  %v5347_v23 = vadd.f32 %v5346_v63, %v5185_v42  ;;  %v4908_v47 = vsub.f32 %v19113_v4, %v14351_v61  ;;  %v19115_v63 = vld [vmem:[#allocation45_spill] sm:$0xff]  ;;  %v5225_v49 = vadd.f32 %v5224_v30, %v5066_v33 }
 0x5c9   :  { %19107 = vst [vmem:[#allocation316_spill] sm:$0xff] %v14462_v0  ;;  %v5186_v0 = vmul.f32 %v5026_v52, %v5026_v52  ;;  %v5307_v62 = vadd.f32 %v5306_v36, %v14306_v20  ;;  %v5273_v40 = vadd.f32 %v5272_v31, %v14182_v37  ;;  %v5152_v20 = vmul.f32 %v19114_v25, %v19114_v25  ;;  %v19116_v31 = vld [vmem:[#allocation297_spill] sm:$0xff] }
 0x5ca   :  { %v4909_v6 = vsub.f32 %v19115_v63, %v14351_v61  ;;  %v5067_v42 = vmul.f32 %v4907_v53, %v4907_v53  ;;  %v5153_v37 = vmul.f32 %v19116_v31, %v19116_v31  ;;  %v5068_v19 = vmul.f32 %v4908_v47, %v4908_v47 }
 0x5cb   :  { %v5308_v52 = vadd.f32 %v5307_v62, %v14310_v27  ;;  %v5348_v14 = vadd.f32 %v5347_v23, %v5186_v0  ;;  %v5274_v24 = vadd.f32 %v5273_v40, %v14186_v10  ;;  %v19117_v27 = vld [vmem:[#allocation184_spill] sm:$0xff]  ;;  %v5189_v53 = vmul.f32 %v14332_v7, %v14332_v7  ;;  %v19118_v62 = vld [vmem:[#allocation170_spill] sm:$0xff] }
 0x5cc   :  { %v4910_v23 = vsub.f32 %v19117_v27, %v14351_v61  ;;  %v5226_v16 = vadd.f32 %v5225_v49, %v5067_v42  ;;  %v5154_v10 = vmul.f32 %v19118_v62, %v19118_v62  ;;  %v5069_v33 = vmul.f32 %v4909_v6, %v4909_v6  ;;  %v19120_v7 = vld [vmem:[#allocation12_spill] sm:$0xff] }
 0x5cd   :  { %v5309_v44 = vadd.f32 %v5308_v52, %v14314_v57  ;;  %v5349_v36 = vadd.f32 %v5348_v14, %v5187_v9  ;;  %v5275_v0 = vadd.f32 %v5274_v24, %v14190_v39  ;;  %v19119_v57 = vld [vmem:[#allocation51_spill] sm:$0xff]  ;;  %v5190_v9 = vmul.f32 %v14336_v51, %v14336_v51 }
 0x5ce   :  { %v4911_v21 = vsub.f32 %v19119_v57, %v14351_v61  ;;  %v5227_v30 = vadd.f32 %v5226_v16, %v5068_v19  ;;  %v5155_v39 = vmul.f32 %v19120_v7, %v19120_v7  ;;  %v5070_v25 = vmul.f32 %v4910_v23, %v4910_v23  ;;  %v19122_v51 = vld [vmem:[#allocation171_spill] sm:$0xff] }
 0x5cf   :  { %v5310_v59 = vadd.f32 %v5309_v44, %v5149_v55  ;;  %v5350_v58 = vadd.f32 %v5349_v36, %v5188_v35  ;;  %v5276_v47 = vadd.f32 %v5275_v0, %v14194_v13  ;;  %v19121_v55 = vld [vmem:[#allocation190_spill] sm:$0xff]  ;;  %v5191_v49 = vmul.f32 %v14341_v22, %v14341_v22  ;;  %v19124_v22 = vld [vmem:[#allocation108_spill] sm:$0xff] }
 0x5d0   :  { %v4912_v14 = vsub.f32 %v19121_v55, %v14351_v61  ;;  %v5228_v42 = vadd.f32 %v5227_v30, %v5069_v33  ;;  %v5156_v13 = vmul.f32 %v19122_v51, %v19122_v51  ;;  %v5071_v36 = vmul.f32 %v4911_v21, %v4911_v21 }
 0x5d1   :  { %v5311_v40 = vadd.f32 %v5310_v59, %v5150_v26  ;;  %v5351_v52 = vadd.f32 %v5350_v58, %v5189_v53  ;;  %v5277_v6 = vadd.f32 %v5276_v47, %v14198_v29  ;;  %v19123_v26 = vld [vmem:[#allocation57_spill] sm:$0xff]  ;;  %v5192_v19 = vmul.f32 %v14345_v8, %v14345_v8  ;;  %v19126_v8 = vld [vmem:[#allocation242_spill] sm:$0xff] }
 0x5d2   :  { %v4913_v44 = vsub.f32 %v19123_v26, %v14351_v61  ;;  %v5229_v31 = vadd.f32 %v5228_v42, %v5070_v25  ;;  %v5157_v29 = vmul.f32 %v19124_v22, %v19124_v22  ;;  %v5072_v59 = vmul.f32 %v4912_v14, %v4912_v14 }
 0x5d3   :  { %v5312_v35 = vadd.f32 %v5311_v40, %v5151_v54  ;;  %v5352_v24 = vadd.f32 %v5351_v52, %v5190_v9  ;;  %v5278_v23 = vadd.f32 %v5277_v6, %v14202_v56  ;;  %v19125_v54 = vld [vmem:[#allocation196_spill] sm:$0xff]  ;;  %v5193_v62 = vmul.f32 %v14349_v41, %v14349_v41  ;;  %v19128_v41 = vld [vmem:[#allocation146_spill] sm:$0xff] }
 0x5d4   :  { %v4914_v0 = vsub.f32 %v19125_v54, %v14351_v61  ;;  %v5230_v58 = vadd.f32 %v5229_v31, %v5071_v36  ;;  %v5158_v56 = vmul.f32 %v19126_v8, %v19126_v8  ;;  %v5073_v47 = vmul.f32 %v4913_v44, %v4913_v44 }
 0x5d5   :  { %v5313_v16 = vadd.f32 %v5312_v35, %v5152_v20  ;;  %v5353_v53 = vadd.f32 %v5352_v24, %v5191_v49  ;;  %v5279_v21 = vadd.f32 %v5278_v23, %v14206_v17  ;;  %v19127_v20 = vld [vmem:[#allocation63_spill] sm:$0xff]  ;;  %v5194_v52 = vmul.f32 %v14355_v34, %v14355_v34 }
 0x5d6   :  { %v4915_v9 = vsub.f32 %v19127_v20, %v14351_v61  ;;  %v5231_v40 = vadd.f32 %v5230_v58, %v5072_v59  ;;  %v5159_v17 = vmul.f32 %v19128_v41, %v19128_v41  ;;  %v5074_v49 = vmul.f32 %v4914_v0, %v4914_v0  ;;  %v19130_v34 = vld [vmem:[#allocation175_spill] sm:$0xff] }
 0x5d7   :  { %v5314_v33 = vadd.f32 %v5313_v16, %v5153_v37  ;;  %v5354_v30 = vadd.f32 %v5353_v53, %v5192_v19  ;;  %v5280_v7 = vadd.f32 %v5279_v21, %v14210_v2  ;;  %v19129_v37 = vld [vmem:[#allocation203_spill] sm:$0xff]  ;;  %v5195_v35 = vmul.f32 %v14359_v11, %v14359_v11 }
 0x5d8   :  { %v4916_v42 = vsub.f32 %v19129_v37, %v14351_v61  ;;  %v5232_v6 = vadd.f32 %v5231_v40, %v5073_v47  ;;  %v5160_v2 = vmul.f32 %v19130_v34, %v19130_v34  ;;  %v5075_v31 = vmul.f32 %v4915_v9, %v4915_v9  ;;  %v19132_v11 = vld [vmem:[#allocation15_spill] sm:$0xff] }
 0x5d9   :  { %v5315_v14 = vadd.f32 %v5314_v33, %v5154_v10  ;;  %v5355_v25 = vadd.f32 %v5354_v30, %v5193_v62  ;;  %v5281_v24 = vadd.f32 %v5280_v7, %v14214_v32  ;;  %v19131_v10 = vld [vmem:[#allocation70_spill] sm:$0xff]  ;;  %v5196_v23 = vmul.f32 %v14363_v48, %v14363_v48  ;;  %v19134_v48 = vld [vmem:[#allocation305_spill] sm:$0xff] }
 0x5da   :  { %v4917_v36 = vsub.f32 %v19131_v10, %v14351_v61  ;;  %v5233_v19 = vadd.f32 %v5232_v6, %v5074_v49  ;;  %v5161_v32 = vmul.f32 %v19132_v11, %v19132_v11  ;;  %v5076_v59 = vmul.f32 %v4916_v42, %v4916_v42 }
 0x5db   :  { %v5316_v51 = vadd.f32 %v5315_v14, %v5155_v39  ;;  %v5356_v44 = vadd.f32 %v5355_v25, %v5194_v52  ;;  %v5282_v16 = vadd.f32 %v5281_v24, %v14218_v12  ;;  %v19133_v39 = vld [vmem:[#allocation276_spill] sm:$0xff]  ;;  %v5197_v62 = vmul.f32 %v14368_v28, %v14368_v28 }
 0x5dc   :  { %v4918_v0 = vsub.f32 %v19133_v39, %v14351_v61  ;;  %v5234_v58 = vadd.f32 %v5233_v19, %v5075_v31  ;;  %v5162_v12 = vmul.f32 %v19134_v48, %v19134_v48  ;;  %v5077_v9 = vmul.f32 %v4917_v36, %v4917_v36  ;;  %v19136_v28 = vld [vmem:[#allocation16_spill] sm:$0xff]  ;;  %v19144_v48 = vld [vmem:[#allocation319_spill] sm:$0xff] }
 0x5dd   :  { %v5317_v53 = vadd.f32 %v5316_v51, %v5156_v13  ;;  %v5357_v22 = vadd.f32 %v5356_v44, %v5195_v35  ;;  %v5283_v21 = vadd.f32 %v5282_v16, %v14222_v18  ;;  %v19135_v13 = vld [vmem:[#allocation211_spill] sm:$0xff]  ;;  %v5198_v40 = vmul.f32 %v14372_v50, %v14372_v50 }
 0x5de   :  { %v4919_v8 = vsub.f32 %v19135_v13, %v14351_v61  ;;  %v5235_v47 = vadd.f32 %v5234_v58, %v5076_v59  ;;  %v5163_v18 = vmul.f32 %v19136_v28, %v19136_v28  ;;  %v5078_v41 = vmul.f32 %v4918_v0, %v4918_v0  ;;  %v19138_v50 = vld [vmem:[#allocation307_spill] sm:$0xff] }
 0x5df   :  { %v5318_v33 = vadd.f32 %v5317_v53, %v5157_v29  ;;  %v5358_v30 = vadd.f32 %v5357_v22, %v5196_v23  ;;  %v5284_v52 = vadd.f32 %v5283_v21, %v14226_v46  ;;  %v19137_v29 = vld [vmem:[#allocation82_spill] sm:$0xff]  ;;  %v5199_v49 = vmul.f32 %v14376_v60, %v14376_v60 }
 0x5e0   :  { %v4920_v25 = vsub.f32 %v19137_v29, %v14351_v61  ;;  %v5236_v42 = vadd.f32 %v5235_v47, %v5077_v9  ;;  %v5164_v46 = vmul.f32 %v19138_v50, %v19138_v50  ;;  %v5079_v44 = vmul.f32 %v4919_v8, %v4919_v8  ;;  %v19140_v60 = vld [vmem:[#allocation150_spill] sm:$0xff] }
 0x5e1   :  { %v5319_v7 = vadd.f32 %v5318_v33, %v5158_v56  ;;  %v5359_v14 = vadd.f32 %v5358_v30, %v5197_v62  ;;  %v5285_v6 = vadd.f32 %v5284_v52, %v14230_v43  ;;  %v19139_v56 = vld [vmem:[#allocation86_spill] sm:$0xff]  ;;  %v5200_v36 = vmul.f32 %v14380_v15, %v14380_v15  ;;  %v19142_v15 = vld [vmem:[#allocation308_spill] sm:$0xff] }
 0x5e2   :  { %v4921_v51 = vsub.f32 %v19139_v56, %v14351_v61  ;;  %v5237_v34 = vadd.f32 %v5236_v42, %v5078_v41  ;;  %v5165_v43 = vmul.f32 %v19140_v60, %v19140_v60  ;;  %v5080_v53 = vmul.f32 %v4920_v25, %v4920_v25  ;;  %v19148_v25 = vld [vmem:[#allocation151_spill] sm:$0xff] }
 0x5e3   :  { %v5320_v35 = vadd.f32 %v5319_v7, %v5159_v17  ;;  %v5360_v24 = vadd.f32 %v5359_v14, %v5198_v40  ;;  %v5286_v31 = vadd.f32 %v5285_v6, %v14234_v45  ;;  %v19141_v17 = vld [vmem:[#allocation221_spill] sm:$0xff]  ;;  %v5201_v11 = vmul.f32 %v14384_v3, %v14384_v3  ;;  %v19145_v3 = vld [vmem:[#allocation318_spill] sm:$0xff]  ;;  %v19147_v14 = vld [vmem:[#allocation19_spill] sm:$0xff] }
 0x5e4   :  { %v4922_v16 = vsub.f32 %v19141_v17, %v14351_v61  ;;  %v5238_v22 = vadd.f32 %v5237_v34, %v5079_v44  ;;  %v5166_v45 = vmul.f32 %v19142_v15, %v19142_v15  ;;  %v5081_v21 = vmul.f32 %v4921_v51, %v4921_v51  ;;  %v19151_v51 = vld [vmem:[#allocation314_spill] sm:$0xff]  ;;  %v19152_v34 = vld [vmem:[#allocation311_spill] sm:$0xff] }
 0x5e5   :  { %v5321_v19 = vadd.f32 %v5320_v35, %v5160_v2  ;;  %v5361_v23 = vadd.f32 %v5360_v24, %v5199_v49  ;;  %v5287_v0 = vadd.f32 %v5286_v31, %v14238_v1  ;;  %v19143_v2 = vld [vmem:[#allocation278_spill] sm:$0xff]  ;;  %v5202_v30 = vmul.f32 %v14388_v5, %v14388_v5  ;;  %v19149_v5 = vld [vmem:[#allocation40_spill] sm:$0xff] }
 0x5e6   :  { %v4923_v62 = vsub.f32 %v19143_v2, %v14351_v61  ;;  %v5239_v33 = vadd.f32 %v5238_v22, %v5080_v53  ;;  %v5167_v1 = vmul.f32 %v19145_v3, %v19145_v3  ;;  %v5082_v52 = vmul.f32 %v4922_v16, %v4922_v16  ;;  %v19160_v3 = vld [vmem:[#allocation159_spill] sm:$0xff] }
 0x5e7   :  { %v5322_v59 = vadd.f32 %v5321_v19, %v5161_v32  ;;  %v5362_v58 = vadd.f32 %v5361_v23, %v5200_v36  ;;  %v5288_v8 = vadd.f32 %v5287_v0, %v19144_v48  ;;  %v19146_v32 = vld [vmem:[#allocation91_spill] sm:$0xff]  ;;  %v5203_v28 = vmul.f32 %v19147_v14, %v19147_v14  ;;  %v19153_v23 = vld [vmem:[#allocation13_spill] sm:$0xff] }
 0x5e8   :  { %v4924_v40 = vsub.f32 %v19146_v32, %v14351_v61  ;;  %v5240_v7 = vadd.f32 %v5239_v33, %v5081_v21  ;;  %v5168_v6 = vmul.f32 %v19149_v5, %v19149_v5  ;;  %v5083_v24 = vmul.f32 %v4923_v62, %v4923_v62  ;;  %v19157_v21 = vld [vmem:[#allocation300_spill] sm:$0xff]  ;;  %v19161_v14 = vld [vmem:[#allocation109_spill] sm:$0xff]  ;;  %v19299_v32 = vld [vmem:[#allocation83_spill] sm:$0xff] }
 0x5e9   :  { %v5323_v9 = vadd.f32 %v5322_v59, %v5162_v12  ;;  %v5363_v47 = vadd.f32 %v5362_v58, %v5201_v11  ;;  %v5289_v41 = vadd.f32 %v5288_v8, %v19148_v25  ;;  %v19150_v12 = vld [vmem:[#allocation287_spill] sm:$0xff]  ;;  %v5204_v44 = vmul.f32 %v19151_v51, %v19151_v51  ;;  %v19155_v11 = vld [vmem:[#allocation152_spill] sm:$0xff] }
 0x5ea   :  { %v4925_v35 = vsub.f32 %v19150_v12, %v14351_v61  ;;  %v5241_v50 = vadd.f32 %v5240_v7, %v5082_v52  ;;  %v5169_v60 = vmul.f32 %v19153_v23, %v19153_v23  ;;  %v5084_v53 = vmul.f32 %v4924_v40, %v4924_v40  ;;  %v19156_v59 = vld [vmem:[#allocation320_spill] sm:$0xff]  ;;  %v19167_v23 = vld [vmem:[#allocation315_spill] sm:$0xff] }
 0x5eb   :  { %v5324_v42 = vadd.f32 %v5323_v9, %v5163_v18  ;;  %v5364_v49 = vadd.f32 %v5363_v47, %v5202_v30  ;;  %v5290_v36 = vadd.f32 %v5289_v41, %v19152_v34  ;;  %v19154_v18 = vld [vmem:[#allocation298_spill] sm:$0xff]  ;;  %v5205_v0 = vmul.f32 %v19155_v11, %v19155_v11  ;;  %v19159_v9 = vld [vmem:[#allocation313_spill] sm:$0xff]  ;;  %v19298_v12 = vld [vmem:[#allocation192_spill] sm:$0xff] }
 0x5ec   :  { %v4926_v16 = vsub.f32 %v19154_v18, %v14351_v61  ;;  %v5242_v22 = vadd.f32 %v5241_v50, %v5083_v24  ;;  %v5170_v33 = vmul.f32 %v19157_v21, %v19157_v21  ;;  %v5085_v48 = vmul.f32 %v4925_v35, %v4925_v35  ;;  %v19164_v35 = vld [vmem:[#allocation111_spill] sm:$0xff]  ;;  %v19297_v18 = vld [vmem:[#allocation58_spill] sm:$0xff] }
 0x5ed   :  { %v5325_v31 = vadd.f32 %v5324_v42, %v5164_v46  ;;  %v5365_v19 = vadd.f32 %v5364_v49, %v5203_v28  ;;  %v5291_v58 = vadd.f32 %v5290_v36, %v19156_v59  ;;  %v19158_v46 = vld [vmem:[#allocation228_spill] sm:$0xff]  ;;  %v5206_v47 = vmul.f32 %v19159_v9, %v19159_v9  ;;  %v19163_v49 = vld [vmem:[#allocation153_spill] sm:$0xff]  ;;  %v19169_v59 = vld [vmem:[#allocation110_spill] sm:$0xff] }
 0x5ee   :  { %v4927_v30 = vsub.f32 %v19158_v46, %v14351_v61  ;;  %v5243_v8 = vadd.f32 %v5242_v22, %v5084_v53  ;;  %v5171_v28 = vmul.f32 %v19161_v14, %v19161_v14  ;;  %v5086_v41 = vmul.f32 %v4926_v16, %v4926_v16  ;;  %v19168_v16 = vld [vmem:[#allocation245_spill] sm:$0xff]  ;;  %v19292_v46 = vld [vmem:[#allocation78_spill] sm:$0xff] }
 0x5ef   :  { %v5326_v15 = vadd.f32 %v5325_v31, %v5165_v43  ;;  %v5366_v62 = vadd.f32 %v5365_v19, %v5204_v44  ;;  %v5292_v40 = vadd.f32 %v5291_v58, %v19160_v3  ;;  %v19162_v43 = vld [vmem:[#allocation290_spill] sm:$0xff]  ;;  %v5207_v5 = vmul.f32 %v19163_v49, %v19163_v49  ;;  %v19165_v44 = vld [vmem:[#allocation243_spill] sm:$0xff] }
 0x5f0   :  { %v4928_v25 = vsub.f32 %v19162_v43, %v14351_v61  ;;  %v5244_v42 = vadd.f32 %v5243_v8, %v5085_v48  ;;  %v5172_v34 = vmul.f32 %v19165_v44, %v19165_v44  ;;  %v5087_v31 = vmul.f32 %v4927_v30, %v4927_v30  ;;  %v19171_v48 = vld [vmem:[#allocation25_spill] sm:$0xff]  ;;  %v19172_v30 = vld [vmem:[#allocation112_spill] sm:$0xff] }
 0x5f1   :  { %v5327_v52 = vadd.f32 %v5326_v15, %v5166_v45  ;;  %v5367_v7 = vadd.f32 %v5366_v62, %v5205_v0  ;;  %v5293_v24 = vadd.f32 %v5292_v40, %v19164_v35  ;;  %v19166_v45 = vld [vmem:[#allocation229_spill] sm:$0xff]  ;;  %v5208_v53 = vmul.f32 %v19167_v23, %v19167_v23  ;;  %v19173_v40 = vld [vmem:[#allocation244_spill] sm:$0xff]  ;;  %v19179_v23 = vld [vmem:[#allocation323_spill] sm:$0xff] }
 0x5f2   :  { %v4929_v36 = vsub.f32 %v19166_v45, %v14351_v61  ;;  %v5245_v19 = vadd.f32 %v5244_v42, %v5086_v41  ;;  %v5173_v58 = vmul.f32 %v19169_v59, %v19169_v59  ;;  %v5088_v62 = vmul.f32 %v4928_v25, %v4928_v25  ;;  %v19175_v42 = vld [vmem:[#allocation321_spill] sm:$0xff]  ;;  %v19176_v25 = vld [vmem:[#allocation246_spill] sm:$0xff]  ;;  %v19289_v45 = vld [vmem:[#allocation204_spill] sm:$0xff] }
 0x5f3   :  { %v5328_v50 = vadd.f32 %v5327_v52, %v5167_v1  ;;  %v5368_v51 = vadd.f32 %v5367_v7, %v5206_v47  ;;  %v5294_v22 = vadd.f32 %v5293_v24, %v19168_v16  ;;  %v19170_v1 = vld [vmem:[#allocation294_spill] sm:$0xff]  ;;  %v5209_v8 = vmul.f32 %v19171_v48, %v19171_v48  ;;  %v19290_v43 = vld [vmem:[#allocation72_spill] sm:$0xff] }
 0x5f4   :  { %v4930_v15 = vsub.f32 %v19170_v1, %v14351_v61  ;;  %v5246_v21 = vadd.f32 %v5245_v19, %v5087_v31  ;;  %v5174_v52 = vmul.f32 %v19173_v40, %v19173_v40  ;;  %v5089_v14 = vmul.f32 %v4929_v36, %v4929_v36  ;;  %v19180_v36 = vld [vmem:[#allocation113_spill] sm:$0xff]  ;;  %v19185_v40 = vld [vmem:[#allocation167_spill] sm:$0xff] }
 0x5f5   :  { %v5329_v11 = vadd.f32 %v5328_v50, %v5168_v6  ;;  %v5369_v0 = vadd.f32 %v5368_v51, %v5207_v5  ;;  %v5295_v9 = vadd.f32 %v5294_v22, %v19172_v30  ;;  %v19174_v6 = vld [vmem:[#allocation281_spill] sm:$0xff]  ;;  %v5210_v49 = vmul.f32 %v19175_v42, %v19175_v42  ;;  %v19177_v50 = vld [vmem:[#allocation174_spill] sm:$0xff] }
 0x5f6   :  { %v4931_v7 = vsub.f32 %v19174_v6, %v14351_v61  ;;  %v5247_v41 = vadd.f32 %v5246_v21, %v5088_v62  ;;  %v5175_v51 = vmul.f32 %v19177_v50, %v19177_v50  ;;  %v5090_v31 = vmul.f32 %v4930_v15, %v4930_v15  ;;  %v19184_v15 = vld [vmem:[#allocation247_spill] sm:$0xff]  ;;  %v19280_v6 = vld [vmem:[#allocation52_spill] sm:$0xff] }
 0x5f7   :  { %v5330_v47 = vadd.f32 %v5329_v11, %v5169_v60  ;;  %v5370_v3 = vadd.f32 %v5369_v0, %v5208_v53  ;;  %v5296_v5 = vadd.f32 %v5295_v9, %v19176_v25  ;;  %v19178_v60 = vld [vmem:[#allocation291_spill] sm:$0xff]  ;;  %v5211_v53 = vmul.f32 %v19179_v23, %v19179_v23  ;;  %v19181_v0 = vld [vmem:[#allocation310_spill] sm:$0xff]  ;;  %v19187_v25 = vld [vmem:[#allocation149_spill] sm:$0xff] }
 0x5f8   :  { %v4932_v44 = vsub.f32 %v19178_v60, %v14351_v61  ;;  %v5248_v19 = vadd.f32 %v5247_v41, %v5089_v14  ;;  %v5176_v59 = vmul.f32 %v19181_v0, %v19181_v0  ;;  %v5091_v21 = vmul.f32 %v4931_v7, %v4931_v7  ;;  %v19189_v7 = vld [vmem:[#allocation18_spill] sm:$0xff]  ;;  %v19274_v60 = vld [vmem:[#allocation47_spill] sm:$0xff] }
 0x5f9   :  { %v5331_v35 = vadd.f32 %v5330_v47, %v5170_v33  ;;  %v5371_v24 = vadd.f32 %v5370_v3, %v5209_v8  ;;  %v5297_v16 = vadd.f32 %v5296_v5, %v19180_v36  ;;  %v19182_v33 = vld [vmem:[#allocation289_spill] sm:$0xff]  ;;  %v19183_v8 = vld [vmem:[#allocation140_spill] sm:$0xff]  ;;  %v4934_v14 = vsub.f32 %v19185_v40, %v14351_v61 }
 0x5fa   :  { %v4933_v62 = vsub.f32 %v19182_v33, %v14351_v61  ;;  %v5249_v48 = vadd.f32 %v5248_v19, %v5090_v31  ;;  %v5212_v30 = vmul.f32 %v19183_v8, %v19183_v8  ;;  %v5092_v42 = vmul.f32 %v4932_v44, %v4932_v44  ;;  %v19188_v5 = vld [vmem:[#allocation145_spill] sm:$0xff]  ;;  %v19190_v19 = vld [vmem:[#allocation302_spill] sm:$0xff]  ;;  %v19193_v44 = vld [vmem:[#allocation312_spill] sm:$0xff] }
 0x5fb   :  { %v5332_v22 = vadd.f32 %v5331_v35, %v5171_v28  ;;  %v5372_v11 = vadd.f32 %v5371_v24, %v5210_v49  ;;  %v5298_v9 = vadd.f32 %v5297_v16, %v19184_v15  ;;  %v19186_v28 = vld [vmem:[#allocation114_spill] sm:$0xff]  ;;  %v4982_v35 = vsub.f32 %v19188_v5, %v19187_v25  ;;  %v19272_v40 = vld [vmem:[#allocation285_spill] sm:$0xff]  ;;  %v19273_v33 = vld [vmem:[#allocation179_spill] sm:$0xff] }
 0x5fc   :  { %v5213_v41 = vmul.f32 %v19186_v28, %v19186_v28  ;;  %v5250_v49 = vadd.f32 %v5249_v48, %v5091_v21  ;;  %v4935_v23 = vsub.f32 %v19190_v19, %v14351_v61  ;;  %v5093_v36 = vmul.f32 %v4933_v62, %v4933_v62  ;;  %v19194_v8 = vld [vmem:[#allocation102_spill] sm:$0xff] }
 0x5fd   :  { %v5333_v47 = vadd.f32 %v5332_v22, %v5172_v34  ;;  %v5373_v3 = vadd.f32 %v5372_v11, %v5211_v53  ;;  %v5299_v24 = vadd.f32 %v5298_v9, %v19189_v7  ;;  %v19191_v34 = vld [vmem:[#allocation248_spill] sm:$0xff]  ;;  %v19192_v22 = vld [vmem:[#allocation105_spill] sm:$0xff]  ;;  %v4936_v15 = vsub.f32 %v19194_v8, %v14351_v61 }
 0x5fe   :  { %v5214_v53 = vmul.f32 %v19191_v34, %v19191_v34  ;;  %v5251_v16 = vadd.f32 %v5250_v49, %v5092_v42  ;;  %v5141_v11 = vmul.f32 %v19192_v22, %v19192_v22  ;;  %v5094_v9 = vmul.f32 %v4934_v14, %v4934_v14  ;;  %v19196_v42 = vld [vmem:[#allocation147_spill] sm:$0xff]  ;;  %v19197_v7 = vld [vmem:[#allocation236_spill] sm:$0xff]  ;;  %v19199_v14 = vld [vmem:[#allocation322_spill] sm:$0xff] }
 0x5ff   :  { %v5334_v50 = vadd.f32 %v5333_v47, %v5173_v58  ;;  %v5374_v31 = vadd.f32 %v5373_v3, %v5212_v30  ;;  %v5300_v0 = vadd.f32 %v5299_v24, %v19193_v44  ;;  %v19195_v58 = vld [vmem:[#allocation115_spill] sm:$0xff]  ;;  %v5142_v3 = vmul.f32 %v4982_v35, %v4982_v35 }
 0x600   :  { %v5215_v30 = vmul.f32 %v19195_v58, %v19195_v58  ;;  %v5252_v47 = vadd.f32 %v5251_v16, %v5093_v36  ;;  %v5177_v49 = vmul.f32 %v19196_v42, %v19196_v42  ;;  %v4937_v24 = vsub.f32 %v19197_v7, %v14351_v61  ;;  %v19200_v36 = vld [vmem:[#allocation104_spill] sm:$0xff] }
 0x601   :  { %v5335_v21 = vadd.f32 %v5334_v50, %v5174_v52  ;;  %v5375_v48 = vadd.f32 %v5374_v31, %v5213_v41  ;;  %v5301_v28 = vadd.f32 %v5300_v0, %v5141_v11  ;;  %v5095_v52 = vmul.f32 %v4935_v23, %v4935_v23  ;;  %v19198_v50 = vld [vmem:[#allocation249_spill] sm:$0xff]  ;;  %v19207_v42 = vld [vmem:[#allocation316_spill] sm:$0xff] }
 0x602   :  { %v5253_v41 = vadd.f32 %v5252_v47, %v5094_v9  ;;  %v5216_v31 = vmul.f32 %v19198_v50, %v19198_v50  ;;  %v5059_v35 = vsub.f32 %v19200_v36, %v19199_v14  ;;  %v5096_v16 = vmul.f32 %v4936_v15, %v4936_v15  ;;  %v19202_v0 = vld [vmem:[#allocation301_spill] sm:$0xff]  ;;  %v19206_v15 = vld [vmem:[#allocation103_spill] sm:$0xff] }
 0x603   :  { %v5336_v5 = vadd.f32 %v5335_v21, %v5175_v51  ;;  %v5376_v62 = vadd.f32 %v5375_v48, %v5214_v53  ;;  %v5302_v34 = vadd.f32 %v5301_v28, %v5142_v3  ;;  %v19201_v51 = vld [vmem:[#allocation37_spill] sm:$0xff]  ;;  %v5178_v21 = vmul.f32 %v19202_v0, %v19202_v0  ;;  %v19203_v48 = vld [vmem:[#allocation22_spill] sm:$0xff] }
 0x604   :  { %v4938_v53 = vsub.f32 %v19201_v51, %v14351_v61  ;;  %v5254_v11 = vadd.f32 %v5253_v41, %v5095_v52  ;;  %v5217_v23 = vmul.f32 %v19203_v48, %v19203_v48  ;;  %v19205_v47 = vld [vmem:[#allocation17_spill] sm:$0xff]  ;;  %v5097_v28 = vmul.f32 %v4937_v24, %v4937_v24  ;;  %v19210_v48 = vld [vmem:[#allocation306_spill] sm:$0xff] }
 0x605   :  { %v5337_v22 = vadd.f32 %v5336_v5, %v5176_v59  ;;  %v5377_v44 = vadd.f32 %v5376_v62, %v5215_v30  ;;  %5303 = vadd.xlane.f32.xlu0 %v5302_v34  ;;  %v19204_v59 = vld [vmem:[#allocation303_spill] sm:$0xff]  ;;  %v5179_v3 = vmul.f32 %v19205_v47, %v19205_v47  ;;  %v4939_v62 = vsub.f32 %v19206_v15, %v14351_v61  ;;  %v19208_v34 = vld [vmem:[#allocation293_spill] sm:$0xff]  ;;  %v19211_v24 = vld [vmem:[#allocation238_spill] sm:$0xff] }
 0x606   :  { %v5060_v30 = vsub.f32 %v19204_v59, %v19199_v14  ;;  %v5255_v5 = vadd.f32 %v5254_v11, %v5096_v16  ;;  %v5218_v52 = vmul.f32 %v19207_v42, %v19207_v42  ;;  %v5219_v0 = vmul.f32 %v5059_v35, %v5059_v35  ;;  %v19212_v47 = vld [vmem:[#allocation158_spill] sm:$0xff] }
 0x607   :  { %v5338_v58 = vadd.f32 %v5337_v22, %v5177_v49  ;;  %v5378_v9 = vadd.f32 %v5377_v44, %v5216_v31  ;;  %v5061_v49 = vsub.f32 %v19208_v34, %v19199_v14  ;;  %v19209_v31 = vld [vmem:[#allocation309_spill] sm:$0xff]  ;;  %v5098_v44 = vmul.f32 %v4938_v53, %v4938_v53 }
 0x608   :  { %v5180_v22 = vmul.f32 %v19209_v31, %v19209_v31  ;;  %v5256_v36 = vadd.f32 %v5255_v5, %v5097_v28  ;;  %v5022_v16 = vsub.f32 %v19211_v24, %v19210_v48  ;;  %v5181_v15 = vmul.f32 %v19212_v47, %v19212_v47  ;;  %v19214_v31 = vld [vmem:[#allocation148_spill] sm:$0xff] }
 0x609   :  { %v5339_v41 = vadd.f32 %v5338_v58, %v5178_v21  ;;  %v5379_v50 = vadd.f32 %v5378_v9, %v5217_v23  ;;  %v19213_v21 = vld [vmem:[#allocation41_spill] sm:$0xff]  ;;  %v5220_v58 = vmul.f32 %v5060_v30, %v5060_v30  ;;  %v5099_v42 = vmul.f32 %v4939_v62, %v4939_v62 }
 0x60a   :  { %v4940_v23 = vsub.f32 %v19213_v21, %v14351_v61  ;;  %v5257_v9 = vadd.f32 %v5256_v36, %v5098_v44  ;;  %v5062_v53 = vsub.f32 %v19214_v31, %v19199_v14  ;;  %v5221_v35 = vmul.f32 %v5061_v49, %v5061_v49 }
 0x60b   :  { %v5340_v11 = vadd.f32 %v5339_v41, %v5179_v3  ;;  %v5380_v59 = vadd.f32 %v5379_v50, %v5218_v52  ;;  %v5182_v5 = vmul.f32 %v5022_v16, %v5022_v16  ;;  %v19215_v52 = vld [vmem:[#allocation14_spill] sm:$0xff] }
 0x60c   :  { %v5258_v3 = vadd.f32 %v5257_v9, %v5099_v42  ;;  %v4941_v41 = vsub.f32 %v19215_v52, %v14351_v61  ;;  %v5100_v50 = vmul.f32 %v4940_v23, %v4940_v23  ;;  %v5222_v7 = vmul.f32 %v5062_v53, %v5062_v53 }
 0x60d   :  { %v5341_v34 = vadd.f32 %v5340_v11, %v5180_v22  ;;  %v5381_v28 = vadd.f32 %v5380_v59, %v5219_v0  ;;  %v19216_v22 = vld [vmem:[#allocation304_spill] sm:$0xff] }
 0x60e   :  { %v5259_v62 = vadd.f32 %v5258_v3, %v5100_v50  ;;  %v4942_v44 = vsub.f32 %v19216_v22, %v14351_v61  ;;  %v5101_v36 = vmul.f32 %v4941_v41, %v4941_v41  ;;  %v14720_v3 = vld [vmem:[%s17460_s2 + $0x8] sm:$0xff] }
 0x60f   :  { %v5342_v51 = vadd.f32 %v5341_v34, %v5181_v15  ;;  %v5382_v24 = vadd.f32 %v5381_v28, %v5220_v58 }
 0x610   :  { %v5260_v49 = vadd.f32 %v5259_v62, %v5101_v36  ;;  %v5102_v0 = vmul.f32 %v4942_v44, %v4942_v44 }
 0x611   :  { %v5343_v47 = vadd.f32 %v5342_v51, %v5182_v5  ;;  %v5383_v21 = vadd.f32 %v5382_v24, %v5221_v35  ;;  %v17736_v51 = vmov 1  }
 0x612   :  { %v5261_v16 = vadd.f32 %v5260_v49, %v5102_v0  ;;  %9909 = vset.pattern.permute.xlu1 %v17736_v51  ;;  %9908 = vset.pattern.permute.xlu2 %v17736_v51 }
 0x613   :  { %5344 = vadd.xlane.f32.xlu2 %v5343_v47  ;;  %v5384_v30 = vadd.f32 %v5383_v21, %v5222_v7 }
 0x615   :  { %5385 = vadd.xlane.f32.xlu1 %v5384_v30 }
 0x61d   :  { %5262 = vadd.xlane.f32.xlu1 %v5261_v16 }
 0x678   :  { %v5304_v11 = vpop.xlane.xlu0 %5303 }
 0x679   :  { %v5388_v59 = vmul.f32 0.0001953125, %v5304_v11 }
 0x67b   :  { %v5396_v15 = vadd.f32 1e-05, %v5388_v59 }
 0x67d   :  { %9915 = vrsqrt.f32 %v5396_v15  ;;  %vm5415_vm3 = vweird.f32 %v5396_v15 }
 0x683   :  { %v9916_v23 = vpop.eup %9915 }
 0x684   :  { %v5410_v7 = vmul.f32 %v9916_v23, %v5396_v15  ;;  %vm5416_vm2 = vweird.f32 %v9916_v23 }
 0x685   :  { %vm5417_vm4 = vmor %vm5415_vm3, %vm5416_vm2 }
 0x686   :  { %v5345_v58 = vpop.xlane.xlu2 %5344  ;;  %v5411_v42 = vmul.f32 %v9916_v23, %v5410_v7 }
 0x687   :  { %v5389_v9 = vmul.f32 0.0001953125, %v5345_v58 }
 0x688   :  { %v5386_v34 = vpop.xlane.xlu1 %5385  ;;  %v5412_v28 = vmul.f32 0.5, %v5411_v42 }
 0x689   :  { %v5397_v31 = vadd.f32 1e-05, %v5389_v9  ;;  %v5390_v53 = vmul.f32 0.0001953125, %v5386_v34  ;;  %v5394_v34 = vld [vmem:[%s17460_s2 + $0x18] sm:$0xff] }
 0x68a   :  { %v5413_v5 = vsub.f32 1.5, %v5412_v28 }
 0x68b   :  { %9917 = vrsqrt.f32 %v5397_v31  ;;  %v5398_v35 = vadd.f32 1e-05, %v5390_v53  ;;  %vm5425_vm6 = vweird.f32 %v5397_v31 }
 0x68c   :  { %v5414_v24 = vmul.f32 %v9916_v23, %v5413_v5 }
 0x68d   :  { %9919 = vrsqrt.f32 %v5398_v35  ;;  %vm5435_vm9 = vweird.f32 %v5398_v35 }
 0x68e   :  { %v5418_v41 = vsel %vm5417_vm4, %v9916_v23, %v5414_v24  ;;  %v5393_v23 = vld [vmem:[%s17460_s2 + $0x10] sm:$0xff] }
 0x68f   :  { %v5440_v21 = vmul.f32 %v5418_v41, %v14720_v3 }
 0x690   :  { %v5263_v52 = vpop.xlane.xlu1 %5262 }
 0x691   :  { %v9918_v50 = vpop.eup %9917  ;;  %v5387_v47 = vmul.f32 0.0001953125, %v5263_v52  ;;  %v5444_v44 = vmul.f32 %v5440_v21, %v19187_v25 }
 0x692   :  { %v5420_v30 = vmul.f32 %v9918_v50, %v5397_v31  ;;  %vm5426_vm5 = vweird.f32 %v9918_v50 }
 0x693   :  { %v9920_v62 = vpop.eup %9919  ;;  %v5395_v22 = vadd.f32 1e-05, %v5387_v47  ;;  %5453 = vrot.lane.b32.xlu1 %v5444_v44, %s10054_s10  ;;  %vm5427_vm8 = vmor %vm5425_vm6, %vm5426_vm5  ;;  %v5391_v47 = vld [vmem:[%s17460_s2] sm:$0xff]  ;;  %v17735_v44 = vmov 2  }
 0x694   :  { %v5421_v36 = vmul.f32 %v9918_v50, %v5420_v30  ;;  %v5430_v49 = vmul.f32 %v9920_v62, %v5398_v35  ;;  %vm5436_vm7 = vweird.f32 %v9920_v62  ;;  %9911 = vset.pattern.permute.xlu0 %v17735_v44 }
 0x695   :  { %9921 = vrsqrt.f32 %v5395_v22  ;;  %vm5437_vm10 = vmor %vm5435_vm9, %vm5436_vm7  ;;  %vm5405_vm12 = vweird.f32 %v5395_v22 }
 0x696   :  { %v5422_v0 = vmul.f32 0.5, %v5421_v36  ;;  %v5431_v16 = vmul.f32 %v9920_v62, %v5430_v49 }
 0x698   :  { %v5423_v11 = vsub.f32 1.5, %v5422_v0  ;;  %v5432_v59 = vmul.f32 0.5, %v5431_v16 }
 0x69a   :  { %v5433_v15 = vsub.f32 1.5, %v5432_v59  ;;  %v5424_v7 = vmul.f32 %v9918_v50, %v5423_v11 }
 0x69b   :  { %v9922_v25 = vpop.eup %9921 }
 0x69c   :  { %v5434_v58 = vmul.f32 %v9920_v62, %v5433_v15  ;;  %v5400_v9 = vmul.f32 %v9922_v25, %v5395_v22  ;;  %v5428_v42 = vsel %vm5427_vm8, %v9918_v50, %v5424_v7  ;;  %vm5406_vm11 = vweird.f32 %v9922_v25  ;;  %v19218_v15 = vld [vmem:[#allocation49_spill] sm:$0xff] }
 0x69d   :  { %v5441_v53 = vmul.f32 %v5428_v42, %v5393_v23  ;;  %vm5407_vm13 = vmor %vm5405_vm12, %vm5406_vm11 }
 0x69e   :  { %v5401_v31 = vmul.f32 %v9922_v25, %v5400_v9  ;;  %v5438_v28 = vsel %vm5437_vm10, %v9920_v62, %v5434_v58  ;;  %v19220_v9 = vld [vmem:[#allocation189_spill] sm:$0xff] }
 0x69f   :  { %5479 = vperm.xlu1 %9909, %v5441_v53   ;;  %v5445_v5 = vmul.f32 %v5441_v53, %v19210_v48  ;;  %v5442_v24 = vmul.f32 %v5438_v28, %v5394_v34 }
 0x6a0   :  { %v5402_v52 = vmul.f32 0.5, %v5401_v31 }
 0x6a1   :  { %5455 = vrot.lane.b32.xlu0 %v5445_v5, %s10054_s10  ;;  %v5446_v41 = vmul.f32 %v5442_v24, %v19199_v14  ;;  %v19217_v14 = vmov 0  }
 0x6a2   :  { %v5403_v35 = vsub.f32 1.5, %v5402_v52 }
 0x6a3   :  { %5457 = vrot.lane.b32.xlu2 %v5446_v41, %s10054_s10 }
 0x6a4   :  { %v5404_v50 = vmul.f32 %v9922_v25, %v5403_v35 }
 0x6a6   :  { %v5408_v30 = vsel %vm5407_vm13, %v9922_v25, %v5404_v50  ;;  %v19219_v25 = vld [vmem:[#allocation55_spill] sm:$0xff]  ;;  %v19226_v50 = vld [vmem:[#allocation142_spill] sm:$0xff] }
 0x6a7   :  { %v5439_v62 = vmul.f32 %v5408_v30, %v5391_v47  ;;  %9910 = vset.pattern.permute.xlu1 %v17735_v44  ;;  %v19227_v30 = vld [vmem:[#allocation93_spill] sm:$0xff]  ;;  %v19255_v44 = vld [vmem:[#allocation272_spill] sm:$0xff] }
 0x6a9   :  { %v5443_v48 = vmul.f32 %v5439_v62, %v14351_v61 }
 0x6ab   :  { %5484 = vperm.xlu2 %9908, %v5442_v24   ;;  %5451 = vrot.lane.b32.xlu0 %v5443_v48, %s10054_s10  ;;  %v19228_v48 = vld [vmem:[#allocation94_spill] sm:$0xff] }
 0x6b3   :  { %5474 = vperm.xlu2 %9908, %v5440_v21  }
 0x6bb   :  { %5469 = vperm.xlu2 %9908, %v5439_v62  }
 0x6c3   :  { %9912 = vset.pattern.permute.xlu2 %v19217_v14 }
 0x6fd   :  { %v5458_v22 = vpop.permute.xlu2 %5457 }
 0x6fe   :  { %v5466_v36 = vsub.f32 %v5394_v34, %v5458_v22  ;;  %v19229_v22 = vld [vmem:[#allocation283_spill] sm:$0xff] }
 0x700   :  { %5664 = vperm.xlu0 %9911, %v5466_v36  }
 0x705   :  { %v5454_v16 = vpop.permute.xlu1 %5453  ;;  %v14744_v59 = vpop.permute.xlu2 %5484 }
 0x706   :  { %v5464_v61 = vsub.f32 %v14720_v3, %v5454_v16  ;;  %v5611_v7 = vmul.f32 %v14744_v59, %v19218_v15  ;;  %v5612_v58 = vmul.f32 %v14744_v59, %v19219_v25  ;;  %v5613_v42 = vmul.f32 %v14744_v59, %v19220_v9  ;;  %v19231_v16 = vld [vmem:[#allocation33_spill] sm:$0xff]  ;;  %v19238_v9 = vld [vmem:[#allocation230_spill] sm:$0xff] }
 0x707   :  { %v5628_v62 = vmul.f32 %v14744_v59, %v19227_v30  ;;  %v5629_v14 = vmul.f32 %v14744_v59, %v19228_v48  ;;  %v5630_v36 = vmul.f32 %v14744_v59, %v19229_v22  ;;  %v19241_v30 = vld [vmem:[#allocation295_spill] sm:$0xff] }
 0x708   :  { %v19242_v48 = vld [vmem:[#allocation11_spill] sm:$0xff] }
 0x713   :  { %v5456_v49 = vpop.permute.xlu0 %5455 }
 0x714   :  { %v5465_v0 = vsub.f32 %v5393_v23, %v5456_v49  ;;  %v19221_v23 = vld [vmem:[#allocation195_spill] sm:$0xff]  ;;  %v19230_v49 = vld [vmem:[#allocation141_spill] sm:$0xff] }
 0x715   :  { %v5614_v34 = vmul.f32 %v14744_v59, %v19221_v23  ;;  %v19239_v23 = vld [vmem:[#allocation98_spill] sm:$0xff] }
 0x716   :  { %5659 = vperm.xlu1 %9910, %v5465_v0   ;;  %v5631_v0 = vmul.f32 %v14744_v59, %v19230_v49 }
 0x71d   :  { %v5452_v11 = vpop.permute.xlu0 %5451 }
 0x71e   :  { %5654 = vperm.xlu1 %9910, %v5464_v61   ;;  %v5463_v21 = vsub.f32 %v5391_v47, %v5452_v11  ;;  %v5627_v47 = vmul.f32 %v14744_v59, %v19226_v50  ;;  %v5632_v61 = vmul.f32 %v14744_v59, %v19231_v16  ;;  %v19240_v50 = vld [vmem:[#allocation6_spill] sm:$0xff] }
 0x720   :  { %5649 = vperm.xlu0 %9911, %v5463_v21  }
 0x772   :  { %v14754_v53 = vpop.permute.xlu0 %5664 }
 0x773   :  { %v14757_v3 = vadd.f32 %v14754_v53, %v5611_v7  ;;  %v14760_v31 = vadd.f32 %v14754_v53, %v5612_v58  ;;  %v14763_v28 = vadd.f32 %v14754_v53, %v5613_v42  ;;  %v14766_v5 = vadd.f32 %v14754_v53, %v5614_v34 }
 0x774   :  { %v14793_v11 = vadd.f32 %v14754_v53, %v5627_v47  ;;  %v14796_v21 = vadd.f32 %v14754_v53, %v5628_v62  ;;  %v14799_v15 = vadd.f32 %v14754_v53, %v5629_v14  ;;  %v14802_v7 = vadd.f32 %v14754_v53, %v5630_v36  ;;  %v19244_v36 = vld [vmem:[#allocation101_spill] sm:$0xff] }
 0x775   :  { %19222 = vst [vmem:[#allocation160_spill] sm:$0xff] %v14757_v3  ;;  %v17740_v24 = vmax.f32 %v14757_v3, 0.0  ;;  %v17739_v52 = vmax.f32 %v14760_v31, 0.0  ;;  %v17738_v41 = vmax.f32 %v14763_v28, 0.0  ;;  %v17737_v35 = vmax.f32 %v14766_v5, 0.0 }
 0x776   :  { %19223 = vst [vmem:[#allocation143_spill] sm:$0xff] %v14760_v31  ;;  %v14805_v25 = vadd.f32 %v14754_v53, %v5631_v0  ;;  %v14808_v58 = vadd.f32 %v14754_v53, %v5632_v61  ;;  %v5633_v42 = vmul.f32 %v14744_v59, %v19238_v9  ;;  %v5634_v34 = vmul.f32 %v14744_v59, %v19239_v23  ;;  %v19245_v0 = vld [vmem:[#allocation235_spill] sm:$0xff]  ;;  %v19246_v61 = vld [vmem:[#allocation166_spill] sm:$0xff] }
 0x777   :  { %19224 = vst [vmem:[#allocation156_spill] sm:$0xff] %v14763_v28  ;;  %6299 = vmatpush.msra.mxu0 %v17740_v24  ;;  %6319 = vmatpush.msra.mxu1 %v17739_v52  ;;  %v5635_v47 = vmul.f32 %v14744_v59, %v19240_v50  ;;  %v5636_v62 = vmul.f32 %v14744_v59, %v19241_v30  ;;  %v19259_v52 = vld [vmem:[#allocation207_spill] sm:$0xff]  ;;  %v19261_v24 = vld [vmem:[#allocation208_spill] sm:$0xff] }
 0x778   :  { %19225 = vst [vmem:[#allocation317_spill] sm:$0xff] %v14766_v5  ;;  %6339 = vmatpush.msra.mxu2 %v17738_v41  ;;  %6359 = vmatpush.msra.mxu3 %v17737_v35  ;;  %v5637_v14 = vmul.f32 %v14744_v59, %v19242_v48  ;;  %v14821_v22 = vadd.f32 %v14754_v53, %v5633_v42  ;;  %v14841_v48 = vpop.permute.xlu1 %5479  ;;  %v14860_v35 = vpop.permute.xlu2 %5474  ;;  %v19262_v5 = vld [vmem:[#allocation80_spill] sm:$0xff] }
 0x779   :  { %19232 = vst [vmem:[#allocation26_spill] sm:$0xff] %v14793_v11  ;;  %v5638_v49 = vmul.f32 %v14744_v59, %v19244_v36  ;;  %v5639_v16 = vmul.f32 %v14744_v59, %v19245_v0  ;;  %v5640_v9 = vmul.f32 %v14744_v59, %v19246_v61  ;;  %v14830_v23 = vadd.f32 %v14754_v53, %v5634_v34  ;;  %v19254_v61 = vld [vmem:[#allocation36_spill] sm:$0xff] }
 0x77a   :  { %19233 = vst [vmem:[#allocation7_spill] sm:$0xff] %v14796_v21  ;;  %v14833_v50 = vadd.f32 %v14754_v53, %v5635_v47  ;;  %v14836_v30 = vadd.f32 %v14754_v53, %v5636_v62  ;;  %v14839_v42 = vadd.f32 %v14754_v53, %v5637_v14  ;;  %v5641_v47 = vmul.f32 %v14744_v59, %v19254_v61  ;;  %v19256_v14 = vld [vmem:[#allocation237_spill] sm:$0xff] }
 0x77b   :  { %19234 = vst [vmem:[#allocation28_spill] sm:$0xff] %v14799_v15  ;;  %v14844_v36 = vadd.f32 %v14754_v53, %v5638_v49  ;;  %v14847_v0 = vadd.f32 %v14754_v53, %v5639_v16  ;;  %v14850_v34 = vadd.f32 %v14754_v53, %v5640_v9  ;;  %v14856_v62 = vmul.f32 %v14744_v59, %v19255_v44  ;;  %v19257_v49 = vld [vmem:[#allocation201_spill] sm:$0xff]  ;;  %v19258_v16 = vld [vmem:[#allocation68_spill] sm:$0xff] }
 0x77c   :  { %19235 = vst [vmem:[#allocation10_spill] sm:$0xff] %v14802_v7  ;;  %v5642_v51 = vmul.f32 %v14744_v59, %v19256_v14  ;;  %v14864_v41 = vmul.f32 %v14744_v59, %v19257_v49  ;;  %v14868_v9 = vmul.f32 %v14744_v59, %v19258_v16  ;;  %v14872_v61 = vmul.f32 %v14744_v59, %v19259_v52  ;;  %v19263_v49 = vld [vmem:[#allocation214_spill] sm:$0xff]  ;;  %v19265_v52 = vld [vmem:[#allocation215_spill] sm:$0xff]  ;;  %v19303_v15 = vld [vmem:[#allocation197_spill] sm:$0xff] }
 0x77d   :  { %19236 = vst [vmem:[#allocation116_spill] sm:$0xff] %v14805_v25  ;;  %v14875_v44 = vadd.f32 %v14754_v53, %v5641_v47  ;;  %v14879_v14 = vmul.f32 %v14744_v59, %v19261_v24  ;;  %v14883_v28 = vmul.f32 %v14744_v59, %v19262_v5  ;;  %v14887_v31 = vmul.f32 %v14744_v59, %v19263_v49  ;;  %v19266_v47 = vld [vmem:[#allocation220_spill] sm:$0xff]  ;;  %v19267_v24 = vld [vmem:[#allocation89_spill] sm:$0xff]  ;;  %v19268_v5 = vld [vmem:[#allocation279_spill] sm:$0xff] }
 0x77e   :  { %19237 = vst [vmem:[#allocation250_spill] sm:$0xff] %v14808_v58  ;;  %v14890_v16 = vadd.f32 %v14754_v53, %v5642_v51  ;;  %v14894_v3 = vmul.f32 %v14744_v59, %v19265_v52  ;;  %v14898_v8 = vmul.f32 %v14744_v59, %v19266_v47  ;;  %v14902_v19 = vmul.f32 %v14744_v59, %v19267_v24  ;;  %v19269_v49 = vld [vmem:[#allocation168_spill] sm:$0xff]  ;;  %v19271_v52 = vld [vmem:[#allocation42_spill] sm:$0xff] }
 0x77f   :  { %19243 = vst [vmem:[#allocation117_spill] sm:$0xff] %v14821_v22  ;;  %v5531_v51 = vmul.f32 %v14860_v35, %v19269_v49  ;;  %v14916_v47 = vmul.f32 %v14744_v59, %v19272_v40  ;;  %v5534_v24 = vmul.f32 %v14860_v35, %v19273_v33  ;;  %v19278_v40 = vld [vmem:[#allocation46_spill] sm:$0xff]  ;;  %v5578_v2 = vmul.f32 %v14841_v48, %v19303_v15 }
 0x780   :  { %19247 = vst [vmem:[#allocation251_spill] sm:$0xff] %v14830_v23  ;;  %v14990_v21 = vpop.permute.xlu2 %5469 }
 0x781   :  { %19248 = vst [vmem:[#allocation21_spill] sm:$0xff] %v14833_v50  ;;  %v19279_v50 = vld [vmem:[#allocation180_spill] sm:$0xff] }
 0x782   :  { %19249 = vst [vmem:[#allocation30_spill] sm:$0xff] %v14836_v30  ;;  %v5573_v33 = vmul.f32 %v14841_v48, %v19279_v50 }
 0x783   :  { %19250 = vst [vmem:[#allocation23_spill] sm:$0xff] %v14839_v42  ;;  %v19276_v42 = vld [vmem:[#allocation53_spill] sm:$0xff] }
 0x784   :  { %19251 = vst [vmem:[#allocation163_spill] sm:$0xff] %v14844_v36  ;;  %v19275_v36 = vld [vmem:[#allocation186_spill] sm:$0xff] }
 0x785   :  { %19252 = vst [vmem:[#allocation155_spill] sm:$0xff] %v14847_v0  ;;  %v5533_v0 = vmul.f32 %v14860_v35, %v19271_v52  ;;  %v14926_v49 = vmul.f32 %v14860_v35, %v19275_v36  ;;  %v19277_v52 = vld [vmem:[#allocation176_spill] sm:$0xff]  ;;  %v19281_v36 = vld [vmem:[#allocation191_spill] sm:$0xff] }
 0x786   :  { %19253 = vst [vmem:[#allocation31_spill] sm:$0xff] %v14850_v34  ;;  %v5571_v30 = vmul.f32 %v14841_v48, %v19277_v52  ;;  %v14944_v22 = vmul.f32 %v14860_v35, %v19281_v36  ;;  %v19283_v52 = vld [vmem:[#allocation64_spill] sm:$0xff] }
 0x787   :  { %19260 = vst [vmem:[#allocation157_spill] sm:$0xff] %v14875_v44  ;;  %v14906_v44 = vmul.f32 %v14744_v59, %v19268_v5  ;;  %v14922_v5 = vmul.f32 %v14860_v35, %v19274_v60  ;;  %v5572_v59 = vmul.f32 %v14841_v48, %v19278_v40  ;;  %v5574_v60 = vmul.f32 %v14841_v48, %v19280_v6  ;;  %v19284_v40 = vld [vmem:[#allocation198_spill] sm:$0xff] }
 0x788   :  { %19264 = vst [vmem:[#allocation118_spill] sm:$0xff] %v14890_v16  ;;  %v19270_v16 = vld [vmem:[#allocation173_spill] sm:$0xff]  ;;  %v14940_v23 = vpop.permute.xlu1 %5659  ;;  %v14952_v58 = vmul.f32 %v14860_v35, %v19283_v52  ;;  %v14956_v50 = vmul.f32 %v14860_v35, %v19284_v40  ;;  %v14972_v52 = vmul.f32 %v14860_v35, %v19289_v45  ;;  %v14976_v40 = vmul.f32 %v14860_v35, %v19290_v43  ;;  %v19296_v43 = vld [vmem:[#allocation187_spill] sm:$0xff] }
 0x789   :  { %v5532_v34 = vmul.f32 %v14860_v35, %v19270_v16  ;;  %v14930_v16 = vmul.f32 %v14860_v35, %v19276_v42  ;;  %v19282_v42 = vld [vmem:[#allocation59_spill] sm:$0xff]  ;;  %v14959_v6 = vadd.f32 %v14940_v23, %v5571_v30  ;;  %v14962_v25 = vadd.f32 %v14940_v23, %v5572_v59 }
 0x78a   :  { %v14948_v1 = vmul.f32 %v14860_v35, %v19282_v42  ;;  %v14965_v36 = vadd.f32 %v14940_v23, %v5573_v33  ;;  %v14968_v42 = vadd.f32 %v14940_v23, %v5574_v60  ;;  %19291 = vst [vmem:[#allocation35_spill] sm:$0xff] %v14976_v40  ;;  %v14980_v30 = vmul.f32 %v14860_v35, %v19292_v46  ;;  %v19294_v59 = vld [vmem:[#allocation79_spill] sm:$0xff] }
 0x78b   :  { %19285 = vst [vmem:[#allocation252_spill] sm:$0xff] %v14959_v6  ;;  %v14984_v7 = vmul.f32 %v14860_v35, %v19294_v59  ;;  %v5575_v11 = vmul.f32 %v14841_v48, %v19296_v43  ;;  %v5576_v46 = vmul.f32 %v14841_v48, %v19297_v18  ;;  %v5577_v59 = vmul.f32 %v14841_v48, %v19298_v12  ;;  %v19304_v43 = vld [vmem:[#allocation65_spill] sm:$0xff]  ;;  %v19305_v18 = vld [vmem:[#allocation71_spill] sm:$0xff] }
 0x78c   :  { %19286 = vst [vmem:[#allocation119_spill] sm:$0xff] %v14962_v25  ;;  %v15000_v33 = vmul.f32 %v14860_v35, %v19299_v32  ;;  %v19301_v60 = vmax.f32 %v14959_v6, 0.0  ;;  %v19302_v45 = vmax.f32 %v14962_v25, 0.0  ;;  %v15014_v12 = vmul.f32 %v14841_v48, %v19305_v18  ;;  %v19309_v25 = vld [vmem:[#allocation77_spill] sm:$0xff] }
 0x78d   :  { %19287 = vst [vmem:[#allocation253_spill] sm:$0xff] %v14965_v36  ;;  %v19306_v32 = vmax.f32 %v14965_v36, 0.0  ;;  %v19307_v6 = vmax.f32 %v14968_v42, 0.0  ;;  %v15026_v15 = vmul.f32 %v14841_v48, %v19309_v25  ;;  %v5491_v18 = vmul.f32 %v14990_v21, %v19111_v38 }
 0x78e   :  { %19288 = vst [vmem:[#allocation169_spill] sm:$0xff] %v14968_v42  ;;  %6300 = vmatpush.msra.mxu0 %v19301_v60  ;;  %6320 = vmatpush.msra.mxu1 %v19302_v45  ;;  %v19308_v60 = vld [vmem:[#allocation205_spill] sm:$0xff]  ;;  %v5495_v38 = vmul.f32 %v14990_v21, %v19119_v57  ;;  %v5498_v57 = vmul.f32 %v14990_v21, %v19125_v54 }
 0x78f   :  { %19293 = vst [vmem:[#allocation181_spill] sm:$0xff] %v14980_v30  ;;  %6340 = vmatpush.msra.mxu2 %v19306_v32  ;;  %6360 = vmatpush.msra.mxu3 %v19307_v6  ;;  %v15022_v45 = vmul.f32 %v14841_v48, %v19308_v60  ;;  %v5492_v32 = vmul.f32 %v14990_v21, %v19113_v4  ;;  %v19311_v42 = vld [vmem:[#allocation217_spill] sm:$0xff]  ;;  %v19313_v60 = vld [vmem:[#allocation84_spill] sm:$0xff] }
 0x790   :  { %19295 = vst [vmem:[#allocation185_spill] sm:$0xff] %v14984_v7  ;;  %v15010_v7 = vmul.f32 %v14841_v48, %v19304_v43  ;;  %v19310_v43 = vld [vmem:[#allocation213_spill] sm:$0xff]  ;;  %v15038_v6 = vmul.f32 %v14841_v48, %v19311_v42  ;;  %v15042_v36 = vmul.f32 %v14841_v48, %v19313_v60  ;;  %v15044_v25 = vpop.permute.xlu1 %5654  ;;  %v5494_v30 = vmul.f32 %v14990_v21, %v19117_v27 }
 0x791   :  { %19300 = vst [vmem:[#allocation62_spill] sm:$0xff] %v15000_v33  ;;  %v15030_v33 = vmul.f32 %v14841_v48, %v19310_v43  ;;  %v5493_v43 = vmul.f32 %v14990_v21, %v19115_v63  ;;  %v5496_v4 = vmul.f32 %v14990_v21, %v19121_v55  ;;  %v15055_v42 = vadd.f32 %v15044_v25, %v5531_v51 }
 0x792   :  { %19312 = vst [vmem:[#allocation76_spill] sm:$0xff] %v15038_v6  ;;  %v15058_v60 = vadd.f32 %v15044_v25, %v5532_v34  ;;  %v15061_v40 = vadd.f32 %v15044_v25, %v5533_v0  ;;  %v15064_v63 = vadd.f32 %v15044_v25, %v5534_v24  ;;  %v5497_v27 = vmul.f32 %v14990_v21, %v19123_v26 }
 0x793   :  { %19314 = vst [vmem:[#allocation120_spill] sm:$0xff] %v15042_v36  ;;  %v15066_v36 = vpop.permute.xlu0 %5649  ;;  %v15074_v55 = vmul.f32 %v14990_v21, %v19127_v20  ;;  %v15078_v34 = vmul.f32 %v14990_v21, %v19129_v37  ;;  %v17754_v0 = vmax.f32 %v15055_v42, 0.0  ;;  %v5795_v6 = vadd.f32 %v14754_v53, %v14856_v62 }
 0x794   :  { %19315 = vst [vmem:[#allocation254_spill] sm:$0xff] %v15064_v63  ;;  %v17753_v51 = vmax.f32 %v15058_v60, 0.0  ;;  %v17755_v24 = vmax.f32 %v15061_v40, 0.0  ;;  %v15085_v26 = vadd.f32 %v15066_v36, %v5491_v18  ;;  %v15088_v54 = vadd.f32 %v15066_v36, %v5492_v32 }
 0x795   :  { %v15091_v20 = vadd.f32 %v15066_v36, %v5493_v43  ;;  %v15094_v37 = vadd.f32 %v15066_v36, %v5494_v30  ;;  %6301 = vmatpush.msra.mxu0 %v17754_v0  ;;  %v5796_v18 = vadd.f32 %v14754_v53, %v14864_v41  ;;  %v15106_v32 = vmul.f32 %v14990_v21, %v19131_v10  ;;  %v15119_v41 = vld [vmem:[%s17461_s3 + $0x8] sm:$0xff] }
 0x796   :  { %19316 = vst [vmem:[#allocation121_spill] sm:$0xff] %v15085_v26  ;;  %6321 = vmatpush.msra.mxu1 %v17753_v51  ;;  %6341 = vmatpush.msra.mxu2 %v17755_v24  ;;  %v19317_v30 = vmax.f32 %v15064_v63, 0.0  ;;  %v17758_v43 = vmax.f32 %v15085_v26, 0.0  ;;  %v17759_v51 = vmax.f32 %v15088_v54, 0.0  ;;  %v5797_v10 = vadd.f32 %v14754_v53, %v14868_v9  ;;  %v19318_v63 = vld [vmem:[#allocation88_spill] sm:$0xff] }
 0x797   :  { %v15127_v24 = vmul.f32 %v14990_v21, %v19133_v39  ;;  %v5755_v62 = vadd.f32 %v14940_v23, %v5575_v11  ;;  %v5756_v0 = vadd.f32 %v14940_v23, %v5576_v46  ;;  %v15137_v9 = vmul.f32 %v14841_v48, %v19318_v63 }
 0x798   :  { %6361 = vmatpush.msra.mxu3 %v19317_v30  ;;  %v5798_v30 = vadd.f32 %v14754_v53, %v14872_v61  ;;  %6302 = vmatpush.msra.mxu0 %v17758_v43  ;;  %v19319_v61 = vmax.f32 %v15091_v20, 0.0  ;;  %v19320_v39 = vmax.f32 %v15094_v37, 0.0  ;;  %v5757_v26 = vadd.f32 %v14940_v23, %v5577_v59 }
 0x799   :  { %6322 = vmatpush.msra.mxu1 %v17759_v51  ;;  %v5758_v43 = vadd.f32 %v14940_v23, %v5578_v2  ;;  %v15147_v51 = vmul.f32 %v14990_v21, %v19135_v13  ;;  %9810 = vmatmul.msk.f32.vlgmr.msra.gmra.mxu0 %vm6283_vm14, %v15119_v41  ;;  %v15153_v11 = vmax.f32 %v5795_v6, 0.0  ;;  %v15155_v46 = vmax.f32 %v5796_v18, 0.0 }
 0x79a   :  { %6342 = vmatpush.msra.mxu2 %v19319_v61  ;;  %6362 = vmatpush.msra.mxu3 %v19320_v39  ;;  %v5715_v63 = vadd.f32 %v15044_v25, %v14922_v5  ;;  %v5716_v2 = vadd.f32 %v15044_v25, %v14926_v49  ;;  %v15165_v13 = vmax.f32 %v5797_v10, 0.0  ;;  %v15167_v59 = vmax.f32 %v5798_v30, 0.0 }
 0x79b   :  { %9811 = vmatmul.msk.f32.vlgmr.msra.gmra.mxu1 %vm6283_vm14, %v15119_v41  ;;  %9812 = vmatmul.msk.f32.vlgmr.msra.gmra.mxu2 %vm6283_vm14, %v15119_v41  ;;  %v5717_v6 = vadd.f32 %v15044_v25, %v14930_v16  ;;  %v5718_v18 = vadd.f32 %v15044_v25, %v14944_v22  ;;  %v15175_v5 = vmax.f32 %v5755_v62, 0.0  ;;  %v15177_v49 = vmax.f32 %v5756_v0, 0.0 }
 0x79c   :  { %9813 = vmatmul.msk.f32.vlgmr.msra.gmra.mxu3 %vm6283_vm14, %v15119_v41  ;;  %6379 = vmatpush.msrb.mxu0 %v15153_v11  ;;  %v5675_v61 = vadd.f32 %v15066_v36, %v5495_v38  ;;  %v5676_v10 = vadd.f32 %v15066_v36, %v5496_v4  ;;  %v15183_v16 = vmax.f32 %v5757_v26, 0.0  ;;  %v15185_v30 = vmax.f32 %v5758_v43, 0.0 }
 0x79d   :  { %6399 = vmatpush.msrb.mxu1 %v15155_v46  ;;  %6419 = vmatpush.msrb.mxu2 %v15165_v13  ;;  %v5677_v22 = vadd.f32 %v15066_v36, %v5497_v27  ;;  %v5678_v39 = vadd.f32 %v15066_v36, %v5498_v57  ;;  %v15191_v0 = vmax.f32 %v5715_v63, 0.0  ;;  %v15193_v38 = vmax.f32 %v5716_v2, 0.0 }
 0x79e   :  { %6439 = vmatpush.msrb.mxu3 %v15167_v59  ;;  %6380 = vmatpush.msrb.mxu0 %v15175_v5  ;;  %v5799_v4 = vadd.f32 %v14754_v53, %v14879_v14  ;;  %v5800_v26 = vadd.f32 %v14754_v53, %v14883_v28  ;;  %v15201_v27 = vmax.f32 %v5717_v6, 0.0  ;;  %v15203_v57 = vmax.f32 %v5718_v18, 0.0  ;;  %v19321_v18 = vld [vmem:[#allocation90_spill] sm:$0xff] }
 0x79f   :  { %6400 = vmatpush.msrb.mxu1 %v15177_v49  ;;  %6420 = vmatpush.msrb.mxu2 %v15183_v16  ;;  %v5801_v43 = vadd.f32 %v14754_v53, %v14887_v31  ;;  %v5802_v62 = vadd.f32 %v14754_v53, %v14894_v3  ;;  %v15211_v14 = vmax.f32 %v5675_v61, 0.0  ;;  %v15213_v28 = vmax.f32 %v5676_v10, 0.0 }
 0x7a0   :  { %6440 = vmatpush.msrb.mxu3 %v15185_v30  ;;  %6381 = vmatpush.msrb.mxu0 %v15191_v0  ;;  %v15217_v63 = vmul.f32 %v14990_v21, %v19137_v29  ;;  %v15221_v2 = vmul.f32 %v14990_v21, %v19139_v56  ;;  %v15225_v3 = vmax.f32 %v5677_v22, 0.0  ;;  %v15227_v31 = vmax.f32 %v5678_v39, 0.0 }
 0x7a1   :  { %6401 = vmatpush.msrb.mxu1 %v15193_v38  ;;  %6421 = vmatpush.msrb.mxu2 %v15201_v27  ;;  %v15231_v6 = vmul.f32 %v14990_v21, %v19141_v17  ;;  %v15235_v29 = vmul.f32 %v14841_v48, %v19321_v18  ;;  %v15239_v56 = vmax.f32 %v5799_v4, 0.0  ;;  %v15241_v61 = vmax.f32 %v5800_v26, 0.0  ;;  %v19324_v18 = vld [vmem:[#allocation282_spill] sm:$0xff] }
 0x7a2   :  { %6441 = vmatpush.msrb.mxu3 %v15203_v57  ;;  %6382 = vmatpush.msrb.mxu0 %v15211_v14  ;;  %v5759_v10 = vadd.f32 %v14940_v23, %v15010_v7  ;;  %v5760_v22 = vadd.f32 %v14940_v23, %v15014_v12  ;;  %v15249_v17 = vmax.f32 %v5801_v43, 0.0  ;;  %v15251_v39 = vmax.f32 %v5802_v62, 0.0  ;;  %v19323_v43 = vld [vmem:[#allocation138_spill] sm:$0xff] }
 0x7a3   :  { %6402 = vmatpush.msrb.mxu1 %v15213_v28  ;;  %6422 = vmatpush.msrb.mxu2 %v15225_v3  ;;  %v5761_v4 = vadd.f32 %v14940_v23, %v15022_v45  ;;  %v5762_v26 = vadd.f32 %v14940_v23, %v15026_v15  ;;  %v5719_v7 = vadd.f32 %v15044_v25, %v14948_v1 }
 0x7a4   :  { %6442 = vmatpush.msrb.mxu3 %v15227_v31  ;;  %19322 = vst [vmem:[#allocation255_spill] sm:$0xff] %v15251_v39  ;;  %6459 = vmatpush.msra.mxu0 %v15239_v56  ;;  %v5720_v12 = vadd.f32 %v15044_v25, %v14952_v58  ;;  %v15265_v62 = vmul.f32 %v14841_v48, %v19323_v43  ;;  %v15281_v58 = vmax.f32 %v5759_v10, 0.0  ;;  %v15283_v43 = vmax.f32 %v5760_v22, 0.0 }
 0x7a5   :  { %6479 = vmatpush.msra.mxu1 %v15241_v61  ;;  %6499 = vmatpush.msra.mxu2 %v15249_v17  ;;  %v5721_v45 = vadd.f32 %v15044_v25, %v14956_v50  ;;  %v5722_v15 = vadd.f32 %v15044_v25, %v14972_v52  ;;  %v15275_v1 = vmul.f32 %v14841_v48, %v19324_v18  ;;  %v15293_v18 = vmax.f32 %v5761_v4, 0.0 }
 0x7a6   :  { %6519 = vmatpush.msra.mxu3 %v15251_v39  ;;  %9814 = vmatmul.msk.f32.vlgmr.msrb.gmra.mxu0 %vm6283_vm14, %v15119_v41  ;;  %v5679_v50 = vadd.f32 %v15066_v36, %v15074_v55  ;;  %v5680_v52 = vadd.f32 %v15066_v36, %v15078_v34  ;;  %v15295_v39 = vmax.f32 %v5762_v26, 0.0  ;;  %v5681_v10 = vadd.f32 %v15066_v36, %v15106_v32 }
 0x7a7   :  { %9815 = vmatmul.msk.f32.vlgmr.msrb.gmra.mxu1 %vm6283_vm14, %v15119_v41  ;;  %9816 = vmatmul.msk.f32.vlgmr.msrb.gmra.mxu2 %vm6283_vm14, %v15119_v41  ;;  %19325 = vst [vmem:[#allocation48_spill] sm:$0xff] %v15293_v18  ;;  %v5682_v22 = vadd.f32 %v15066_v36, %v15127_v24  ;;  %v15303_v55 = vmax.f32 %v5719_v7, 0.0  ;;  %v15305_v34 = vmax.f32 %v5720_v12, 0.0  ;;  %v5803_v4 = vadd.f32 %v14754_v53, %v14898_v8 }
 0x7a8   :  { %9817 = vmatmul.msk.f32.vlgmr.msrb.gmra.mxu3 %vm6283_vm14, %v15119_v41  ;;  %19326 = vst [vmem:[#allocation193_spill] sm:$0xff] %v15295_v39  ;;  %6460 = vmatpush.msra.mxu0 %v15281_v58  ;;  %v5804_v26 = vadd.f32 %v14754_v53, %v14902_v19  ;;  %v15313_v32 = vmax.f32 %v5721_v45, 0.0  ;;  %v15315_v24 = vmax.f32 %v5722_v15, 0.0  ;;  %v5805_v7 = vadd.f32 %v14754_v53, %v14906_v44  ;;  %v19333_v15 = vld [vmem:[#allocation218_spill] sm:$0xff] }
 0x7a9   :  { %6480 = vmatpush.msra.mxu1 %v15283_v43  ;;  %19327 = vst [vmem:[#allocation50_spill] sm:$0xff] %v15305_v34  ;;  %6500 = vmatpush.msra.mxu2 %v15293_v18  ;;  %v5806_v12 = vadd.f32 %v14754_v53, %v14916_v47  ;;  %v15323_v8 = vmax.f32 %v5679_v50, 0.0  ;;  %v15325_v19 = vmax.f32 %v5680_v52, 0.0  ;;  %v19332_v18 = vld [vmem:[#allocation92_spill] sm:$0xff]  ;;  %v15337_v53 = vmax.f32 %v5681_v10, 0.0  ;;  %v19336_v47 = vld [vmem:[#allocation222_spill] sm:$0xff] }
 0x7aa   :  { %6520 = vmatpush.msra.mxu3 %v15295_v39  ;;  %19328 = vst [vmem:[#allocation194_spill] sm:$0xff] %v15313_v32  ;;  %6461 = vmatpush.msra.mxu0 %v15303_v55  ;;  %v15329_v45 = vmul.f32 %v14841_v48, %v19332_v18  ;;  %v15333_v39 = vmul.f32 %v14860_v35, %v19333_v15  ;;  %v15339_v44 = vmax.f32 %v5682_v22, 0.0  ;;  %v19337_v52 = vld [vmem:[#allocation223_spill] sm:$0xff]  ;;  %v15351_v15 = vmax.f32 %v5803_v4, 0.0  ;;  %v19340_v22 = vld [vmem:[#allocation76_spill] sm:$0xff] }
 0x7ab   :  { %19329 = vst [vmem:[#allocation273_spill] sm:$0xff] %v15315_v24  ;;  %6481 = vmatpush.msra.mxu1 %v15305_v34  ;;  %6501 = vmatpush.msra.mxu2 %v15313_v32  ;;  %v15343_v50 = vmul.f32 %v14860_v35, %v19336_v47  ;;  %v15347_v18 = vmul.f32 %v14860_v35, %v19337_v52  ;;  %v15353_v32 = vmax.f32 %v5804_v26, 0.0  ;;  %v15361_v47 = vmax.f32 %v5805_v7, 0.0  ;;  %v19346_v7 = vld [vmem:[#allocation225_spill] sm:$0xff]  ;;  %v19357_v34 = vld [vmem:[#allocation287_spill] sm:$0xff] }
 0x7ac   :  { %19330 = vst [vmem:[#allocation274_spill] sm:$0xff] %v15323_v8  ;;  %6521 = vmatpush.msra.mxu3 %v15315_v24  ;;  %6462 = vmatpush.msra.mxu0 %v15323_v8  ;;  %v5763_v10 = vadd.f32 %v14940_v23, %v15030_v33  ;;  %v5764_v24 = vadd.f32 %v14940_v23, %v19340_v22  ;;  %v15363_v52 = vmax.f32 %v5806_v12, 0.0  ;;  %v19343_v8 = vld [vmem:[#allocation120_spill] sm:$0xff]  ;;  %v19344_v33 = vld [vmem:[#allocation35_spill] sm:$0xff] }
 0x7ad   :  { %19331 = vst [vmem:[#allocation183_spill] sm:$0xff] %v15325_v19  ;;  %6482 = vmatpush.msra.mxu1 %v15325_v19  ;;  %6502 = vmatpush.msra.mxu2 %v15337_v53  ;;  %v5765_v4 = vadd.f32 %v14940_v23, %v19343_v8  ;;  %v5766_v26 = vadd.f32 %v14940_v23, %v15137_v9  ;;  %v19347_v8 = vld [vmem:[#allocation185_spill] sm:$0xff]  ;;  %v19349_v19 = vld [vmem:[#allocation278_spill] sm:$0xff] }
 0x7ae   :  { %19334 = vst [vmem:[#allocation60_spill] sm:$0xff] %v15337_v53  ;;  %6522 = vmatpush.msra.mxu3 %v15339_v44  ;;  %6539 = vmatpush.msrb.mxu0 %v15351_v15  ;;  %v5723_v22 = vadd.f32 %v15044_v25, %v19344_v33  ;;  %v19345_v53 = vld [vmem:[#allocation181_spill] sm:$0xff]  ;;  %v15377_v12 = vmul.f32 %v14860_v35, %v19346_v7  ;;  %v15395_v7 = vmax.f32 %v5764_v24, 0.0 }
 0x7af   :  { %19335 = vst [vmem:[#allocation199_spill] sm:$0xff] %v15339_v44  ;;  %6559 = vmatpush.msrb.mxu1 %v15353_v32  ;;  %v5724_v44 = vadd.f32 %v15044_v25, %v19345_v53  ;;  %6579 = vmatpush.msrb.mxu2 %v15361_v47  ;;  %v5725_v9 = vadd.f32 %v15044_v25, %v19347_v8  ;;  %v15393_v53 = vmax.f32 %v5763_v10, 0.0 }
 0x7b0   :  { %19338 = vst [vmem:[#allocation210_spill] sm:$0xff] %v15351_v15  ;;  %6599 = vmatpush.msrb.mxu3 %v15363_v52  ;;  %v19348_v15 = vld [vmem:[#allocation62_spill] sm:$0xff]  ;;  %v15387_v33 = vmul.f32 %v14990_v21, %v19349_v19  ;;  %9818 = vmatmul.msk.f32.vlgmr.msra.gmra.mxu0 %vm6283_vm14, %v15119_v41  ;;  %v5683_v8 = vadd.f32 %v15066_v36, %v15147_v51  ;;  %v15405_v19 = vmax.f32 %v5765_v4, 0.0  ;;  %v15415_v51 = vmax.f32 %v5723_v22, 0.0 }
 0x7b1   :  { %19339 = vst [vmem:[#allocation67_spill] sm:$0xff] %v15353_v32  ;;  %v5726_v32 = vadd.f32 %v15044_v25, %v19348_v15  ;;  %9819 = vmatmul.msk.f32.vlgmr.msra.gmra.mxu1 %vm6283_vm14, %v15119_v41  ;;  %v5684_v15 = vadd.f32 %v15066_v36, %v15217_v63  ;;  %9820 = vmatmul.msk.f32.vlgmr.msra.gmra.mxu2 %vm6283_vm14, %v15119_v41  ;;  %v15417_v63 = vmax.f32 %v5724_v44, 0.0 }
 0x7b2   :  { %19341 = vst [vmem:[#allocation216_spill] sm:$0xff] %v15361_v47  ;;  %9821 = vmatmul.msk.f32.vlgmr.msra.gmra.mxu3 %vm6283_vm14, %v15119_v41  ;;  %v5685_v24 = vadd.f32 %v15066_v36, %v15221_v2  ;;  %v5686_v10 = vadd.f32 %v15066_v36, %v15231_v6  ;;  %6540 = vmatpush.msrb.mxu0 %v15393_v53  ;;  %v19356_v47 = vld [vmem:[#allocation91_spill] sm:$0xff]  ;;  %v15425_v2 = vmax.f32 %v5725_v9, 0.0 }
 0x7b3   :  { %19342 = vst [vmem:[#allocation122_spill] sm:$0xff] %v15363_v52  ;;  %v15407_v52 = vmax.f32 %v5766_v26, 0.0  ;;  %6560 = vmatpush.msrb.mxu1 %v15395_v7  ;;  %v5508_v4 = vmul.f32 %v14990_v21, %v19356_v47  ;;  %v5509_v26 = vmul.f32 %v14990_v21, %v19357_v34  ;;  %6580 = vmatpush.msrb.mxu2 %v15405_v19  ;;  %v15427_v6 = vmax.f32 %v5726_v32, 0.0 }
 0x7b4   :  { %19350 = vst [vmem:[#allocation256_spill] sm:$0xff] %v15393_v53  ;;  %v19360_v53 = vld [vmem:[#allocation298_spill] sm:$0xff]  ;;  %6541 = vmatpush.msrb.mxu0 %v15415_v51  ;;  %v15437_v34 = vmax.f32 %v5683_v8, 0.0  ;;  %v15439_v47 = vmax.f32 %v5684_v15, 0.0  ;;  %v5767_v9 = vadd.f32 %v14940_v23, %v15235_v29  ;;  %v5768_v32 = vadd.f32 %v14940_v23, %v15265_v62 }
 0x7b5   :  { %19351 = vst [vmem:[#allocation126_spill] sm:$0xff] %v15395_v7  ;;  %6600 = vmatpush.msrb.mxu3 %v15407_v52  ;;  %v5510_v22 = vmul.f32 %v14990_v21, %v19360_v53  ;;  %v19361_v7 = vld [vmem:[#allocation227_spill] sm:$0xff]  ;;  %6561 = vmatpush.msrb.mxu1 %v15417_v63  ;;  %v15447_v53 = vmax.f32 %v5685_v24, 0.0  ;;  %v5769_v8 = vadd.f32 %v14940_v23, %v15275_v1  ;;  %v19366_v29 = vld [vmem:[#allocation26_spill] sm:$0xff]  ;;  %v19372_v1 = vld [vmem:[#allocation28_spill] sm:$0xff] }
 0x7b6   :  { %19352 = vst [vmem:[#allocation260_spill] sm:$0xff] %v15405_v19  ;;  %v15433_v44 = vmul.f32 %v14841_v48, %v19361_v7  ;;  %6581 = vmatpush.msrb.mxu2 %v15425_v2  ;;  %v15449_v7 = vmax.f32 %v5686_v10, 0.0  ;;  %v5770_v15 = vadd.f32 %v14940_v23, %v15329_v45  ;;  %6542 = vmatpush.msrb.mxu0 %v15437_v34  ;;  %v15458_v62 = vmax.f32 %v19366_v29, 0.0  ;;  %v19370_v24 = vld [vmem:[#allocation286_spill] sm:$0xff]  ;;  %v19376_v29 = vld [vmem:[#allocation9_spill] sm:$0xff] }
 0x7b7   :  { %19353 = vst [vmem:[#allocation69_spill] sm:$0xff] %v15407_v52  ;;  %6601 = vmatpush.msrb.mxu3 %v15427_v6  ;;  %6562 = vmatpush.msrb.mxu1 %v15439_v47  ;;  %v5592_v10 = vmul.f32 %v14841_v48, %v19370_v24  ;;  %v15470_v45 = vmax.f32 %v19372_v1, 0.0  ;;  %v19377_v52 = vld [vmem:[#allocation5_spill] sm:$0xff]  ;;  %v15485_v24 = vmax.f32 %v5768_v32, 0.0  ;;  %v5727_v1 = vadd.f32 %v15044_v25, %v15333_v39 }
 0x7b8   :  { %19354 = vst [vmem:[#allocation85_spill] sm:$0xff] %v15415_v51  ;;  %6582 = vmatpush.msrb.mxu2 %v15447_v53  ;;  %v15479_v19 = vmul.f32 %v14860_v35, %v19377_v52  ;;  %6619 = vmatpush.msra.mxu0 %v15458_v62  ;;  %v15493_v52 = vmax.f32 %v5769_v8, 0.0  ;;  %v5730_v32 = vadd.f32 %v15044_v25, %v15377_v12 }
 0x7b9   :  { %19355 = vst [vmem:[#allocation54_spill] sm:$0xff] %v15417_v63  ;;  %6602 = vmatpush.msrb.mxu3 %v15449_v7  ;;  %v5687_v39 = vadd.f32 %v15066_v36, %v15387_v33  ;;  %v5690_v12 = vadd.f32 %v15066_v36, %v5510_v22  ;;  %9822 = vmatmul.msk.f32.vlgmr.msrb.gmra.mxu0 %vm6283_vm14, %v15119_v41  ;;  %v15518_v33 = vmax.f32 %v5727_v1, 0.0  ;;  %v19390_v1 = vld [vmem:[#allocation290_spill] sm:$0xff] }
 0x7ba   :  { %19358 = vst [vmem:[#allocation61_spill] sm:$0xff] %v15425_v2  ;;  %v19368_v2 = vld [vmem:[#allocation7_spill] sm:$0xff]  ;;  %6659 = vmatpush.msra.mxu2 %v15470_v45  ;;  %9823 = vmatmul.msk.f32.vlgmr.msrb.gmra.mxu1 %vm6283_vm14, %v15119_v41 }
 0x7bb   :  { %19359 = vst [vmem:[#allocation188_spill] sm:$0xff] %v15427_v6  ;;  %v15461_v63 = vmax.f32 %v19368_v2, 0.0  ;;  %v19371_v6 = vld [vmem:[#allocation288_spill] sm:$0xff]  ;;  %v5594_v2 = vmul.f32 %v14841_v48, %v19376_v29  ;;  %v15495_v29 = vmax.f32 %v5770_v15, 0.0  ;;  %9824 = vmatmul.msk.f32.vlgmr.msrb.gmra.mxu2 %vm6283_vm14, %v15119_v41  ;;  %9825 = vmatmul.msk.f32.vlgmr.msrb.gmra.mxu3 %vm6283_vm14, %v15119_v41 }
 0x7bc   :  { %19362 = vst [vmem:[#allocation66_spill] sm:$0xff] %v15437_v34  ;;  %v5593_v51 = vmul.f32 %v14841_v48, %v19371_v6  ;;  %v15483_v6 = vmax.f32 %v5767_v9, 0.0  ;;  %v5729_v9 = vadd.f32 %v15044_v25, %v15347_v18  ;;  %6660 = vmatpush.msra.mxu2 %v15493_v52  ;;  %v5689_v18 = vadd.f32 %v15066_v36, %v5509_v26  ;;  %v19383_v15 = vld [vmem:[#allocation280_spill] sm:$0xff] }
 0x7bd   :  { %19363 = vst [vmem:[#allocation202_spill] sm:$0xff] %v15439_v47  ;;  %v19374_v47 = vld [vmem:[#allocation10_spill] sm:$0xff]  ;;  %6639 = vmatpush.msra.mxu1 %v15461_v63 }
 0x7be   :  { %19364 = vst [vmem:[#allocation275_spill] sm:$0xff] %v15447_v53  ;;  %v15473_v34 = vmax.f32 %v19374_v47, 0.0  ;;  %v5728_v47 = vadd.f32 %v15044_v25, %v15343_v50  ;;  %6620 = vmatpush.msra.mxu0 %v15483_v6  ;;  %v5688_v50 = vadd.f32 %v15066_v36, %v5508_v4  ;;  %v15530_v22 = vmax.f32 %v5729_v9, 0.0 }
 0x7bf   :  { %19365 = vst [vmem:[#allocation206_spill] sm:$0xff] %v15449_v7  ;;  %6640 = vmatpush.msra.mxu1 %v15485_v24  ;;  %v5771_v9 = vadd.f32 %v14940_v23, %v15433_v44 }
 0x7c0   :  { %19367 = vst [vmem:[#allocation219_spill] sm:$0xff] %v15458_v62  ;;  %6679 = vmatpush.msra.mxu3 %v15473_v34  ;;  %v15520_v4 = vmax.f32 %v5728_v47, 0.0  ;;  %v5512_v47 = vmul.f32 %v14990_v21, %v19390_v1  ;;  %6621 = vmatpush.msra.mxu0 %v15518_v33  ;;  %v15549_v1 = vmax.f32 %v5689_v18, 0.0 }
 0x7c1   :  { %19369 = vst [vmem:[#allocation127_spill] sm:$0xff] %v15461_v63  ;;  %6661 = vmatpush.msra.mxu2 %v15530_v22  ;;  %v19407_v63 = vld [vmem:[#allocation284_spill] sm:$0xff] }
 0x7c2   :  { %19373 = vst [vmem:[#allocation261_spill] sm:$0xff] %v15470_v45  ;;  %6680 = vmatpush.msra.mxu3 %v15495_v29  ;;  %6641 = vmatpush.msra.mxu1 %v15520_v4  ;;  %v5597_v62 = vmul.f32 %v14841_v48, %v19407_v63 }
 0x7c3   :  { %19375 = vst [vmem:[#allocation73_spill] sm:$0xff] %v15473_v34  ;;  %v19382_v34 = vld [vmem:[#allocation226_spill] sm:$0xff]  ;;  %6662 = vmatpush.msra.mxu2 %v15549_v1 }
 0x7c4   :  { %19378 = vst [vmem:[#allocation56_spill] sm:$0xff] %v15483_v6  ;;  %v5552_v8 = vmul.f32 %v14860_v35, %v19382_v34  ;;  %v5553_v6 = vmul.f32 %v14860_v35, %v19383_v15  ;;  %v19386_v34 = vld [vmem:[#allocation139_spill] sm:$0xff]  ;;  %v15532_v15 = vmax.f32 %v5730_v32, 0.0  ;;  %v5772_v32 = vadd.f32 %v14940_v23, %v5592_v10  ;;  %v19398_v10 = vld [vmem:[#allocation250_spill] sm:$0xff]  ;;  %9828 = vmatmul.msk.f32.vlgmr.msra.gmra.mxu2 %vm6283_vm14, %v15119_v41 }
 0x7c5   :  { %19379 = vst [vmem:[#allocation200_spill] sm:$0xff] %v15485_v24  ;;  %v19391_v24 = vld [vmem:[#allocation229_spill] sm:$0xff] }
 0x7c6   :  { %19380 = vst [vmem:[#allocation75_spill] sm:$0xff] %v15493_v52  ;;  %v19387_v52 = vld [vmem:[#allocation228_spill] sm:$0xff]  ;;  %v5513_v45 = vmul.f32 %v14990_v21, %v19391_v24  ;;  %6681 = vmatpush.msra.mxu3 %v15532_v15  ;;  %v15551_v24 = vmax.f32 %v5690_v12, 0.0 }
 0x7c7   :  { %19381 = vst [vmem:[#allocation277_spill] sm:$0xff] %v15495_v29  ;;  %v5554_v29 = vmul.f32 %v14860_v35, %v19386_v34  ;;  %v5511_v26 = vmul.f32 %v14990_v21, %v19387_v52  ;;  %v15540_v52 = vmax.f32 %v5687_v39, 0.0  ;;  %v15542_v34 = vmax.f32 %v5688_v50, 0.0  ;;  %v19396_v50 = vld [vmem:[#allocation116_spill] sm:$0xff] }
 0x7c8   :  { %19384 = vst [vmem:[#allocation87_spill] sm:$0xff] %v15518_v33  ;;  %v5773_v33 = vadd.f32 %v14940_v23, %v5593_v51  ;;  %v5774_v39 = vadd.f32 %v14940_v23, %v5594_v2  ;;  %v15558_v44 = vmax.f32 %v19396_v50, 0.0  ;;  %6682 = vmatpush.msra.mxu3 %v15551_v24  ;;  %v19402_v51 = vld [vmem:[#allocation117_spill] sm:$0xff]  ;;  %v19406_v50 = vld [vmem:[#allocation232_spill] sm:$0xff] }
 0x7c9   :  { %19385 = vst [vmem:[#allocation128_spill] sm:$0xff] %v15520_v4  ;;  %6622 = vmatpush.msra.mxu0 %v15540_v52  ;;  %6642 = vmatpush.msra.mxu1 %v15542_v34  ;;  %v15561_v4 = vmax.f32 %v19398_v10, 0.0  ;;  %v15570_v2 = vmax.f32 %v19402_v51, 0.0  ;;  %v5596_v10 = vmul.f32 %v14841_v48, %v19406_v50  ;;  %v5731_v51 = vadd.f32 %v15044_v25, %v15479_v19 }
 0x7ca   :  { %19388 = vst [vmem:[#allocation262_spill] sm:$0xff] %v15530_v22  ;;  %v19400_v22 = vld [vmem:[#allocation294_spill] sm:$0xff]  ;;  %v15590_v50 = vmax.f32 %v5773_v33, 0.0  ;;  %v15592_v63 = vmax.f32 %v5774_v39, 0.0  ;;  %v5691_v19 = vadd.f32 %v15066_v36, %v5511_v26  ;;  %v5693_v33 = vadd.f32 %v15066_v36, %v5513_v45  ;;  %9826 = vmatmul.msk.f32.vlgmr.msra.gmra.mxu0 %vm6283_vm14, %v15119_v41  ;;  %9827 = vmatmul.msk.f32.vlgmr.msra.gmra.mxu1 %vm6283_vm14, %v15119_v41 }
 0x7cb   :  { %19389 = vst [vmem:[#allocation74_spill] sm:$0xff] %v15532_v15  ;;  %v5514_v18 = vmul.f32 %v14990_v21, %v19400_v22  ;;  %v19401_v15 = vld [vmem:[#allocation96_spill] sm:$0xff]  ;;  %6699 = vmatpush.msrb.mxu0 %v15558_v44  ;;  %6719 = vmatpush.msrb.mxu1 %v15561_v4  ;;  %v15581_v22 = vmax.f32 %v5771_v9, 0.0  ;;  %v5734_v9 = vadd.f32 %v15044_v25, %v5554_v29  ;;  %v19413_v29 = vld [vmem:[#allocation95_spill] sm:$0xff]  ;;  %v15612_v26 = vmax.f32 %v5731_v51, 0.0  ;;  %v19420_v51 = vld [vmem:[#allocation97_spill] sm:$0xff] }
 0x7cc   :  { %19392 = vst [vmem:[#allocation224_spill] sm:$0xff] %v15540_v52  ;;  %v5595_v12 = vmul.f32 %v14841_v48, %v19401_v15  ;;  %v15583_v15 = vmax.f32 %v5772_v32, 0.0  ;;  %6739 = vmatpush.msrb.mxu2 %v15570_v2  ;;  %v19412_v32 = vld [vmem:[#allocation233_spill] sm:$0xff]  ;;  %v5555_v39 = vmul.f32 %v14860_v35, %v19413_v29  ;;  %9829 = vmatmul.msk.f32.vlgmr.msra.gmra.mxu3 %vm6283_vm14, %v15119_v41 }
 0x7cd   :  { %19393 = vst [vmem:[#allocation209_spill] sm:$0xff] %v15542_v34  ;;  %v19404_v34 = vld [vmem:[#allocation251_spill] sm:$0xff]  ;;  %6700 = vmatpush.msrb.mxu0 %v15581_v22  ;;  %v15626_v29 = vmax.f32 %v5734_v9, 0.0  ;;  %v15642_v9 = vmax.f32 %v5693_v33, 0.0 }
 0x7ce   :  { %19394 = vst [vmem:[#allocation4_spill] sm:$0xff] %v15549_v1  ;;  %v15573_v52 = vmax.f32 %v19404_v34, 0.0  ;;  %v5732_v34 = vadd.f32 %v15044_v25, %v5552_v8  ;;  %6720 = vmatpush.msrb.mxu1 %v15583_v15  ;;  %v5692_v8 = vadd.f32 %v15066_v36, %v5512_v47  ;;  %6740 = vmatpush.msrb.mxu2 %v15590_v50 }
 0x7cf   :  { %19395 = vst [vmem:[#allocation129_spill] sm:$0xff] %v15551_v24  ;;  %6701 = vmatpush.msrb.mxu0 %v15612_v26 }
 0x7d0   :  { %19397 = vst [vmem:[#allocation263_spill] sm:$0xff] %v15558_v44  ;;  %6759 = vmatpush.msrb.mxu3 %v15573_v52  ;;  %v5733_v44 = vadd.f32 %v15044_v25, %v5553_v6  ;;  %v5694_v6 = vadd.f32 %v15066_v36, %v5514_v18  ;;  %v15614_v47 = vmax.f32 %v5732_v34, 0.0  ;;  %v5558_v34 = vmul.f32 %v14860_v35, %v19420_v51 }
 0x7d1   :  { %19399 = vst [vmem:[#allocation212_spill] sm:$0xff] %v15561_v4 }
 0x7d2   :  { %19403 = vst [vmem:[#allocation130_spill] sm:$0xff] %v15570_v2  ;;  %v5598_v2 = vmul.f32 %v14841_v48, %v19412_v32  ;;  %6760 = vmatpush.msrb.mxu3 %v15592_v63  ;;  %v19416_v32 = vld [vmem:[#allocation299_spill] sm:$0xff]  ;;  %v15624_v18 = vmax.f32 %v5733_v44, 0.0  ;;  %6721 = vmatpush.msrb.mxu1 %v15614_v47  ;;  %v5776_v44 = vadd.f32 %v14940_v23, %v5596_v10  ;;  %v15644_v51 = vmax.f32 %v5694_v6, 0.0  ;;  %v19428_v10 = vld [vmem:[#allocation30_spill] sm:$0xff] }
 0x7d3   :  { %19405 = vst [vmem:[#allocation264_spill] sm:$0xff] %v15573_v52  ;;  %v5775_v52 = vadd.f32 %v14940_v23, %v5595_v12  ;;  %v19432_v6 = vld [vmem:[#allocation163_spill] sm:$0xff] }
 0x7d4   :  { %19408 = vst [vmem:[#allocation131_spill] sm:$0xff] %v15581_v22  ;;  %6741 = vmatpush.msrb.mxu2 %v15624_v18  ;;  %6761 = vmatpush.msrb.mxu3 %v15626_v29 }
 0x7d5   :  { %19409 = vst [vmem:[#allocation265_spill] sm:$0xff] %v15583_v15  ;;  %v19421_v15 = vld [vmem:[#allocation281_spill] sm:$0xff] }
 0x7d6   :  { %19410 = vst [vmem:[#allocation81_spill] sm:$0xff] %v15590_v50  ;;  %v19417_v50 = vld [vmem:[#allocation144_spill] sm:$0xff]  ;;  %v5515_v22 = vmul.f32 %v14990_v21, %v19421_v15  ;;  %v5777_v15 = vadd.f32 %v14940_v23, %v5597_v62  ;;  %6742 = vmatpush.msrb.mxu2 %v15642_v9  ;;  %6762 = vmatpush.msrb.mxu3 %v15644_v51  ;;  %v19430_v62 = vld [vmem:[#allocation23_spill] sm:$0xff] }
 0x7d7   :  { %19411 = vst [vmem:[#allocation123_spill] sm:$0xff] %v15592_v63  ;;  %v5556_v63 = vmul.f32 %v14860_v35, %v19416_v32  ;;  %v5557_v45 = vmul.f32 %v14860_v35, %v19417_v50  ;;  %v15634_v50 = vmax.f32 %v5691_v19, 0.0  ;;  %v15636_v32 = vmax.f32 %v5692_v8, 0.0  ;;  %v19426_v19 = vld [vmem:[#allocation21_spill] sm:$0xff]  ;;  %9832 = vmatmul.msk.f32.vlgmr.msrb.gmra.mxu2 %vm6283_vm14, %v15119_v41  ;;  %9833 = vmatmul.msk.f32.vlgmr.msrb.gmra.mxu3 %vm6283_vm14, %v15119_v41 }
 0x7d8   :  { %19414 = vst [vmem:[#allocation257_spill] sm:$0xff] %v15612_v26  ;;  %v15651_v12 = vmax.f32 %v19426_v19, 0.0  ;;  %v15654_v8 = vmax.f32 %v19428_v10, 0.0  ;;  %v19435_v10 = vld [vmem:[#allocation291_spill] sm:$0xff] }
 0x7d9   :  { %19415 = vst [vmem:[#allocation132_spill] sm:$0xff] %v15614_v47  ;;  %v5778_v47 = vadd.f32 %v14940_v23, %v5598_v2  ;;  %6702 = vmatpush.msrb.mxu0 %v15634_v50  ;;  %6722 = vmatpush.msrb.mxu1 %v15636_v32  ;;  %v5736_v33 = vadd.f32 %v15044_v25, %v5556_v63  ;;  %v15661_v2 = vmax.f32 %v19430_v62, 0.0  ;;  %v15672_v63 = vmax.f32 %v5776_v44, 0.0  ;;  %v19436_v62 = vld [vmem:[#allocation289_spill] sm:$0xff] }
 0x7da   :  { %19418 = vst [vmem:[#allocation266_spill] sm:$0xff] %v15624_v18  ;;  %v5737_v19 = vadd.f32 %v15044_v25, %v5557_v45  ;;  %v15680_v45 = vmax.f32 %v5777_v15, 0.0  ;;  %9830 = vmatmul.msk.f32.vlgmr.msrb.gmra.mxu0 %vm6283_vm14, %v15119_v41  ;;  %9831 = vmatmul.msk.f32.vlgmr.msrb.gmra.mxu1 %vm6283_vm14, %v15119_v41 }
 0x7db   :  { %19419 = vst [vmem:[#allocation133_spill] sm:$0xff] %v15626_v29  ;;  %v5735_v29 = vadd.f32 %v15044_v25, %v5555_v39  ;;  %6779 = vmatpush.msra.mxu0 %v15651_v12  ;;  %6799 = vmatpush.msra.mxu1 %v15654_v8  ;;  %v15670_v39 = vmax.f32 %v5775_v52, 0.0 }
 0x7dc   :  { %19422 = vst [vmem:[#allocation267_spill] sm:$0xff] %v15634_v50  ;;  %v15664_v50 = vmax.f32 %v19432_v6, 0.0  ;;  %6819 = vmatpush.msra.mxu2 %v15661_v2  ;;  %v19439_v6 = vld [vmem:[#allocation167_spill] sm:$0xff] }
 0x7dd   :  { %19423 = vst [vmem:[#allocation124_spill] sm:$0xff] %v15636_v32  ;;  %v5738_v32 = vadd.f32 %v15044_v25, %v5558_v34  ;;  %v15682_v34 = vmax.f32 %v5778_v47, 0.0  ;;  %v5518_v52 = vmul.f32 %v14990_v21, %v19439_v6  ;;  %6780 = vmatpush.msra.mxu0 %v15670_v39  ;;  %6800 = vmatpush.msra.mxu1 %v15672_v63  ;;  %v15698_v47 = vmax.f32 %v5737_v19, 0.0 }
 0x7de   :  { %19424 = vst [vmem:[#allocation258_spill] sm:$0xff] %v15642_v9  ;;  %v5517_v9 = vmul.f32 %v14990_v21, %v19436_v62  ;;  %6839 = vmatpush.msra.mxu3 %v15664_v50  ;;  %v15692_v62 = vmax.f32 %v5736_v33, 0.0  ;;  %6820 = vmatpush.msra.mxu2 %v15680_v45 }
 0x7df   :  { %19425 = vst [vmem:[#allocation134_spill] sm:$0xff] %v15644_v51  ;;  %v5516_v51 = vmul.f32 %v14990_v21, %v19435_v10  ;;  %v15690_v10 = vmax.f32 %v5735_v29, 0.0  ;;  %v15700_v6 = vmax.f32 %v5738_v32, 0.0  ;;  %v19445_v29 = vld [vmem:[#allocation234_spill] sm:$0xff]  ;;  %v19448_v32 = vld [vmem:[#allocation231_spill] sm:$0xff] }
 0x7e0   :  { %19427 = vst [vmem:[#allocation268_spill] sm:$0xff] %v15651_v12  ;;  %6840 = vmatpush.msra.mxu3 %v15682_v34  ;;  %6801 = vmatpush.msra.mxu1 %v15692_v62 }
 0x7e1   :  { %19429 = vst [vmem:[#allocation135_spill] sm:$0xff] %v15654_v8  ;;  %v19440_v8 = vld [vmem:[#allocation8_spill] sm:$0xff]  ;;  %v5696_v15 = vadd.f32 %v15066_v36, %v5516_v51  ;;  %6781 = vmatpush.msra.mxu0 %v15690_v10  ;;  %6821 = vmatpush.msra.mxu2 %v15698_v47 }
 0x7e2   :  { %19431 = vst [vmem:[#allocation269_spill] sm:$0xff] %v15661_v2  ;;  %v5599_v44 = vmul.f32 %v14841_v48, %v19440_v8  ;;  %v5697_v8 = vadd.f32 %v15066_v36, %v5517_v9  ;;  %v19446_v51 = vld [vmem:[#allocation292_spill] sm:$0xff]  ;;  %6841 = vmatpush.msra.mxu3 %v15700_v6  ;;  %v5559_v9 = vmul.f32 %v14860_v35, %v19448_v32 }
 0x7e3   :  { %19433 = vst [vmem:[#allocation125_spill] sm:$0xff] %v15664_v50  ;;  %v5695_v50 = vadd.f32 %v15066_v36, %v5515_v22  ;;  %v5600_v22 = vmul.f32 %v14841_v48, %v19445_v29  ;;  %v5601_v33 = vmul.f32 %v14841_v48, %v19446_v51  ;;  %v19453_v51 = vld [vmem:[#allocation100_spill] sm:$0xff] }
 0x7e4   :  { %19434 = vst [vmem:[#allocation259_spill] sm:$0xff] %v15672_v63  ;;  %v5698_v63 = vadd.f32 %v15066_v36, %v5518_v52  ;;  %v19449_v52 = vld [vmem:[#allocation32_spill] sm:$0xff]  ;;  %v15729_v29 = vadd.f32 %v14940_v23, %v5599_v44  ;;  %v5562_v32 = vmul.f32 %v14860_v35, %v19453_v51  ;;  %v19459_v51 = vld [vmem:[#allocation31_spill] sm:$0xff] }
 0x7e5   :  { %19437 = vst [vmem:[#allocation136_spill] sm:$0xff] %v15680_v45  ;;  %v19447_v45 = vld [vmem:[#allocation296_spill] sm:$0xff]  ;;  %v6147_v44 = vld [vmem:[%s17462_s4] sm:$0xff] }
 0x7e6   :  { %19438 = vst [vmem:[#allocation270_spill] sm:$0xff] %v15682_v34  ;;  %v5602_v19 = vmul.f32 %v14841_v48, %v19447_v45  ;;  %v15724_v48 = vmax.f32 %v5695_v50, 0.0  ;;  %v15726_v45 = vmax.f32 %v5696_v15, 0.0  ;;  %v15742_v50 = vadd.f32 %v14940_v23, %v5600_v22  ;;  %v19473_v22 = vld [vmem:[#allocation236_spill] sm:$0xff]  ;;  %6280 = vperm.xlu2 %9912, %v6147_v44  }
 0x7e7   :  { %19441 = vst [vmem:[#allocation137_spill] sm:$0xff] %v15690_v10  ;;  %v5560_v10 = vmul.f32 %v14860_v35, %v19449_v52  ;;  %v15739_v52 = vmax.f32 %v5698_v63, 0.0  ;;  %v15745_v15 = vadd.f32 %v14940_v23, %v5601_v33  ;;  %v15755_v63 = vadd.f32 %v15044_v25, %v5559_v9  ;;  %v19463_v33 = vld [vmem:[#allocation118_spill] sm:$0xff] }
 0x7e8   :  { %19442 = vst [vmem:[#allocation271_spill] sm:$0xff] %v15692_v62  ;;  %v19450_v62 = vld [vmem:[#allocation99_spill] sm:$0xff]  ;;  %6782 = vmatpush.msra.mxu0 %v15724_v48  ;;  %6802 = vmatpush.msra.mxu1 %v15726_v45  ;;  %v19467_v9 = vmax.f32 %v19459_v51, 0.0  ;;  %v19472_v51 = vld [vmem:[#allocation102_spill] sm:$0xff] }
 0x7e9   :  { %19443 = vst [vmem:[#allocation20_spill] sm:$0xff] %v15698_v47  ;;  %v5561_v34 = vmul.f32 %v14860_v35, %v19450_v62  ;;  %v15737_v62 = vmax.f32 %v5697_v8, 0.0  ;;  %v19458_v35 = vld [vmem:[#allocation155_spill] sm:$0xff]  ;;  %v15752_v47 = vadd.f32 %v14940_v23, %v5602_v19  ;;  %6842 = vmatpush.msra.mxu3 %v15739_v52  ;;  %v19462_v8 = vld [vmem:[#allocation157_spill] sm:$0xff]  ;;  %9834 = vmatmul.msk.f32.vlgmr.msra.gmra.mxu0 %vm6283_vm14, %v15119_v41 }
 0x7ea   :  { %19444 = vst [vmem:[#allocation154_spill] sm:$0xff] %v15700_v6  ;;  %v15765_v6 = vadd.f32 %v15044_v25, %v5560_v10  ;;  %v19466_v19 = vmax.f32 %v19458_v35, 0.0  ;;  %6879 = vmatpush.msrb.mxu1 %v19467_v9  ;;  %v19470_v10 = vmax.f32 %v19462_v8, 0.0  ;;  %v5520_v9 = vmul.f32 %v14990_v21, %v19472_v51  ;;  %v19476_v35 = vld [vmem:[#allocation37_spill] sm:$0xff]  ;;  %9837 = vmatmul.msk.f32.vlgmr.msra.gmra.mxu3 %vm6283_vm14, %v15119_v41  ;;  %v19538_v8 = vld [vmem:[#allocation200_spill] sm:$0xff] }
 0x7eb   :  { %19451 = vst [vmem:[#allocation24_spill] sm:$0xff] %v15724_v48  ;;  %6822 = vmatpush.msra.mxu2 %v15737_v62  ;;  %v15768_v23 = vadd.f32 %v15044_v25, %v5561_v34  ;;  %v15776_v48 = vadd.f32 %v15044_v25, %v5562_v32  ;;  %v19471_v34 = vmax.f32 %v19463_v33, 0.0  ;;  %v5521_v25 = vmul.f32 %v14990_v21, %v19473_v22 }
 0x7ec   :  { %19452 = vst [vmem:[#allocation165_spill] sm:$0xff] %v15729_v29  ;;  %6859 = vmatpush.msrb.mxu0 %v19466_v19  ;;  %v19474_v32 = vmax.f32 %v15729_v29, 0.0  ;;  %v5522_v19 = vmul.f32 %v14990_v21, %v19476_v35  ;;  %v19477_v33 = vmax.f32 %v15742_v50, 0.0  ;;  %v19478_v51 = vmax.f32 %v15745_v15, 0.0  ;;  %9835 = vmatmul.msk.f32.vlgmr.msra.gmra.mxu1 %vm6283_vm14, %v15119_v41  ;;  %v19537_v29 = vld [vmem:[#allocation56_spill] sm:$0xff] }
 0x7ed   :  { %19454 = vst [vmem:[#allocation162_spill] sm:$0xff] %v15737_v62  ;;  %6899 = vmatpush.msrb.mxu2 %v19470_v10  ;;  %6919 = vmatpush.msrb.mxu3 %v19471_v34  ;;  %v17891_v44 = vmax.f32 %v15765_v6, 0.0  ;;  %v17890_v22 = vmax.f32 %v15768_v23, 0.0  ;;  %v15809_v10 = vadd.f32 %v15066_v36, %v5521_v25  ;;  %v19483_v25 = vld [vmem:[#allocation160_spill] sm:$0xff] }
 0x7ee   :  { %19455 = vst [vmem:[#allocation29_spill] sm:$0xff] %v15739_v52  ;;  %v19469_v52 = vld [vmem:[#allocation302_spill] sm:$0xff]  ;;  %6860 = vmatpush.msrb.mxu0 %v19474_v32  ;;  %6880 = vmatpush.msrb.mxu1 %v19477_v33  ;;  %v15806_v32 = vadd.f32 %v15066_v36, %v5520_v9  ;;  %v15817_v35 = vadd.f32 %v15066_v36, %v5522_v19 }
 0x7ef   :  { %19456 = vst [vmem:[#allocation34_spill] sm:$0xff] %v15742_v50  ;;  %v5519_v62 = vmul.f32 %v14990_v21, %v19469_v52  ;;  %v17893_v52 = vmax.f32 %v15752_v47, 0.0  ;;  %6900 = vmatpush.msrb.mxu2 %v19478_v51  ;;  %v19481_v21 = vmax.f32 %v15755_v63, 0.0  ;;  %v17897_v19 = vmax.f32 %v15809_v10, 0.0  ;;  %v19536_v50 = vld [vmem:[#allocation73_spill] sm:$0xff] }
 0x7f0   :  { %19457 = vst [vmem:[#allocation39_spill] sm:$0xff] %v15745_v15  ;;  %6881 = vmatpush.msrb.mxu1 %v17891_v44  ;;  %9836 = vmatmul.msk.f32.vlgmr.msra.gmra.mxu2 %vm6283_vm14, %v15119_v41  ;;  %v17899_v9 = vmax.f32 %v15817_v35, 0.0  ;;  %v19484_v51 = vmax.f32 %v19483_v25, 0.0  ;;  %v19497_v25 = vld [vmem:[#allocation169_spill] sm:$0xff] }
 0x7f1   :  { %19460 = vst [vmem:[#allocation43_spill] sm:$0xff] %v15752_v47  ;;  %v15795_v34 = vadd.f32 %v15066_v36, %v5519_v62  ;;  %6920 = vmatpush.msrb.mxu3 %v17893_v52  ;;  %6861 = vmatpush.msrb.mxu0 %v19481_v21  ;;  %v17889_v62 = vmax.f32 %v15776_v48, 0.0  ;;  %v17895_v36 = vmax.f32 %v15806_v32, 0.0  ;;  %v19485_v21 = vld [vmem:[#allocation143_spill] sm:$0xff]  ;;  %v19535_v15 = vld [vmem:[#allocation261_spill] sm:$0xff] }
 0x7f2   :  { %19461 = vst [vmem:[#allocation177_spill] sm:$0xff] %v15755_v63  ;;  %6901 = vmatpush.msrb.mxu2 %v17890_v22  ;;  %v19487_v22 = vld [vmem:[#allocation156_spill] sm:$0xff]  ;;  %v19533_v63 = vld [vmem:[#allocation219_spill] sm:$0xff] }
 0x7f3   :  { %19464 = vst [vmem:[#allocation44_spill] sm:$0xff] %v15765_v6  ;;  %6921 = vmatpush.msrb.mxu3 %v17889_v62  ;;  %v17892_v33 = vmax.f32 %v15795_v34, 0.0  ;;  %6882 = vmatpush.msrb.mxu1 %v17895_v36  ;;  %v19486_v62 = vmax.f32 %v19485_v21, 0.0  ;;  %v19488_v44 = vmax.f32 %v19487_v22, 0.0  ;;  %v19502_v22 = vld [vmem:[#allocation254_spill] sm:$0xff]  ;;  %v19516_v21 = vld [vmem:[#allocation183_spill] sm:$0xff] }
 0x7f4   :  { %19465 = vst [vmem:[#allocation182_spill] sm:$0xff] %v15768_v23  ;;  %6902 = vmatpush.msrb.mxu2 %v17897_v19  ;;  %9839 = vmatmul.msk.f32.vlgmr.msrb.gmra.mxu1 %vm6283_vm14, %v15119_v41  ;;  %v19531_v23 = vld [vmem:[#allocation66_spill] sm:$0xff]  ;;  %v19534_v47 = vld [vmem:[#allocation127_spill] sm:$0xff] }
 0x7f5   :  { %19468 = vst [vmem:[#allocation239_spill] sm:$0xff] %v15776_v48  ;;  %6862 = vmatpush.msrb.mxu0 %v17892_v33  ;;  %6922 = vmatpush.msrb.mxu3 %v17899_v9  ;;  %v19489_v33 = vld [vmem:[#allocation317_spill] sm:$0xff]  ;;  %v19530_v48 = vld [vmem:[#allocation188_spill] sm:$0xff]  ;;  %v19532_v6 = vld [vmem:[#allocation202_spill] sm:$0xff] }
 0x7f6   :  { %19475 = vst [vmem:[#allocation27_spill] sm:$0xff] %v15795_v34  ;;  %7125 = vmatpush.msra.mxu1 %v19486_v62  ;;  %7145 = vmatpush.msra.mxu2 %v19488_v44  ;;  %v19490_v52 = vmax.f32 %v19489_v33, 0.0  ;;  %v19499_v62 = vmax.f32 %v15055_v42, 0.0  ;;  %v19500_v44 = vmax.f32 %v15058_v60, 0.0  ;;  %v19508_v42 = vmax.f32 %v15094_v37, 0.0  ;;  %v19509_v60 = vld [vmem:[#allocation255_spill] sm:$0xff] }
 0x7f7   :  { %19479 = vst [vmem:[#allocation161_spill] sm:$0xff] %v15806_v32  ;;  %7105 = vmatpush.msra.mxu0 %v19484_v51  ;;  %v19491_v32 = vld [vmem:[#allocation252_spill] sm:$0xff]  ;;  %v19498_v51 = vmax.f32 %v19497_v25, 0.0  ;;  %9841 = vmatmul.msk.f32.vlgmr.msrb.gmra.mxu3 %vm6283_vm14, %v15119_v41  ;;  %v19512_v37 = vld [vmem:[#allocation50_spill] sm:$0xff]  ;;  %v19529_v34 = vld [vmem:[#allocation61_spill] sm:$0xff] }
 0x7f8   :  { %19480 = vst [vmem:[#allocation164_spill] sm:$0xff] %v15809_v10  ;;  %7165 = vmatpush.msra.mxu3 %v19490_v52  ;;  %v19492_v36 = vmax.f32 %v19491_v32, 0.0  ;;  %v19493_v10 = vld [vmem:[#allocation119_spill] sm:$0xff]  ;;  %v19501_v52 = vmax.f32 %v15061_v40, 0.0  ;;  %v19503_v32 = vmax.f32 %v19502_v22, 0.0  ;;  %9838 = vmatmul.msk.f32.vlgmr.msrb.gmra.mxu0 %vm6283_vm14, %v15119_v41  ;;  %v15899_v40 = vld [vmem:[%s17461_s3 + $0x10] sm:$0xff] }
 0x7f9   :  { %19482 = vst [vmem:[#allocation106_spill] sm:$0xff] %v15817_v35  ;;  %v19494_v19 = vmax.f32 %v19493_v10, 0.0  ;;  %v19495_v35 = vld [vmem:[#allocation253_spill] sm:$0xff]  ;;  %9840 = vmatmul.msk.f32.vlgmr.msrb.gmra.mxu2 %vm6283_vm14, %v15119_v41  ;;  %v19513_v41 = vld [vmem:[#allocation194_spill] sm:$0xff]  ;;  %v19517_v25 = vld [vmem:[#allocation60_spill] sm:$0xff] }
 0x7fa   :  { %7106 = vmatpush.msra.mxu0 %v19492_v36  ;;  %v19496_v9 = vmax.f32 %v19495_v35, 0.0  ;;  %7166 = vmatpush.msra.mxu3 %v19498_v51  ;;  %v19504_v10 = vld [vmem:[#allocation121_spill] sm:$0xff]  ;;  %v19506_v35 = vmax.f32 %v15088_v54, 0.0  ;;  %v19507_v36 = vmax.f32 %v15091_v20, 0.0  ;;  %v19510_v54 = vld [vmem:[#allocation48_spill] sm:$0xff]  ;;  %v19518_v51 = vld [vmem:[#allocation199_spill] sm:$0xff] }
 0x7fb   :  { %7126 = vmatpush.msra.mxu1 %v19494_v19  ;;  %v19505_v33 = vmax.f32 %v19504_v10, 0.0  ;;  %v19511_v20 = vld [vmem:[#allocation193_spill] sm:$0xff]  ;;  %v19522_v22 = vld [vmem:[#allocation122_spill] sm:$0xff] }
 0x7fc   :  { %7146 = vmatpush.msra.mxu2 %v19496_v9  ;;  %7107 = vmatpush.msra.mxu0 %v19499_v62  ;;  %v19514_v19 = vld [vmem:[#allocation273_spill] sm:$0xff]  ;;  %v19515_v9 = vld [vmem:[#allocation274_spill] sm:$0xff] }
 0x7fd   :  { %7127 = vmatpush.msra.mxu1 %v19500_v44  ;;  %7167 = vmatpush.msra.mxu3 %v19503_v32  ;;  %v19519_v62 = vld [vmem:[#allocation210_spill] sm:$0xff]  ;;  %v19520_v44 = vld [vmem:[#allocation67_spill] sm:$0xff]  ;;  %v19523_v32 = vld [vmem:[#allocation256_spill] sm:$0xff] }
 0x7fe   :  { %7147 = vmatpush.msra.mxu2 %v19501_v52  ;;  %7108 = vmatpush.msra.mxu0 %v19505_v33  ;;  %v19521_v52 = vld [vmem:[#allocation216_spill] sm:$0xff]  ;;  %v19524_v10 = vld [vmem:[#allocation126_spill] sm:$0xff] }
 0x7ff   :  { %7128 = vmatpush.msra.mxu1 %v19506_v35  ;;  %7168 = vmatpush.msra.mxu3 %v19508_v42  ;;  %v19525_v33 = vld [vmem:[#allocation260_spill] sm:$0xff]  ;;  %v19526_v35 = vld [vmem:[#allocation69_spill] sm:$0xff]  ;;  %v19528_v42 = vld [vmem:[#allocation54_spill] sm:$0xff] }
 0x800   :  { %7148 = vmatpush.msra.mxu2 %v19507_v36  ;;  %7185 = vmatpush.msrb.mxu0 %v15153_v11  ;;  %v19527_v36 = vld [vmem:[#allocation85_spill] sm:$0xff] }
 0x801   :  { %7205 = vmatpush.msrb.mxu1 %v15155_v46  ;;  %7245 = vmatpush.msrb.mxu3 %v15167_v59 }
 0x802   :  { %7225 = vmatpush.msrb.mxu2 %v15165_v13  ;;  %7186 = vmatpush.msrb.mxu0 %v15175_v5 }
 0x803   :  { %7206 = vmatpush.msrb.mxu1 %v15177_v49  ;;  %7246 = vmatpush.msrb.mxu3 %v15185_v30 }
 0x804   :  { %7226 = vmatpush.msrb.mxu2 %v15183_v16  ;;  %7187 = vmatpush.msrb.mxu0 %v15191_v0 }
 0x805   :  { %7207 = vmatpush.msrb.mxu1 %v15193_v38  ;;  %7247 = vmatpush.msrb.mxu3 %v15203_v57 }
 0x806   :  { %7227 = vmatpush.msrb.mxu2 %v15201_v27  ;;  %7188 = vmatpush.msrb.mxu0 %v15211_v14 }
 0x807   :  { %7208 = vmatpush.msrb.mxu1 %v15213_v28  ;;  %7248 = vmatpush.msrb.mxu3 %v15227_v31 }
 0x808   :  { %7228 = vmatpush.msrb.mxu2 %v15225_v3  ;;  %9843 = vmatmul.msk.f32.vlgmr.msra.gmra.mxu0 %vm6283_vm14, %v15899_v40 }
 0x809   :  { %9844 = vmatmul.msk.f32.vlgmr.msra.gmra.mxu1 %vm6283_vm14, %v15899_v40  ;;  %9845 = vmatmul.msk.f32.vlgmr.msra.gmra.mxu2 %vm6283_vm14, %v15899_v40 }
 0x80a   :  { %9846 = vmatmul.msk.f32.vlgmr.msra.gmra.mxu3 %vm6283_vm14, %v15899_v40  ;;  %7265 = vmatpush.msra.mxu0 %v15239_v56 }
 0x80b   :  { %7285 = vmatpush.msra.mxu1 %v15241_v61  ;;  %7305 = vmatpush.msra.mxu2 %v15249_v17 }
 0x80c   :  { %7325 = vmatpush.msra.mxu3 %v19509_v60  ;;  %7266 = vmatpush.msra.mxu0 %v15281_v58 }
 0x80d   :  { %7286 = vmatpush.msra.mxu1 %v15283_v43  ;;  %7306 = vmatpush.msra.mxu2 %v19510_v54 }
 0x80e   :  { %7326 = vmatpush.msra.mxu3 %v19511_v20  ;;  %7267 = vmatpush.msra.mxu0 %v15303_v55 }
 0x80f   :  { %7287 = vmatpush.msra.mxu1 %v19512_v37  ;;  %7307 = vmatpush.msra.mxu2 %v19513_v41 }
 0x810   :  { %7327 = vmatpush.msra.mxu3 %v19514_v19  ;;  %7268 = vmatpush.msra.mxu0 %v19515_v9 }
 0x811   :  { %7288 = vmatpush.msra.mxu1 %v19516_v21  ;;  %7308 = vmatpush.msra.mxu2 %v19517_v25 }
 0x812   :  { %7328 = vmatpush.msra.mxu3 %v19518_v51  ;;  %9847 = vmatmul.msk.f32.vlgmr.msrb.gmra.mxu0 %vm6283_vm14, %v15899_v40 }
 0x813   :  { %9848 = vmatmul.msk.f32.vlgmr.msrb.gmra.mxu1 %vm6283_vm14, %v15899_v40  ;;  %9849 = vmatmul.msk.f32.vlgmr.msrb.gmra.mxu2 %vm6283_vm14, %v15899_v40 }
 0x814   :  { %9850 = vmatmul.msk.f32.vlgmr.msrb.gmra.mxu3 %vm6283_vm14, %v15899_v40  ;;  %7345 = vmatpush.msrb.mxu0 %v19519_v62 }
 0x815   :  { %7365 = vmatpush.msrb.mxu1 %v19520_v44  ;;  %7385 = vmatpush.msrb.mxu2 %v19521_v52 }
 0x816   :  { %7405 = vmatpush.msrb.mxu3 %v19522_v22  ;;  %7346 = vmatpush.msrb.mxu0 %v19523_v32 }
 0x817   :  { %7366 = vmatpush.msrb.mxu1 %v19524_v10  ;;  %7386 = vmatpush.msrb.mxu2 %v19525_v33 }
 0x818   :  { %7406 = vmatpush.msrb.mxu3 %v19526_v35  ;;  %7347 = vmatpush.msrb.mxu0 %v19527_v36 }
 0x819   :  { %7367 = vmatpush.msrb.mxu1 %v19528_v42  ;;  %7387 = vmatpush.msrb.mxu2 %v19529_v34 }
 0x81a   :  { %7407 = vmatpush.msrb.mxu3 %v19530_v48  ;;  %7348 = vmatpush.msrb.mxu0 %v19531_v23  ;;  %v19542_v23 = vld [vmem:[#allocation128_spill] sm:$0xff]  ;;  %v19543_v48 = vld [vmem:[#allocation262_spill] sm:$0xff] }
 0x81b   :  { %7368 = vmatpush.msrb.mxu1 %v19532_v6  ;;  %7388 = vmatpush.msrb.mxu2 %v15447_v53  ;;  %v19540_v53 = vld [vmem:[#allocation277_spill] sm:$0xff]  ;;  %v19541_v6 = vld [vmem:[#allocation87_spill] sm:$0xff] }
 0x81c   :  { %7408 = vmatpush.msrb.mxu3 %v15449_v7  ;;  %9851 = vmatmul.msk.f32.vlgmr.msra.gmra.mxu0 %vm6283_vm14, %v15899_v40  ;;  %v19539_v7 = vld [vmem:[#allocation75_spill] sm:$0xff] }
 0x81d   :  { %9852 = vmatmul.msk.f32.vlgmr.msra.gmra.mxu1 %vm6283_vm14, %v15899_v40  ;;  %9853 = vmatmul.msk.f32.vlgmr.msra.gmra.mxu2 %vm6283_vm14, %v15899_v40 }
 0x81e   :  { %9854 = vmatmul.msk.f32.vlgmr.msra.gmra.mxu3 %vm6283_vm14, %v15899_v40  ;;  %7425 = vmatpush.msra.mxu0 %v19533_v63  ;;  %v19544_v63 = vld [vmem:[#allocation74_spill] sm:$0xff] }
 0x81f   :  { %7445 = vmatpush.msra.mxu1 %v19534_v47  ;;  %7465 = vmatpush.msra.mxu2 %v19535_v15  ;;  %v19545_v47 = vld [vmem:[#allocation224_spill] sm:$0xff]  ;;  %v19546_v15 = vld [vmem:[#allocation209_spill] sm:$0xff] }
 0x820   :  { %7485 = vmatpush.msra.mxu3 %v19536_v50  ;;  %7426 = vmatpush.msra.mxu0 %v19537_v29 }
 0x821   :  { %7446 = vmatpush.msra.mxu1 %v19538_v8  ;;  %7466 = vmatpush.msra.mxu2 %v19539_v7 }
 0x822   :  { %7486 = vmatpush.msra.mxu3 %v19540_v53  ;;  %7427 = vmatpush.msra.mxu0 %v19541_v6  ;;  %v19554_v6 = vld [vmem:[#allocation132_spill] sm:$0xff] }
 0x823   :  { %7447 = vmatpush.msra.mxu1 %v19542_v23  ;;  %7467 = vmatpush.msra.mxu2 %v19543_v48  ;;  %v19552_v48 = vld [vmem:[#allocation81_spill] sm:$0xff]  ;;  %v19553_v23 = vld [vmem:[#allocation123_spill] sm:$0xff] }
 0x824   :  { %7487 = vmatpush.msra.mxu3 %v19544_v63  ;;  %7428 = vmatpush.msra.mxu0 %v19545_v47  ;;  %v19547_v63 = vld [vmem:[#allocation263_spill] sm:$0xff]  ;;  %v19551_v47 = vld [vmem:[#allocation265_spill] sm:$0xff] }
 0x825   :  { %7448 = vmatpush.msra.mxu1 %v19546_v15  ;;  %7468 = vmatpush.msra.mxu2 %v15549_v1  ;;  %v19548_v15 = vld [vmem:[#allocation130_spill] sm:$0xff]  ;;  %v19549_v1 = vld [vmem:[#allocation264_spill] sm:$0xff] }
 0x826   :  { %7488 = vmatpush.msra.mxu3 %v15551_v24  ;;  %9855 = vmatmul.msk.f32.vlgmr.msrb.gmra.mxu0 %vm6283_vm14, %v15899_v40  ;;  %v19550_v24 = vld [vmem:[#allocation131_spill] sm:$0xff] }
 0x827   :  { %9856 = vmatmul.msk.f32.vlgmr.msrb.gmra.mxu1 %vm6283_vm14, %v15899_v40  ;;  %9857 = vmatmul.msk.f32.vlgmr.msrb.gmra.mxu2 %vm6283_vm14, %v15899_v40 }
 0x828   :  { %9858 = vmatmul.msk.f32.vlgmr.msrb.gmra.mxu3 %vm6283_vm14, %v15899_v40  ;;  %7505 = vmatpush.msrb.mxu0 %v19547_v63  ;;  %v19555_v63 = vld [vmem:[#allocation133_spill] sm:$0xff] }
 0x829   :  { %7525 = vmatpush.msrb.mxu1 %v15561_v4  ;;  %7545 = vmatpush.msrb.mxu2 %v19548_v15  ;;  %v19556_v4 = vld [vmem:[#allocation267_spill] sm:$0xff]  ;;  %v19557_v15 = vld [vmem:[#allocation124_spill] sm:$0xff] }
 0x82a   :  { %7565 = vmatpush.msrb.mxu3 %v19549_v1  ;;  %7506 = vmatpush.msrb.mxu0 %v19550_v24  ;;  %v19558_v1 = vld [vmem:[#allocation258_spill] sm:$0xff] }
 0x82b   :  { %7526 = vmatpush.msrb.mxu1 %v19551_v47  ;;  %7546 = vmatpush.msrb.mxu2 %v19552_v48  ;;  %v19559_v24 = vld [vmem:[#allocation134_spill] sm:$0xff] }
 0x82c   :  { %7566 = vmatpush.msrb.mxu3 %v19553_v23  ;;  %7507 = vmatpush.msrb.mxu0 %v15612_v26  ;;  %v16021_v26 = vpop.f32.mrf.mxu1 }
 0x82d   :  { %7527 = vmatpush.msrb.mxu1 %v19554_v6  ;;  %7547 = vmatpush.msrb.mxu2 %v15624_v18  ;;  %v19565_v18 = vld [vmem:[#allocation137_spill] sm:$0xff]  ;;  %v16019_v6 = vpop.f32.mrf.mxu0 }
 0x82e   :  { %7567 = vmatpush.msrb.mxu3 %v19555_v63  ;;  %7508 = vmatpush.msrb.mxu0 %v19556_v4  ;;  %v19560_v4 = vld [vmem:[#allocation135_spill] sm:$0xff]  ;;  %v19564_v63 = vld [vmem:[#allocation270_spill] sm:$0xff] }
 0x82f   :  { %7528 = vmatpush.msrb.mxu1 %v19557_v15  ;;  %7548 = vmatpush.msrb.mxu2 %v19558_v1  ;;  %v19561_v1 = vld [vmem:[#allocation125_spill] sm:$0xff]  ;;  %v19563_v15 = vld [vmem:[#allocation136_spill] sm:$0xff] }
 0x830   :  { %7568 = vmatpush.msrb.mxu3 %v19559_v24  ;;  %9859 = vmatmul.msk.f32.vlgmr.msra.gmra.mxu0 %vm6283_vm14, %v15899_v40  ;;  %v19562_v24 = vld [vmem:[#allocation259_spill] sm:$0xff] }
 0x831   :  { %9860 = vmatmul.msk.f32.vlgmr.msra.gmra.mxu1 %vm6283_vm14, %v15899_v40  ;;  %9861 = vmatmul.msk.f32.vlgmr.msra.gmra.mxu2 %vm6283_vm14, %v15899_v40 }
 0x832   :  { %9862 = vmatmul.msk.f32.vlgmr.msra.gmra.mxu3 %vm6283_vm14, %v15899_v40  ;;  %7585 = vmatpush.msra.mxu0 %v15651_v12  ;;  %v19566_v12 = vld [vmem:[#allocation271_spill] sm:$0xff] }
 0x833   :  { %7605 = vmatpush.msra.mxu1 %v19560_v4  ;;  %7625 = vmatpush.msra.mxu2 %v15661_v2  ;;  %v19567_v4 = vld [vmem:[#allocation20_spill] sm:$0xff]  ;;  %v19568_v2 = vld [vmem:[#allocation154_spill] sm:$0xff] }
 0x834   :  { %7645 = vmatpush.msra.mxu3 %v19561_v1  ;;  %7586 = vmatpush.msra.mxu0 %v15670_v39  ;;  %v19569_v1 = vld [vmem:[#allocation24_spill] sm:$0xff] }
 0x835   :  { %7606 = vmatpush.msra.mxu1 %v19562_v24  ;;  %7626 = vmatpush.msra.mxu2 %v19563_v15  ;;  %v19570_v24 = vld [vmem:[#allocation162_spill] sm:$0xff]  ;;  %v19571_v15 = vld [vmem:[#allocation29_spill] sm:$0xff] }
 0x836   :  { %7646 = vmatpush.msra.mxu3 %v19564_v63  ;;  %7587 = vmatpush.msra.mxu0 %v19565_v18 }
 0x837   :  { %7607 = vmatpush.msra.mxu1 %v19566_v12  ;;  %7627 = vmatpush.msra.mxu2 %v19567_v4 }
 0x838   :  { %7647 = vmatpush.msra.mxu3 %v19568_v2  ;;  %7588 = vmatpush.msra.mxu0 %v19569_v1 }
 0x839   :  { %7608 = vmatpush.msra.mxu1 %v15726_v45  ;;  %7628 = vmatpush.msra.mxu2 %v19570_v24  ;;  %v16047_v24 = vpop.f32.mrf.mxu3 }
 0x83a   :  { %7648 = vmatpush.msra.mxu3 %v19571_v15  ;;  %9863 = vmatmul.msk.f32.vlgmr.msrb.gmra.mxu0 %vm6283_vm14, %v15899_v40  ;;  %v16043_v15 = vpop.f32.mrf.mxu2 }
 0x83b   :  { %9864 = vmatmul.msk.f32.vlgmr.msrb.gmra.mxu1 %vm6283_vm14, %v15899_v40  ;;  %9865 = vmatmul.msk.f32.vlgmr.msrb.gmra.mxu2 %vm6283_vm14, %v15899_v40 }
 0x83c   :  { %9866 = vmatmul.msk.f32.vlgmr.msrb.gmra.mxu3 %vm6283_vm14, %v15899_v40  ;;  %7668 = vmatpush.msrb.mxu0 %v15153_v11  ;;  %v16051_v11 = vpop.f32.mrf.mxu0 }
 0x83d   :  { %7688 = vmatpush.msrb.mxu1 %v15155_v46  ;;  %7708 = vmatpush.msrb.mxu2 %v15165_v13  ;;  %v16053_v46 = vpop.f32.mrf.mxu1 }
 0x83e   :  { %7728 = vmatpush.msrb.mxu3 %v15167_v59  ;;  %7669 = vmatpush.msrb.mxu0 %v15175_v5 }
 0x83f   :  { %7689 = vmatpush.msrb.mxu1 %v15177_v49  ;;  %7709 = vmatpush.msrb.mxu2 %v15183_v16  ;;  %v16092_v16 = vld [vmem:[%s17461_s3] sm:$0xff] }
 0x840   :  { %7729 = vmatpush.msrb.mxu3 %v15185_v30  ;;  %7670 = vmatpush.msrb.mxu0 %v15191_v0  ;;  %v16110_v30 = vpop.permute.xlu2 %6280 }
 0x841   :  { %7690 = vmatpush.msrb.mxu1 %v15193_v38  ;;  %7710 = vmatpush.msrb.mxu2 %v15201_v27  ;;  %v16079_v59 = vpop.f32.mrf.mxu3 }
 0x842   :  { %7730 = vmatpush.msrb.mxu3 %v15203_v57  ;;  %7671 = vmatpush.msrb.mxu0 %v15211_v14  ;;  %v16075_v13 = vpop.f32.mrf.mxu2  ;;  %v16130_v14 = vadd.f32 %v16019_v6, %v16110_v30  ;;  %v19581_v6 = vld [vmem:[#allocation261_spill] sm:$0xff] }
 0x843   :  { %7691 = vmatpush.msrb.mxu1 %v15213_v28  ;;  %7711 = vmatpush.msrb.mxu2 %v15225_v3  ;;  %v16134_v28 = vadd.f32 %v16021_v26, %v16110_v30  ;;  %v19573_v3 = vld [vmem:[#allocation188_spill] sm:$0xff]  ;;  %v19580_v26 = vld [vmem:[#allocation127_spill] sm:$0xff] }
 0x844   :  { %7731 = vmatpush.msrb.mxu3 %v15227_v31  ;;  %9867 = vmatmul.msk.f32.vlgmr.msra.gmra.mxu0 %vm6283_vm14, %v15899_v40  ;;  %v16083_v5 = vpop.f32.mrf.mxu0  ;;  %v19574_v31 = vld [vmem:[#allocation66_spill] sm:$0xff] }
 0x845   :  { %9868 = vmatmul.msk.f32.vlgmr.msra.gmra.mxu1 %vm6283_vm14, %v15899_v40  ;;  %9869 = vmatmul.msk.f32.vlgmr.msra.gmra.mxu2 %vm6283_vm14, %v15899_v40  ;;  %v16085_v49 = vpop.f32.mrf.mxu1  ;;  %19572 = vst [vmem:[#allocation38_spill] sm:$0xff] %v16134_v28 }
 0x846   :  { %9870 = vmatmul.msk.f32.vlgmr.msra.gmra.mxu3 %vm6283_vm14, %v15899_v40  ;;  %7748 = vmatpush.msra.mxu0 %v15239_v56  ;;  %v19575_v56 = vld [vmem:[#allocation202_spill] sm:$0xff] }
 0x847   :  { %7768 = vmatpush.msra.mxu1 %v15241_v61  ;;  %7788 = vmatpush.msra.mxu2 %v15249_v17  ;;  %v19576_v61 = vld [vmem:[#allocation275_spill] sm:$0xff]  ;;  %v16142_v17 = vadd.f32 %v16043_v15, %v16110_v30  ;;  %v16160_v15 = vadd.f32 %v16047_v24, %v16110_v30 }
 0x848   :  { %7808 = vmatpush.msra.mxu3 %v19509_v60  ;;  %7749 = vmatpush.msra.mxu0 %v15281_v58  ;;  %v19578_v58 = vld [vmem:[#allocation206_spill] sm:$0xff] }
 0x849   :  { %7769 = vmatpush.msra.mxu1 %v15283_v43  ;;  %7789 = vmatpush.msra.mxu2 %v19510_v54  ;;  %v16116_v38 = vpop.f32.mrf.mxu3  ;;  %19577 = vst [vmem:[#allocation240_spill] sm:$0xff] %v16142_v17  ;;  %v8332_v43 = vadd.f32 %v16134_v28, %v16130_v14  ;;  %v19583_v54 = vld [vmem:[#allocation87_spill] sm:$0xff] }
 0x84a   :  { %7809 = vmatpush.msra.mxu3 %v19511_v20  ;;  %7750 = vmatpush.msra.mxu0 %v15303_v55  ;;  %v16114_v0 = vpop.f32.mrf.mxu2  ;;  %v19579_v55 = vld [vmem:[#allocation219_spill] sm:$0xff]  ;;  %19582 = vst [vmem:[#allocation172_spill] sm:$0xff] %v16160_v15 }
 0x84b   :  { %7770 = vmatpush.msra.mxu1 %v19512_v37  ;;  %7790 = vmatpush.msra.mxu2 %v19513_v41  ;;  %v19584_v37 = vld [vmem:[#allocation128_spill] sm:$0xff]  ;;  %v19587_v41 = vld [vmem:[#allocation74_spill] sm:$0xff] }
 0x84c   :  { %7810 = vmatpush.msra.mxu3 %v19514_v19  ;;  %7751 = vmatpush.msra.mxu0 %v19515_v9  ;;  %v16122_v27 = vpop.f32.mrf.mxu0  ;;  %v19590_v19 = vld [vmem:[#allocation4_spill] sm:$0xff]  ;;  %v19591_v9 = vld [vmem:[#allocation129_spill] sm:$0xff] }
 0x84d   :  { %7771 = vmatpush.msra.mxu1 %v19516_v21  ;;  %7791 = vmatpush.msra.mxu2 %v19517_v25  ;;  %v16124_v57 = vpop.f32.mrf.mxu1  ;;  %v16197_v21 = vadd.f32 %v16053_v46, %v16110_v30  ;;  %v19598_v46 = vld [vmem:[#allocation132_spill] sm:$0xff] }
 0x84e   :  { %7811 = vmatpush.msra.mxu3 %v19518_v51  ;;  %9871 = vmatmul.msk.f32.vlgmr.msrb.gmra.mxu0 %vm6283_vm14, %v16092_v16  ;;  %v19592_v51 = vld [vmem:[#allocation263_spill] sm:$0xff] }
 0x84f   :  { %9872 = vmatmul.msk.f32.vlgmr.msrb.gmra.mxu1 %vm6283_vm14, %v16092_v16  ;;  %9873 = vmatmul.msk.f32.vlgmr.msrb.gmra.mxu2 %vm6283_vm14, %v16092_v16 }
 0x850   :  { %9874 = vmatmul.msk.f32.vlgmr.msrb.gmra.mxu3 %vm6283_vm14, %v16092_v16  ;;  %7828 = vmatpush.msrb.mxu0 %v19519_v62 }
 0x851   :  { %7848 = vmatpush.msrb.mxu1 %v19520_v44  ;;  %7868 = vmatpush.msrb.mxu2 %v19521_v52  ;;  %v16167_v60 = vpop.f32.mrf.mxu3  ;;  %v19593_v44 = vld [vmem:[#allocation212_spill] sm:$0xff]  ;;  %v19594_v52 = vld [vmem:[#allocation130_spill] sm:$0xff] }
 0x852   :  { %7888 = vmatpush.msrb.mxu3 %v19522_v22  ;;  %7829 = vmatpush.msrb.mxu0 %v19523_v32  ;;  %v16165_v40 = vpop.f32.mrf.mxu2  ;;  %v19595_v32 = vld [vmem:[#allocation264_spill] sm:$0xff] }
 0x853   :  { %7849 = vmatpush.msrb.mxu1 %v19524_v10  ;;  %7869 = vmatpush.msrb.mxu2 %v19525_v33  ;;  %v19596_v10 = vld [vmem:[#allocation131_spill] sm:$0xff]  ;;  %v16215_v33 = vadd.f32 %v16075_v13, %v16110_v30 }
 0x854   :  { %7889 = vmatpush.msrb.mxu3 %v19526_v35  ;;  %7830 = vmatpush.msrb.mxu0 %v19527_v36  ;;  %v16173_v24 = vpop.f32.mrf.mxu0 }
 0x855   :  { %7850 = vmatpush.msrb.mxu1 %v19528_v42  ;;  %7870 = vmatpush.msrb.mxu2 %v19529_v34  ;;  %v8333_v34 = vadd.f32 %v8332_v43, %v16142_v17  ;;  %v16175_v20 = vpop.f32.mrf.mxu1  ;;  %v19597_v42 = vld [vmem:[#allocation257_spill] sm:$0xff] }
 0x856   :  { %7890 = vmatpush.msrb.mxu3 %v19573_v3  ;;  %7831 = vmatpush.msrb.mxu0 %v19574_v31  ;;  %v19599_v3 = vld [vmem:[#allocation266_spill] sm:$0xff]  ;;  %v16231_v31 = vadd.f32 %v16079_v59, %v16110_v30  ;;  %v19605_v59 = vld [vmem:[#allocation268_spill] sm:$0xff] }
 0x857   :  { %7851 = vmatpush.msrb.mxu1 %v19575_v56  ;;  %7871 = vmatpush.msrb.mxu2 %v19576_v61  ;;  %v19602_v56 = vld [vmem:[#allocation124_spill] sm:$0xff]  ;;  %v19604_v61 = vld [vmem:[#allocation134_spill] sm:$0xff] }
 0x858   :  { %7891 = vmatpush.msrb.mxu3 %v19578_v58  ;;  %9875 = vmatmul.msk.f32.vlgmr.msra.gmra.mxu0 %vm6283_vm14, %v16092_v16 }
 0x859   :  { %9876 = vmatmul.msk.f32.vlgmr.msra.gmra.mxu1 %vm6283_vm14, %v16092_v16  ;;  %9877 = vmatmul.msk.f32.vlgmr.msra.gmra.mxu2 %vm6283_vm14, %v16092_v16  ;;  %v16207_v22 = vpop.f32.mrf.mxu3 }
 0x85a   :  { %9878 = vmatmul.msk.f32.vlgmr.msra.gmra.mxu3 %vm6283_vm14, %v16092_v16  ;;  %7908 = vmatpush.msra.mxu0 %v19579_v55  ;;  %v16203_v62 = vpop.f32.mrf.mxu2  ;;  %v16250_v55 = vadd.f32 %v16083_v5, %v16110_v30 }
 0x85b   :  { %7928 = vmatpush.msra.mxu1 %v19580_v26  ;;  %7948 = vmatpush.msra.mxu2 %v19581_v6  ;;  %v19606_v26 = vld [vmem:[#allocation135_spill] sm:$0xff]  ;;  %v19607_v6 = vld [vmem:[#allocation269_spill] sm:$0xff] }
 0x85c   :  { %7968 = vmatpush.msra.mxu3 %v19536_v50  ;;  %7909 = vmatpush.msra.mxu0 %v19537_v29  ;;  %v19585_v50 = vld [vmem:[#allocation262_spill] sm:$0xff]  ;;  %v16181_v29 = vadd.f32 %v16051_v11, %v16110_v30  ;;  %v16218_v36 = vpop.f32.mrf.mxu0 }
 0x85d   :  { %7929 = vmatpush.msra.mxu1 %v19538_v8  ;;  %7949 = vmatpush.msra.mxu2 %v19539_v7  ;;  %v8334_v8 = vadd.f32 %v8333_v34, %v16160_v15  ;;  %v19588_v7 = vld [vmem:[#allocation224_spill] sm:$0xff]  ;;  %v16222_v11 = vpop.f32.mrf.mxu1 }
 0x85e   :  { %7969 = vmatpush.msra.mxu3 %v19540_v53  ;;  %7910 = vmatpush.msra.mxu0 %v19583_v54  ;;  %19586 = vst [vmem:[#allocation107_spill] sm:$0xff] %v16181_v29  ;;  %v19589_v53 = vld [vmem:[#allocation209_spill] sm:$0xff] }
 0x85f   :  { %7930 = vmatpush.msra.mxu1 %v19584_v37  ;;  %7950 = vmatpush.msra.mxu2 %v19585_v50  ;;  %v8335_v25 = vadd.f32 %v8334_v8, %v16181_v29  ;;  %v19608_v54 = vld [vmem:[#allocation125_spill] sm:$0xff]  ;;  %v19609_v37 = vld [vmem:[#allocation259_spill] sm:$0xff]  ;;  %v19610_v50 = vld [vmem:[#allocation136_spill] sm:$0xff] }
 0x860   :  { %7970 = vmatpush.msra.mxu3 %v19587_v41  ;;  %7911 = vmatpush.msra.mxu0 %v19588_v7  ;;  %v16269_v7 = vadd.f32 %v16085_v49, %v16110_v30 }
 0x861   :  { %7931 = vmatpush.msra.mxu1 %v19589_v53  ;;  %7951 = vmatpush.msra.mxu2 %v19590_v19  ;;  %v8336_v35 = vadd.f32 %v8335_v25, %v16197_v21  ;;  %v16254_v34 = vpop.f32.mrf.mxu3  ;;  %v19617_v53 = vld [vmem:[#allocation157_spill] sm:$0xff] }
 0x862   :  { %7971 = vmatpush.msra.mxu3 %v19591_v9  ;;  %9879 = vmatmul.msk.f32.vlgmr.msrb.gmra.mxu0 %vm6283_vm14, %v16092_v16  ;;  %v16245_v58 = vpop.f32.mrf.mxu2  ;;  %v19619_v9 = vld [vmem:[#allocation118_spill] sm:$0xff] }
 0x863   :  { %9880 = vmatmul.msk.f32.vlgmr.msrb.gmra.mxu1 %vm6283_vm14, %v16092_v16  ;;  %9881 = vmatmul.msk.f32.vlgmr.msrb.gmra.mxu2 %vm6283_vm14, %v16092_v16  ;;  %v8337_v13 = vadd.f32 %v8336_v35, %v16215_v33  ;;  %v19620_v25 = vmax.f32 %v19619_v9, 0.0 }
 0x864   :  { %9882 = vmatmul.msk.f32.vlgmr.msrb.gmra.mxu3 %vm6283_vm14, %v16092_v16  ;;  %7988 = vmatpush.msrb.mxu0 %v19592_v51  ;;  %v19621_v51 = vld [vmem:[#allocation165_spill] sm:$0xff] }
 0x865   :  { %8008 = vmatpush.msrb.mxu1 %v19593_v44  ;;  %8028 = vmatpush.msrb.mxu2 %v19594_v52  ;;  %v8338_v43 = vadd.f32 %v8337_v13, %v16231_v31  ;;  %v19622_v44 = vmax.f32 %v19621_v51, 0.0  ;;  %v19629_v13 = vld [vmem:[#allocation177_spill] sm:$0xff] }
 0x866   :  { %8048 = vmatpush.msrb.mxu3 %v19595_v32  ;;  %7989 = vmatpush.msrb.mxu0 %v19596_v10  ;;  %v16260_v8 = vpop.f32.mrf.mxu0  ;;  %v16308_v32 = vadd.f32 %v16116_v38, %v16110_v30  ;;  %v19623_v10 = vld [vmem:[#allocation34_spill] sm:$0xff] }
 0x867   :  { %8009 = vmatpush.msrb.mxu1 %v19551_v47  ;;  %8029 = vmatpush.msrb.mxu2 %v19552_v48  ;;  %v19600_v47 = vld [vmem:[#allocation133_spill] sm:$0xff]  ;;  %v19601_v48 = vld [vmem:[#allocation267_spill] sm:$0xff]  ;;  %v8339_v41 = vadd.f32 %v8338_v43, %v16250_v55  ;;  %v19624_v35 = vmax.f32 %v19623_v10, 0.0  ;;  %v19633_v38 = vld [vmem:[#allocation182_spill] sm:$0xff]  ;;  %v16379_v10 = vadd.f32 %v16167_v60, %v16110_v30  ;;  %v16397_v60 = vadd.f32 %v16175_v20, %v16110_v30 }
 0x868   :  { %8049 = vmatpush.msrb.mxu3 %v19553_v23  ;;  %7990 = vmatpush.msrb.mxu0 %v19597_v42  ;;  %v19603_v23 = vld [vmem:[#allocation258_spill] sm:$0xff]  ;;  %v19625_v42 = vld [vmem:[#allocation39_spill] sm:$0xff]  ;;  %v19634_v43 = vmax.f32 %v19633_v38, 0.0  ;;  %v16415_v20 = vadd.f32 %v16207_v22, %v16110_v30 }
 0x869   :  { %8010 = vmatpush.msrb.mxu1 %v19598_v46  ;;  %8030 = vmatpush.msrb.mxu2 %v19599_v3  ;;  %v16264_v5 = vpop.f32.mrf.mxu1  ;;  %v19626_v46 = vmax.f32 %v19625_v42, 0.0  ;;  %19646 = vst [vmem:[#allocation178_spill] sm:$0xff] %v16397_v60 }
 0x86a   :  { %8050 = vmatpush.msrb.mxu3 %v19600_v47  ;;  %7991 = vmatpush.msrb.mxu0 %v19601_v48  ;;  %v19627_v47 = vld [vmem:[#allocation43_spill] sm:$0xff]  ;;  %19648 = vst [vmem:[#allocation45_spill] sm:$0xff] %v16415_v20 }
 0x86b   :  { %8011 = vmatpush.msrb.mxu1 %v19602_v56  ;;  %8031 = vmatpush.msrb.mxu2 %v19603_v23  ;;  %v19628_v48 = vmax.f32 %v19627_v47, 0.0  ;;  %v19630_v56 = vmax.f32 %v19629_v13, 0.0 }
 0x86c   :  { %8051 = vmatpush.msrb.mxu3 %v19604_v61  ;;  %9883 = vmatmul.msk.f32.vlgmr.msra.gmra.mxu0 %vm6283_vm14, %v16092_v16  ;;  %v19631_v61 = vld [vmem:[#allocation44_spill] sm:$0xff] }
 0x86d   :  { %9884 = vmatmul.msk.f32.vlgmr.msra.gmra.mxu1 %vm6283_vm14, %v16092_v16  ;;  %9885 = vmatmul.msk.f32.vlgmr.msra.gmra.mxu2 %vm6283_vm14, %v16092_v16  ;;  %v16299_v19 = vpop.f32.mrf.mxu3 }
 0x86e   :  { %9886 = vmatmul.msk.f32.vlgmr.msra.gmra.mxu3 %vm6283_vm14, %v16092_v16  ;;  %8068 = vmatpush.msra.mxu0 %v19605_v59  ;;  %v19632_v59 = vmax.f32 %v19631_v61, 0.0  ;;  %v16404_v61 = vadd.f32 %v16203_v62, %v16110_v30 }
 0x86f   :  { %8088 = vmatpush.msra.mxu1 %v19606_v26  ;;  %8108 = vmatpush.msra.mxu2 %v19607_v6  ;;  %v19635_v26 = vld [vmem:[#allocation239_spill] sm:$0xff] }
 0x870   :  { %8128 = vmatpush.msra.mxu3 %v19608_v54  ;;  %8069 = vmatpush.msra.mxu0 %v15670_v39  ;;  %v19611_v39 = vld [vmem:[#allocation162_spill] sm:$0xff]  ;;  %v19636_v6 = vmax.f32 %v19635_v26, 0.0  ;;  %v19637_v54 = vld [vmem:[#allocation27_spill] sm:$0xff]  ;;  %19647 = vst [vmem:[#allocation241_spill] sm:$0xff] %v16404_v61 }
 0x871   :  { %8089 = vmatpush.msra.mxu1 %v19609_v37  ;;  %8109 = vmatpush.msra.mxu2 %v19610_v50  ;;  %v16320_v23 = vpop.f32.mrf.mxu1  ;;  %v19638_v37 = vmax.f32 %v19637_v54, 0.0 }
 0x872   :  { %8129 = vmatpush.msra.mxu3 %v19564_v63  ;;  %8070 = vmatpush.msra.mxu0 %v19565_v18  ;;  %v19612_v18 = vld [vmem:[#allocation29_spill] sm:$0xff]  ;;  %v8340_v63 = vadd.f32 %v8339_v41, %v16269_v7  ;;  %v16333_v41 = vadd.f32 %v16122_v27, %v16110_v30 }
 0x873   :  { %8090 = vmatpush.msra.mxu1 %v19566_v12  ;;  %8110 = vmatpush.msra.mxu2 %v19567_v4  ;;  %v16283_v12 = vadd.f32 %v16114_v0, %v16110_v30  ;;  %v19613_v4 = vld [vmem:[#allocation155_spill] sm:$0xff]  ;;  %v19618_v0 = vmax.f32 %v19617_v53, 0.0 }
 0x874   :  { %8130 = vmatpush.msra.mxu3 %v19568_v2  ;;  %8071 = vmatpush.msra.mxu0 %v19569_v1  ;;  %v19614_v1 = vmax.f32 %v19613_v4, 0.0  ;;  %v16293_v2 = vpop.f32.mrf.mxu2 }
 0x875   :  { %8091 = vmatpush.msra.mxu1 %v15726_v45  ;;  %8111 = vmatpush.msra.mxu2 %v19611_v39  ;;  %v19615_v45 = vld [vmem:[#allocation31_spill] sm:$0xff]  ;;  %v8341_v52 = vadd.f32 %v8340_v63, %v16283_v12  ;;  %v16314_v3 = vpop.f32.mrf.mxu0  ;;  %v19639_v39 = vld [vmem:[#allocation161_spill] sm:$0xff]  ;;  %v19641_v63 = vld [vmem:[#allocation164_spill] sm:$0xff] }
 0x876   :  { %8131 = vmatpush.msra.mxu3 %v19612_v18  ;;  %9887 = vmatmul.msk.f32.vlgmr.msrb.gmra.mxu0 %vm6283_vm14, %v16092_v16  ;;  %v19616_v49 = vmax.f32 %v19615_v45, 0.0  ;;  %v19640_v18 = vmax.f32 %v19639_v39, 0.0  ;;  %v19642_v4 = vmax.f32 %v19641_v63, 0.0 }
 0x877   :  { %9888 = vmatmul.msk.f32.vlgmr.msrb.gmra.mxu1 %vm6283_vm14, %v16092_v16  ;;  %9889 = vmatmul.msk.f32.vlgmr.msrb.gmra.mxu2 %vm6283_vm14, %v16092_v16  ;;  %v8342_v50 = vadd.f32 %v8341_v52, %v16308_v32  ;;  %v16366_v52 = vadd.f32 %v16165_v40, %v16110_v30 }
 0x878   :  { %9890 = vmatmul.msk.f32.vlgmr.msrb.gmra.mxu3 %vm6283_vm14, %v16092_v16  ;;  %8148 = vmatpush.msrb.mxu0 %v19614_v1  ;;  %v19643_v1 = vld [vmem:[#allocation106_spill] sm:$0xff] }
 0x879   :  { %8168 = vmatpush.msrb.mxu1 %v19616_v49  ;;  %8188 = vmatpush.msrb.mxu2 %v19618_v0  ;;  %v19644_v45 = vmax.f32 %v19643_v1, 0.0  ;;  %v19645_v49 = vmov 1   ;;  %v8343_v53 = vadd.f32 %v8342_v50, %v16333_v41  ;;  %v16355_v0 = vadd.f32 %v16124_v57, %v16110_v30 }
 0x87a   :  { %8208 = vmatpush.msrb.mxu3 %v19620_v25  ;;  %8149 = vmatpush.msrb.mxu0 %v19622_v44  ;;  %v16357_v9 = vpop.f32.mrf.mxu3  ;;  %v16429_v50 = vadd.f32 %v16222_v11, %v16110_v30  ;;  %v16445_v1 = vadd.f32 %v16254_v34, %v16110_v30 }
 0x87b   :  { %8169 = vmatpush.msrb.mxu1 %v19624_v35  ;;  %8189 = vmatpush.msrb.mxu2 %v19626_v46  ;;  %v8344_v44 = vadd.f32 %v8343_v53, %v16355_v0  ;;  %v16388_v46 = vadd.f32 %v16173_v24, %v16110_v30 }
 0x87c   :  { %8209 = vmatpush.msrb.mxu3 %v19628_v48  ;;  %8150 = vmatpush.msrb.mxu0 %v19630_v56  ;;  %v16349_v27 = vpop.f32.mrf.mxu2  ;;  %19650 = vst [vmem:[#allocation184_spill] sm:$0xff] %v16429_v50 }
 0x87d   :  { %8170 = vmatpush.msrb.mxu1 %v19632_v59  ;;  %8190 = vmatpush.msrb.mxu2 %v19634_v43  ;;  %v8345_v57 = vadd.f32 %v8344_v44, %v16366_v52  ;;  %19652 = vst [vmem:[#allocation51_spill] sm:$0xff] %v16445_v1 }
 0x87e   :  { %8210 = vmatpush.msrb.mxu3 %v19636_v6  ;;  %8151 = vmatpush.msrb.mxu0 %v19638_v37  ;;  %v16420_v6 = vadd.f32 %v16218_v36, %v16110_v30  ;;  %v16438_v36 = vadd.f32 %v16245_v58, %v16110_v30  ;;  %v16456_v58 = vadd.f32 %v16260_v8, %v16110_v30 }
 0x87f   :  { %8171 = vmatpush.msrb.mxu1 %v19640_v18  ;;  %8191 = vmatpush.msrb.mxu2 %v19642_v4  ;;  %v8346_v42 = vadd.f32 %v8345_v57, %v16379_v10  ;;  %v16461_v57 = vadd.f32 %v16264_v5, %v16110_v30  ;;  %v16479_v5 = vadd.f32 %v16299_v19, %v16110_v30 }
 0x880   :  { %8211 = vmatpush.msrb.mxu3 %v19644_v45  ;;  %9891 = vmatmul.msk.f32.vlgmr.msra.gmra.mxu0 %vm6283_vm14, %v16092_v16  ;;  %19649 = vst [vmem:[#allocation297_spill] sm:$0xff] %v16420_v6  ;;  %v16497_v19 = vadd.f32 %v16320_v23, %v16110_v30  ;;  %v16512_v23 = vadd.f32 %v16357_v9, %v16110_v30 }
 0x881   :  { %9892 = vmatmul.msk.f32.vlgmr.msra.gmra.mxu1 %vm6283_vm14, %v16092_v16  ;;  %9893 = vmatmul.msk.f32.vlgmr.msra.gmra.mxu2 %vm6283_vm14, %v16092_v16  ;;  %19651 = vst [vmem:[#allocation170_spill] sm:$0xff] %v16438_v36 }
 0x882   :  { %9894 = vmatmul.msk.f32.vlgmr.msra.gmra.mxu3 %vm6283_vm14, %v16092_v16  ;;  %9913 = vset.pattern.permute.xlu2 %v19645_v49  ;;  %19653 = vst [vmem:[#allocation12_spill] sm:$0xff] %v16456_v58 }
 0x883   :  { %19654 = vst [vmem:[#allocation190_spill] sm:$0xff] %v16461_v57 }
 0x884   :  { %19656 = vst [vmem:[#allocation57_spill] sm:$0xff] %v16479_v5 }
 0x885   :  { %v16359_v25 = vpop.f32.mrf.mxu0  ;;  %19658 = vst [vmem:[#allocation196_spill] sm:$0xff] %v16497_v19 }
 0x886   :  { %v16361_v51 = vpop.f32.mrf.mxu1 }
 0x888   :  { %9895 = vmatmul.msk.f32.vlgmr.msrb.gmra.mxu0 %vm6283_vm14, %v16092_v16 }
 0x889   :  { %9896 = vmatmul.msk.f32.vlgmr.msrb.gmra.mxu1 %vm6283_vm14, %v16092_v16  ;;  %9897 = vmatmul.msk.f32.vlgmr.msrb.gmra.mxu2 %vm6283_vm14, %v16092_v16 }
 0x88a   :  { %9898 = vmatmul.msk.f32.vlgmr.msrb.gmra.mxu3 %vm6283_vm14, %v16092_v16  ;;  %v8347_v16 = vadd.f32 %v8346_v42, %v16388_v46 }
 0x88c   :  { %v16381_v40 = vpop.f32.mrf.mxu2  ;;  %v8348_v56 = vadd.f32 %v8347_v16, %v16397_v60 }
 0x88d   :  { %v16383_v35 = vpop.f32.mrf.mxu3 }
 0x88e   :  { %v8349_v43 = vadd.f32 %v8348_v56, %v16404_v61  ;;  %v16470_v56 = vadd.f32 %v16293_v2, %v16110_v30 }
 0x88f   :  { %v16390_v47 = vpop.f32.mrf.mxu0 }
 0x890   :  { %v16392_v48 = vpop.f32.mrf.mxu1  ;;  %v8350_v26 = vadd.f32 %v8349_v43, %v16415_v20  ;;  %19655 = vst [vmem:[#allocation171_spill] sm:$0xff] %v16470_v56 }
 0x892   :  { %v8351_v37 = vadd.f32 %v8350_v26, %v16420_v6 }
 0x894   :  { %v8352_v18 = vadd.f32 %v8351_v37, %v16429_v50 }
 0x896   :  { %v16399_v13 = vpop.f32.mrf.mxu2  ;;  %v8353_v4 = vadd.f32 %v8352_v18, %v16438_v36 }
 0x897   :  { %v16406_v24 = vpop.f32.mrf.mxu3 }
 0x898   :  { %v8354_v53 = vadd.f32 %v8353_v4, %v16445_v1  ;;  %v16486_v4 = vadd.f32 %v16314_v3, %v16110_v30 }
 0x899   :  { %v16408_v59 = vpop.f32.mrf.mxu0 }
 0x89a   :  { %v16410_v38 = vpop.f32.mrf.mxu1  ;;  %v8355_v44 = vadd.f32 %v8354_v53, %v16456_v58  ;;  %19657 = vst [vmem:[#allocation108_spill] sm:$0xff] %v16486_v4 }
 0x89c   :  { %v8356_v16 = vadd.f32 %v8355_v44, %v16461_v57 }
 0x89e   :  { %v8357_v26 = vadd.f32 %v8356_v16, %v16470_v56 }
 0x8a0   :  { %v16422_v62 = vpop.f32.mrf.mxu2  ;;  %v8358_v18 = vadd.f32 %v8357_v26, %v16479_v5  ;;  %v16502_v26 = vadd.f32 %v16349_v27, %v16110_v30 }
 0x8a1   :  { %v16424_v54 = vpop.f32.mrf.mxu3 }
 0x8a2   :  { %v8359_v16 = vadd.f32 %v8358_v18, %v16486_v4  ;;  %19659 = vst [vmem:[#allocation242_spill] sm:$0xff] %v16502_v26 }
 0x8a3   :  { %v16431_v39 = vpop.f32.mrf.mxu0 }
 0x8a4   :  { %v16433_v22 = vpop.f32.mrf.mxu1  ;;  %v8360_v56 = vadd.f32 %v8359_v16, %v16497_v19 }
 0x8a6   :  { %v8361_v57 = vadd.f32 %v8360_v56, %v16502_v26 }
 0x8a8   :  { %v8362_v27 = vadd.f32 %v8361_v57, %v16512_v23 }
 0x8aa   :  { %v16440_v63 = vpop.f32.mrf.mxu2 }
 0x8ab   :  { %v16447_v11 = vpop.f32.mrf.mxu3 }
 0x8ad   :  { %v16449_v45 = vpop.f32.mrf.mxu0 }
 0x8ae   :  { %v16451_v49 = vpop.f32.mrf.mxu1 }
 0x8b4   :  { %v16463_v34 = vpop.f32.mrf.mxu2 }
 0x8b5   :  { %v16465_v42 = vpop.f32.mrf.mxu3 }
 0x8b7   :  { %v16472_v43 = vpop.f32.mrf.mxu0 }
 0x8b8   :  { %v16474_v8 = vpop.f32.mrf.mxu1 }
 0x8be   :  { %v16481_v37 = vpop.f32.mrf.mxu2 }
 0x8bf   :  { %v16488_v2 = vpop.f32.mrf.mxu3 }
 0x8c1   :  { %v16490_v53 = vpop.f32.mrf.mxu0 }
 0x8c2   :  { %v16492_v44 = vpop.f32.mrf.mxu1 }
 0x8c8   :  { %v16504_v3 = vpop.f32.mrf.mxu2 }
 0x8c9   :  { %v16506_v5 = vpop.f32.mrf.mxu3 }
 0x8cb   :  { %v7673_v58 = vpop.f32.mrf.mxu0 }
 0x8cc   :  { %v7674_v1 = vadd.f32 %v7673_v58, %v16359_v25  ;;  %v7693_v18 = vpop.f32.mrf.mxu1 }
 0x8cd   :  { %v7694_v19 = vadd.f32 %v7693_v18, %v16361_v51 }
 0x8ce   :  { %v16515_v16 = vadd.f32 %v7674_v1, %v16110_v30 }
 0x8cf   :  { %v16521_v56 = vadd.f32 %v7694_v19, %v16110_v30 }
 0x8d0   :  { %v8363_v4 = vadd.f32 %v8362_v27, %v16515_v16 }
 0x8d2   :  { %v7713_v36 = vpop.f32.mrf.mxu2  ;;  %v8364_v9 = vadd.f32 %v8363_v4, %v16521_v56 }
 0x8d3   :  { %v7714_v25 = vadd.f32 %v7713_v36, %v16381_v40  ;;  %v7733_v58 = vpop.f32.mrf.mxu3 }
 0x8d4   :  { %v7734_v26 = vadd.f32 %v7733_v58, %v16383_v35 }
 0x8d5   :  { %v16527_v1 = vadd.f32 %v7714_v25, %v16110_v30  ;;  %v7753_v50 = vpop.f32.mrf.mxu0 }
 0x8d6   :  { %v7754_v57 = vadd.f32 %v7753_v50, %v16390_v47  ;;  %v7773_v51 = vpop.f32.mrf.mxu1  ;;  %v16532_v27 = vadd.f32 %v7734_v26, %v16110_v30 }
 0x8d7   :  { %v8365_v18 = vadd.f32 %v8364_v9, %v16527_v1  ;;  %v7774_v19 = vadd.f32 %v7773_v51, %v16392_v48 }
 0x8d8   :  { %v16537_v35 = vadd.f32 %v7754_v57, %v16110_v30 }
 0x8d9   :  { %v8366_v40 = vadd.f32 %v8365_v18, %v16532_v27  ;;  %v16541_v4 = vadd.f32 %v7774_v19, %v16110_v30 }
 0x8db   :  { %v8367_v36 = vadd.f32 %v8366_v40, %v16537_v35 }
 0x8dc   :  { %v7793_v25 = vpop.f32.mrf.mxu2 }
 0x8dd   :  { %v8368_v47 = vadd.f32 %v8367_v36, %v16541_v4  ;;  %v7794_v50 = vadd.f32 %v7793_v25, %v16399_v13  ;;  %v7813_v58 = vpop.f32.mrf.mxu3 }
 0x8de   :  { %v7814_v26 = vadd.f32 %v7813_v58, %v16406_v24 }
 0x8df   :  { %v16547_v48 = vadd.f32 %v7794_v50, %v16110_v30  ;;  %v7833_v9 = vpop.f32.mrf.mxu0 }
 0x8e0   :  { %v7834_v57 = vadd.f32 %v7833_v9, %v16408_v59  ;;  %v7853_v51 = vpop.f32.mrf.mxu1  ;;  %v16552_v19 = vadd.f32 %v7814_v26, %v16110_v30 }
 0x8e1   :  { %v8369_v18 = vadd.f32 %v8368_v47, %v16547_v48  ;;  %v7854_v40 = vadd.f32 %v7853_v51, %v16410_v38 }
 0x8e2   :  { %v16557_v13 = vadd.f32 %v7834_v57, %v16110_v30 }
 0x8e3   :  { %v8370_v36 = vadd.f32 %v8369_v18, %v16552_v19  ;;  %v16561_v25 = vadd.f32 %v7854_v40, %v16110_v30 }
 0x8e5   :  { %v8371_v24 = vadd.f32 %v8370_v36, %v16557_v13 }
 0x8e6   :  { %v7873_v50 = vpop.f32.mrf.mxu2 }
 0x8e7   :  { %v8372_v59 = vadd.f32 %v8371_v24, %v16561_v25  ;;  %v7874_v47 = vadd.f32 %v7873_v50, %v16422_v62  ;;  %v7893_v58 = vpop.f32.mrf.mxu3 }
 0x8e8   :  { %v7894_v26 = vadd.f32 %v7893_v58, %v16424_v54 }
 0x8e9   :  { %v16567_v38 = vadd.f32 %v7874_v47, %v16110_v30  ;;  %v7913_v9 = vpop.f32.mrf.mxu0 }
 0x8ea   :  { %v7914_v57 = vadd.f32 %v7913_v9, %v16431_v39  ;;  %v7933_v51 = vpop.f32.mrf.mxu1  ;;  %v16572_v40 = vadd.f32 %v7894_v26, %v16110_v30 }
 0x8eb   :  { %v8373_v18 = vadd.f32 %v8372_v59, %v16567_v38  ;;  %v7934_v36 = vadd.f32 %v7933_v51, %v16433_v22 }
 0x8ec   :  { %v16577_v62 = vadd.f32 %v7914_v57, %v16110_v30 }
 0x8ed   :  { %v8374_v24 = vadd.f32 %v8373_v18, %v16572_v40  ;;  %v16581_v50 = vadd.f32 %v7934_v36, %v16110_v30 }
 0x8ef   :  { %v8375_v54 = vadd.f32 %v8374_v24, %v16577_v62 }
 0x8f0   :  { %v7953_v47 = vpop.f32.mrf.mxu2 }
 0x8f1   :  { %v8376_v39 = vadd.f32 %v8375_v54, %v16581_v50  ;;  %v7954_v59 = vadd.f32 %v7953_v47, %v16440_v63  ;;  %v7973_v58 = vpop.f32.mrf.mxu3 }
 0x8f2   :  { %v7974_v26 = vadd.f32 %v7973_v58, %v16447_v11 }
 0x8f3   :  { %v16587_v22 = vadd.f32 %v7954_v59, %v16110_v30  ;;  %v7993_v9 = vpop.f32.mrf.mxu0 }
 0x8f4   :  { %v7994_v57 = vadd.f32 %v7993_v9, %v16449_v45  ;;  %v8013_v51 = vpop.f32.mrf.mxu1  ;;  %v16592_v36 = vadd.f32 %v7974_v26, %v16110_v30 }
 0x8f5   :  { %v8377_v18 = vadd.f32 %v8376_v39, %v16587_v22  ;;  %v8014_v24 = vadd.f32 %v8013_v51, %v16451_v49 }
 0x8f6   :  { %v16597_v63 = vadd.f32 %v7994_v57, %v16110_v30 }
 0x8f7   :  { %v8378_v54 = vadd.f32 %v8377_v18, %v16592_v36  ;;  %v16601_v47 = vadd.f32 %v8014_v24, %v16110_v30 }
 0x8f9   :  { %v8379_v11 = vadd.f32 %v8378_v54, %v16597_v63 }
 0x8fa   :  { %v8033_v59 = vpop.f32.mrf.mxu2 }
 0x8fb   :  { %v8380_v45 = vadd.f32 %v8379_v11, %v16601_v47  ;;  %v8034_v39 = vadd.f32 %v8033_v59, %v16463_v34  ;;  %v8053_v58 = vpop.f32.mrf.mxu3 }
 0x8fc   :  { %v8054_v26 = vadd.f32 %v8053_v58, %v16465_v42 }
 0x8fd   :  { %v16607_v49 = vadd.f32 %v8034_v39, %v16110_v30  ;;  %v8073_v9 = vpop.f32.mrf.mxu0 }
 0x8fe   :  { %v8074_v57 = vadd.f32 %v8073_v9, %v16472_v43  ;;  %v8093_v51 = vpop.f32.mrf.mxu1  ;;  %v16612_v24 = vadd.f32 %v8054_v26, %v16110_v30 }
 0x8ff   :  { %v8381_v18 = vadd.f32 %v8380_v45, %v16607_v49  ;;  %v8094_v54 = vadd.f32 %v8093_v51, %v16474_v8 }
 0x900   :  { %v16617_v34 = vadd.f32 %v8074_v57, %v16110_v30 }
 0x901   :  { %v8382_v11 = vadd.f32 %v8381_v18, %v16612_v24  ;;  %v16621_v59 = vadd.f32 %v8094_v54, %v16110_v30 }
 0x903   :  { %v8383_v42 = vadd.f32 %v8382_v11, %v16617_v34 }
 0x904   :  { %v8113_v39 = vpop.f32.mrf.mxu2 }
 0x905   :  { %v8384_v43 = vadd.f32 %v8383_v42, %v16621_v59  ;;  %v8114_v45 = vadd.f32 %v8113_v39, %v16481_v37  ;;  %v8133_v58 = vpop.f32.mrf.mxu3  ;;  %v8153_v26 = vpop.f32.mrf.mxu0 }
 0x906   :  { %v8134_v9 = vadd.f32 %v8133_v58, %v16488_v2  ;;  %v8173_v8 = vpop.f32.mrf.mxu1  ;;  %v8154_v57 = vadd.f32 %v8153_v26, %v16490_v53 }
 0x907   :  { %v16627_v51 = vadd.f32 %v8114_v45, %v16110_v30  ;;  %v8174_v11 = vadd.f32 %v8173_v8, %v16492_v44 }
 0x908   :  { %v16632_v54 = vadd.f32 %v8134_v9, %v16110_v30  ;;  %v16637_v37 = vadd.f32 %v8154_v57, %v16110_v30 }
 0x909   :  { %v8385_v18 = vadd.f32 %v8384_v43, %v16627_v51  ;;  %v16641_v45 = vadd.f32 %v8174_v11, %v16110_v30 }
 0x90a   :  { %19660 = vst [vmem:[#allocation63_spill] sm:$0xff] %v16632_v54 }
 0x90b   :  { %v8386_v42 = vadd.f32 %v8385_v18, %v16632_v54  ;;  %19661 = vst [vmem:[#allocation146_spill] sm:$0xff] %v16637_v37 }
 0x90c   :  { %v8193_v39 = vpop.f32.mrf.mxu2  ;;  %19662 = vst [vmem:[#allocation203_spill] sm:$0xff] %v16641_v45 }
 0x90d   :  { %v8387_v2 = vadd.f32 %v8386_v42, %v16637_v37  ;;  %v8194_v53 = vadd.f32 %v8193_v39, %v16504_v3  ;;  %v8213_v58 = vpop.f32.mrf.mxu3 }
 0x90e   :  { %v8214_v43 = vadd.f32 %v8213_v58, %v16506_v5 }
 0x90f   :  { %v16646_v26 = vadd.f32 %v8194_v53, %v16110_v30  ;;  %v8388_v44 = vadd.f32 %v8387_v2, %v16641_v45 }
 0x910   :  { %v16650_v9 = vadd.f32 %v8214_v43, %v16110_v30 }
 0x911   :  { %19663 = vst [vmem:[#allocation175_spill] sm:$0xff] %v16646_v26  ;;  %v8389_v8 = vadd.f32 %v8388_v44, %v16646_v26 }
 0x913   :  { %v8390_v57 = vadd.f32 %v8389_v8, %v16650_v9 }
 0x915   :  { %8391 = vadd.xlane.f32.xlu1 %v8390_v57 }
 0x988   :  { %v8392_v18 = vpop.xlane.xlu1 %8391 }
 0x989   :  { %v16654_v11 = vmul.f32 0.00013020834, %v8392_v18 }
 0x98b   :  { %v8394_v3 = vsub.f32 %v16130_v14, %v16654_v11  ;;  %v8395_v5 = vsub.f32 %v16134_v28, %v16654_v11  ;;  %v8396_v42 = vsub.f32 %v16142_v17, %v16654_v11  ;;  %v8397_v2 = vsub.f32 %v16160_v15, %v16654_v11 }
 0x98c   :  { %v8398_v53 = vsub.f32 %v16181_v29, %v16654_v11  ;;  %v8399_v44 = vsub.f32 %v16197_v21, %v16654_v11  ;;  %v8400_v18 = vsub.f32 %v16215_v33, %v16654_v11  ;;  %v8402_v29 = vsub.f32 %v16250_v55, %v16654_v11 }
 0x98d   :  { %v8454_v39 = vmul.f32 %v8394_v3, %v8394_v3  ;;  %v8455_v30 = vmul.f32 %v8395_v5, %v8395_v5  ;;  %v8456_v58 = vmul.f32 %v8396_v42, %v8396_v42  ;;  %v8457_v8 = vmul.f32 %v8397_v2, %v8397_v2 }
 0x98e   :  { %v8458_v28 = vmul.f32 %v8398_v53, %v8398_v53  ;;  %v8401_v3 = vsub.f32 %v16231_v31, %v16654_v11  ;;  %v8459_v5 = vmul.f32 %v8399_v44, %v8399_v44  ;;  %v8460_v42 = vmul.f32 %v8400_v18, %v8400_v18 }
 0x98f   :  { %v8514_v43 = vadd.f32 %v8455_v30, %v8454_v39  ;;  %v8403_v30 = vsub.f32 %v16269_v7, %v16654_v11  ;;  %v8462_v53 = vmul.f32 %v8402_v29, %v8402_v29 }
 0x990   :  { %v8461_v2 = vmul.f32 %v8401_v3, %v8401_v3 }
 0x991   :  { %v8515_v57 = vadd.f32 %v8514_v43, %v8456_v58  ;;  %v8404_v43 = vsub.f32 %v16283_v12, %v16654_v11  ;;  %v8463_v44 = vmul.f32 %v8403_v30, %v8403_v30 }
 0x993   :  { %v8516_v17 = vadd.f32 %v8515_v57, %v8457_v8  ;;  %v8405_v57 = vsub.f32 %v16308_v32, %v16654_v11  ;;  %v8464_v18 = vmul.f32 %v8404_v43, %v8404_v43 }
 0x995   :  { %v8517_v15 = vadd.f32 %v8516_v17, %v8458_v28  ;;  %v8406_v17 = vsub.f32 %v16333_v41, %v16654_v11  ;;  %v8465_v3 = vmul.f32 %v8405_v57, %v8405_v57 }
 0x997   :  { %v8518_v39 = vadd.f32 %v8517_v15, %v8459_v5  ;;  %v8407_v5 = vsub.f32 %v16355_v0, %v16654_v11  ;;  %v8466_v29 = vmul.f32 %v8406_v17, %v8406_v17 }
 0x999   :  { %v8519_v58 = vadd.f32 %v8518_v39, %v8460_v42  ;;  %v8408_v39 = vsub.f32 %v16366_v52, %v16654_v11  ;;  %v8467_v30 = vmul.f32 %v8407_v5, %v8407_v5 }
 0x99b   :  { %v8520_v8 = vadd.f32 %v8519_v58, %v8461_v2  ;;  %v8409_v58 = vsub.f32 %v16379_v10, %v16654_v11  ;;  %v8468_v43 = vmul.f32 %v8408_v39, %v8408_v39 }
 0x99d   :  { %v8521_v28 = vadd.f32 %v8520_v8, %v8462_v53  ;;  %v8410_v8 = vsub.f32 %v16388_v46, %v16654_v11  ;;  %v8469_v57 = vmul.f32 %v8409_v58, %v8409_v58 }
 0x99f   :  { %v8522_v15 = vadd.f32 %v8521_v28, %v8463_v44  ;;  %v8411_v28 = vsub.f32 %v16397_v60, %v16654_v11  ;;  %v8470_v17 = vmul.f32 %v8410_v8, %v8410_v8 }
 0x9a1   :  { %v8523_v42 = vadd.f32 %v8522_v15, %v8464_v18  ;;  %v8412_v15 = vsub.f32 %v16404_v61, %v16654_v11  ;;  %v8471_v5 = vmul.f32 %v8411_v28, %v8411_v28 }
 0x9a3   :  { %v8524_v2 = vadd.f32 %v8523_v42, %v8465_v3  ;;  %v8413_v42 = vsub.f32 %v16415_v20, %v16654_v11  ;;  %v8472_v39 = vmul.f32 %v8412_v15, %v8412_v15 }
 0x9a5   :  { %v8525_v53 = vadd.f32 %v8524_v2, %v8466_v29  ;;  %v8414_v2 = vsub.f32 %v16420_v6, %v16654_v11  ;;  %v8473_v58 = vmul.f32 %v8413_v42, %v8413_v42 }
 0x9a7   :  { %v8526_v44 = vadd.f32 %v8525_v53, %v8467_v30  ;;  %v19664_v53 = vld [vmem:[#allocation184_spill] sm:$0xff]  ;;  %v8474_v8 = vmul.f32 %v8414_v2, %v8414_v2 }
 0x9a8   :  { %v8415_v60 = vsub.f32 %v19664_v53, %v16654_v11 }
 0x9a9   :  { %v8527_v18 = vadd.f32 %v8526_v44, %v8468_v43  ;;  %v19665_v44 = vld [vmem:[#allocation170_spill] sm:$0xff] }
 0x9aa   :  { %v8416_v61 = vsub.f32 %v19665_v44, %v16654_v11  ;;  %v8475_v28 = vmul.f32 %v8415_v60, %v8415_v60 }
 0x9ab   :  { %v8528_v3 = vadd.f32 %v8527_v18, %v8469_v57  ;;  %v19666_v18 = vld [vmem:[#allocation51_spill] sm:$0xff] }
 0x9ac   :  { %v8417_v20 = vsub.f32 %v19666_v18, %v16654_v11  ;;  %v8476_v15 = vmul.f32 %v8416_v61, %v8416_v61 }
 0x9ad   :  { %v8529_v29 = vadd.f32 %v8528_v3, %v8470_v17  ;;  %v19667_v3 = vld [vmem:[#allocation12_spill] sm:$0xff] }
 0x9ae   :  { %v8418_v6 = vsub.f32 %v19667_v3, %v16654_v11  ;;  %v8477_v42 = vmul.f32 %v8417_v20, %v8417_v20 }
 0x9af   :  { %v8530_v30 = vadd.f32 %v8529_v29, %v8471_v5  ;;  %v19668_v29 = vld [vmem:[#allocation190_spill] sm:$0xff] }
 0x9b0   :  { %v8419_v53 = vsub.f32 %v19668_v29, %v16654_v11  ;;  %v8478_v2 = vmul.f32 %v8418_v6, %v8418_v6 }
 0x9b1   :  { %v8531_v43 = vadd.f32 %v8530_v30, %v8472_v39  ;;  %v19669_v30 = vld [vmem:[#allocation171_spill] sm:$0xff] }
 0x9b2   :  { %v8420_v44 = vsub.f32 %v19669_v30, %v16654_v11  ;;  %v8479_v60 = vmul.f32 %v8419_v53, %v8419_v53 }
 0x9b3   :  { %v8532_v57 = vadd.f32 %v8531_v43, %v8473_v58  ;;  %v19670_v43 = vld [vmem:[#allocation57_spill] sm:$0xff] }
 0x9b4   :  { %v8421_v18 = vsub.f32 %v19670_v43, %v16654_v11  ;;  %v8480_v61 = vmul.f32 %v8420_v44, %v8420_v44 }
 0x9b5   :  { %v8533_v17 = vadd.f32 %v8532_v57, %v8474_v8  ;;  %v19671_v57 = vld [vmem:[#allocation108_spill] sm:$0xff] }
 0x9b6   :  { %v8422_v3 = vsub.f32 %v19671_v57, %v16654_v11  ;;  %v8481_v20 = vmul.f32 %v8421_v18, %v8421_v18 }
 0x9b7   :  { %v8534_v5 = vadd.f32 %v8533_v17, %v8475_v28  ;;  %v19672_v17 = vld [vmem:[#allocation196_spill] sm:$0xff] }
 0x9b8   :  { %v8423_v29 = vsub.f32 %v19672_v17, %v16654_v11  ;;  %v8482_v6 = vmul.f32 %v8422_v3, %v8422_v3 }
 0x9b9   :  { %v8535_v39 = vadd.f32 %v8534_v5, %v8476_v15  ;;  %v19673_v5 = vld [vmem:[#allocation242_spill] sm:$0xff] }
 0x9ba   :  { %v8424_v30 = vsub.f32 %v19673_v5, %v16654_v11  ;;  %v8483_v53 = vmul.f32 %v8423_v29, %v8423_v29 }
 0x9bb   :  { %v8536_v58 = vadd.f32 %v8535_v39, %v8477_v42  ;;  %v8425_v39 = vsub.f32 %v16512_v23, %v16654_v11 }
 0x9bc   :  { %v8484_v44 = vmul.f32 %v8424_v30, %v8424_v30 }
 0x9bd   :  { %v8537_v8 = vadd.f32 %v8536_v58, %v8478_v2  ;;  %v8426_v58 = vsub.f32 %v16515_v16, %v16654_v11  ;;  %v8485_v18 = vmul.f32 %v8425_v39, %v8425_v39 }
 0x9bf   :  { %v8538_v28 = vadd.f32 %v8537_v8, %v8479_v60  ;;  %v8427_v8 = vsub.f32 %v16521_v56, %v16654_v11  ;;  %v8486_v3 = vmul.f32 %v8426_v58, %v8426_v58 }
 0x9c1   :  { %v8539_v15 = vadd.f32 %v8538_v28, %v8480_v61  ;;  %v8428_v28 = vsub.f32 %v16527_v1, %v16654_v11  ;;  %v8487_v29 = vmul.f32 %v8427_v8, %v8427_v8 }
 0x9c3   :  { %v8540_v42 = vadd.f32 %v8539_v15, %v8481_v20  ;;  %v8429_v15 = vsub.f32 %v16532_v27, %v16654_v11  ;;  %v8488_v30 = vmul.f32 %v8428_v28, %v8428_v28 }
 0x9c5   :  { %v8541_v2 = vadd.f32 %v8540_v42, %v8482_v6  ;;  %v8430_v42 = vsub.f32 %v16537_v35, %v16654_v11  ;;  %v8489_v39 = vmul.f32 %v8429_v15, %v8429_v15 }
 0x9c7   :  { %v8542_v60 = vadd.f32 %v8541_v2, %v8483_v53  ;;  %v8431_v2 = vsub.f32 %v16541_v4, %v16654_v11  ;;  %v8490_v58 = vmul.f32 %v8430_v42, %v8430_v42 }
 0x9c9   :  { %v8543_v61 = vadd.f32 %v8542_v60, %v8484_v44  ;;  %v8432_v60 = vsub.f32 %v16547_v48, %v16654_v11  ;;  %v8491_v8 = vmul.f32 %v8431_v2, %v8431_v2 }
 0x9cb   :  { %v8544_v20 = vadd.f32 %v8543_v61, %v8485_v18  ;;  %v8433_v61 = vsub.f32 %v16552_v19, %v16654_v11  ;;  %v8492_v28 = vmul.f32 %v8432_v60, %v8432_v60 }
 0x9cd   :  { %v8545_v6 = vadd.f32 %v8544_v20, %v8486_v3  ;;  %v8434_v20 = vsub.f32 %v16557_v13, %v16654_v11  ;;  %v8493_v15 = vmul.f32 %v8433_v61, %v8433_v61 }
 0x9cf   :  { %v8546_v53 = vadd.f32 %v8545_v6, %v8487_v29  ;;  %v8435_v6 = vsub.f32 %v16561_v25, %v16654_v11  ;;  %v8494_v42 = vmul.f32 %v8434_v20, %v8434_v20 }
 0x9d1   :  { %v8547_v44 = vadd.f32 %v8546_v53, %v8488_v30  ;;  %v8436_v53 = vsub.f32 %v16567_v38, %v16654_v11  ;;  %v8495_v2 = vmul.f32 %v8435_v6, %v8435_v6 }
 0x9d3   :  { %v8548_v18 = vadd.f32 %v8547_v44, %v8489_v39  ;;  %v8437_v44 = vsub.f32 %v16572_v40, %v16654_v11  ;;  %v8496_v60 = vmul.f32 %v8436_v53, %v8436_v53 }
 0x9d5   :  { %v8549_v3 = vadd.f32 %v8548_v18, %v8490_v58  ;;  %v8438_v18 = vsub.f32 %v16577_v62, %v16654_v11  ;;  %v8497_v61 = vmul.f32 %v8437_v44, %v8437_v44 }
 0x9d7   :  { %v8550_v29 = vadd.f32 %v8549_v3, %v8491_v8  ;;  %v8439_v3 = vsub.f32 %v16581_v50, %v16654_v11  ;;  %v8498_v20 = vmul.f32 %v8438_v18, %v8438_v18 }
 0x9d9   :  { %v8551_v30 = vadd.f32 %v8550_v29, %v8492_v28  ;;  %v8440_v29 = vsub.f32 %v16587_v22, %v16654_v11  ;;  %v8499_v6 = vmul.f32 %v8439_v3, %v8439_v3 }
 0x9db   :  { %v8552_v39 = vadd.f32 %v8551_v30, %v8493_v15  ;;  %v8441_v30 = vsub.f32 %v16592_v36, %v16654_v11  ;;  %v8500_v53 = vmul.f32 %v8440_v29, %v8440_v29 }
 0x9dd   :  { %v8553_v58 = vadd.f32 %v8552_v39, %v8494_v42  ;;  %v8442_v39 = vsub.f32 %v16597_v63, %v16654_v11  ;;  %v8501_v44 = vmul.f32 %v8441_v30, %v8441_v30 }
 0x9df   :  { %v8554_v8 = vadd.f32 %v8553_v58, %v8495_v2  ;;  %v8443_v58 = vsub.f32 %v16601_v47, %v16654_v11  ;;  %v8502_v18 = vmul.f32 %v8442_v39, %v8442_v39 }
 0x9e1   :  { %v8555_v28 = vadd.f32 %v8554_v8, %v8496_v60  ;;  %v8444_v8 = vsub.f32 %v16607_v49, %v16654_v11  ;;  %v8503_v3 = vmul.f32 %v8443_v58, %v8443_v58 }
 0x9e3   :  { %v8556_v15 = vadd.f32 %v8555_v28, %v8497_v61  ;;  %v8445_v28 = vsub.f32 %v16612_v24, %v16654_v11  ;;  %v8504_v29 = vmul.f32 %v8444_v8, %v8444_v8 }
 0x9e5   :  { %v8557_v42 = vadd.f32 %v8556_v15, %v8498_v20  ;;  %v8446_v15 = vsub.f32 %v16617_v34, %v16654_v11  ;;  %v8505_v30 = vmul.f32 %v8445_v28, %v8445_v28 }
 0x9e7   :  { %v8558_v2 = vadd.f32 %v8557_v42, %v8499_v6  ;;  %v8447_v42 = vsub.f32 %v16621_v59, %v16654_v11  ;;  %v8506_v39 = vmul.f32 %v8446_v15, %v8446_v15 }
 0x9e9   :  { %v8559_v60 = vadd.f32 %v8558_v2, %v8500_v53  ;;  %v8448_v2 = vsub.f32 %v16627_v51, %v16654_v11  ;;  %v8507_v58 = vmul.f32 %v8447_v42, %v8447_v42 }
 0x9eb   :  { %v8560_v61 = vadd.f32 %v8559_v60, %v8501_v44  ;;  %v8449_v60 = vsub.f32 %v16632_v54, %v16654_v11  ;;  %v8508_v8 = vmul.f32 %v8448_v2, %v8448_v2 }
 0x9ed   :  { %v8561_v20 = vadd.f32 %v8560_v61, %v8502_v18  ;;  %v8450_v61 = vsub.f32 %v16637_v37, %v16654_v11  ;;  %v8509_v28 = vmul.f32 %v8449_v60, %v8449_v60 }
 0x9ef   :  { %v8562_v6 = vadd.f32 %v8561_v20, %v8503_v3  ;;  %v8451_v20 = vsub.f32 %v16641_v45, %v16654_v11  ;;  %v8510_v15 = vmul.f32 %v8450_v61, %v8450_v61 }
 0x9f1   :  { %v8563_v53 = vadd.f32 %v8562_v6, %v8504_v29  ;;  %v8452_v6 = vsub.f32 %v16646_v26, %v16654_v11  ;;  %v8511_v42 = vmul.f32 %v8451_v20, %v8451_v20 }
 0x9f3   :  { %v8564_v44 = vadd.f32 %v8563_v53, %v8505_v30  ;;  %v8453_v53 = vsub.f32 %v16650_v9, %v16654_v11 }
 0x9f5   :  { %v8565_v18 = vadd.f32 %v8564_v44, %v8506_v39  ;;  %v8512_v44 = vmul.f32 %v8452_v6, %v8452_v6  ;;  %v8513_v37 = vmul.f32 %v8453_v53, %v8453_v53 }
 0x9f7   :  { %v8566_v3 = vadd.f32 %v8565_v18, %v8507_v58 }
 0x9f9   :  { %v8567_v29 = vadd.f32 %v8566_v3, %v8508_v8 }
 0x9fb   :  { %v8568_v30 = vadd.f32 %v8567_v29, %v8509_v28 }
 0x9fd   :  { %v8569_v39 = vadd.f32 %v8568_v30, %v8510_v15 }
 0x9ff   :  { %v8570_v54 = vadd.f32 %v8569_v39, %v8511_v42  ;;  %v19675_v42 = vld [vmem:[#allocation38_spill] sm:$0xff] }
 0xa01   :  { %v8571_v2 = vadd.f32 %v8570_v54, %v8512_v44  ;;  %v10049_v54 = vld [vmem:[%s17462_s4] sm:$0xff]  ;;  %v19676_v44 = vld [vmem:[#allocation240_spill] sm:$0xff] }
 0xa03   :  { %v8572_v58 = vadd.f32 %v8571_v2, %v8513_v37 }
 0xa05   :  { %8573 = vadd.xlane.f32.xlu0 %v8572_v58 }
 0xa78   :  { %v8574_v18 = vpop.xlane.xlu0 %8573 }
 0xa79   :  { %v8575_v45 = vmul.f32 0.00013020834, %v8574_v18  ;;  %v19678_v18 = vld [vmem:[#allocation107_spill] sm:$0xff] }
 0xa7b   :  { %v8577_v60 = vadd.f32 1e-05, %v8575_v45  ;;  %v19674_v45 = vmov 2  }
 0xa7d   :  { %9923 = vrsqrt.f32 %v8577_v60  ;;  %vm8584_vm1 = vweird.f32 %v8577_v60 }
 0xa83   :  { %v9924_v8 = vpop.eup %9923 }
 0xa84   :  { %v8579_v3 = vmul.f32 %v9924_v8, %v8577_v60  ;;  %vm8585_vm15 = vweird.f32 %v9924_v8 }
 0xa85   :  { %vm8586_vm2 = vmor %vm8584_vm1, %vm8585_vm15 }
 0xa86   :  { %v8580_v26 = vmul.f32 %v9924_v8, %v8579_v3 }
 0xa88   :  { %v8581_v61 = vmul.f32 0.5, %v8580_v26 }
 0xa8a   :  { %v8582_v28 = vsub.f32 1.5, %v8581_v61 }
 0xa8c   :  { %v8583_v29 = vmul.f32 %v9924_v8, %v8582_v28 }
 0xa8e   :  { %v8587_v20 = vsel %vm8586_vm2, %v9924_v8, %v8583_v29 }
 0xa8f   :  { %v8588_v37 = vmul.f32 %v10049_v54, %v8587_v20 }
 0xa91   :  { %v8589_v6 = vmul.f32 %v8588_v37, %v16654_v11  ;;  %v19677_v11 = vld [vmem:[#allocation172_spill] sm:$0xff] }
 0xa93   :  { %8591 = vrot.lane.b32.xlu2 %v8589_v6, %s10054_s10  ;;  %v19682_v6 = vld [vmem:[#allocation297_spill] sm:$0xff] }
 0xa9b   :  { %8597 = vperm.xlu2 %9913, %v8588_v37  }
 0xaa3   :  { %9914 = vset.pattern.permute.xlu2 %v19674_v45  ;;  %v19683_v45 = vld [vmem:[#allocation184_spill] sm:$0xff] }
 0xaed   :  { %v8592_v15 = vpop.permute.xlu2 %8591 }
 0xaee   :  { %v8594_v26 = vsub.f32 %v10049_v54, %v8592_v15  ;;  %v19684_v15 = vld [vmem:[#allocation170_spill] sm:$0xff] }
 0xaf0   :  { %8662 = vperm.xlu2 %9914, %v8594_v26  }
 0xaf5   :  { %v16782_v30 = vpop.permute.xlu2 %8597 }
 0xaf6   :  { %v8600_v53 = vmul.f32 %v16782_v30, %v16130_v14  ;;  %v8601_v39 = vmul.f32 %v16782_v30, %v19675_v42  ;;  %v8602_v2 = vmul.f32 %v16782_v30, %v19676_v44  ;;  %v8603_v58 = vmul.f32 %v16782_v30, %v19677_v11  ;;  %v19685_v42 = vld [vmem:[#allocation51_spill] sm:$0xff]  ;;  %v19686_v11 = vld [vmem:[#allocation12_spill] sm:$0xff] }
 0xaf7   :  { %v8604_v60 = vmul.f32 %v16782_v30, %v19678_v18  ;;  %v8605_v8 = vmul.f32 %v16782_v30, %v16197_v21  ;;  %v8606_v3 = vmul.f32 %v16782_v30, %v16215_v33  ;;  %v8607_v14 = vmul.f32 %v16782_v30, %v16231_v31 }
 0xaf8   :  { %v8608_v61 = vmul.f32 %v16782_v30, %v16250_v55  ;;  %v8609_v28 = vmul.f32 %v16782_v30, %v16269_v7  ;;  %v8610_v29 = vmul.f32 %v16782_v30, %v16283_v12  ;;  %v8611_v20 = vmul.f32 %v16782_v30, %v16308_v32  ;;  %v19679_v32 = vld [vmem:[#allocation178_spill] sm:$0xff] }
 0xaf9   :  { %v16810_v21 = vmul.f32 %v16782_v30, %v16333_v41  ;;  %v16814_v33 = vmul.f32 %v16782_v30, %v16355_v0  ;;  %v16818_v31 = vmul.f32 %v16782_v30, %v16366_v52  ;;  %v16824_v7 = vmul.f32 %v16782_v30, %v16379_v10  ;;  %v19680_v0 = vld [vmem:[#allocation241_spill] sm:$0xff] }
 0xafa   :  { %v16828_v12 = vmul.f32 %v16782_v30, %v16388_v46  ;;  %v16832_v41 = vmul.f32 %v16782_v30, %v19679_v32  ;;  %v16836_v54 = vmul.f32 %v16782_v30, %v19680_v0  ;;  %v19681_v52 = vld [vmem:[#allocation45_spill] sm:$0xff]  ;;  %v16844_v10 = vmul.f32 %v16782_v30, %v19682_v6  ;;  %v19687_v32 = vld [vmem:[#allocation190_spill] sm:$0xff]  ;;  %v19688_v6 = vld [vmem:[#allocation171_spill] sm:$0xff] }
 0xafb   :  { %v16840_v37 = vmul.f32 %v16782_v30, %v19681_v52  ;;  %v16848_v46 = vmul.f32 %v16782_v30, %v19683_v45  ;;  %v16852_v26 = vmul.f32 %v16782_v30, %v19684_v15  ;;  %v16856_v44 = vmul.f32 %v16782_v30, %v19685_v42 }
 0xafc   :  { %v16860_v18 = vmul.f32 %v16782_v30, %v19686_v11  ;;  %v16864_v0 = vmul.f32 %v16782_v30, %v19687_v32  ;;  %v16869_v45 = vmul.f32 %v16782_v30, %v19688_v6  ;;  %v16873_v15 = vmul.f32 %v16782_v30, %v19670_v43 }
 0xafd   :  { %v16877_v42 = vmul.f32 %v16782_v30, %v19671_v57  ;;  %v16882_v32 = vmul.f32 %v16782_v30, %v19672_v17  ;;  %v16890_v6 = vmul.f32 %v16782_v30, %v16512_v23  ;;  %v16895_v57 = vmul.f32 %v16782_v30, %v16515_v16 }
 0xafe   :  { %v16903_v17 = vmul.f32 %v16782_v30, %v16527_v1  ;;  %v16908_v23 = vmul.f32 %v16782_v30, %v16532_v27  ;;  %v16921_v1 = vmul.f32 %v16782_v30, %v16547_v48  ;;  %v16926_v27 = vmul.f32 %v16782_v30, %v16552_v19 }
 0xaff   :  { %v16939_v48 = vmul.f32 %v16782_v30, %v16567_v38  ;;  %v16944_v19 = vmul.f32 %v16782_v30, %v16572_v40  ;;  %v16957_v38 = vmul.f32 %v16782_v30, %v16587_v22  ;;  %v16975_v22 = vmul.f32 %v16782_v30, %v16601_v47 }
 0xb4a   :  { %v16820_v55 = vpop.permute.xlu2 %8662 }
 0xb4b   :  { %v8665_v52 = vadd.f32 %v16820_v55, %v8600_v53  ;;  %v8666_v11 = vadd.f32 %v16820_v55, %v8601_v39  ;;  %v16886_v53 = vmul.f32 %v16782_v30, %v19673_v5  ;;  %v8667_v43 = vadd.f32 %v16820_v55, %v8602_v2 }
 0xb4c   :  { %v16899_v39 = vmul.f32 %v16782_v30, %v16521_v56  ;;  %v8668_v5 = vadd.f32 %v16820_v55, %v8603_v58  ;;  %v16912_v2 = vmul.f32 %v16782_v30, %v16537_v35  ;;  %v8669_v16 = vadd.f32 %v16820_v55, %v8604_v60 }
 0xb4d   :  { %9925 = vtanh.f32 %v8665_v52  ;;  %v16917_v56 = vmul.f32 %v16782_v30, %v16541_v4  ;;  %v8670_v58 = vadd.f32 %v16820_v55, %v8605_v8  ;;  %v16930_v35 = vmul.f32 %v16782_v30, %v16557_v13 }
 0xb4e   :  { %9927 = vtanh.f32 %v8666_v11  ;;  %v8671_v60 = vadd.f32 %v16820_v55, %v8606_v3  ;;  %v16935_v4 = vmul.f32 %v16782_v30, %v16561_v25  ;;  %v8672_v8 = vadd.f32 %v16820_v55, %v8607_v14 }
 0xb4f   :  { %9929 = vtanh.f32 %v8667_v43  ;;  %v16948_v13 = vmul.f32 %v16782_v30, %v16577_v62  ;;  %v8673_v3 = vadd.f32 %v16820_v55, %v8608_v61  ;;  %v16953_v25 = vmul.f32 %v16782_v30, %v16581_v50 }
 0xb50   :  { %9931 = vtanh.f32 %v8668_v5  ;;  %v8674_v14 = vadd.f32 %v16820_v55, %v8609_v28  ;;  %v16964_v62 = vmul.f32 %v16782_v30, %v16592_v36  ;;  %v16968_v61 = vmul.f32 %v16782_v30, %v16597_v63  ;;  %v19689_v5 = vld [vmem:[#allocation63_spill] sm:$0xff] }
 0xb51   :  { %9933 = vtanh.f32 %v8669_v16  ;;  %v8675_v50 = vadd.f32 %v16820_v55, %v8610_v29  ;;  %v16979_v28 = vmul.f32 %v16782_v30, %v16607_v49  ;;  %v8676_v36 = vadd.f32 %v16820_v55, %v8611_v20  ;;  %v19690_v16 = vld [vmem:[#allocation146_spill] sm:$0xff] }
 0xb52   :  { %9935 = vtanh.f32 %v8670_v58  ;;  %v16986_v63 = vmul.f32 %v16782_v30, %v16612_v24  ;;  %v16990_v29 = vmul.f32 %v16782_v30, %v16617_v34  ;;  %v8677_v47 = vadd.f32 %v16820_v55, %v16810_v21 }
 0xb53   :  { %v16960_v40 = vpop.eup %9925  ;;  %9937 = vtanh.f32 %v8671_v60  ;;  %v16998_v49 = vmul.f32 %v16782_v30, %v16621_v59  ;;  %v17002_v20 = vmul.f32 %v16782_v30, %v16627_v51  ;;  %v8678_v24 = vadd.f32 %v16820_v55, %v16814_v33  ;;  %v19691_v60 = vld [vmem:[#allocation203_spill] sm:$0xff] }
 0xb54   :  { %v16971_v52 = vpop.eup %9927  ;;  %9939 = vtanh.f32 %v8672_v8  ;;  %v17010_v21 = vmul.f32 %v16782_v30, %v19689_v5  ;;  %v17014_v58 = vmul.f32 %v16782_v30, %v19690_v16  ;;  %v8679_v59 = vadd.f32 %v16820_v55, %v16818_v31  ;;  %v19692_v8 = vld [vmem:[#allocation175_spill] sm:$0xff] }
 0xb55   :  { %v16982_v11 = vpop.eup %9929  ;;  %9941 = vtanh.f32 %v8673_v3  ;;  %v17022_v33 = vmul.f32 %v16782_v30, %v19691_v60  ;;  %v17026_v3 = vmul.f32 %v16782_v30, %v19692_v8  ;;  %v17034_v31 = vmul.f32 %v16782_v30, %v16650_v9 }
 0xb56   :  { %v16994_v43 = vpop.eup %9931  ;;  %9943 = vtanh.f32 %v8674_v14  ;;  %v8680_v14 = vadd.f32 %v16820_v55, %v16824_v7  ;;  %v8682_v16 = vadd.f32 %v16820_v55, %v16832_v41  ;;  %v8683_v8 = vadd.f32 %v16820_v55, %v16836_v54 }
 0xb57   :  { %v17006_v34 = vpop.eup %9933  ;;  %9945 = vtanh.f32 %v8675_v50  ;;  %v8681_v50 = vadd.f32 %v16820_v55, %v16828_v12  ;;  %v8684_v7 = vadd.f32 %v16820_v55, %v16840_v37  ;;  %v8686_v30 = vadd.f32 %v16820_v55, %v16848_v46 }
 0xb58   :  { %v17018_v51 = vpop.eup %9935  ;;  %9947 = vtanh.f32 %v8676_v36  ;;  %v8685_v36 = vadd.f32 %v16820_v55, %v16844_v10  ;;  %v8687_v12 = vadd.f32 %v16820_v55, %v16852_v26  ;;  %v8688_v41 = vadd.f32 %v16820_v55, %v16856_v44 }
 0xb59   :  { %v17030_v5 = vpop.eup %9937  ;;  %9949 = vtanh.f32 %v8677_v47  ;;  %v8689_v37 = vadd.f32 %v16820_v55, %v16860_v18  ;;  %v8690_v10 = vadd.f32 %v16820_v55, %v16864_v0  ;;  %v8691_v47 = vadd.f32 %v16820_v55, %v16869_v45 }
 0xb5a   :  { %v17040_v60 = vpop.eup %9939  ;;  %9951 = vtanh.f32 %v8678_v24  ;;  %v8692_v26 = vadd.f32 %v16820_v55, %v16873_v15  ;;  %v8693_v44 = vadd.f32 %v16820_v55, %v16877_v42  ;;  %v8694_v24 = vadd.f32 %v16820_v55, %v16882_v32 }
 0xb5b   :  { %v17048_v9 = vpop.eup %9941  ;;  %9953 = vtanh.f32 %v8679_v59  ;;  %v17076_v0 = vadd.f32 %v16820_v55, %v16886_v53  ;;  %v17080_v45 = vadd.f32 %v16820_v55, %v16890_v6  ;;  %v17084_v15 = vadd.f32 %v16820_v55, %v16895_v57 }
 0xb5c   :  { %v17056_v54 = vpop.eup %9943  ;;  %9955 = vtanh.f32 %v8680_v14  ;;  %v17090_v32 = vadd.f32 %v16820_v55, %v16899_v39  ;;  %v17094_v59 = vadd.f32 %v16820_v55, %v16903_v17  ;;  %v17098_v53 = vadd.f32 %v16820_v55, %v16908_v23 }
 0xb5d   :  { %v17064_v46 = vpop.eup %9945  ;;  %9957 = vtanh.f32 %v8681_v50  ;;  %v17104_v57 = vadd.f32 %v16820_v55, %v16912_v2  ;;  %v17108_v14 = vadd.f32 %v16820_v55, %v16917_v56  ;;  %v17112_v39 = vadd.f32 %v16820_v55, %v16921_v1 }
 0xb5e   :  { %v17072_v18 = vpop.eup %9947  ;;  %9959 = vtanh.f32 %v8682_v16  ;;  %v17118_v23 = vadd.f32 %v16820_v55, %v16926_v27  ;;  %v17122_v50 = vadd.f32 %v16820_v55, %v16930_v35  ;;  %v17126_v2 = vadd.f32 %v16820_v55, %v16935_v4 }
 0xb5f   :  { %v17086_v42 = vpop.eup %9949  ;;  %9961 = vtanh.f32 %v8683_v8  ;;  %v17132_v1 = vadd.f32 %v16820_v55, %v16939_v48  ;;  %v17136_v16 = vadd.f32 %v16820_v55, %v16944_v19  ;;  %v17140_v27 = vadd.f32 %v16820_v55, %v16948_v13 }
 0xb60   :  { %v17100_v6 = vpop.eup %9951  ;;  %9963 = vtanh.f32 %v8684_v7  ;;  %v17146_v4 = vadd.f32 %v16820_v55, %v16953_v25  ;;  %v17150_v8 = vadd.f32 %v16820_v55, %v16957_v38  ;;  %v17154_v48 = vadd.f32 %v16820_v55, %v16964_v62 }
 0xb61   :  { %v17114_v17 = vpop.eup %9953  ;;  %9965 = vtanh.f32 %v8685_v36  ;;  %v17160_v13 = vadd.f32 %v16820_v55, %v16968_v61  ;;  %v17164_v7 = vadd.f32 %v16820_v55, %v16975_v22  ;;  %v17168_v25 = vadd.f32 %v16820_v55, %v16979_v28 }
 0xb62   :  { %v17128_v56 = vpop.eup %9955  ;;  %9967 = vtanh.f32 %v8686_v30  ;;  %v17174_v62 = vadd.f32 %v16820_v55, %v16986_v63  ;;  %v17178_v36 = vadd.f32 %v16820_v55, %v16990_v29  ;;  %v17182_v61 = vadd.f32 %v16820_v55, %v16998_v49 }
 0xb63   :  { %v17142_v35 = vpop.eup %9957  ;;  %9969 = vtanh.f32 %v8687_v12  ;;  %v17188_v28 = vadd.f32 %v16820_v55, %v17002_v20  ;;  %v17192_v30 = vadd.f32 %v16820_v55, %v17010_v21  ;;  %v17196_v63 = vadd.f32 %v16820_v55, %v17014_v58 }
 0xb64   :  { %v17156_v19 = vpop.eup %9959  ;;  %9971 = vtanh.f32 %v8688_v41  ;;  %v17202_v49 = vadd.f32 %v16820_v55, %v17022_v33  ;;  %v17206_v12 = vadd.f32 %v16820_v55, %v17026_v3  ;;  %v17210_v20 = vadd.f32 %v16820_v55, %v17034_v31 }
 0xb65   :  { %v17170_v38 = vpop.eup %9961  ;;  %9973 = vtanh.f32 %v8689_v37  ;;  %v8849_v58 = vrot.slane %v16960_v40, 4  ;;  %v8850_v41 = vrot.slane %v16971_v52, 4  ;;  %v8851_v37 = vrot.slane %v16982_v11, 4 }
 0xb66   :  { %v17184_v22 = vpop.eup %9963  ;;  %9975 = vtanh.f32 %v8690_v10  ;;  %19695 = vst [vmem:[#allocation276_spill] sm:$0xff] %v17210_v20  ;;  %v8852_v3 = vrot.slane %v16994_v43, 4  ;;  %v8897_v10 = vrot.slane %v17006_v34, 4  ;;  %v8898_v55 = vrot.slane %v17018_v51, 4 }
 0xb67   :  { %19693 = vst [vmem:[#allocation70_spill] sm:$0xff] %v17184_v22  ;;  %v17198_v29 = vpop.eup %9965  ;;  %9977 = vtanh.f32 %v8691_v47  ;;  %v8853_v47 = vadd.f32 %v16960_v40, %v8849_v58  ;;  %v8900_v22 = vrot.slane %v17040_v60, 4 }
 0xb68   :  { %19694 = vst [vmem:[#allocation15_spill] sm:$0xff] %v17198_v29  ;;  %v17212_v21 = vpop.eup %9967  ;;  %9979 = vtanh.f32 %v8692_v26  ;;  %v8854_v26 = vadd.f32 %v16971_v52, %v8850_v41  ;;  %v8901_v40 = vadd.f32 %v17006_v34, %v8897_v10  ;;  %v8902_v52 = vadd.f32 %v17018_v51, %v8898_v55 }
 0xb69   :  { %19696 = vst [vmem:[#allocation305_spill] sm:$0xff] %v17212_v21  ;;  %v17217_v33 = vpop.eup %9969  ;;  %9981 = vtanh.f32 %v8693_v44  ;;  %v8855_v21 = vadd.f32 %v16982_v11, %v8851_v37  ;;  %v8856_v44 = vadd.f32 %v16994_v43, %v8852_v3  ;;  %v8904_v58 = vadd.f32 %v17040_v60, %v8900_v22 }
 0xb6a   :  { %19697 = vst [vmem:[#allocation211_spill] sm:$0xff] %v17217_v33  ;;  %v17222_v31 = vpop.eup %9971  ;;  %9983 = vtanh.f32 %v8694_v24  ;;  %v8899_v33 = vrot.slane %v17030_v5, 4  ;;  %v8861_v24 = vrot.slane %v8854_v26, 4  ;;  %v8909_v37 = vrot.slane %v8902_v52, 4 }
 0xb6b   :  { %v17227_v29 = vpop.eup %9973  ;;  %9985 = vtanh.f32 %v17076_v0  ;;  %v8862_v0 = vrot.slane %v8856_v44, 4  ;;  %v8945_v34 = vrot.slane %v17048_v9, 4  ;;  %v8946_v60 = vrot.slane %v17056_v54, 4 }
 0xb6c   :  { %v17233_v20 = vpop.eup %9975  ;;  %9987 = vtanh.f32 %v17080_v45  ;;  %v8903_v43 = vadd.f32 %v17030_v5, %v8899_v33  ;;  %v8863_v45 = vsel %vm154_vm0, %v8853_v47, %v8861_v24  ;;  %v8910_v5 = vrot.slane %v8904_v58, 4 }
 0xb6d   :  { %v17238_v11 = vpop.eup %9977  ;;  %9989 = vtanh.f32 %v17084_v15  ;;  %v8864_v51 = vsel %vm154_vm0, %v8855_v21, %v8862_v0  ;;  %8867 = vst [vmem:[%s17463_s5] sm:$0xff] %v8863_v45  ;;  %v8948_v22 = vrot.slane %v17072_v18, 4  ;;  %v8950_v10 = vadd.f32 %v17056_v54, %v8946_v60 }
 0xb6e   :  { %v17243_v41 = vpop.eup %9979  ;;  %9991 = vtanh.f32 %v17090_v32  ;;  %8868 = vst [vmem:[%s17463_s5 + $0x8] sm:$0xff] %v8864_v51  ;;  %v8911_v32 = vsel %vm154_vm0, %v8901_v40, %v8909_v37  ;;  %v8912_v33 = vsel %vm154_vm0, %v8903_v43, %v8910_v5  ;;  %v8993_v26 = vrot.slane %v17086_v42, 4 }
 0xb6f   :  { %v17248_v3 = vpop.eup %9981  ;;  %9993 = vtanh.f32 %v17094_v59  ;;  %v8947_v59 = vrot.slane %v17064_v46, 4  ;;  %8915 = vst [vmem:[%s17463_s5 + $0x20] sm:$0xff] %v8911_v32  ;;  %v8952_v47 = vadd.f32 %v17072_v18, %v8948_v22  ;;  %v8994_v54 = vrot.slane %v17100_v6, 4 }
 0xb70   :  { %v17256_v15 = vpop.eup %9983  ;;  %9995 = vtanh.f32 %v17098_v53  ;;  %v8949_v53 = vadd.f32 %v17048_v9, %v8945_v34  ;;  %8916 = vst [vmem:[%s17463_s5 + $0x28] sm:$0xff] %v8912_v33  ;;  %v8957_v9 = vrot.slane %v8950_v10, 4  ;;  %v8995_v24 = vrot.slane %v17114_v17, 4 }
 0xb71   :  { %v17265_v21 = vpop.eup %9985  ;;  %9997 = vtanh.f32 %v17104_v57  ;;  %v8951_v57 = vadd.f32 %v17064_v46, %v8947_v59  ;;  %v8958_v52 = vrot.slane %v8952_v47, 4  ;;  %v8996_v0 = vrot.slane %v17128_v56, 4 }
 0xb72   :  { %v17274_v55 = vpop.eup %9987  ;;  %9999 = vtanh.f32 %v17108_v14  ;;  %v8959_v43 = vsel %vm154_vm0, %v8949_v53, %v8957_v9  ;;  %v17305_v32 = vadd.f32 %v17114_v17, %v8995_v24 }
 0xb73   :  { %v9990_v44 = vpop.eup %9989  ;;  %10001 = vtanh.f32 %v17112_v39  ;;  %v17291_v39 = vadd.f32 %v17086_v42, %v8993_v26  ;;  %8963 = vst [vmem:[%s17463_s5 + $0x40] sm:$0xff] %v8959_v43  ;;  %v8998_v42 = vadd.f32 %v17100_v6, %v8994_v54  ;;  %v9000_v6 = vadd.f32 %v17128_v56, %v8996_v0 }
 0xb74   :  { %v9992_v40 = vpop.eup %9991  ;;  %10003 = vtanh.f32 %v17118_v23  ;;  %v8873_v14 = vrot.slane %v9990_v44, 4  ;;  %v8960_v23 = vsel %vm154_vm0, %v8951_v57, %v8958_v52 }
 0xb75   :  { %v9994_v46 = vpop.eup %9993  ;;  %10005 = vtanh.f32 %v17122_v50  ;;  %v8874_v18 = vrot.slane %v9992_v40, 4  ;;  %8964 = vst [vmem:[%s17463_s5 + $0x48] sm:$0xff] %v8960_v23 }
 0xb76   :  { %v9996_v58 = vpop.eup %9995  ;;  %10007 = vtanh.f32 %v17126_v2  ;;  %v8875_v45 = vrot.slane %v9994_v46, 4  ;;  %v8877_v37 = vadd.f32 %v9990_v44, %v8873_v14 }
 0xb77   :  { %v9998_v34 = vpop.eup %9997  ;;  %10009 = vtanh.f32 %v17132_v1  ;;  %v8876_v50 = vrot.slane %v9996_v58, 4  ;;  %v8878_v51 = vadd.f32 %v9992_v40, %v8874_v18 }
 0xb78   :  { %v10000_v2 = vpop.eup %9999  ;;  %10011 = vtanh.f32 %v17136_v16  ;;  %v8879_v5 = vadd.f32 %v9994_v46, %v8875_v45  ;;  %v8921_v60 = vrot.slane %v9998_v34, 4 }
 0xb79   :  { %v10002_v59 = vpop.eup %10001  ;;  %10013 = vtanh.f32 %v17140_v27  ;;  %v8880_v1 = vadd.f32 %v9996_v58, %v8876_v50  ;;  %v8885_v22 = vrot.slane %v8878_v51, 4  ;;  %v8922_v33 = vrot.slane %v10000_v2, 4 }
 0xb7a   :  { %v10004_v53 = vpop.eup %10003  ;;  %10015 = vtanh.f32 %v17146_v4  ;;  %v8923_v10 = vrot.slane %v10002_v59, 4  ;;  %v8925_v57 = vadd.f32 %v9998_v34, %v8921_v60 }
 0xb7b   :  { %v10006_v47 = vpop.eup %10005  ;;  %10017 = vtanh.f32 %v17150_v8  ;;  %v8886_v16 = vrot.slane %v8880_v1, 4  ;;  %v8887_v17 = vsel %vm154_vm0, %v8877_v37, %v8885_v22  ;;  %v8924_v26 = vrot.slane %v10004_v53, 4 }
 0xb7c   :  { %v10008_v44 = vpop.eup %10007  ;;  %10019 = vtanh.f32 %v17154_v48  ;;  %8891 = vst [vmem:[%s17463_s5 + $0x10] sm:$0xff] %v8887_v17  ;;  %v8926_v27 = vadd.f32 %v10000_v2, %v8922_v33  ;;  %v8927_v4 = vadd.f32 %v10002_v59, %v8923_v10  ;;  %v8969_v9 = vrot.slane %v10006_v47, 4  ;;  %v19698_v17 = vld [vmem:[#allocation276_spill] sm:$0xff] }
 0xb7d   :  { %v10010_v54 = vpop.eup %10009  ;;  %10021 = vtanh.f32 %v17160_v13  ;;  %v8888_v56 = vsel %vm154_vm0, %v8879_v5, %v8886_v16  ;;  %v8928_v8 = vadd.f32 %v10004_v53, %v8924_v26  ;;  %v8970_v24 = vrot.slane %v10008_v44, 4 }
 0xb7e   :  { %v10012_v40 = vpop.eup %10011  ;;  %10023 = vtanh.f32 %v17164_v7  ;;  %8892 = vst [vmem:[%s17463_s5 + $0x18] sm:$0xff] %v8888_v56  ;;  %v8933_v48 = vrot.slane %v8926_v27, 4  ;;  %v8971_v14 = vrot.slane %v10010_v54, 4  ;;  %v8973_v52 = vadd.f32 %v10006_v47, %v8969_v9 }
 0xb7f   :  { %v10014_v0 = vpop.eup %10013  ;;  %10025 = vtanh.f32 %v17168_v25  ;;  %v8934_v46 = vrot.slane %v8928_v8, 4  ;;  %v8972_v18 = vrot.slane %v10012_v40, 4  ;;  %v8974_v13 = vadd.f32 %v10008_v44, %v8970_v24  ;;  %v19699_v44 = vld [vmem:[#allocation70_spill] sm:$0xff] }
 0xb80   :  { %v10016_v43 = vpop.eup %10015  ;;  %10027 = vtanh.f32 %v17174_v62  ;;  %v8935_v58 = vsel %vm154_vm0, %v8925_v57, %v8933_v48  ;;  %v8975_v45 = vadd.f32 %v10010_v54, %v8971_v14  ;;  %v9005_v7 = vrot.slane %v8998_v42, 4 }
 0xb81   :  { %v10018_v37 = vpop.eup %10017  ;;  %10029 = vtanh.f32 %v17178_v36  ;;  %v8936_v23 = vsel %vm154_vm0, %v8927_v4, %v8934_v46  ;;  %8939 = vst [vmem:[%s17463_s5 + $0x30] sm:$0xff] %v8935_v58  ;;  %v8976_v25 = vadd.f32 %v10012_v40, %v8972_v18  ;;  %v8981_v34 = vrot.slane %v8974_v13, 4  ;;  %v19700_v46 = vld [vmem:[#allocation15_spill] sm:$0xff] }
 0xb82   :  { %v10020_v50 = vpop.eup %10019  ;;  %10031 = vtanh.f32 %v17182_v61  ;;  %8940 = vst [vmem:[%s17463_s5 + $0x38] sm:$0xff] %v8936_v23  ;;  %v9006_v62 = vrot.slane %v9000_v6, 4  ;;  %v9007_v51 = vsel %vm154_vm0, %v17291_v39, %v9005_v7  ;;  %v9017_v36 = vrot.slane %v10014_v0, 4  ;;  %v19701_v7 = vld [vmem:[#allocation305_spill] sm:$0xff] }
 0xb83   :  { %v10022_v42 = vpop.eup %10021  ;;  %10033 = vtanh.f32 %v17188_v28  ;;  %v8982_v2 = vrot.slane %v8976_v25, 4  ;;  %v8983_v5 = vsel %vm154_vm0, %v8973_v52, %v8981_v34  ;;  %9011 = vst [vmem:[%s17463_s5 + $0x60] sm:$0xff] %v9007_v51  ;;  %v9018_v61 = vrot.slane %v10016_v43, 4 }
 0xb84   :  { %v10024_v60 = vpop.eup %10023  ;;  %10035 = vtanh.f32 %v17192_v30  ;;  %8987 = vst [vmem:[%s17463_s5 + $0x50] sm:$0xff] %v8983_v5  ;;  %v9008_v39 = vsel %vm154_vm0, %v17305_v32, %v9006_v62  ;;  %v9019_v59 = vrot.slane %v10018_v37, 4  ;;  %v9020_v28 = vrot.slane %v10020_v50, 4 }
 0xb85   :  { %v10026_v1 = vpop.eup %10025  ;;  %10037 = vtanh.f32 %v17196_v63  ;;  %v8984_v22 = vsel %vm154_vm0, %v8975_v45, %v8982_v2  ;;  %9012 = vst [vmem:[%s17463_s5 + $0x68] sm:$0xff] %v9008_v39  ;;  %v9022_v33 = vadd.f32 %v10016_v43, %v9018_v61  ;;  %v9021_v32 = vadd.f32 %v10014_v0, %v9017_v36 }
 0xb86   :  { %v10028_v30 = vpop.eup %10027  ;;  %10039 = vtanh.f32 %v17202_v49  ;;  %8988 = vst [vmem:[%s17463_s5 + $0x58] sm:$0xff] %v8984_v22  ;;  %v9024_v53 = vadd.f32 %v10020_v50, %v9020_v28  ;;  %v9041_v10 = vrot.slane %v17142_v35, 4  ;;  %v9042_v6 = vrot.slane %v17156_v19, 4  ;;  %v19702_v50 = vld [vmem:[#allocation211_spill] sm:$0xff] }
 0xb87   :  { %v10030_v57 = vpop.eup %10029  ;;  %10041 = vtanh.f32 %v17206_v12  ;;  %v9029_v63 = vrot.slane %v9022_v33, 4  ;;  %v9043_v47 = vrot.slane %v17170_v38, 4  ;;  %v9023_v49 = vadd.f32 %v10018_v37, %v9019_v59 }
 0xb88   :  { %v10032_v16 = vpop.eup %10031  ;;  %10043 = vtanh.f32 %v19698_v17  ;;  %v9030_v26 = vrot.slane %v9024_v53, 4  ;;  %v9044_v27 = vrot.slane %v19699_v44, 4  ;;  %v9045_v54 = vadd.f32 %v17142_v35, %v9041_v10 }
 0xb89   :  { %v10034_v4 = vpop.eup %10033  ;;  %v9031_v9 = vsel %vm154_vm0, %v9021_v32, %v9029_v63  ;;  %v9046_v56 = vadd.f32 %v17156_v19, %v9042_v6  ;;  %v9065_v12 = vrot.slane %v10022_v42, 4  ;;  %v9066_v48 = vrot.slane %v10024_v60, 4 }
 0xb8a   :  { %v10036_v8 = vpop.eup %10035  ;;  %v9032_v24 = vsel %vm154_vm0, %v9023_v49, %v9030_v26  ;;  %9035 = vst [vmem:[%s17463_s5 + $0x70] sm:$0xff] %v9031_v9  ;;  %v9048_v40 = vadd.f32 %v19699_v44, %v9044_v27  ;;  %v9067_v14 = vrot.slane %v10026_v1, 4  ;;  %v9047_v35 = vadd.f32 %v17170_v38, %v9043_v47 }
 0xb8b   :  { %v17370_v52 = vpop.eup %10037  ;;  %9036 = vst [vmem:[%s17463_s5 + $0x78] sm:$0xff] %v9032_v24  ;;  %v9053_v19 = vrot.slane %v9046_v56, 4  ;;  %v9068_v0 = vrot.slane %v10028_v30, 4  ;;  %v9089_v18 = vrot.slane %v19700_v46, 4  ;;  %v9069_v58 = vadd.f32 %v10022_v42, %v9065_v12 }
 0xb8c   :  { %v10040_v13 = vpop.eup %10039  ;;  %v9054_v43 = vrot.slane %v9048_v40, 4  ;;  %v9070_v45 = vadd.f32 %v10024_v60, %v9066_v48  ;;  %v9090_v37 = vrot.slane %v19701_v7, 4  ;;  %v9091_v62 = vrot.slane %v19702_v50, 4 }
 0xb8d   :  { %v10042_v23 = vpop.eup %10041  ;;  %v9055_v25 = vsel %vm154_vm0, %v9045_v54, %v9053_v19  ;;  %v9072_v34 = vadd.f32 %v10028_v30, %v9068_v0  ;;  %v9092_v51 = vrot.slane %v17222_v31, 4  ;;  %v9071_v2 = vadd.f32 %v10026_v1, %v9067_v14 }
 0xb8e   :  { %v10044_v36 = vpop.eup %10043  ;;  %v9056_v38 = vsel %vm154_vm0, %v9047_v35, %v9054_v43  ;;  %9059 = vst [vmem:[%s17463_s5 + $0x80] sm:$0xff] %v9055_v25  ;;  %v9077_v42 = vrot.slane %v9070_v45, 4  ;;  %v9094_v5 = vadd.f32 %v19701_v7, %v9090_v37  ;;  %v9093_v60 = vadd.f32 %v19700_v46, %v9089_v18 }
 0xb8f   :  { %9060 = vst [vmem:[%s17463_s5 + $0x88] sm:$0xff] %v9056_v38  ;;  %v9078_v61 = vrot.slane %v9072_v34, 4  ;;  %v9096_v39 = vadd.f32 %v17222_v31, %v9092_v51  ;;  %v9113_v59 = vrot.slane %v10030_v57, 4  ;;  %v9114_v33 = vrot.slane %v10032_v16, 4 }
 0xb90   :  { %v9079_v28 = vsel %vm154_vm0, %v9069_v58, %v9077_v42  ;;  %v9101_v22 = vrot.slane %v9094_v5, 4  ;;  %v9115_v30 = vrot.slane %v10034_v4, 4  ;;  %v9095_v32 = vadd.f32 %v19702_v50, %v9091_v62 }
 0xb91   :  { %v9080_v1 = vsel %vm154_vm0, %v9071_v2, %v9078_v61  ;;  %9083 = vst [vmem:[%s17463_s5 + $0x90] sm:$0xff] %v9079_v28  ;;  %v9102_v53 = vrot.slane %v9096_v39, 4  ;;  %v9116_v10 = vrot.slane %v10036_v8, 4  ;;  %v9117_v63 = vadd.f32 %v10030_v57, %v9113_v59 }
 0xb92   :  { %9084 = vst [vmem:[%s17463_s5 + $0x98] sm:$0xff] %v9080_v1  ;;  %v9103_v31 = vsel %vm154_vm0, %v9093_v60, %v9101_v22  ;;  %v9118_v6 = vadd.f32 %v10032_v16, %v9114_v33  ;;  %v9137_v47 = vrot.slane %v17227_v29, 4  ;;  %v9138_v26 = vrot.slane %v17233_v20, 4 }
 0xb93   :  { %v9104_v17 = vsel %vm154_vm0, %v9095_v32, %v9102_v53  ;;  %9107 = vst [vmem:[%s17463_s5 + $0xa0] sm:$0xff] %v9103_v31  ;;  %v9120_v49 = vadd.f32 %v10036_v8, %v9116_v10  ;;  %v9139_v44 = vrot.slane %v17238_v11, 4  ;;  %v9119_v27 = vadd.f32 %v10034_v4, %v9115_v30 }
 0xb94   :  { %9108 = vst [vmem:[%s17463_s5 + $0xa8] sm:$0xff] %v9104_v17  ;;  %v9125_v57 = vrot.slane %v9118_v6, 4  ;;  %v9140_v16 = vrot.slane %v17243_v41, 4  ;;  %v9161_v9 = vrot.slane %v17370_v52, 4  ;;  %v9141_v56 = vadd.f32 %v17227_v29, %v9137_v47 }
 0xb95   :  { %v9126_v54 = vrot.slane %v9120_v49, 4  ;;  %v9142_v12 = vadd.f32 %v17233_v20, %v9138_v26  ;;  %v9162_v8 = vrot.slane %v10040_v13, 4  ;;  %v9163_v48 = vrot.slane %v10042_v23, 4 }
 0xb96   :  { %v9127_v24 = vsel %vm154_vm0, %v9117_v63, %v9125_v57  ;;  %v9144_v40 = vadd.f32 %v17243_v41, %v9140_v16  ;;  %v9164_v14 = vrot.slane %v10044_v36, 4  ;;  %v9143_v4 = vadd.f32 %v17238_v11, %v9139_v44 }
 0xb97   :  { %v9128_v35 = vsel %vm154_vm0, %v9119_v27, %v9126_v54  ;;  %9131 = vst [vmem:[%s17463_s5 + $0xb0] sm:$0xff] %v9127_v24  ;;  %v9149_v19 = vrot.slane %v9142_v12, 4  ;;  %v9166_v0 = vadd.f32 %v10040_v13, %v9162_v8  ;;  %v9165_v20 = vadd.f32 %v17370_v52, %v9161_v9 }
 0xb98   :  { %9132 = vst [vmem:[%s17463_s5 + $0xb8] sm:$0xff] %v9128_v35  ;;  %v9150_v29 = vrot.slane %v9144_v40, 4  ;;  %v9167_v41 = vadd.f32 %v10042_v23, %v9163_v48  ;;  %v9168_v46 = vadd.f32 %v10044_v36, %v9164_v14  ;;  %v9185_v58 = vrot.slane %v17248_v3, 4 }
 0xb99   :  { %v9151_v18 = vsel %vm154_vm0, %v9141_v56, %v9149_v19  ;;  %v9173_v43 = vrot.slane %v9166_v0, 4  ;;  %v9186_v45 = vrot.slane %v17256_v15, 4  ;;  %v9187_v7 = vrot.slane %v17265_v21, 4 }
 0xb9a   :  { %v9152_v11 = vsel %vm154_vm0, %v9143_v4, %v9150_v29  ;;  %9155 = vst [vmem:[%s17463_s5 + $0xc0] sm:$0xff] %v9151_v18  ;;  %v9174_v13 = vrot.slane %v9168_v46, 4  ;;  %v9188_v52 = vrot.slane %v17274_v55, 4  ;;  %v9189_v50 = vadd.f32 %v17248_v3, %v9185_v58 }
 0xb9b   :  { %9156 = vst [vmem:[%s17463_s5 + $0xc8] sm:$0xff] %v9152_v11  ;;  %v9175_v37 = vsel %vm154_vm0, %v9165_v20, %v9173_v43  ;;  %v9190_v23 = vadd.f32 %v17256_v15, %v9186_v45  ;;  %v9191_v51 = vadd.f32 %v17265_v21, %v9187_v7 }
 0xb9c   :  { %v9176_v25 = vsel %vm154_vm0, %v9167_v41, %v9174_v13  ;;  %9179 = vst [vmem:[%s17463_s5 + $0xd0] sm:$0xff] %v9175_v37  ;;  %v9192_v34 = vadd.f32 %v17274_v55, %v9188_v52 }
 0xb9d   :  { %9180 = vst [vmem:[%s17463_s5 + $0xd8] sm:$0xff] %v9176_v25  ;;  %v9197_v62 = vrot.slane %v9190_v23, 4 }
 0xb9e   :  { %v9198_v36 = vrot.slane %v9192_v34, 4 }
 0xb9f   :  { %v9199_v15 = vsel %vm154_vm0, %v9189_v50, %v9197_v62 }
 0xba0   :  { %v9200_v38 = vsel %vm154_vm0, %v9191_v51, %v9198_v36  ;;  %9203 = vst [vmem:[%s17463_s5 + $0xe0] sm:$0xff] %v9199_v15 }
 0xba1   :  { %9204 = vst [vmem:[%s17463_s5 + $0xe8] sm:$0xff] %v9200_v38 }

</bundles_post_ra>
